<compile_context>
chip_gen: v5e
topology: v5e:2x2
jax: 0.10.0
libtpu: 0.0.40
codegen_flags: <defaults>
</compile_context>

<pallas_src>
import functools

import numpy as np
import jax
import jax.numpy as jnp
from jax.experimental import pallas as pl
from jax.experimental.pallas import tpu as pltpu


# ---------------------------------------------------------------------------
# Host-side helpers
# ---------------------------------------------------------------------------

def _build_tap_masks(H, W, nb):
    """(nb*HW, 9) f32 masks: mask[r, k] == 1 iff tap k of a 3x3/pad=1 conv is in
    bounds for the spatial position (r mod HW)."""
    HW = H * W
    m = np.zeros((HW, 9), np.float32)
    k = 0
    for dy in (-1, 0, 1):
        for dx in (-1, 0, 1):
            for i in range(H):
                for j in range(W):
                    if 0 <= i + dy < H and 0 <= j + dx < W:
                        m[i * W + j, k] = 1.0
            k += 1
    return jnp.asarray(np.tile(m, (nb, 1)))


def init_params(key, inplanes, planes, cfg, reduction):
    """Raw (unfolded, unpadded, f32) parameters in torch-equivalent layout."""
    c4 = cfg * 4
    hidden = c4 // reduction
    ks = jax.random.split(key, 13)

    def nrm(k, shape, scale):
        return jax.random.normal(k, shape, jnp.float32) * scale

    return dict(
        # conv1x1(inplanes, planes): torch (planes, inplanes, 1, 1) -> (inplanes, planes)
        w1=nrm(ks[0], (inplanes, planes), 1.0 / np.sqrt(inplanes)),
        g1=jax.random.uniform(ks[1], (1, planes), jnp.float32, 0.5, 1.5),
        b1=nrm(ks[2], (1, planes), 0.1),
        # conv3x3(planes, cfg): torch (cfg, planes, 3, 3) -> (9, planes, cfg)
        w2=nrm(ks[3], (9, planes, cfg), 1.0 / np.sqrt(9 * planes)),
        g2=jax.random.uniform(ks[4], (1, cfg), jnp.float32, 0.5, 1.5),
        b2=nrm(ks[5], (1, cfg), 0.1),
        # conv1x1(cfg, cfg*4): torch (cfg*4, cfg, 1, 1) -> (cfg, cfg*4)
        w3=nrm(ks[6], (cfg, c4), 1.0 / np.sqrt(cfg)),
        g3=jax.random.uniform(ks[7], (1, c4), jnp.float32, 0.5, 1.5),
        b3=nrm(ks[8], (1, c4), 0.1),
        # SE: Linear(c4, c4//r) -> ReLU -> Linear(c4//r, c4) -> Sigmoid
        wf1=nrm(ks[9], (c4, hidden), 1.0 / np.sqrt(c4)),
        bf1=nrm(ks[10], (1, hidden), 0.1),
        wf2=nrm(ks[11], (hidden, c4), 1.0 / np.sqrt(hidden)),
        bf2=nrm(ks[12], (1, c4), 0.1),
    )


def prepare_params(raw, cin_pad, c4_pad, compute_dtype=jnp.bfloat16):
    """Fold eval-mode BN into the conv weights, pad the residual/IO channel dims
    to a lane-dense width, flatten the 3x3 weight to (9*planes, cfg) and cast
    matmul weights to the compute dtype (biases stay f32)."""
    cin, planes = raw["w1"].shape
    cfg, c4 = raw["w3"].shape

    w1 = raw["w1"] * raw["g1"]                                  # (cin, planes)
    w1 = jnp.pad(w1, ((0, cin_pad - cin), (0, 0)))
    w2 = (raw["w2"] * raw["g2"].reshape(1, 1, cfg)).reshape(9 * planes, cfg)
    w3 = raw["w3"] * raw["g3"]                                  # (cfg, c4)
    w3 = jnp.pad(w3, ((0, 0), (0, c4_pad - c4)))
    b3 = jnp.pad(raw["b3"], ((0, 0), (0, c4_pad - c4)))
    wf1 = jnp.pad(raw["wf1"], ((0, c4_pad - c4), (0, 0)))
    wf2 = jnp.pad(raw["wf2"], ((0, 0), (0, c4_pad - c4)))
    bf2 = jnp.pad(raw["bf2"], ((0, 0), (0, c4_pad - c4)))

    return dict(
        w1=w1.astype(compute_dtype), b1=raw["b1"],
        w2=w2.astype(compute_dtype), b2=raw["b2"],
        w3=w3.astype(compute_dtype), b3=b3,
        wf1=wf1.astype(compute_dtype), bf1=raw["bf1"],
        wf2=wf2.astype(compute_dtype), bf2=bf2,
    )


# ---------------------------------------------------------------------------
# Pallas kernel
# ---------------------------------------------------------------------------

def _bottleneck_kernel(x_ref, mask_ref,
                       w1_ref, b1_ref, w2_ref, b2_ref, w3_ref, b3_ref,
                       wf1_ref, bf1_ref, wf2_ref, bf2_ref,
                       out_ref, *, W):
    nb, hw, cin_p = x_ref.shape
    M = nb * hw
    c4_p = out_ref.shape[-1]
    cdt = w1_ref.dtype                                   # bf16 matmul operands

    x3 = x_ref[...]                                      # (nb, HW, cin_p) f32
    x2 = x3.reshape(M, cin_p)

    # conv1 (1x1) + folded BN1 + ReLU
    h1 = jnp.dot(x2.astype(cdt), w1_ref[...], preferred_element_type=jnp.float32)
    h1 = jnp.maximum(h1 + b1_ref[...], 0.0)              # (M, planes) f32

    # conv2 (3x3, pad=1, stride=1): im2col via static sublane shifts + boundary
    # masks, then ONE matmul with K = 9*planes.
    def shift_rows(a, d):
        # out[r] = a[r + d], zero-filled outside [0, M)
        if d == 0:
            return a
        if d > 0:
            pad = jnp.zeros((d, a.shape[1]), a.dtype)
            return jnp.concatenate([a[d:, :], pad], axis=0)
        pad = jnp.zeros((-d, a.shape[1]), a.dtype)
        return jnp.concatenate([pad, a[:d, :]], axis=0)

    cols = []
    k = 0
    for dy in (-1, 0, 1):
        for dx in (-1, 0, 1):
            d = dy * W + dx
            col = shift_rows(h1, d)
            if d != 0:
                col = col * mask_ref[:, k:k + 1]         # zero out-of-bounds taps
            cols.append(col)
            k += 1
    patch = jnp.concatenate(cols, axis=-1)               # (M, 9*planes) f32
    h2 = jnp.dot(patch.astype(cdt), w2_ref[...], preferred_element_type=jnp.float32)
    h2 = jnp.maximum(h2 + b2_ref[...], 0.0)              # (M, cfg) f32

    # conv3 (1x1) + folded BN3
    h3 = jnp.dot(h2.astype(cdt), w3_ref[...], preferred_element_type=jnp.float32)
    h3 = h3 + b3_ref[...]                                # (M, c4_p) f32

    # SE: per-image global average pool -> FC -> ReLU -> FC -> sigmoid -> gate
    h3_3 = h3.reshape(nb, hw, c4_p)
    pooled = jnp.mean(h3_3, axis=1)                      # (nb, c4_p) f32
    z = jnp.dot(pooled.astype(cdt), wf1_ref[...], preferred_element_type=jnp.float32)
    z = jnp.maximum(z + bf1_ref[...], 0.0)               # (nb, hidden)
    logits = jnp.dot(z.astype(cdt), wf2_ref[...], preferred_element_type=jnp.float32)
    gate = jax.nn.sigmoid(logits + bf2_ref[...])         # (nb, c4_p)

    # identity residual (downsample=None, stride=1) + final ReLU
    out = jnp.maximum(h3_3 * gate[:, None, :] + x3, 0.0)
    out_ref[...] = out.astype(out_ref.dtype)


# ---------------------------------------------------------------------------
# Wrapper
# ---------------------------------------------------------------------------

def cifar_se_bottleneck1(x_nchw, raw_params, nb=None, compute_dtype=jnp.bfloat16):
    N, cin, H, W = x_nchw.shape
    HW = H * W
    cfg, c4 = raw_params["w3"].shape
    assert cin == c4, "identity residual requires inplanes == cfg * 4"

    LANE = 128
    cin_pad = ((cin + LANE - 1) // LANE) * LANE          # lane-dense residual/IO
    c4_pad = cin_pad

    if nb is None:
        # ~512+ rows per grid step, but keep the grid splitting N evenly.
        target = max(1, 512 // HW)
        nb = max(d for d in range(1, N + 1) if N % d == 0 and d <= target)
    assert N % nb == 0
    M = nb * HW

    p = prepare_params(raw_params, cin_pad, c4_pad, compute_dtype)
    mask = _build_tap_masks(H, W, nb)                    # (M, 9) f32

    # NCHW -> (N, HW, cin) -> pad channels to lane-dense width
    x_flat = jnp.transpose(x_nchw, (0, 2, 3, 1)).reshape(N, HW, cin)
    x_flat = jnp.pad(x_flat, ((0, 0), (0, 0), (0, cin_pad - cin)))

    def chunk_spec(c):                                   # one batch chunk per step
        return pl.BlockSpec((nb, HW, c), lambda n: (n, 0, 0))

    def const_spec(shape):                               # whole array every step
        nd = len(shape)
        return pl.BlockSpec(shape, lambda n, _nd=nd: (0,) * _nd)

    in_specs = [
        chunk_spec(cin_pad),
        const_spec(mask.shape),
        const_spec(p["w1"].shape), const_spec(p["b1"].shape),
        const_spec(p["w2"].shape), const_spec(p["b2"].shape),
        const_spec(p["w3"].shape), const_spec(p["b3"].shape),
        const_spec(p["wf1"].shape), const_spec(p["bf1"].shape),
        const_spec(p["wf2"].shape), const_spec(p["bf2"].shape),
    ]

    out_flat = pl.pallas_call(
        functools.partial(_bottleneck_kernel, W=W),
        out_shape=jax.ShapeDtypeStruct((N, HW, c4_pad), x_nchw.dtype),
        grid_spec=pltpu.PrefetchScalarGridSpec(
            num_scalar_prefetch=0,
            grid=(N // nb,),
            in_specs=in_specs,
            out_specs=chunk_spec(c4_pad),
        ),
        compiler_params=pltpu.CompilerParams(
            dimension_semantics=("parallel",),
            vmem_limit_bytes=32 * 1024 * 1024,
        ),
    )(x_flat, mask,
      p["w1"], p["b1"], p["w2"], p["b2"], p["w3"], p["b3"],
      p["wf1"], p["bf1"], p["wf2"], p["bf2"])

    out = out_flat[..., :c4].reshape(N, H, W, c4)
    return jnp.transpose(out, (0, 3, 1, 2))


# ---------------------------------------------------------------------------
# Pure-JAX reference (eval-mode BN), mirrors the PyTorch forward
# ---------------------------------------------------------------------------

def reference_forward(x_nchw, p):
    dn = ("NCHW", "OIHW", "NCHW")
    planes, cfg = p["w2"].shape[1], p["w2"].shape[2]
    w1 = jnp.transpose(p["w1"])[:, :, None, None]                         # (planes, Cin, 1, 1)
    w2 = jnp.transpose(p["w2"].reshape(3, 3, planes, cfg), (3, 2, 0, 1))  # (cfg, planes, 3, 3)
    w3 = jnp.transpose(p["w3"])[:, :, None, None]                         # (cfg*4, cfg, 1, 1)

    def bn(y, g, b):
        return y * g.reshape(1, -1, 1, 1) + b.reshape(1, -1, 1, 1)

    h = jax.lax.conv_general_dilated(x_nchw, w1, (1, 1), "VALID", dimension_numbers=dn)
    h = jax.nn.relu(bn(h, p["g1"], p["b1"]))
    h = jax.lax.conv_general_dilated(h, w2, (1, 1), ((1, 1), (1, 1)), dimension_numbers=dn)
    h = jax.nn.relu(bn(h, p["g2"], p["b2"]))
    h = jax.lax.conv_general_dilated(h, w3, (1, 1), "VALID", dimension_numbers=dn)
    h = bn(h, p["g3"], p["b3"])
    pooled = jnp.mean(h, axis=(2, 3))
    z = jax.nn.relu(pooled @ p["wf1"] + p["bf1"])
    gate = jax.nn.sigmoid(z @ p["wf2"] + p["bf2"])
    h = h * gate[:, :, None, None]
    return jax.nn.relu(h + x_nchw)


if __name__ == "__main__":
    # Small, module-consistent shapes: inplanes == cfg*4 so the identity residual holds.
    N, H, W = 4, 16, 16
    planes, cfg, reduction = 4, 4, 4
    inplanes = cfg * 4                                   # 16

    key = jax.random.PRNGKey(0)
    kx, kp = jax.random.split(key)
    x = jax.random.normal(kx, (N, inplanes, H, W), jnp.float32)   # NCHW like PyTorch

    raw_params = init_params(kp, inplanes, planes, cfg, reduction)

    out = cifar_se_bottleneck1(x, raw_params)            # nb auto-chosen (=2 here)
    out = jax.block_until_ready(out)

    ref = reference_forward(x, raw_params)
    assert out.shape == (N, cfg * 4, H, W)
    np.testing.assert_allclose(np.asarray(out), np.asarray(ref), rtol=5e-2, atol=5e-2)

    print("KERNEL_OK")
</pallas_src>

<mosaic_0001>
module attributes {stable_mosaic.version = 11 : i64} {
  func.func @_bottleneck_kernel(%arg0: i32, %arg1: memref<2x256x128xf32, #tpu.memory_space<vmem>>, %arg2: memref<512x9xf32, #tpu.memory_space<vmem>>, %arg3: memref<128x4xbf16, #tpu.memory_space<vmem>>, %arg4: memref<1x4xf32, #tpu.memory_space<vmem>>, %arg5: memref<36x4xbf16, #tpu.memory_space<vmem>>, %arg6: memref<1x4xf32, #tpu.memory_space<vmem>>, %arg7: memref<4x128xbf16, #tpu.memory_space<vmem>>, %arg8: memref<1x128xf32, #tpu.memory_space<vmem>>, %arg9: memref<128x4xbf16, #tpu.memory_space<vmem>>, %arg10: memref<1x4xf32, #tpu.memory_space<vmem>>, %arg11: memref<4x128xbf16, #tpu.memory_space<vmem>>, %arg12: memref<1x128xf32, #tpu.memory_space<vmem>>, %arg13: memref<2x256x128xf32, #tpu.memory_space<vmem>>) attributes {dimension_semantics = [#tpu.dimension_semantics<parallel>], iteration_bounds = array<i64: 2>, scalar_prefetch = 0 : i64, scratch_operands = 0 : i64, tpu.core_type = #tpu.core_type<tc>, window_params = [{transform_indices = @transform_0, window_bounds = array<i64: 2, 256, 128>}, {pipeline_mode = #tpu.pipeline_mode<synchronous>, transform_indices = @transform_1, window_bounds = array<i64: 512, 9>}, {pipeline_mode = #tpu.pipeline_mode<synchronous>, transform_indices = @transform_2, window_bounds = array<i64: 128, 4>}, {pipeline_mode = #tpu.pipeline_mode<synchronous>, transform_indices = @transform_3, window_bounds = array<i64: 1, 4>}, {pipeline_mode = #tpu.pipeline_mode<synchronous>, transform_indices = @transform_4, window_bounds = array<i64: 36, 4>}, {pipeline_mode = #tpu.pipeline_mode<synchronous>, transform_indices = @transform_5, window_bounds = array<i64: 1, 4>}, {pipeline_mode = #tpu.pipeline_mode<synchronous>, transform_indices = @transform_6, window_bounds = array<i64: 4, 128>}, {pipeline_mode = #tpu.pipeline_mode<synchronous>, transform_indices = @transform_7, window_bounds = array<i64: 1, 128>}, {pipeline_mode = #tpu.pipeline_mode<synchronous>, transform_indices = @transform_8, window_bounds = array<i64: 128, 4>}, {pipeline_mode = #tpu.pipeline_mode<synchronous>, transform_indices = @transform_9, window_bounds = array<i64: 1, 4>}, {pipeline_mode = #tpu.pipeline_mode<synchronous>, transform_indices = @transform_10, window_bounds = array<i64: 4, 128>}, {pipeline_mode = #tpu.pipeline_mode<synchronous>, transform_indices = @transform_11, window_bounds = array<i64: 1, 128>}, {transform_indices = @transform_12, window_bounds = array<i64: 2, 256, 128>}]} {
    %c0 = arith.constant 0 : index
    %c0_0 = arith.constant 0 : index
    %c0_1 = arith.constant 0 : index
    %0 = vector.load %arg1[%c0, %c0_0, %c0_1] : memref<2x256x128xf32, #tpu.memory_space<vmem>>, vector<2x256x128xf32>
    %1 = vector.shape_cast %0 : vector<2x256x128xf32> to vector<512x128xf32>
    %2 = arith.truncf %1 : vector<512x128xf32> to vector<512x128xbf16>
    %c0_2 = arith.constant 0 : index
    %c0_3 = arith.constant 0 : index
    %3 = vector.load %arg3[%c0_2, %c0_3] : memref<128x4xbf16, #tpu.memory_space<vmem>>, vector<128x4xbf16>
    %cst = arith.constant dense<0.000000e+00> : vector<512x4xf32>
    %4 = tpu.matmul %2, %3, %cst {dimension_numbers = #tpu.dot_dimension_numbers<[1], [0], [0], [1], [0, 0, 1, 1], [], []>} : vector<512x128xbf16>, vector<128x4xbf16>, vector<512x4xf32> -> vector<512x4xf32>
    %c0_4 = arith.constant 0 : index
    %c0_5 = arith.constant 0 : index
    %5 = vector.load %arg4[%c0_4, %c0_5] : memref<1x4xf32, #tpu.memory_space<vmem>>, vector<1x4xf32>
    %6 = vector.broadcast %5 : vector<1x4xf32> to vector<512x4xf32>
    %7 = arith.addf %4, %6 : vector<512x4xf32>
    %cst_6 = arith.constant 0.000000e+00 : f32
    %8 = vector.broadcast %cst_6 : f32 to vector<512x4xf32>
    %9 = arith.maximumf %7, %8 : vector<512x4xf32>
    %cst_7 = arith.constant 0.000000e+00 : f32
    %10 = vector.broadcast %cst_7 : f32 to vector<17x4xf32>
    %11 = vector.extract_strided_slice %9 {offsets = [0, 0], sizes = [495, 4], strides = [1, 1]} : vector<512x4xf32> to vector<495x4xf32>
    %12 = tpu.concatenate %10, %11 in 0 : vector<17x4xf32>, vector<495x4xf32> -> vector<512x4xf32>
    %c0_8 = arith.constant 0 : index
    %c0_9 = arith.constant 0 : index
    %13 = vector.load %arg2[%c0_8, %c0_9] : memref<512x9xf32, #tpu.memory_space<vmem>>, vector<512x1xf32>
    %14 = vector.broadcast %13 : vector<512x1xf32> to vector<512x4xf32>
    %15 = arith.mulf %12, %14 : vector<512x4xf32>
    %cst_10 = arith.constant 0.000000e+00 : f32
    %16 = vector.broadcast %cst_10 : f32 to vector<16x4xf32>
    %17 = vector.extract_strided_slice %9 {offsets = [0, 0], sizes = [496, 4], strides = [1, 1]} : vector<512x4xf32> to vector<496x4xf32>
    %18 = tpu.concatenate %16, %17 in 0 : vector<16x4xf32>, vector<496x4xf32> -> vector<512x4xf32>
    %c0_11 = arith.constant 0 : index
    %c1 = arith.constant 1 : index
    %19 = vector.load %arg2[%c0_11, %c1] : memref<512x9xf32, #tpu.memory_space<vmem>>, vector<512x1xf32>
    %20 = vector.broadcast %19 : vector<512x1xf32> to vector<512x4xf32>
    %21 = arith.mulf %18, %20 : vector<512x4xf32>
    %cst_12 = arith.constant 0.000000e+00 : f32
    %22 = vector.broadcast %cst_12 : f32 to vector<15x4xf32>
    %23 = vector.extract_strided_slice %9 {offsets = [0, 0], sizes = [497, 4], strides = [1, 1]} : vector<512x4xf32> to vector<497x4xf32>
    %24 = tpu.concatenate %22, %23 in 0 : vector<15x4xf32>, vector<497x4xf32> -> vector<512x4xf32>
    %c0_13 = arith.constant 0 : index
    %c2 = arith.constant 2 : index
    %25 = vector.load %arg2[%c0_13, %c2] : memref<512x9xf32, #tpu.memory_space<vmem>>, vector<512x1xf32>
    %26 = vector.broadcast %25 : vector<512x1xf32> to vector<512x4xf32>
    %27 = arith.mulf %24, %26 : vector<512x4xf32>
    %cst_14 = arith.constant 0.000000e+00 : f32
    %28 = vector.broadcast %cst_14 : f32 to vector<1x4xf32>
    %29 = vector.extract_strided_slice %9 {offsets = [0, 0], sizes = [511, 4], strides = [1, 1]} : vector<512x4xf32> to vector<511x4xf32>
    %30 = tpu.concatenate %28, %29 in 0 : vector<1x4xf32>, vector<511x4xf32> -> vector<512x4xf32>
    %c0_15 = arith.constant 0 : index
    %c3 = arith.constant 3 : index
    %31 = vector.load %arg2[%c0_15, %c3] : memref<512x9xf32, #tpu.memory_space<vmem>>, vector<512x1xf32>
    %32 = vector.broadcast %31 : vector<512x1xf32> to vector<512x4xf32>
    %33 = arith.mulf %30, %32 : vector<512x4xf32>
    %cst_16 = arith.constant 0.000000e+00 : f32
    %34 = vector.broadcast %cst_16 : f32 to vector<1x4xf32>
    %35 = vector.extract_strided_slice %9 {offsets = [1, 0], sizes = [511, 4], strides = [1, 1]} : vector<512x4xf32> to vector<511x4xf32>
    %36 = tpu.concatenate %35, %34 in 0 : vector<511x4xf32>, vector<1x4xf32> -> vector<512x4xf32>
    %c0_17 = arith.constant 0 : index
    %c5 = arith.constant 5 : index
    %37 = vector.load %arg2[%c0_17, %c5] : memref<512x9xf32, #tpu.memory_space<vmem>>, vector<512x1xf32>
    %38 = vector.broadcast %37 : vector<512x1xf32> to vector<512x4xf32>
    %39 = arith.mulf %36, %38 : vector<512x4xf32>
    %cst_18 = arith.constant 0.000000e+00 : f32
    %40 = vector.broadcast %cst_18 : f32 to vector<15x4xf32>
    %41 = vector.extract_strided_slice %9 {offsets = [15, 0], sizes = [497, 4], strides = [1, 1]} : vector<512x4xf32> to vector<497x4xf32>
    %42 = tpu.concatenate %41, %40 in 0 : vector<497x4xf32>, vector<15x4xf32> -> vector<512x4xf32>
    %c0_19 = arith.constant 0 : index
    %c6 = arith.constant 6 : index
    %43 = vector.load %arg2[%c0_19, %c6] : memref<512x9xf32, #tpu.memory_space<vmem>>, vector<512x1xf32>
    %44 = vector.broadcast %43 : vector<512x1xf32> to vector<512x4xf32>
    %45 = arith.mulf %42, %44 : vector<512x4xf32>
    %cst_20 = arith.constant 0.000000e+00 : f32
    %46 = vector.broadcast %cst_20 : f32 to vector<16x4xf32>
    %47 = vector.extract_strided_slice %9 {offsets = [16, 0], sizes = [496, 4], strides = [1, 1]} : vector<512x4xf32> to vector<496x4xf32>
    %48 = tpu.concatenate %47, %46 in 0 : vector<496x4xf32>, vector<16x4xf32> -> vector<512x4xf32>
    %c0_21 = arith.constant 0 : index
    %c7 = arith.constant 7 : index
    %49 = vector.load %arg2[%c0_21, %c7] : memref<512x9xf32, #tpu.memory_space<vmem>>, vector<512x1xf32>
    %50 = vector.broadcast %49 : vector<512x1xf32> to vector<512x4xf32>
    %51 = arith.mulf %48, %50 : vector<512x4xf32>
    %cst_22 = arith.constant 0.000000e+00 : f32
    %52 = vector.broadcast %cst_22 : f32 to vector<17x4xf32>
    %53 = vector.extract_strided_slice %9 {offsets = [17, 0], sizes = [495, 4], strides = [1, 1]} : vector<512x4xf32> to vector<495x4xf32>
    %54 = tpu.concatenate %53, %52 in 0 : vector<495x4xf32>, vector<17x4xf32> -> vector<512x4xf32>
    %c0_23 = arith.constant 0 : index
    %c8 = arith.constant 8 : index
    %55 = vector.load %arg2[%c0_23, %c8] : memref<512x9xf32, #tpu.memory_space<vmem>>, vector<512x1xf32>
    %56 = vector.broadcast %55 : vector<512x1xf32> to vector<512x4xf32>
    %57 = arith.mulf %54, %56 : vector<512x4xf32>
    %58 = tpu.concatenate %15, %21, %27, %33, %9, %39, %45, %51, %57 in 1 : vector<512x4xf32>, vector<512x4xf32>, vector<512x4xf32>, vector<512x4xf32>, vector<512x4xf32>, vector<512x4xf32>, vector<512x4xf32>, vector<512x4xf32>, vector<512x4xf32> -> vector<512x36xf32>
    %59 = arith.truncf %58 : vector<512x36xf32> to vector<512x36xbf16>
    %c0_24 = arith.constant 0 : index
    %c0_25 = arith.constant 0 : index
    %60 = vector.load %arg5[%c0_24, %c0_25] : memref<36x4xbf16, #tpu.memory_space<vmem>>, vector<36x4xbf16>
    %cst_26 = arith.constant dense<0.000000e+00> : vector<512x4xf32>
    %61 = tpu.matmul %59, %60, %cst_26 {dimension_numbers = #tpu.dot_dimension_numbers<[1], [0], [0], [1], [0, 0, 1, 1], [], []>} : vector<512x36xbf16>, vector<36x4xbf16>, vector<512x4xf32> -> vector<512x4xf32>
    %c0_27 = arith.constant 0 : index
    %c0_28 = arith.constant 0 : index
    %62 = vector.load %arg6[%c0_27, %c0_28] : memref<1x4xf32, #tpu.memory_space<vmem>>, vector<1x4xf32>
    %63 = vector.broadcast %62 : vector<1x4xf32> to vector<512x4xf32>
    %64 = arith.addf %61, %63 : vector<512x4xf32>
    %cst_29 = arith.constant 0.000000e+00 : f32
    %65 = vector.broadcast %cst_29 : f32 to vector<512x4xf32>
    %66 = arith.maximumf %64, %65 : vector<512x4xf32>
    %67 = arith.truncf %66 : vector<512x4xf32> to vector<512x4xbf16>
    %c0_30 = arith.constant 0 : index
    %c0_31 = arith.constant 0 : index
    %68 = vector.load %arg7[%c0_30, %c0_31] : memref<4x128xbf16, #tpu.memory_space<vmem>>, vector<4x128xbf16>
    %cst_32 = arith.constant dense<0.000000e+00> : vector<512x128xf32>
    %69 = tpu.matmul %67, %68, %cst_32 {dimension_numbers = #tpu.dot_dimension_numbers<[1], [0], [0], [1], [0, 0, 1, 1], [], []>} : vector<512x4xbf16>, vector<4x128xbf16>, vector<512x128xf32> -> vector<512x128xf32>
    %c0_33 = arith.constant 0 : index
    %c0_34 = arith.constant 0 : index
    %70 = vector.load %arg8[%c0_33, %c0_34] : memref<1x128xf32, #tpu.memory_space<vmem>>, vector<1x128xf32>
    %71 = vector.broadcast %70 : vector<1x128xf32> to vector<512x128xf32>
    %72 = arith.addf %69, %71 : vector<512x128xf32>
    %73 = vector.shape_cast %72 : vector<512x128xf32> to vector<2x256x128xf32>
    %cst_35 = arith.constant dense<0.000000e+00> : vector<2x128xf32>
    %74 = vector.multi_reduction <add>, %73, %cst_35 [1] : vector<2x256x128xf32> to vector<2x128xf32>
    %cst_36 = arith.constant 2.560000e+02 : f32
    %75 = vector.broadcast %cst_36 : f32 to vector<2x128xf32>
    %76 = arith.divf %74, %75 : vector<2x128xf32>
    %77 = arith.truncf %76 : vector<2x128xf32> to vector<2x128xbf16>
    %c0_37 = arith.constant 0 : index
    %c0_38 = arith.constant 0 : index
    %78 = vector.load %arg9[%c0_37, %c0_38] : memref<128x4xbf16, #tpu.memory_space<vmem>>, vector<128x4xbf16>
    %cst_39 = arith.constant dense<0.000000e+00> : vector<2x4xf32>
    %79 = tpu.matmul %77, %78, %cst_39 {dimension_numbers = #tpu.dot_dimension_numbers<[1], [0], [0], [1], [0, 0, 1, 1], [], []>} : vector<2x128xbf16>, vector<128x4xbf16>, vector<2x4xf32> -> vector<2x4xf32>
    %c0_40 = arith.constant 0 : index
    %c0_41 = arith.constant 0 : index
    %80 = vector.load %arg10[%c0_40, %c0_41] : memref<1x4xf32, #tpu.memory_space<vmem>>, vector<1x4xf32>
    %81 = vector.broadcast %80 : vector<1x4xf32> to vector<2x4xf32>
    %82 = arith.addf %79, %81 : vector<2x4xf32>
    %cst_42 = arith.constant 0.000000e+00 : f32
    %83 = vector.broadcast %cst_42 : f32 to vector<2x4xf32>
    %84 = arith.maximumf %82, %83 : vector<2x4xf32>
    %85 = arith.truncf %84 : vector<2x4xf32> to vector<2x4xbf16>
    %c0_43 = arith.constant 0 : index
    %c0_44 = arith.constant 0 : index
    %86 = vector.load %arg11[%c0_43, %c0_44] : memref<4x128xbf16, #tpu.memory_space<vmem>>, vector<4x128xbf16>
    %cst_45 = arith.constant dense<0.000000e+00> : vector<2x128xf32>
    %87 = tpu.matmul %85, %86, %cst_45 {dimension_numbers = #tpu.dot_dimension_numbers<[1], [0], [0], [1], [0, 0, 1, 1], [], []>} : vector<2x4xbf16>, vector<4x128xbf16>, vector<2x128xf32> -> vector<2x128xf32>
    %c0_46 = arith.constant 0 : index
    %c0_47 = arith.constant 0 : index
    %88 = vector.load %arg12[%c0_46, %c0_47] : memref<1x128xf32, #tpu.memory_space<vmem>>, vector<1x128xf32>
    %89 = vector.broadcast %88 : vector<1x128xf32> to vector<2x128xf32>
    %90 = arith.addf %87, %89 : vector<2x128xf32>
    %91 = arith.negf %90 : vector<2x128xf32>
    %92 = math.exp %91 : vector<2x128xf32>
    %cst_48 = arith.constant 1.000000e+00 : f32
    %93 = vector.broadcast %cst_48 : f32 to vector<2x128xf32>
    %94 = arith.addf %93, %92 : vector<2x128xf32>
    %95 = arith.divf %93, %94 : vector<2x128xf32>
    %96 = vector.shape_cast %95 : vector<2x128xf32> to vector<2x1x128xf32>
    %97 = vector.broadcast %96 : vector<2x1x128xf32> to vector<2x256x128xf32>
    %98 = arith.mulf %73, %97 : vector<2x256x128xf32>
    %99 = arith.addf %98, %0 : vector<2x256x128xf32>
    %cst_49 = arith.constant 0.000000e+00 : f32
    %100 = vector.broadcast %cst_49 : f32 to vector<2x256x128xf32>
    %101 = arith.maximumf %99, %100 : vector<2x256x128xf32>
    %c0_50 = arith.constant 0 : index
    %c0_51 = arith.constant 0 : index
    %c0_52 = arith.constant 0 : index
    %102 = vector.load %arg13[%c0_50, %c0_51, %c0_52] : memref<2x256x128xf32, #tpu.memory_space<vmem>>, vector<2x256x128xf32>
    tpu.vector_store %arg13[%c0_50, %c0_51, %c0_52], %101 {strides = array<i32>} : memref<2x256x128xf32, #tpu.memory_space<vmem>>, vector<2x256x128xf32>,
    return
  }
  func.func @transform_0(%arg0: i32) -> (i32, i32, i32) {
    %c0_i32 = arith.constant 0 : i32
    %c0_i32_0 = arith.constant 0 : i32
    %c0_i32_1 = arith.constant 0 : i32
    return %arg0, %c0_i32, %c0_i32_0 : i32, i32, i32
  }
  func.func @transform_1(%arg0: i32) -> (i32, i32) {
    %c0_i32 = arith.constant 0 : i32
    %c0_i32_0 = arith.constant 0 : i32
    %c0_i32_1 = arith.constant 0 : i32
    return %c0_i32, %c0_i32_0 : i32, i32
  }
  func.func @transform_2(%arg0: i32) -> (i32, i32) {
    %c0_i32 = arith.constant 0 : i32
    %c0_i32_0 = arith.constant 0 : i32
    %c0_i32_1 = arith.constant 0 : i32
    return %c0_i32, %c0_i32_0 : i32, i32
  }
  func.func @transform_3(%arg0: i32) -> (i32, i32) {
    %c0_i32 = arith.constant 0 : i32
    %c0_i32_0 = arith.constant 0 : i32
    %c0_i32_1 = arith.constant 0 : i32
    return %c0_i32, %c0_i32_0 : i32, i32
  }
  func.func @transform_4(%arg0: i32) -> (i32, i32) {
    %c0_i32 = arith.constant 0 : i32
    %c0_i32_0 = arith.constant 0 : i32
    %c0_i32_1 = arith.constant 0 : i32
    return %c0_i32, %c0_i32_0 : i32, i32
  }
  func.func @transform_5(%arg0: i32) -> (i32, i32) {
    %c0_i32 = arith.constant 0 : i32
    %c0_i32_0 = arith.constant 0 : i32
    %c0_i32_1 = arith.constant 0 : i32
    return %c0_i32, %c0_i32_0 : i32, i32
  }
  func.func @transform_6(%arg0: i32) -> (i32, i32) {
    %c0_i32 = arith.constant 0 : i32
    %c0_i32_0 = arith.constant 0 : i32
    %c0_i32_1 = arith.constant 0 : i32
    return %c0_i32, %c0_i32_0 : i32, i32
  }
  func.func @transform_7(%arg0: i32) -> (i32, i32) {
    %c0_i32 = arith.constant 0 : i32
    %c0_i32_0 = arith.constant 0 : i32
    %c0_i32_1 = arith.constant 0 : i32
    return %c0_i32, %c0_i32_0 : i32, i32
  }
  func.func @transform_8(%arg0: i32) -> (i32, i32) {
    %c0_i32 = arith.constant 0 : i32
    %c0_i32_0 = arith.constant 0 : i32
    %c0_i32_1 = arith.constant 0 : i32
    return %c0_i32, %c0_i32_0 : i32, i32
  }
  func.func @transform_9(%arg0: i32) -> (i32, i32) {
    %c0_i32 = arith.constant 0 : i32
    %c0_i32_0 = arith.constant 0 : i32
    %c0_i32_1 = arith.constant 0 : i32
    return %c0_i32, %c0_i32_0 : i32, i32
  }
  func.func @transform_10(%arg0: i32) -> (i32, i32) {
    %c0_i32 = arith.constant 0 : i32
    %c0_i32_0 = arith.constant 0 : i32
    %c0_i32_1 = arith.constant 0 : i32
    return %c0_i32, %c0_i32_0 : i32, i32
  }
  func.func @transform_11(%arg0: i32) -> (i32, i32) {
    %c0_i32 = arith.constant 0 : i32
    %c0_i32_0 = arith.constant 0 : i32
    %c0_i32_1 = arith.constant 0 : i32
    return %c0_i32, %c0_i32_0 : i32, i32
  }
  func.func @transform_12(%arg0: i32) -> (i32, i32, i32) {
    %c0_i32 = arith.constant 0 : i32
    %c0_i32_0 = arith.constant 0 : i32
    %c0_i32_1 = arith.constant 0 : i32
    return %arg0, %c0_i32, %c0_i32_0 : i32, i32, i32
  }
}

</mosaic_0001>

<bundles_post_ra>
// kernel: tpu_custom_call.1
= control target key start
LH: loop header
LB: loop body
LE: loop exit
PB: predicated region body
PF: predicated region fallthrough
CT: control target
= control target key end

     0   :  { %17 = vsyncpa [#allocation3], 0  ;;  %s17002_s0 = inlined_call_operand.hbm [shape: f32[4,256,128], index: 0, kind: input, shape index: {}]   ;;  %s17003_s1 = inlined_call_operand.vmem [shape: f32[512,9], index: 1, kind: input, shape index: {}]   ;;  %s17004_s2 = inlined_call_operand.vmem [shape: bf16[128,4], index: 2, kind: input, shape index: {}]   ;;  %s17005_s3 = inlined_call_operand.vmem [shape: f32[1,4], index: 3, kind: input, shape index: {}]   ;;  %s17006_s4 = inlined_call_operand.vmem [shape: bf16[36,4], index: 4, kind: input, shape index: {}]   ;;  %s17007_s5 = inlined_call_operand.vmem [shape: f32[1,4], index: 5, kind: input, shape index: {}]   ;;  %s17008_s6 = inlined_call_operand.vmem [shape: bf16[4,128], index: 6, kind: input, shape index: {}]   ;;  %s17009_s7 = inlined_call_operand.vmem [shape: f32[1,128], index: 7, kind: input, shape index: {}]   ;;  %s17010_s8 = inlined_call_operand.vmem [shape: bf16[128,4], index: 8, kind: input, shape index: {}]   ;;  %s17011_s9 = inlined_call_operand.vmem [shape: f32[1,4], index: 9, kind: input, shape index: {}]   ;;  %s17012_s10 = inlined_call_operand.vmem [shape: bf16[4,128], index: 10, kind: input, shape index: {}]   ;;  %s17013_s11 = inlined_call_operand.vmem [shape: f32[1,128], index: 11, kind: input, shape index: {}]   ;;  %s17014_s12 = inlined_call_operand.hbm [shape: f32[4,256,128], index: 12, kind: output, shape index: {}]  }
   0x1   :  { %19 = vsyncpa [#allocation3 + $0x1], 0 }
   0x2   :  { %20 = vsyncpa [#allocation4], 0 }
   0x3   :  { %22 = vsyncpa [#allocation4 + $0x1], 0  ;;  %s9665_s21 = smov 0   ;;  %s9667_s22 = smov 0  }
   0x4   :  { %s9669_s23 = smov 0   ;;  %s9671_s24 = smov 0  }
   0x5 LB: > { %17463 = sst [smem:[#allocation8_spill]] %s9566_s21  ;;  %s9686_s25 = sadd.s32 4294967295, %s9578_s24   ;;  %s9578_s24 = sphi %s9671_s24, %s19228_s24   ;;  %s9574_s23 = sphi %s9669_s23, %s19230_s23   ;;  %s9570_s22 = sphi %s9667_s22, %s19232_s22   ;;  %s9566_s21 = sphi %s9665_s21, %s19231_s21  }
   0x6   : > { %17464 = sst [smem:[#allocation9_spill]] %s9574_s23  ;;  %s7747_s26 = sadd.s32 4294967294, %s9578_s24  }
   0x7   : > { %s9690_s27 = sadd.s32 1, %s9578_s24   ;;  %s35_s28 = sadd.s32 1, %s9574_s23 }
   0x8   : > { %17465 = sst [smem:[#allocation10_spill]] %s9690_s27  ;;  %s32_s29 = ssub.s32 %s9578_s24, %s9690_s27 }
   0x9   : > { %p42_p0 = scmp.ne.s32.totalorder %s9574_s23, %s9570_s22  ;;  %p33_p1 = scmp.eq.s32.totalorder %s32_s29, 0 }
   0xa   : > { %p43_p2 = scmp.eq.s32.totalorder %s9578_s24, 0  ;;  %p48_p3 = scmp.ne.s32.totalorder %s9570_s22, %s9566_s21 }
   0xb   : > { %p49_p4 = scmp.eq.s32.totalorder %s9686_s25, 0  ;;  %p303_p7 = scmp.eq.s32.totalorder %s9686_s25, 1 }
   0xc   : > { %s9702_s30 = scalar_select %p33_p1, %s9574_s23, %s35_s28  }
   0xd   : > { %p9704_p5 = por %p43_p2, %p42_p0  ;;  %p9708_p6 = por %p49_p4, %p48_p3 }
   0xe   : > { %17466 = sst [smem:[#allocation11_spill]] %s9702_s30  ;;  %p309_p8 = scmp.eq.s32.totalorder %s7747_s26, 1 }
   0xf   : > { %p7947_p10 = scmp.lt.s32.totalorder %s9578_s24, 2  ;;  %p9715_p11 = por %p303_p7, %p42_p0 }
  0x10   : > { %p9719_p12 = por %p309_p8, %p48_p3  ;;  %s362_s17 = sand.u32 1, %s9574_s23  }
  0x11   : > { %s17469_s15 = scalar_select %p9715_p11, 1, 0 }
  0x12   : > { %s17471_s16 = scalar_select %p9719_p12, 1, 0 }
  0x13   : > { %17470 = sst [smem:[#allocation12_spill]] %s17469_s15  ;;  %s7902_s18 = sshll.u32 %s9578_s24, 9 }
  0x14   : > { %17472 = sst [smem:[#allocation13_spill]] %s17471_s16  ;;  %s7750_s19 = sshll.u32 %s362_s17, 9 }
  0x15   : > { %s372_s29 = scalar_lea.hbm %s17002_s0, %s7902_s18  ;;  %s366_s26 = scalar_lea.vmem [#allocation2], %s7750_s19 }
  0x16   : > { %s373_s30 = sshll.u32 %s372_s29, 4  ;;  %s375_s27 = sshll.u32 %s366_s26, 4  ;;  %s374_s30 = int_to_ptr.hbm [resolvable:$true] %s373_s30  ;;  %s376_s27 = int_to_ptr.vmem [resolvable:$true] %s375_s27 }
  0x17   : > { %p9730_p13 = pnand %p7947_p10, %p9704_p5  ;;  %p7754_p0 = scmp.ge.s32.totalorder %s9578_s24, 1 }
  0x18   : > { %p383_p1 = scmp.lt.s32.totalorder %s9578_s24, 3  ;;  %s363_s23 = scalar_lea.sflag [#allocation3], %s362_s17 }
  0x19   : > { %s9482_s16 = sshra.s32 %s374_s30, 4  ;;  %p9486_p3 = pneg %p9730_p13  ;;  %s9483_s16 = int_to_ptr.hbm [resolvable:$true] %s9482_s16 }
  0x1a   : > { %s9484_s15 = scalar_lea.hbm %s9483_s16, 512  ;;  %s9489_s13 = scalar_lea.hbm %s17002_s0, 1024 }
  0x1b   : > { %p9485_p2 = scmp.ne.s32.totalorder %s9483_s16, %s9484_s15  ;;  %p9490_p5 = scmp.lt.s32.totalorder %s9483_s16, %s17002_s0 }
  0x1c   : > { %p9491_p8 = scmp.lt.s32.totalorder %s9489_s13, %s9484_s15 }
  0x1d   : > { %p9487_p4 = pnand %p9486_p3, %p9485_p2 }
  0x1e   : > { %p9492_p10 = por %p9491_p8, %p9490_p5 }
  0x1f   : > { %p9488_p7 = pneg %p9487_p4 }
  0x21   : > { %p9493_p9 = pnand %p9492_p10, %p9488_p7 }
  0x23   : > { %9496 = shalt.err (!%p9493_p9)
}
  0x24   : > { %s9580_s17 = smov 128   ;;  %s9581_s29 = smov 8  }
  0x25   : > { %7942 = dma.hbm_to_vmem [thread:$0]  (!%p9730_p13), %s374_s30, 8192, %s376_s27, %s363_s23, %s9580_s17, %s9580_s17, %s9581_s29  }
  0x26   : > { %p384_p2 = pnand %p7754_p0, %p383_p1 }
  0x28   : > { %387 = sbr.rel (%p384_p2) target bundleno = 2927 (0xb6f), region = 68 }
  0x2d   : > { %s9751_s26 = sand.u32 1, %s9570_s22  }
  0x2e   : > { %s7755_s15 = sshll.u32 %s9751_s26, 9  ;;  %s390_s16 = scalar_lea.sflag [#allocation3], %s9751_s26 }
  0x2f   : > { %s9757_s18 = scalar_lea.vmem [#allocation2], %s7755_s15 }
  0x30   : > { %9557 = dma.done.wait (%p9708_p6), %s390_s16, 8192  }
  0x31   : > { %9559 = vsyncadd (%p9708_p6), %s390_s16, 4294959104  ;;  %v9582_v0 = vmov 0   ;;  %v9766_v1 = vld [vmem:[%s17003_s1 + $0x20] sm:$0xff]  ;;  %v9771_v2 = vld [vmem:[%s17003_s1 + $0x10] sm:$0xff]  ;;  %s9590_s19 = smov 4   ;;  %vm1853_vm0 = vcmask 1046528  }
  0x32   : > { %8003 = vset.pattern.permute.xlu2 %v9582_v0  ;;  %8002 = vset.pattern.permute.xlu1 %v9582_v0  ;;  %v9776_v3 = vld [vmem:[%s17003_s1] sm:$0xff]  ;;  %v7910_v4 = vld [vmem:[%s17004_s2 + $0x38] sm:$0xff]  ;;  %v7909_v5 = vld [vmem:[%s17004_s2 + $0x30] sm:$0xff]  ;;  %s9591_s17 = smov 8   ;;  %vm897_vm1 = vcmask 1040384   ;;  %s9592_s29 = smov 12  }
  0x33   : > { %8001 = vset.pattern.permute.xlu0 %v9582_v0  ;;  %1170 = vperm.xlu2 %8003, %v9766_v1   ;;  %v9790_v6 = vld [vmem:[%s17003_s1 + $0x28] sm:$0xff]  ;;  %v9795_v7 = vld [vmem:[%s17003_s1 + $0x18] sm:$0xff]  ;;  %v7907_v10 = vld [vmem:[%s17004_s2 + $0x20] sm:$0xff]  ;;  %s9593_s16 = smov 16   ;;  %s9594_s21 = smov 28   ;;  %vm6634_vm2 = vcmask 1041408  }
  0x34   : > { %1160 = vperm.xlu1 %8002, %v9771_v2   ;;  %1150 = vperm.xlu0 %8001, %v9776_v3   ;;  %v9800_v8 = vld [vmem:[%s17003_s1 + $0x8] sm:$0xff]  ;;  %v9814_v11 = vld [vmem:[%s17003_s1 + $0x40] sm:$0xff]  ;;  %v9819_v12 = vld [vmem:[%s17003_s1 + $0x38] sm:$0xff]  ;;  %s9595_s23 = smov 20   ;;  %s9596_s27 = smov 32   ;;  %vm5961_vm3 = vcmask 31744  }
  0x35   : > { %602 = vmatpush.bf16.msra.mxu0 %v7910_v4  ;;  %7923 = vmatpush.bf16.msra.mxu3 %v7910_v4  ;;  %17474 = vst [vmem:[#allocation14_spill] sm:$0xff] %v9800_v8  ;;  %v7908_v9 = vld [vmem:[%s17004_s2 + $0x28] sm:$0xff]  ;;  %v9824_v13 = vld [vmem:[%s17003_s1 + $0x30] sm:$0xff]  ;;  %v7906_v14 = vld [vmem:[%s17004_s2 + $0x18] sm:$0xff]  ;;  %s9597_s30 = smov 24   ;;  %vm6026_vm4 = vcmask 64512  }
  0x36   : > { %v7905_v15 = vld [vmem:[%s17004_s2 + $0x10] sm:$0xff]  ;;  %v9838_v16 = vld [vmem:[%s17003_s1 + $0x58] sm:$0xff]  ;;  %v9848_v18 = vld [vmem:[%s17003_s1 + $0x48] sm:$0xff]  ;;  %vm6091_vm5 = vcmask 97280   ;;  %vm6156_vm6 = vcmask 130048   ;;  %vm6221_vm7 = vcmask 162816  }
  0x37   : > { %v9843_v17 = vld [vmem:[%s17003_s1 + $0x50] sm:$0xff]  ;;  %v7904_v19 = vld [vmem:[%s17004_s2 + $0x8] sm:$0xff]  ;;  %v7903_v20 = vld [vmem:[%s17004_s2] sm:$0xff]  ;;  %vm6286_vm8 = vcmask 195584   ;;  %vm6351_vm9 = vcmask 228352   ;;  %vm6416_vm10 = vcmask 261120  }
  0x38   : > { %v438_v21 = vld [vmem:[%s9757_s18] sm:$0xff]  ;;  %v439_v22 = vld [vmem:[%s9757_s18 + $0x8] sm:$0xff]  ;;  %v9866_v25 = vld [vmem:[%s17003_s1 + $0x70] sm:$0xff]  ;;  %vm6537_vm11 = vcmask 293888   ;;  %vm7285_vm13 = vcmask 1041409   ;;  %s7658_s14 = scalar_lea.sflag [#allocation4], %s9751_s26 }
  0x39   : > { %603 = vmatpush.bf16.msra.mxu0 %v7909_v5  ;;  %7924 = vmatpush.bf16.msra.mxu3 %v7909_v5  ;;  %v486_v23 = vld [vmem:[%s9757_s18 + $0x180] sm:$0xff]  ;;  %v487_v24 = vld [vmem:[%s9757_s18 + $0x188] sm:$0xff]  ;;  %v502_v27 = vpack.c.bf16 %v439_v22, %v438_v21  ;;  %v9894_v32 = vld [vmem:[%s17003_s1 + $0x78] sm:$0xff] }
  0x3a   : > { %v9871_v26 = vld [vmem:[%s17003_s1 + $0x68] sm:$0xff]  ;;  %v9876_v28 = vld [vmem:[%s17003_s1 + $0x60] sm:$0xff]  ;;  %v526_v29 = vpack.c.bf16 %v487_v24, %v486_v23  ;;  %v440_v33 = vld [vmem:[%s9757_s18 + $0x10] sm:$0xff] }
  0x3b   : > { %1175 = vperm.xlu2 %8003, %v9790_v6   ;;  %v9884_v30 = vld [vmem:[%s17003_s1 + $0x88] sm:$0xff]  ;;  %v9889_v31 = vld [vmem:[%s17003_s1 + $0x80] sm:$0xff]  ;;  %v441_v34 = vld [vmem:[%s9757_s18 + $0x18] sm:$0xff] }
  0x3c   : > { %1165 = vperm.xlu1 %8002, %v9795_v7   ;;  %1155 = vperm.xlu0 %8001, %v9800_v8   ;;  %v488_v35 = vld [vmem:[%s9757_s18 + $0x190] sm:$0xff]  ;;  %v489_v36 = vld [vmem:[%s9757_s18 + $0x198] sm:$0xff]  ;;  %v9906_v37 = vld [vmem:[%s17003_s1 + $0xa0] sm:$0xff]  ;;  %v503_v39 = vpack.c.bf16 %v441_v34, %v440_v33 }
  0x3d   : > { %604 = vmatpush.bf16.msra.mxu0 %v7908_v9  ;;  %7925 = vmatpush.bf16.msra.mxu3 %v7908_v9  ;;  %v9911_v38 = vld [vmem:[%s17003_s1 + $0x98] sm:$0xff]  ;;  %v9916_v40 = vld [vmem:[%s17003_s1 + $0x90] sm:$0xff]  ;;  %v527_v41 = vpack.c.bf16 %v489_v36, %v488_v35  ;;  %v9934_v44 = vld [vmem:[%s17003_s1 + $0xa8] sm:$0xff] }
  0x3e   : > { %v9924_v42 = vld [vmem:[%s17003_s1 + $0xb8] sm:$0xff]  ;;  %v9929_v43 = vld [vmem:[%s17003_s1 + $0xb0] sm:$0xff]  ;;  %v442_v45 = vld [vmem:[%s9757_s18 + $0x20] sm:$0xff] }
  0x3f   : > { %v443_v46 = vld [vmem:[%s9757_s18 + $0x28] sm:$0xff]  ;;  %v490_v47 = vld [vmem:[%s9757_s18 + $0x1a0] sm:$0xff]  ;;  %v9946_v49 = vld [vmem:[%s17003_s1 + $0xd0] sm:$0xff] }
  0x40   : > { %v491_v48 = vld [vmem:[%s9757_s18 + $0x1a8] sm:$0xff]  ;;  %v504_v51 = vpack.c.bf16 %v443_v46, %v442_v45  ;;  %v9956_v52 = vld [vmem:[%s17003_s1 + $0xc0] sm:$0xff]  ;;  %v9974_v56 = vld [vmem:[%s17003_s1 + $0xd8] sm:$0xff] }
  0x41   : > { %605 = vmatpush.bf16.msra.mxu0 %v7907_v10  ;;  %7926 = vmatpush.bf16.msra.mxu3 %v7907_v10  ;;  %v9951_v50 = vld [vmem:[%s17003_s1 + $0xc8] sm:$0xff]  ;;  %v528_v53 = vpack.c.bf16 %v491_v48, %v490_v47  ;;  %v9969_v55 = vld [vmem:[%s17003_s1 + $0xe0] sm:$0xff]  ;;  %v444_v57 = vld [vmem:[%s9757_s18 + $0x30] sm:$0xff] }
  0x42   : > { %v9964_v54 = vld [vmem:[%s17003_s1 + $0xe8] sm:$0xff]  ;;  %v445_v58 = vld [vmem:[%s9757_s18 + $0x38] sm:$0xff]  ;;  %v492_v59 = vld [vmem:[%s9757_s18 + $0x1b0] sm:$0xff] }
  0x43   : > { %1190 = vperm.xlu2 %8003, %v9814_v11   ;;  %v493_v60 = vld [vmem:[%s9757_s18 + $0x1b8] sm:$0xff]  ;;  %v9986_v61 = vld [vmem:[%s17003_s1 + $0x100] sm:$0xff]  ;;  %v505_v63 = vpack.c.bf16 %v445_v58, %v444_v57  ;;  %v9996_v0 = vld [vmem:[%s17003_s1 + $0xf0] sm:$0xff] }
  0x44   : > { %1185 = vperm.xlu1 %8002, %v9819_v12   ;;  %1180 = vperm.xlu0 %8001, %v9824_v13   ;;  %v9991_v62 = vld [vmem:[%s17003_s1 + $0xf8] sm:$0xff]  ;;  %v529_v4 = vpack.c.bf16 %v493_v60, %v492_v59  ;;  %v10009_v9 = vld [vmem:[%s17003_s1 + $0x110] sm:$0xff]  ;;  %v10014_v10 = vld [vmem:[%s17003_s1 + $0x108] sm:$0xff] }
  0x45   : > { %606 = vmatpush.bf16.msra.mxu0 %v7906_v14  ;;  %7927 = vmatpush.bf16.msra.mxu3 %v7906_v14  ;;  %v10004_v5 = vld [vmem:[%s17003_s1 + $0x118] sm:$0xff]  ;;  %v495_v21 = vld [vmem:[%s9757_s18 + $0x1c8] sm:$0xff]  ;;  %v10028_v22 = vld [vmem:[%s17003_s1 + $0x130] sm:$0xff] }
  0x46   : > { %v10033_v23 = vld [vmem:[%s17003_s1 + $0x128] sm:$0xff]  ;;  %v10053_v35 = vld [vmem:[%s17003_s1 + $0x140] sm:$0xff]  ;;  %v10058_v36 = vld [vmem:[%s17003_s1 + $0x138] sm:$0xff] }
  0x47   : > { %v10048_v34 = vld [vmem:[%s17003_s1 + $0x148] sm:$0xff]  ;;  %v449_v45 = vld [vmem:[%s9757_s18 + $0x58] sm:$0xff]  ;;  %v496_v46 = vld [vmem:[%s9757_s18 + $0x1d0] sm:$0xff] }
  0x48   : > { %v497_v47 = vld [vmem:[%s9757_s18 + $0x1d8] sm:$0xff]  ;;  %v10072_v48 = vld [vmem:[%s17003_s1 + $0x160] sm:$0xff]  ;;  %v10082_v57 = vld [vmem:[%s17003_s1 + $0x150] sm:$0xff] }
  0x49   : > { %607 = vmatpush.bf16.msra.mxu0 %v7905_v15  ;;  %7928 = vmatpush.bf16.msra.mxu3 %v7905_v15  ;;  %v446_v15 = vld [vmem:[%s9757_s18 + $0x40] sm:$0xff]  ;;  %v531_v58 = vpack.c.bf16 %v497_v47, %v496_v46  ;;  %v499_v46 = vld [vmem:[%s9757_s18 + $0x1e8] sm:$0xff]  ;;  %v10124_v47 = vld [vmem:[%s17003_s1 + $0x190] sm:$0xff] }
  0x4b   : > { %1205 = vperm.xlu2 %8003, %v9838_v16  }
  0x4c   : > { %1200 = vperm.xlu1 %8002, %v9843_v17   ;;  %1195 = vperm.xlu0 %8001, %v9848_v18  }
  0x4d   : > { %608 = vmatpush.bf16.msra.mxu0 %v7904_v19  ;;  %7929 = vmatpush.bf16.msra.mxu3 %v7904_v19  ;;  %v447_v19 = vld [vmem:[%s9757_s18 + $0x48] sm:$0xff] }
  0x4e   : > { %v506_v24 = vpack.c.bf16 %v447_v19, %v446_v15  ;;  %v10101_v15 = vld [vmem:[%s17003_s1 + $0x170] sm:$0xff]  ;;  %v10106_v19 = vld [vmem:[%s17003_s1 + $0x168] sm:$0xff] }
  0x51   : > { %609 = vmatpush.bf16.msra.mxu0 %v7903_v20  ;;  %7930 = vmatpush.bf16.msra.mxu3 %v7903_v20  ;;  %v494_v20 = vld [vmem:[%s9757_s18 + $0x1c0] sm:$0xff] }
  0x53   : > { %1220 = vperm.xlu2 %8003, %v9866_v25  }
  0x54   : > { %1215 = vperm.xlu1 %8002, %v9871_v26   ;;  %1210 = vperm.xlu0 %8001, %v9876_v28  }
  0x55   : > { %610 = vmatmul.bf16.vlgmr.msra.gmra.mxu0 %v502_v27  ;;  %730 = vmatmul.bf16.vlgmr.msra.gmra.mxu3 %v526_v29  ;;  %v10038_v27 = vld [vmem:[%s17003_s1 + $0x120] sm:$0xff]  ;;  %v530_v29 = vpack.c.bf16 %v495_v21, %v494_v20 }
  0x5b   : > { %1235 = vperm.xlu2 %8003, %v9884_v30  }
  0x5c   : > { %1230 = vperm.xlu1 %8002, %v9889_v31   ;;  %1225 = vperm.xlu0 %8001, %v9894_v32  }
  0x63   : > { %1250 = vperm.xlu2 %8003, %v9906_v37  }
  0x64   : > { %1245 = vperm.xlu1 %8002, %v9911_v38   ;;  %1240 = vperm.xlu0 %8001, %v9916_v40  }
  0x65   : > { %615 = vmatmul.bf16.gmra.mxu0 %v503_v39  ;;  %735 = vmatmul.bf16.gmra.mxu3 %v527_v41  ;;  %v448_v41 = vld [vmem:[%s9757_s18 + $0x50] sm:$0xff] }
  0x6b   : > { %1265 = vperm.xlu2 %8003, %v9924_v42  }
  0x6c   : > { %1260 = vperm.xlu1 %8002, %v9929_v43   ;;  %1255 = vperm.xlu0 %8001, %v9934_v44  }
  0x73   : > { %1280 = vperm.xlu2 %8003, %v9946_v49  }
  0x74   : > { %1275 = vperm.xlu1 %8002, %v9951_v50   ;;  %1270 = vperm.xlu0 %8001, %v9956_v52  }
  0x75   : > { %620 = vmatmul.bf16.gmra.mxu0 %v504_v51  ;;  %740 = vmatmul.bf16.gmra.mxu3 %v528_v53  ;;  %v10077_v51 = vld [vmem:[%s17003_s1 + $0x158] sm:$0xff]  ;;  %v507_v53 = vpack.c.bf16 %v449_v45, %v448_v41  ;;  %v498_v45 = vld [vmem:[%s9757_s18 + $0x1e0] sm:$0xff] }
  0x7b   : > { %1295 = vperm.xlu2 %8003, %v9964_v54  }
  0x7c   : > { %1290 = vperm.xlu1 %8002, %v9969_v55   ;;  %1285 = vperm.xlu0 %8001, %v9974_v56  }
  0x83   : > { %1310 = vperm.xlu2 %8003, %v9986_v61  }
  0x84   : > { %1305 = vperm.xlu1 %8002, %v9991_v62   ;;  %1300 = vperm.xlu0 %8001, %v9996_v0  }
  0x85   : > { %625 = vmatmul.bf16.gmra.mxu0 %v505_v63  ;;  %745 = vmatmul.bf16.gmra.mxu3 %v529_v4  ;;  %v10096_v4 = vld [vmem:[%s17003_s1 + $0x178] sm:$0xff] }
  0x8b   : > { %1325 = vperm.xlu2 %8003, %v10004_v5  }
  0x8c   : > { %1320 = vperm.xlu1 %8002, %v10009_v9   ;;  %1315 = vperm.xlu0 %8001, %v10014_v10  }
  0x8d   : > { %v10019_v14 = vpop.permute.xlu2 %1170 }
  0x8e   : > { %17475 = vst [vmem:[#allocation15_spill] sm:$0xff] %v10019_v14  ;;  %v10174_v14 = vld [vmem:[%s17003_s1 + $0x1c0] sm:$0xff] }
  0x8f   : > { %17492 = vst [vmem:[#allocation32_spill] sm:$0xff] %v10174_v14 }
  0x93   : > { %1340 = vperm.xlu2 %8003, %v10028_v22  }
  0x94   : > { %1335 = vperm.xlu1 %8002, %v10033_v23   ;;  %1330 = vperm.xlu0 %8001, %v10038_v27  }
  0x95   : > { %630 = vmatmul.bf16.gmra.mxu0 %v506_v24  ;;  %750 = vmatmul.bf16.gmra.mxu3 %v530_v29  ;;  %v10043_v33 = vpop.permute.xlu2 %1175  ;;  %v450_v24 = vld [vmem:[%s9757_s18 + $0x60] sm:$0xff]  ;;  %v451_v29 = vld [vmem:[%s9757_s18 + $0x68] sm:$0xff] }
  0x96   : > { %17476 = vst [vmem:[#allocation16_spill] sm:$0xff] %v10043_v33 }
  0x9b   : > { %1355 = vperm.xlu2 %8003, %v10048_v34  }
  0x9c   : > { %1350 = vperm.xlu1 %8002, %v10053_v35   ;;  %1345 = vperm.xlu0 %8001, %v10058_v36  }
  0x9d   : > { %v10063_v39 = vpop.permute.xlu2 %1190 }
  0x9e   : > { %17477 = vst [vmem:[#allocation17_spill] sm:$0xff] %v10063_v39 }
  0xa3   : > { %1370 = vperm.xlu2 %8003, %v10072_v48  }
  0xa4   : > { %1365 = vperm.xlu1 %8002, %v10077_v51   ;;  %1360 = vperm.xlu0 %8001, %v10082_v57  }
  0xa5   : > { %635 = vmatmul.bf16.gmra.mxu0 %v507_v53  ;;  %755 = vmatmul.bf16.gmra.mxu3 %v531_v58  ;;  %v10087_v59 = vpop.permute.xlu2 %1205  ;;  %v10129_v53 = vld [vmem:[%s17003_s1 + $0x188] sm:$0xff]  ;;  %v508_v58 = vpack.c.bf16 %v451_v29, %v450_v24 }
  0xa6   : > { %17478 = vst [vmem:[#allocation18_spill] sm:$0xff] %v10087_v59  ;;  %v10089_v60 = vpop.permute.xlu1 %1160  ;;  %v10091_v63 = vpop.permute.xlu0 %1150  ;;  %v532_v59 = vpack.c.bf16 %v499_v46, %v498_v45  ;;  %v10148_v29 = vld [vmem:[%s17003_s1 + $0x1a8] sm:$0xff]  ;;  %v10153_v45 = vld [vmem:[%s17003_s1 + $0x1a0] sm:$0xff] }
  0xa7   : > { %17479 = vst [vmem:[#allocation19_spill] sm:$0xff] %v10089_v60 }
  0xa8   : > { %17480 = vst [vmem:[#allocation20_spill] sm:$0xff] %v10091_v63  ;;  %v455_v63 = vld [vmem:[%s9757_s18 + $0x88] sm:$0xff] }
  0xa9   : > { %17487 = vst [vmem:[#allocation27_spill] sm:$0xff] %v10153_v45 }
  0xab   : > { %1385 = vperm.xlu2 %8003, %v10096_v4  }
  0xac   : > { %1380 = vperm.xlu1 %8002, %v10101_v15   ;;  %1375 = vperm.xlu0 %8001, %v10106_v19  }
  0xad   : > { %v10111_v20 = vpop.permute.xlu2 %1220 }
  0xae   : > { %17481 = vst [vmem:[#allocation21_spill] sm:$0xff] %v10111_v20  ;;  %v10113_v21 = vpop.permute.xlu1 %1165  ;;  %v10117_v41 = vpop.permute.xlu0 %1155  ;;  %v10134_v20 = vld [vmem:[%s17003_s1 + $0x180] sm:$0xff] }
  0xaf   : > { %17482 = vst [vmem:[#allocation22_spill] sm:$0xff] %v10113_v21  ;;  %v10179_v21 = vld [vmem:[%s17003_s1 + $0x1b8] sm:$0xff] }
  0xb0   : > { %17483 = vst [vmem:[#allocation23_spill] sm:$0xff] %v10117_v41 }
  0xb1   : > { %17493 = vst [vmem:[#allocation33_spill] sm:$0xff] %v10179_v21 }
  0xb3   : > { %1400 = vperm.xlu2 %8003, %v10124_v47  }
  0xb4   : > { %1395 = vperm.xlu1 %8002, %v10129_v53   ;;  %1390 = vperm.xlu0 %8001, %v10134_v20  }
  0xb5   : > { %640 = vmatmul.bf16.gmra.mxu0 %v508_v58  ;;  %760 = vmatmul.bf16.gmra.mxu3 %v532_v59  ;;  %v10139_v39 = vpop.permute.xlu2 %1235  ;;  %v10158_v59 = vld [vmem:[%s17003_s1 + $0x198] sm:$0xff] }
  0xb6   : > { %17484 = vst [vmem:[#allocation24_spill] sm:$0xff] %v10139_v39  ;;  %v10141_v33 = vpop.permute.xlu1 %1185  ;;  %v10143_v24 = vpop.permute.xlu0 %1180  ;;  %v452_v39 = vld [vmem:[%s9757_s18 + $0x70] sm:$0xff] }
  0xb7   : > { %17485 = vst [vmem:[#allocation25_spill] sm:$0xff] %v10141_v33  ;;  %v453_v33 = vld [vmem:[%s9757_s18 + $0x78] sm:$0xff] }
  0xb8   : > { %17486 = vst [vmem:[#allocation26_spill] sm:$0xff] %v10143_v24  ;;  %v509_v60 = vpack.c.bf16 %v453_v33, %v452_v39  ;;  %v10198_v33 = vld [vmem:[%s17003_s1 + $0x1d8] sm:$0xff]  ;;  %v10203_v39 = vld [vmem:[%s17003_s1 + $0x1d0] sm:$0xff] }
  0xb9   : > { %17488 = vst [vmem:[#allocation28_spill] sm:$0xff] %v10158_v59 }
  0xba   : > { %17498 = vst [vmem:[#allocation38_spill] sm:$0xff] %v10198_v33 }
  0xbb   : > { %1415 = vperm.xlu2 %8003, %v10148_v29   ;;  %17499 = vst [vmem:[#allocation39_spill] sm:$0xff] %v10203_v39 }
  0xbc   : > { %1410 = vperm.xlu1 %8002, %v10153_v45   ;;  %1405 = vperm.xlu0 %8001, %v10158_v59  }
  0xbd   : > { %v10163_v46 = vpop.permute.xlu2 %1250 }
  0xbe   : > { %17489 = vst [vmem:[#allocation29_spill] sm:$0xff] %v10163_v46  ;;  %v10165_v58 = vpop.permute.xlu1 %1200  ;;  %v10169_v24 = vpop.permute.xlu0 %1195  ;;  %v10184_v46 = vld [vmem:[%s17003_s1 + $0x1b0] sm:$0xff] }
  0xbf   : > { %17490 = vst [vmem:[#allocation30_spill] sm:$0xff] %v10165_v58 }
  0xc0   : > { %17491 = vst [vmem:[#allocation31_spill] sm:$0xff] %v10169_v24 }
  0xc1   : > { %17494 = vst [vmem:[#allocation34_spill] sm:$0xff] %v10184_v46 }
  0xc3   : > { %1430 = vperm.xlu2 %8003, %v10174_v14  }
  0xc4   : > { %1425 = vperm.xlu1 %8002, %v10179_v21   ;;  %1420 = vperm.xlu0 %8001, %v10184_v46   ;;  %v10224_v21 = vld [vmem:[%s17003_s1 + $0x1f0] sm:$0xff] }
  0xc5   : > { %645 = vmatmul.bf16.gmra.mxu0 %v509_v60  ;;  %v10189_v58 = vpop.permute.xlu2 %1265  ;;  %v10208_v60 = vld [vmem:[%s17003_s1 + $0x1c8] sm:$0xff]  ;;  %17504 = vst [vmem:[#allocation44_spill] sm:$0xff] %v10224_v21 }
  0xc6   : > { %17495 = vst [vmem:[#allocation35_spill] sm:$0xff] %v10189_v58  ;;  %v10191_v24 = vpop.permute.xlu1 %1215  ;;  %v10193_v41 = vpop.permute.xlu0 %1210 }
  0xc7   : > { %17496 = vst [vmem:[#allocation36_spill] sm:$0xff] %v10191_v24 }
  0xc8   : > { %17497 = vst [vmem:[#allocation37_spill] sm:$0xff] %v10193_v41  ;;  %v454_v41 = vld [vmem:[%s9757_s18 + $0x80] sm:$0xff] }
  0xc9   : > { %17500 = vst [vmem:[#allocation40_spill] sm:$0xff] %v10208_v60 }
  0xcb   : > { %1445 = vperm.xlu2 %8003, %v10198_v33   ;;  %v10229_v33 = vld [vmem:[%s17003_s1 + $0x1e8] sm:$0xff] }
  0xcc   : > { %1440 = vperm.xlu1 %8002, %v10203_v39   ;;  %1435 = vperm.xlu0 %8001, %v10208_v60   ;;  %17505 = vst [vmem:[#allocation45_spill] sm:$0xff] %v10229_v33  ;;  %v510_v39 = vpack.c.bf16 %v455_v63, %v454_v41  ;;  %v10248_v63 = vld [vmem:[%s17003_s1 + $0x1f8] sm:$0xff]  ;;  %v9583_v41 = vmov 1  }
  0xcd   : > { %v10213_v58 = vpop.permute.xlu2 %1280 }
  0xce   : > { %17501 = vst [vmem:[#allocation41_spill] sm:$0xff] %v10213_v58  ;;  %v10215_v24 = vpop.permute.xlu1 %1230  ;;  %v10219_v14 = vpop.permute.xlu0 %1225  ;;  %v10234_v58 = vld [vmem:[%s17003_s1 + $0x1e0] sm:$0xff] }
  0xcf   : > { %17502 = vst [vmem:[#allocation42_spill] sm:$0xff] %v10215_v24 }
  0xd0   : > { %17503 = vst [vmem:[#allocation43_spill] sm:$0xff] %v10219_v14 }
  0xd1   : > { %17506 = vst [vmem:[#allocation46_spill] sm:$0xff] %v10234_v58 }
  0xd3   : > { %1460 = vperm.xlu2 %8003, %v10224_v21   ;;  %v456_v21 = vld [vmem:[%s9757_s18 + $0x90] sm:$0xff] }
  0xd4   : > { %1455 = vperm.xlu1 %8002, %v10229_v33   ;;  %1450 = vperm.xlu0 %8001, %v10234_v58   ;;  %v457_v33 = vld [vmem:[%s9757_s18 + $0x98] sm:$0xff] }
  0xd5   : > { %650 = vmatmul.bf16.gmra.mxu0 %v510_v39  ;;  %v10239_v24 = vpop.permute.xlu2 %1295  ;;  %v511_v58 = vpack.c.bf16 %v457_v33, %v456_v21 }
  0xd6   : > { %17507 = vst [vmem:[#allocation47_spill] sm:$0xff] %v10239_v24  ;;  %v10241_v14 = vpop.permute.xlu1 %1245  ;;  %v10243_v60 = vpop.permute.xlu0 %1240 }
  0xd7   : > { %17508 = vst [vmem:[#allocation48_spill] sm:$0xff] %v10241_v14  ;;  %v10257_v14 = vpop.f32.mrf.mxu0 }
  0xd8   : > { %17509 = vst [vmem:[#allocation49_spill] sm:$0xff] %v10243_v60 }
  0xd9   : > { %17512 = vst [vmem:[#allocation52_spill] sm:$0xff] %v10257_v14  ;;  %v459_v14 = vld [vmem:[%s9757_s18 + $0xa8] sm:$0xff] }
  0xdb   : > { %8005 = vset.pattern.permute.xlu2 %v9583_v41 }
  0xdc   : > { %8004 = vset.pattern.permute.xlu1 %v9583_v41  ;;  %1465 = vperm.xlu0 %8001, %v10248_v63  }
  0xdd   : > { %1537 = vperm.xlu2 %8005, %v9800_v8   ;;  %1533 = vperm.xlu1 %8004, %v9776_v3   ;;  %v10253_v39 = vpop.permute.xlu2 %1310 }
  0xde   : > { %17510 = vst [vmem:[#allocation50_spill] sm:$0xff] %v10253_v39  ;;  %v10255_v24 = vpop.permute.xlu1 %1260  ;;  %v10259_v60 = vpop.permute.xlu0 %1255 }
  0xdf   : > { %17511 = vst [vmem:[#allocation51_spill] sm:$0xff] %v10255_v24 }
  0xe0   : > { %17513 = vst [vmem:[#allocation53_spill] sm:$0xff] %v10259_v60  ;;  %v10272_v60 = vpop.f32.mrf.mxu0 }
  0xe1   : > { %17517 = vst [vmem:[#allocation57_spill] sm:$0xff] %v10272_v60  ;;  %v461_v60 = vld [vmem:[%s9757_s18 + $0xb8] sm:$0xff] }
  0xe4   : > { %8006 = vset.pattern.permute.xlu0 %v9583_v41 }
  0xe5   : > { %1549 = vperm.xlu2 %8005, %v9766_v1   ;;  %1545 = vperm.xlu1 %8004, %v9795_v7   ;;  %v10266_v8 = vpop.permute.xlu2 %1325 }
  0xe6   : > { %1541 = vperm.xlu0 %8006, %v9771_v2   ;;  %17514 = vst [vmem:[#allocation54_spill] sm:$0xff] %v10266_v8  ;;  %v10268_v39 = vpop.permute.xlu1 %1275  ;;  %655 = vmatmul.bf16.gmra.mxu0 %v511_v58  ;;  %v10270_v24 = vpop.permute.xlu0 %1270  ;;  %v458_v8 = vld [vmem:[%s9757_s18 + $0xa0] sm:$0xff] }
  0xe7   : > { %17515 = vst [vmem:[#allocation55_spill] sm:$0xff] %v10268_v39  ;;  %v512_v58 = vpack.c.bf16 %v459_v14, %v458_v8 }
  0xe8   : > { %17516 = vst [vmem:[#allocation56_spill] sm:$0xff] %v10270_v24  ;;  %v10285_v39 = vpop.f32.mrf.mxu0 }
  0xe9   : > { %17521 = vst [vmem:[#allocation61_spill] sm:$0xff] %v10285_v39 }
  0xed   : > { %1557 = vperm.xlu2 %8005, %v9824_v13   ;;  %1553 = vperm.xlu1 %8004, %v9790_v6   ;;  %v10277_v21 = vpop.permute.xlu2 %1340 }
  0xee   : > { %1561 = vperm.xlu0 %8006, %v9819_v12   ;;  %17518 = vst [vmem:[#allocation58_spill] sm:$0xff] %v10277_v21  ;;  %v10279_v33 = vpop.permute.xlu1 %1290  ;;  %v10281_v41 = vpop.permute.xlu0 %1285 }
  0xef   : > { %17519 = vst [vmem:[#allocation59_spill] sm:$0xff] %v10279_v33 }
  0xf0   : > { %17520 = vst [vmem:[#allocation60_spill] sm:$0xff] %v10281_v41  ;;  %v10296_v41 = vpop.f32.mrf.mxu0 }
  0xf1   : > { %17525 = vst [vmem:[#allocation65_spill] sm:$0xff] %v10296_v41  ;;  %v463_v41 = vld [vmem:[%s9757_s18 + $0xc8] sm:$0xff] }
  0xf5   : > { %1569 = vperm.xlu2 %8005, %v9848_v18   ;;  %1565 = vperm.xlu1 %8004, %v9814_v11   ;;  %v10290_v24 = vpop.permute.xlu2 %1355 }
  0xf6   : > { %1573 = vperm.xlu0 %8006, %v9843_v17   ;;  %17522 = vst [vmem:[#allocation62_spill] sm:$0xff] %v10290_v24  ;;  %v10292_v21 = vpop.permute.xlu1 %1305  ;;  %660 = vmatmul.bf16.gmra.mxu0 %v512_v58  ;;  %v10294_v33 = vpop.permute.xlu0 %1300  ;;  %v460_v24 = vld [vmem:[%s9757_s18 + $0xb0] sm:$0xff] }
  0xf7   : > { %17523 = vst [vmem:[#allocation63_spill] sm:$0xff] %v10292_v21  ;;  %v513_v58 = vpack.c.bf16 %v461_v60, %v460_v24 }
  0xf8   : > { %17524 = vst [vmem:[#allocation64_spill] sm:$0xff] %v10294_v33 }
  0xfd   : > { %1581 = vperm.xlu2 %8005, %v9876_v28   ;;  %1577 = vperm.xlu1 %8004, %v9838_v16   ;;  %v10301_v8 = vpop.permute.xlu2 %1370 }
  0xfe   : > { %1585 = vperm.xlu0 %8006, %v9871_v26   ;;  %17526 = vst [vmem:[#allocation66_spill] sm:$0xff] %v10301_v8  ;;  %v10303_v14 = vpop.permute.xlu1 %1320  ;;  %v10305_v39 = vpop.permute.xlu0 %1315 }
  0xff   : > { %17527 = vst [vmem:[#allocation67_spill] sm:$0xff] %v10303_v14  ;;  %v10316_v8 = vpop.f32.mrf.mxu0 }
 0x100   : > { %17528 = vst [vmem:[#allocation68_spill] sm:$0xff] %v10305_v39 }
 0x101   : > { %17531 = vst [vmem:[#allocation71_spill] sm:$0xff] %v10316_v8 }
 0x105   : > { %1593 = vperm.xlu2 %8005, %v9894_v32   ;;  %1589 = vperm.xlu1 %8004, %v9866_v25   ;;  %v10312_v21 = vpop.permute.xlu2 %1385 }
 0x106   : > { %1597 = vperm.xlu0 %8006, %v9889_v31   ;;  %17529 = vst [vmem:[#allocation69_spill] sm:$0xff] %v10312_v21  ;;  %v10314_v33 = vpop.permute.xlu1 %1335  ;;  %665 = vmatmul.bf16.gmra.mxu0 %v513_v58  ;;  %v10318_v14 = vpop.permute.xlu0 %1330  ;;  %v462_v21 = vld [vmem:[%s9757_s18 + $0xc0] sm:$0xff] }
 0x107   : > { %17530 = vst [vmem:[#allocation70_spill] sm:$0xff] %v10314_v33  ;;  %v10331_v33 = vpop.f32.mrf.mxu0  ;;  %v514_v58 = vpack.c.bf16 %v463_v41, %v462_v21 }
 0x108   : > { %17532 = vst [vmem:[#allocation72_spill] sm:$0xff] %v10318_v14 }
 0x109   : > { %17536 = vst [vmem:[#allocation76_spill] sm:$0xff] %v10331_v33  ;;  %v465_v33 = vld [vmem:[%s9757_s18 + $0xd8] sm:$0xff] }
 0x10d   : > { %1605 = vperm.xlu2 %8005, %v9916_v40   ;;  %1601 = vperm.xlu1 %8004, %v9884_v30   ;;  %v10323_v24 = vpop.permute.xlu2 %1400 }
 0x10e   : > { %1609 = vperm.xlu0 %8006, %v9911_v38   ;;  %17533 = vst [vmem:[#allocation73_spill] sm:$0xff] %v10323_v24  ;;  %v10325_v60 = vpop.permute.xlu1 %1350  ;;  %v10327_v39 = vpop.permute.xlu0 %1345 }
 0x10f   : > { %17534 = vst [vmem:[#allocation74_spill] sm:$0xff] %v10325_v60 }
 0x110   : > { %17535 = vst [vmem:[#allocation75_spill] sm:$0xff] %v10327_v39  ;;  %v10342_v39 = vpop.f32.mrf.mxu0 }
 0x111   : > { %17540 = vst [vmem:[#allocation80_spill] sm:$0xff] %v10342_v39  ;;  %v467_v39 = vld [vmem:[%s9757_s18 + $0xe8] sm:$0xff] }
 0x115   : > { %1617 = vperm.xlu2 %8005, %v9934_v44   ;;  %1613 = vperm.xlu1 %8004, %v9906_v37   ;;  %v10336_v14 = vpop.permute.xlu2 %1415 }
 0x116   : > { %1621 = vperm.xlu0 %8006, %v9929_v43   ;;  %17537 = vst [vmem:[#allocation77_spill] sm:$0xff] %v10336_v14  ;;  %v10338_v24 = vpop.permute.xlu1 %1365  ;;  %670 = vmatmul.bf16.gmra.mxu0 %v514_v58  ;;  %v10340_v60 = vpop.permute.xlu0 %1360  ;;  %v464_v14 = vld [vmem:[%s9757_s18 + $0xd0] sm:$0xff] }
 0x117   : > { %17538 = vst [vmem:[#allocation78_spill] sm:$0xff] %v10338_v24  ;;  %v515_v24 = vpack.c.bf16 %v465_v33, %v464_v14 }
 0x118   : > { %17539 = vst [vmem:[#allocation79_spill] sm:$0xff] %v10340_v60  ;;  %v10355_v58 = vpop.f32.mrf.mxu0 }
 0x119   : > { %17544 = vst [vmem:[#allocation84_spill] sm:$0xff] %v10355_v58 }
 0x11d   : > { %1629 = vperm.xlu2 %8005, %v9956_v52   ;;  %1625 = vperm.xlu1 %8004, %v9924_v42   ;;  %v10347_v21 = vpop.permute.xlu2 %1430 }
 0x11e   : > { %1633 = vperm.xlu0 %8006, %v9951_v50   ;;  %17541 = vst [vmem:[#allocation81_spill] sm:$0xff] %v10347_v21  ;;  %v10349_v41 = vpop.permute.xlu1 %1380  ;;  %v10351_v8 = vpop.permute.xlu0 %1375 }
 0x11f   : > { %17542 = vst [vmem:[#allocation82_spill] sm:$0xff] %v10349_v41 }
 0x120   : > { %17543 = vst [vmem:[#allocation83_spill] sm:$0xff] %v10351_v8  ;;  %v10375_v58 = vpop.f32.mrf.mxu0 }
 0x121   : > { %17551 = vst [vmem:[#allocation91_spill] sm:$0xff] %v10375_v58 }
 0x125   : > { %1641 = vperm.xlu2 %8005, %v9974_v56   ;;  %1637 = vperm.xlu1 %8004, %v9946_v49   ;;  %v10360_v60 = vpop.permute.xlu2 %1445 }
 0x126   : > { %1645 = vperm.xlu0 %8006, %v9969_v55   ;;  %17545 = vst [vmem:[#allocation85_spill] sm:$0xff] %v10360_v60  ;;  %v10362_v21 = vpop.permute.xlu1 %1395  ;;  %675 = vmatmul.bf16.gmra.mxu0 %v515_v24  ;;  %v10364_v41 = vpop.permute.xlu0 %1390  ;;  %v466_v60 = vld [vmem:[%s9757_s18 + $0xe0] sm:$0xff] }
 0x127   : > { %17546 = vst [vmem:[#allocation86_spill] sm:$0xff] %v10362_v21  ;;  %v516_v24 = vpack.c.bf16 %v467_v39, %v466_v60 }
 0x128   : > { %17547 = vst [vmem:[#allocation87_spill] sm:$0xff] %v10364_v41 }
 0x12d   : > { %1653 = vperm.xlu2 %8005, %v9996_v0   ;;  %1649 = vperm.xlu1 %8004, %v9964_v54   ;;  %v10369_v33 = vpop.permute.xlu2 %1460 }
 0x12e   : > { %1657 = vperm.xlu0 %8006, %v9991_v62   ;;  %17548 = vst [vmem:[#allocation88_spill] sm:$0xff] %v10369_v33  ;;  %v10371_v14 = vpop.permute.xlu1 %1410  ;;  %v10373_v8 = vpop.permute.xlu0 %1405 }
 0x12f   : > { %17549 = vst [vmem:[#allocation89_spill] sm:$0xff] %v10371_v14 }
 0x130   : > { %17550 = vst [vmem:[#allocation90_spill] sm:$0xff] %v10373_v8  ;;  %v10388_v8 = vpop.f32.mrf.mxu0 }
 0x131   : > { %17555 = vst [vmem:[#allocation95_spill] sm:$0xff] %v10388_v8 }
 0x135   : > { %1665 = vperm.xlu2 %8005, %v10014_v10   ;;  %1661 = vperm.xlu1 %8004, %v9986_v61  }
 0x136   : > { %1669 = vperm.xlu0 %8006, %v10009_v9   ;;  %v10382_v41 = vpop.permute.xlu1 %1425  ;;  %680 = vmatmul.bf16.gmra.mxu0 %v516_v24  ;;  %v10384_v33 = vpop.permute.xlu0 %1420  ;;  %v469_v24 = vld [vmem:[%s9757_s18 + $0xf8] sm:$0xff] }
 0x137   : > { %17552 = vst [vmem:[#allocation92_spill] sm:$0xff] %v10382_v41  ;;  %v10386_v21 = vpop.permute.xlu2 %1537  ;;  %v468_v41 = vld [vmem:[%s9757_s18 + $0xf0] sm:$0xff] }
 0x138   : > { %17553 = vst [vmem:[#allocation93_spill] sm:$0xff] %v10384_v33  ;;  %v517_v58 = vpack.c.bf16 %v469_v24, %v468_v41  ;;  %v10401_v33 = vpop.f32.mrf.mxu0 }
 0x139   : > { %17554 = vst [vmem:[#allocation94_spill] sm:$0xff] %v10386_v21 }
 0x13a   : > { %17559 = vst [vmem:[#allocation99_spill] sm:$0xff] %v10401_v33 }
 0x13d   : > { %1677 = vperm.xlu2 %8005, %v10038_v27   ;;  %1673 = vperm.xlu1 %8004, %v10004_v5  }
 0x13e   : > { %1681 = vperm.xlu0 %8006, %v10033_v23   ;;  %v10393_v39 = vpop.permute.xlu1 %1440  ;;  %v10395_v60 = vpop.permute.xlu0 %1435 }
 0x13f   : > { %17556 = vst [vmem:[#allocation96_spill] sm:$0xff] %v10393_v39  ;;  %v10397_v14 = vpop.permute.xlu2 %1549 }
 0x140   : > { %17557 = vst [vmem:[#allocation97_spill] sm:$0xff] %v10395_v60  ;;  %v10413_v41 = vpop.f32.mrf.mxu0 }
 0x141   : > { %17558 = vst [vmem:[#allocation98_spill] sm:$0xff] %v10397_v14 }
 0x142   : > { %17563 = vst [vmem:[#allocation103_spill] sm:$0xff] %v10413_v41 }
 0x145   : > { %1689 = vperm.xlu2 %8005, %v10058_v36   ;;  %1685 = vperm.xlu1 %8004, %v10028_v22  }
 0x146   : > { %1693 = vperm.xlu0 %8006, %v10053_v35   ;;  %v10406_v8 = vpop.permute.xlu1 %1455  ;;  %685 = vmatmul.bf16.gmra.mxu0 %v517_v58  ;;  %v10408_v39 = vpop.permute.xlu0 %1450  ;;  %v471_v58 = vld [vmem:[%s9757_s18 + $0x108] sm:$0xff] }
 0x147   : > { %17560 = vst [vmem:[#allocation100_spill] sm:$0xff] %v10406_v8  ;;  %v10410_v60 = vpop.permute.xlu2 %1557  ;;  %v470_v8 = vld [vmem:[%s9757_s18 + $0x100] sm:$0xff] }
 0x148   : > { %17561 = vst [vmem:[#allocation101_spill] sm:$0xff] %v10408_v39  ;;  %v518_v39 = vpack.c.bf16 %v471_v58, %v470_v8 }
 0x149   : > { %17562 = vst [vmem:[#allocation102_spill] sm:$0xff] %v10410_v60 }
 0x14d   : > { %1701 = vperm.xlu2 %8005, %v10082_v57   ;;  %1697 = vperm.xlu1 %8004, %v10048_v34  }
 0x14e   : > { %1705 = vperm.xlu0 %8006, %v10077_v51   ;;  %v10417_v24 = vpop.permute.xlu0 %1465 }
 0x14f   : > { %17564 = vst [vmem:[#allocation104_spill] sm:$0xff] %v10417_v24  ;;  %v10419_v14 = vpop.permute.xlu2 %1569  ;;  %v10421_v33 = vpop.permute.xlu1 %1533 }
 0x150   : > { %17565 = vst [vmem:[#allocation105_spill] sm:$0xff] %v10419_v14  ;;  %v10434_v14 = vpop.f32.mrf.mxu0 }
 0x151   : > { %17566 = vst [vmem:[#allocation106_spill] sm:$0xff] %v10421_v33 }
 0x152   : > { %17570 = vst [vmem:[#allocation110_spill] sm:$0xff] %v10434_v14 }
 0x155   : > { %1713 = vperm.xlu2 %8005, %v10106_v19   ;;  %1709 = vperm.xlu1 %8004, %v10072_v48  }
 0x156   : > { %1717 = vperm.xlu0 %8006, %v10101_v15   ;;  %690 = vmatmul.bf16.gmra.mxu0 %v518_v39  ;;  %v472_v39 = vld [vmem:[%s9757_s18 + $0x110] sm:$0xff] }
 0x157   : > { %v10428_v60 = vpop.permute.xlu2 %1581  ;;  %v10430_v41 = vpop.permute.xlu1 %1545 }
 0x158   : > { %17567 = vst [vmem:[#allocation107_spill] sm:$0xff] %v10428_v60  ;;  %v10432_v24 = vpop.permute.xlu0 %1541  ;;  %v473_v60 = vld [vmem:[%s9757_s18 + $0x118] sm:$0xff]  ;;  %v10447_v21 = vpop.f32.mrf.mxu0 }
 0x159   : > { %17568 = vst [vmem:[#allocation108_spill] sm:$0xff] %v10430_v41 }
 0x15a   : > { %17569 = vst [vmem:[#allocation109_spill] sm:$0xff] %v10432_v24  ;;  %v519_v24 = vpack.c.bf16 %v473_v60, %v472_v39  ;;  %v17579_v60 = vld [vmem:[#allocation33_spill] sm:$0xff] }
 0x15b   : > { %17574 = vst [vmem:[#allocation114_spill] sm:$0xff] %v10447_v21 }
 0x15d   : > { %1725 = vperm.xlu2 %8005, %v10134_v20   ;;  %1721 = vperm.xlu1 %8004, %v10096_v4  }
 0x15e   : > { %1729 = vperm.xlu0 %8006, %v10129_v53  }
 0x15f   : > { %v10439_v8 = vpop.permute.xlu2 %1593  ;;  %v10441_v58 = vpop.permute.xlu1 %1553 }
 0x160   : > { %17571 = vst [vmem:[#allocation111_spill] sm:$0xff] %v10439_v8  ;;  %v10443_v33 = vpop.permute.xlu0 %1561 }
 0x161   : > { %17572 = vst [vmem:[#allocation112_spill] sm:$0xff] %v10441_v58  ;;  %v10458_v58 = vpop.f32.mrf.mxu0 }
 0x162   : > { %17573 = vst [vmem:[#allocation113_spill] sm:$0xff] %v10443_v33 }
 0x163   : > { %17578 = vst [vmem:[#allocation118_spill] sm:$0xff] %v10458_v58  ;;  %v17584_v58 = vld [vmem:[#allocation32_spill] sm:$0xff] }
 0x165   : > { %1737 = vperm.xlu2 %8005, %v10158_v59   ;;  %1733 = vperm.xlu1 %8004, %v10124_v47   ;;  %v17583_v59 = vld [vmem:[#allocation40_spill] sm:$0xff] }
 0x166   : > { %1741 = vperm.xlu0 %8006, %v10153_v45   ;;  %695 = vmatmul.bf16.gmra.mxu0 %v519_v24  ;;  %v474_v24 = vld [vmem:[%s9757_s18 + $0x120] sm:$0xff] }
 0x167   : > { %v10452_v14 = vpop.permute.xlu2 %1605  ;;  %v10454_v8 = vpop.permute.xlu1 %1565  ;;  %v17591_v45 = vld [vmem:[#allocation38_spill] sm:$0xff] }
 0x168   : > { %17575 = vst [vmem:[#allocation115_spill] sm:$0xff] %v10452_v14  ;;  %v10456_v41 = vpop.permute.xlu0 %1573  ;;  %v475_v14 = vld [vmem:[%s9757_s18 + $0x128] sm:$0xff] }
 0x169   : > { %17576 = vst [vmem:[#allocation116_spill] sm:$0xff] %v10454_v8  ;;  %v520_v8 = vpack.c.bf16 %v475_v14, %v474_v24  ;;  %v17592_v14 = vld [vmem:[#allocation45_spill] sm:$0xff] }
 0x16a   : > { %17577 = vst [vmem:[#allocation117_spill] sm:$0xff] %v10456_v41  ;;  %v17585_v41 = vld [vmem:[#allocation39_spill] sm:$0xff] }
 0x16d   : > { %1749 = vperm.xlu2 %8005, %v10184_v46   ;;  %1745 = vperm.xlu1 %8004, %v10148_v29   ;;  %v10474_v46 = vpop.f32.mrf.mxu0 }
 0x16e   : > { %1753 = vperm.xlu0 %8006, %v17579_v60   ;;  %17586 = vst [vmem:[#allocation122_spill] sm:$0xff] %v10474_v46  ;;  %v476_v46 = vld [vmem:[%s9757_s18 + $0x130] sm:$0xff] }
 0x16f   : > { %v10463_v39 = vpop.permute.xlu2 %1617  ;;  %v10465_v21 = vpop.permute.xlu1 %1577 }
 0x170   : > { %17580 = vst [vmem:[#allocation119_spill] sm:$0xff] %v10463_v39  ;;  %v10467_v33 = vpop.permute.xlu0 %1585 }
 0x171   : > { %17581 = vst [vmem:[#allocation120_spill] sm:$0xff] %v10465_v21 }
 0x172   : > { %17582 = vst [vmem:[#allocation121_spill] sm:$0xff] %v10467_v33  ;;  %v17590_v33 = vld [vmem:[#allocation46_spill] sm:$0xff] }
 0x175   : > { %1761 = vperm.xlu2 %8005, %v17583_v59   ;;  %1757 = vperm.xlu1 %8004, %v17584_v58   ;;  %v10493_v58 = vpop.f32.mrf.mxu0 }
 0x176   : > { %1765 = vperm.xlu0 %8006, %v17585_v41   ;;  %700 = vmatmul.bf16.gmra.mxu0 %v520_v8  ;;  %v477_v8 = vld [vmem:[%s9757_s18 + $0x138] sm:$0xff]  ;;  %17596 = vst [vmem:[#allocation127_spill] sm:$0xff] %v10493_v58 }
 0x177   : > { %v10476_v60 = vpop.permute.xlu2 %1629  ;;  %v10478_v39 = vpop.permute.xlu1 %1589 }
 0x178   : > { %17587 = vst [vmem:[#allocation123_spill] sm:$0xff] %v10476_v60  ;;  %v10480_v21 = vpop.permute.xlu0 %1597  ;;  %v521_v60 = vpack.c.bf16 %v477_v8, %v476_v46  ;;  %v17602_v46 = vld [vmem:[#allocation14_spill] sm:$0xff] }
 0x179   : > { %17588 = vst [vmem:[#allocation124_spill] sm:$0xff] %v10478_v39  ;;  %v17597_v39 = vld [vmem:[#allocation44_spill] sm:$0xff] }
 0x17a   : > { %17589 = vst [vmem:[#allocation125_spill] sm:$0xff] %v10480_v21  ;;  %v9584_v21 = vmov 2  }
 0x17d   : > { %1773 = vperm.xlu2 %8005, %v17590_v33   ;;  %1769 = vperm.xlu1 %8004, %v17591_v45   ;;  %v10504_v33 = vpop.f32.mrf.mxu0 }
 0x17e   : > { %1777 = vperm.xlu0 %8006, %v17592_v14   ;;  %17601 = vst [vmem:[#allocation130_spill] sm:$0xff] %v10504_v33  ;;  %v11114_v33 = vld [vmem:[%s17003_s1 + $0x188] sm:$0xff] }
 0x17f   : > { %v10485_v24 = vpop.permute.xlu2 %1641  ;;  %v10487_v59 = vpop.permute.xlu1 %1601 }
 0x180   : > { %17593 = vst [vmem:[#allocation38_spill] sm:$0xff] %v10485_v24  ;;  %v10489_v41 = vpop.permute.xlu0 %1609 }
 0x181   : > { %17594 = vst [vmem:[#allocation45_spill] sm:$0xff] %v10487_v59 }
 0x182   : > { %17595 = vst [vmem:[#allocation126_spill] sm:$0xff] %v10489_v41 }
 0x185   : > { %1785 = vperm.xlu2 %8005, %v10248_v63   ;;  %1781 = vperm.xlu1 %8004, %v17597_v39  }
 0x186   : > { %8007 = vset.pattern.permute.xlu0 %v9584_v21  ;;  %705 = vmatmul.bf16.gmra.mxu0 %v521_v60 }
 0x187   : > { %2044 = vperm.xlu0 %8007, %v9776_v3   ;;  %v10498_v24 = vpop.permute.xlu2 %1653  ;;  %v10500_v59 = vpop.permute.xlu1 %1613 }
 0x188   : > { %17598 = vst [vmem:[#allocation44_spill] sm:$0xff] %v10498_v24  ;;  %v10502_v41 = vpop.permute.xlu0 %1621  ;;  %v478_v24 = vld [vmem:[%s9757_s18 + $0x140] sm:$0xff] }
 0x189   : > { %17599 = vst [vmem:[#allocation128_spill] sm:$0xff] %v10500_v59  ;;  %v479_v59 = vld [vmem:[%s9757_s18 + $0x148] sm:$0xff] }
 0x18a   : > { %17600 = vst [vmem:[#allocation129_spill] sm:$0xff] %v10502_v41  ;;  %v522_v58 = vpack.c.bf16 %v479_v59, %v478_v24  ;;  %v10517_v41 = vpop.f32.mrf.mxu0 }
 0x18b   : > { %17606 = vst [vmem:[#allocation133_spill] sm:$0xff] %v10517_v41  ;;  %v10990_v41 = vld [vmem:[%s17003_s1 + $0xf8] sm:$0xff] }
 0x18d   : > { %8009 = vset.pattern.permute.xlu2 %v9584_v21  ;;  %8008 = vset.pattern.permute.xlu1 %v9584_v21 }
 0x18e   : > { %2052 = vperm.xlu2 %8009, %v9771_v2   ;;  %2048 = vperm.xlu1 %8008, %v17602_v46  }
 0x18f   : > { %2064 = vperm.xlu0 %8007, %v9790_v6   ;;  %v10509_v8 = vpop.permute.xlu2 %1665  ;;  %v10511_v60 = vpop.permute.xlu1 %1625 }
 0x190   : > { %17603 = vst [vmem:[#allocation14_spill] sm:$0xff] %v10509_v8  ;;  %v10513_v3 = vpop.permute.xlu0 %1633  ;;  %v10870_v8 = vld [vmem:[%s17003_s1 + $0x80] sm:$0xff] }
 0x191   : > { %17604 = vst [vmem:[#allocation131_spill] sm:$0xff] %v10511_v60  ;;  %v10942_v60 = vld [vmem:[%s17003_s1 + $0xc8] sm:$0xff] }
 0x192   : > { %17605 = vst [vmem:[#allocation132_spill] sm:$0xff] %v10513_v3  ;;  %v10529_v59 = vpop.f32.mrf.mxu0  ;;  %v11057_v3 = vld [vmem:[%s17003_s1 + $0x140] sm:$0xff] }
 0x193   : > { %17610 = vst [vmem:[#allocation137_spill] sm:$0xff] %v10529_v59  ;;  %v10966_v59 = vld [vmem:[%s17003_s1 + $0xe0] sm:$0xff] }
 0x196   : > { %2060 = vperm.xlu2 %8009, %v9766_v1   ;;  %710 = vmatmul.bf16.gmra.mxu0 %v522_v58  ;;  %v480_v58 = vld [vmem:[%s9757_s18 + $0x150] sm:$0xff] }
 0x197   : > { %2056 = vperm.xlu1 %8008, %v9795_v7   ;;  %v10521_v2 = vpop.permute.xlu2 %1677  ;;  %2076 = vperm.xlu0 %8007, %v9814_v11   ;;  %v10524_v6 = vpop.permute.xlu1 %1637  ;;  %v481_v11 = vld [vmem:[%s9757_s18 + $0x158] sm:$0xff] }
 0x198   : > { %17607 = vst [vmem:[#allocation134_spill] sm:$0xff] %v10521_v2  ;;  %v10526_v21 = vpop.permute.xlu0 %1645  ;;  %v523_v46 = vpack.c.bf16 %v481_v11, %v480_v58  ;;  %v482_v11 = vld [vmem:[%s9757_s18 + $0x160] sm:$0xff]  ;;  %v11032_v2 = vld [vmem:[%s17003_s1 + $0x130] sm:$0xff] }
 0x199   : > { %17608 = vst [vmem:[#allocation135_spill] sm:$0xff] %v10524_v6  ;;  %v10894_v6 = vld [vmem:[%s17003_s1 + $0x98] sm:$0xff] }
 0x19a   : > { %17609 = vst [vmem:[#allocation136_spill] sm:$0xff] %v10526_v21 }
 0x19e   : > { %2072 = vperm.xlu2 %8009, %v9819_v12  }
 0x19f   : > { %2068 = vperm.xlu1 %8008, %v9824_v13   ;;  %v10532_v24 = vpop.permute.xlu2 %1689  ;;  %2088 = vperm.xlu0 %8007, %v9838_v16   ;;  %v10535_v1 = vpop.permute.xlu1 %1649 }
 0x1a0   : > { %17611 = vst [vmem:[#allocation138_spill] sm:$0xff] %v10532_v24  ;;  %v10537_v7 = vpop.permute.xlu0 %1657  ;;  %v10550_v24 = vpop.f32.mrf.mxu0 }
 0x1a1   : > { %17612 = vst [vmem:[#allocation139_spill] sm:$0xff] %v10535_v1  ;;  %v10918_v1 = vld [vmem:[%s17003_s1 + $0xb0] sm:$0xff] }
 0x1a2   : > { %17613 = vst [vmem:[#allocation140_spill] sm:$0xff] %v10537_v7  ;;  %v11051_v7 = vld [vmem:[%s17003_s1 + $0x148] sm:$0xff] }
 0x1a3   : > { %17617 = vst [vmem:[#allocation144_spill] sm:$0xff] %v10550_v24  ;;  %v10960_v24 = vld [vmem:[%s17003_s1 + $0xe8] sm:$0xff] }
 0x1a6   : > { %2084 = vperm.xlu2 %8009, %v9843_v17   ;;  %715 = vmatmul.bf16.gmra.mxu0 %v523_v46 }
 0x1a7   : > { %2080 = vperm.xlu1 %8008, %v9848_v18   ;;  %v10543_v12 = vpop.permute.xlu2 %1701  ;;  %2100 = vperm.xlu0 %8007, %v9866_v25   ;;  %v10546_v13 = vpop.permute.xlu1 %1661  ;;  %v483_v25 = vld [vmem:[%s9757_s18 + $0x168] sm:$0xff] }
 0x1a8   : > { %17614 = vst [vmem:[#allocation141_spill] sm:$0xff] %v10543_v12  ;;  %v10548_v16 = vpop.permute.xlu0 %1669  ;;  %v10563_v46 = vpop.f32.mrf.mxu0  ;;  %v11014_v12 = vld [vmem:[%s17003_s1 + $0x110] sm:$0xff] }
 0x1a9   : > { %17615 = vst [vmem:[#allocation142_spill] sm:$0xff] %v10546_v13  ;;  %v524_v13 = vpack.c.bf16 %v483_v25, %v482_v11 }
 0x1aa   : > { %17616 = vst [vmem:[#allocation143_spill] sm:$0xff] %v10548_v16  ;;  %v10846_v16 = vld [vmem:[%s17003_s1 + $0x68] sm:$0xff] }
 0x1ab   : > { %17621 = vst [vmem:[#allocation148_spill] sm:$0xff] %v10563_v46  ;;  %v10984_v46 = vld [vmem:[%s17003_s1 + $0x100] sm:$0xff] }
 0x1ae   : > { %2096 = vperm.xlu2 %8009, %v9871_v26  }
 0x1af   : > { %2092 = vperm.xlu1 %8008, %v9876_v28   ;;  %v10554_v58 = vpop.permute.xlu2 %1713  ;;  %2112 = vperm.xlu0 %8007, %v9884_v30   ;;  %v10557_v17 = vpop.permute.xlu1 %1673 }
 0x1b0   : > { %17618 = vst [vmem:[#allocation145_spill] sm:$0xff] %v10554_v58  ;;  %v10559_v18 = vpop.permute.xlu0 %1681  ;;  %v10574_v58 = vpop.f32.mrf.mxu0 }
 0x1b1   : > { %17619 = vst [vmem:[#allocation146_spill] sm:$0xff] %v10557_v17 }
 0x1b2   : > { %17620 = vst [vmem:[#allocation147_spill] sm:$0xff] %v10559_v18  ;;  %v11038_v18 = vld [vmem:[%s17003_s1 + $0x128] sm:$0xff] }
 0x1b3   : > { %17625 = vst [vmem:[#allocation152_spill] sm:$0xff] %v10574_v58  ;;  %v11095_v58 = vld [vmem:[%s17003_s1 + $0x170] sm:$0xff] }
 0x1b6   : > { %2108 = vperm.xlu2 %8009, %v9889_v31   ;;  %720 = vmatmul.bf16.gmra.mxu0 %v524_v13  ;;  %v484_v13 = vld [vmem:[%s9757_s18 + $0x170] sm:$0xff] }
 0x1b7   : > { %2104 = vperm.xlu1 %8008, %v9894_v32   ;;  %v10567_v26 = vpop.permute.xlu2 %1725  ;;  %2124 = vperm.xlu0 %8007, %v9906_v37   ;;  %v10570_v28 = vpop.permute.xlu1 %1685  ;;  %v485_v37 = vld [vmem:[%s9757_s18 + $0x178] sm:$0xff] }
 0x1b8   : > { %17622 = vst [vmem:[#allocation149_spill] sm:$0xff] %v10567_v26  ;;  %v10572_v30 = vpop.permute.xlu0 %1693  ;;  %v525_v25 = vpack.c.bf16 %v485_v37, %v484_v13 }
 0x1b9   : > { %17623 = vst [vmem:[#allocation150_spill] sm:$0xff] %v10570_v28  ;;  %v10588_v28 = vpop.f32.mrf.mxu0 }
 0x1ba   : > { %17624 = vst [vmem:[#allocation151_spill] sm:$0xff] %v10572_v30  ;;  %v10816_v30 = vld [vmem:[%s17003_s1 + $0x58] sm:$0xff] }
 0x1bb   : > { %17629 = vst [vmem:[#allocation156_spill] sm:$0xff] %v10588_v28  ;;  %v11076_v28 = vld [vmem:[%s17003_s1 + $0x158] sm:$0xff] }
 0x1be   : > { %2120 = vperm.xlu2 %8009, %v9911_v38  }
 0x1bf   : > { %2116 = vperm.xlu1 %8008, %v9916_v40   ;;  %v10578_v11 = vpop.permute.xlu2 %1737  ;;  %2136 = vperm.xlu0 %8007, %v9924_v42   ;;  %v10581_v31 = vpop.permute.xlu1 %1697 }
 0x1c0   : > { %17626 = vst [vmem:[#allocation153_spill] sm:$0xff] %v10578_v11  ;;  %v10583_v32 = vpop.permute.xlu0 %1705  ;;  %v10744_v11 = vld [vmem:[%s17003_s1 + $0x18] sm:$0xff] }
 0x1c1   : > { %17627 = vst [vmem:[#allocation154_spill] sm:$0xff] %v10581_v31  ;;  %v10840_v31 = vld [vmem:[%s17003_s1 + $0x70] sm:$0xff] }
 0x1c2   : > { %17628 = vst [vmem:[#allocation155_spill] sm:$0xff] %v10583_v32 }
 0x1c6   : > { %2132 = vperm.xlu2 %8009, %v9929_v43   ;;  %725 = vmatmul.bf16.gmra.mxu0 %v525_v25 }
 0x1c7   : > { %2128 = vperm.xlu1 %8008, %v9934_v44   ;;  %v10591_v38 = vpop.permute.xlu2 %1749  ;;  %2148 = vperm.xlu0 %8007, %v9946_v49   ;;  %v10594_v40 = vpop.permute.xlu1 %1709 }
 0x1c8   : > { %17630 = vst [vmem:[#allocation157_spill] sm:$0xff] %v10591_v38  ;;  %v10596_v42 = vpop.permute.xlu0 %1717 }
 0x1c9   : > { %17631 = vst [vmem:[#allocation158_spill] sm:$0xff] %v10594_v40 }
 0x1ca   : > { %17632 = vst [vmem:[#allocation159_spill] sm:$0xff] %v10596_v42  ;;  %v10792_v42 = vld [vmem:[%s17003_s1 + $0x40] sm:$0xff] }
 0x1cb   : > { %17691 = vst [vmem:[#allocation202_spill] sm:$0xff] %v10792_v42 }
 0x1ce   : > { %2144 = vperm.xlu2 %8009, %v9951_v50  }
 0x1cf   : > { %2140 = vperm.xlu1 %8008, %v9956_v52   ;;  %v10600_v13 = vpop.permute.xlu2 %1761  ;;  %2160 = vperm.xlu0 %8007, %v9964_v54   ;;  %v10603_v43 = vpop.permute.xlu1 %1721 }
 0x1d0   : > { %17633 = vst [vmem:[#allocation160_spill] sm:$0xff] %v10600_v13  ;;  %v10605_v37 = vpop.permute.xlu0 %1729  ;;  %v17676_v13 = vld [vmem:[#allocation46_spill] sm:$0xff] }
 0x1d1   : > { %17634 = vst [vmem:[#allocation161_spill] sm:$0xff] %v10603_v43 }
 0x1d2   : > { %17635 = vst [vmem:[#allocation162_spill] sm:$0xff] %v10605_v37  ;;  %v11008_v37 = vld [vmem:[%s17003_s1 + $0x118] sm:$0xff] }
 0x1d6   : > { %2156 = vperm.xlu2 %8009, %v9969_v55  }
 0x1d7   : > { %2152 = vperm.xlu1 %8008, %v9974_v56   ;;  %v10609_v44 = vpop.permute.xlu2 %1773  ;;  %2172 = vperm.xlu0 %8007, %v9986_v61   ;;  %v10612_v49 = vpop.permute.xlu1 %1733 }
 0x1d8   : > { %17636 = vst [vmem:[#allocation163_spill] sm:$0xff] %v10609_v44  ;;  %v10614_v50 = vpop.permute.xlu0 %1741 }
 0x1d9   : > { %17637 = vst [vmem:[#allocation164_spill] sm:$0xff] %v10612_v49 }
 0x1da   : > { %17638 = vst [vmem:[#allocation165_spill] sm:$0xff] %v10614_v50  ;;  %v10750_v50 = vld [vmem:[%s17003_s1 + $0x10] sm:$0xff] }
 0x1de   : > { %2168 = vperm.xlu2 %8009, %v9991_v62  }
 0x1df   : > { %2164 = vperm.xlu1 %8008, %v9996_v0   ;;  %v10618_v52 = vpop.permute.xlu2 %1785  ;;  %2184 = vperm.xlu0 %8007, %v10004_v5   ;;  %v10621_v54 = vpop.permute.xlu1 %1745 }
 0x1e0   : > { %17639 = vst [vmem:[#allocation166_spill] sm:$0xff] %v10618_v52  ;;  %v10623_v55 = vpop.permute.xlu0 %1753  ;;  %v17671_v52 = vld [vmem:[#allocation39_spill] sm:$0xff] }
 0x1e1   : > { %17640 = vst [vmem:[#allocation167_spill] sm:$0xff] %v10621_v54  ;;  %v10768_v54 = vld [vmem:[%s17003_s1 + $0x28] sm:$0xff] }
 0x1e2   : > { %17641 = vst [vmem:[#allocation168_spill] sm:$0xff] %v10623_v55 }
 0x1e3   : > { %17687 = vst [vmem:[#allocation198_spill] sm:$0xff] %v10768_v54 }
 0x1e6   : > { %2180 = vperm.xlu2 %8009, %v10009_v9  }
 0x1e7   : > { %2176 = vperm.xlu1 %8008, %v10014_v10   ;;  %2196 = vperm.xlu0 %8007, %v10028_v22   ;;  %v10628_v56 = vpop.permute.xlu1 %1757 }
 0x1e8   : > { %17642 = vst [vmem:[#allocation169_spill] sm:$0xff] %v10628_v56  ;;  %v10630_v61 = vpop.permute.xlu0 %1765  ;;  %v10632_v62 = vpop.permute.xlu2 %2052  ;;  %v10726_v56 = vld [vmem:[%s17003_s1] sm:$0xff] }
 0x1e9   : > { %17643 = vst [vmem:[#allocation170_spill] sm:$0xff] %v10630_v61 }
 0x1ea   : > { %17644 = vst [vmem:[#allocation171_spill] sm:$0xff] %v10632_v62  ;;  %v10888_v62 = vld [vmem:[%s17003_s1 + $0xa0] sm:$0xff] }
 0x1eb   : > { %17680 = vst [vmem:[#allocation191_spill] sm:$0xff] %v10726_v56 }
 0x1ee   : > { %2192 = vperm.xlu2 %8009, %v10033_v23  }
 0x1ef   : > { %2188 = vperm.xlu1 %8008, %v10038_v27   ;;  %2208 = vperm.xlu0 %8007, %v10048_v34   ;;  %v10637_v0 = vpop.permute.xlu1 %1769  ;;  %v500_v27 = vld [vmem:[%s9757_s18 + $0x1f0] sm:$0xff]  ;;  %v501_v34 = vld [vmem:[%s9757_s18 + $0x1f8] sm:$0xff] }
 0x1f0   : > { %17645 = vst [vmem:[#allocation172_spill] sm:$0xff] %v10637_v0  ;;  %v10639_v5 = vpop.permute.xlu0 %1777  ;;  %v10641_v9 = vpop.permute.xlu2 %2060  ;;  %v533_v25 = vpack.c.bf16 %v501_v34, %v500_v27  ;;  %v17660_v34 = vld [vmem:[#allocation27_spill] sm:$0xff]  ;;  %v10732_v0 = vld [vmem:[%s17003_s1 + $0x30] sm:$0xff] }
 0x1f1   : > { %17646 = vst [vmem:[#allocation173_spill] sm:$0xff] %v10639_v5  ;;  %v10936_v5 = vld [vmem:[%s17003_s1 + $0xd0] sm:$0xff] }
 0x1f2   : > { %17647 = vst [vmem:[#allocation174_spill] sm:$0xff] %v10641_v9  ;;  %765 = vmatmul.bf16.gmra.mxu3 %v533_v25  ;;  %v17662_v25 = vld [vmem:[#allocation32_spill] sm:$0xff]  ;;  %v17667_v9 = vld [vmem:[#allocation34_spill] sm:$0xff] }
 0x1f6   : > { %2204 = vperm.xlu2 %8009, %v10053_v35  }
 0x1f7   : > { %2200 = vperm.xlu1 %8008, %v10058_v36   ;;  %2220 = vperm.xlu0 %8007, %v10072_v48   ;;  %v10646_v10 = vpop.permute.xlu1 %1781 }
 0x1f8   : > { %17648 = vst [vmem:[#allocation175_spill] sm:$0xff] %v10646_v10  ;;  %v10648_v22 = vpop.permute.xlu2 %2072  ;;  %v17672_v10 = vld [vmem:[#allocation40_spill] sm:$0xff] }
 0x1f9   : > { %17649 = vst [vmem:[#allocation176_spill] sm:$0xff] %v10648_v22  ;;  %v10650_v23 = vpop.permute.xlu0 %2044 }
 0x1fa   : > { %17650 = vst [vmem:[#allocation177_spill] sm:$0xff] %v10650_v23 }
 0x1fe   : > { %2216 = vperm.xlu2 %8009, %v10077_v51  }
 0x1ff   : > { %2212 = vperm.xlu1 %8008, %v10082_v57   ;;  %2232 = vperm.xlu0 %8007, %v10096_v4  }
 0x200   : > { %v10657_v35 = vpop.permute.xlu2 %2084  ;;  %v10659_v36 = vpop.permute.xlu1 %2048 }
 0x201   : > { %17651 = vst [vmem:[#allocation178_spill] sm:$0xff] %v10657_v35  ;;  %v10661_v48 = vpop.permute.xlu0 %2064 }
 0x202   : > { %17652 = vst [vmem:[#allocation179_spill] sm:$0xff] %v10659_v36 }
 0x203   : > { %17653 = vst [vmem:[#allocation180_spill] sm:$0xff] %v10661_v48  ;;  %v17666_v48 = vld [vmem:[#allocation33_spill] sm:$0xff] }
 0x206   : > { %2228 = vperm.xlu2 %8009, %v10101_v15  }
 0x207   : > { %2224 = vperm.xlu1 %8008, %v10106_v19   ;;  %2244 = vperm.xlu0 %8007, %v10124_v47   ;;  %v17661_v47 = vld [vmem:[#allocation28_spill] sm:$0xff] }
 0x208   : > { %v10666_v51 = vpop.permute.xlu2 %2096 }
 0x209   : > { %17654 = vst [vmem:[#allocation181_spill] sm:$0xff] %v10666_v51  ;;  %v10668_v22 = vpop.permute.xlu1 %2056  ;;  %v10670_v57 = vpop.permute.xlu0 %2076 }
 0x20a   : > { %17655 = vst [vmem:[#allocation182_spill] sm:$0xff] %v10668_v22  ;;  %v10912_v22 = vld [vmem:[%s17003_s1 + $0xb8] sm:$0xff] }
 0x20b   : > { %17656 = vst [vmem:[#allocation183_spill] sm:$0xff] %v10670_v57  ;;  %v10864_v57 = vld [vmem:[%s17003_s1 + $0x88] sm:$0xff] }
 0x20e   : > { %2240 = vperm.xlu2 %8009, %v10129_v53  }
 0x20f   : > { %2236 = vperm.xlu1 %8008, %v10134_v20   ;;  %2256 = vperm.xlu0 %8007, %v10148_v29  }
 0x210   : > { %v10675_v4 = vpop.permute.xlu2 %2108 }
 0x211   : > { %17657 = vst [vmem:[#allocation184_spill] sm:$0xff] %v10675_v4  ;;  %v10677_v27 = vpop.permute.xlu1 %2068  ;;  %v10679_v15 = vpop.permute.xlu0 %2088 }
 0x212   : > { %17658 = vst [vmem:[#allocation185_spill] sm:$0xff] %v10677_v27 }
 0x213   : > { %17659 = vst [vmem:[#allocation186_spill] sm:$0xff] %v10679_v15 }
 0x216   : > { %2252 = vperm.xlu2 %8009, %v17660_v34  }
 0x217   : > { %2248 = vperm.xlu1 %8008, %v17661_v47   ;;  %2268 = vperm.xlu0 %8007, %v17662_v25  }
 0x218   : > { %v10684_v35 = vpop.permute.xlu2 %2120 }
 0x219   : > { %17663 = vst [vmem:[#allocation27_spill] sm:$0xff] %v10684_v35  ;;  %v10686_v51 = vpop.permute.xlu1 %2080  ;;  %v10688_v53 = vpop.permute.xlu0 %2100 }
 0x21a   : > { %17664 = vst [vmem:[#allocation28_spill] sm:$0xff] %v10686_v51 }
 0x21b   : > { %17665 = vst [vmem:[#allocation32_spill] sm:$0xff] %v10688_v53 }
 0x21e   : > { %2264 = vperm.xlu2 %8009, %v17666_v48  }
 0x21f   : > { %2260 = vperm.xlu1 %8008, %v17667_v9   ;;  %2280 = vperm.xlu0 %8007, %v17591_v45  }
 0x220   : > { %v10693_v4 = vpop.permute.xlu2 %2132 }
 0x221   : > { %17668 = vst [vmem:[#allocation33_spill] sm:$0xff] %v10693_v4  ;;  %v10695_v15 = vpop.permute.xlu1 %2092  ;;  %v10697_v27 = vpop.permute.xlu0 %2112  ;;  %v9585_v4 = vmov 3  }
 0x222   : > { %17669 = vst [vmem:[#allocation34_spill] sm:$0xff] %v10695_v15 }
 0x223   : > { %17670 = vst [vmem:[#allocation187_spill] sm:$0xff] %v10697_v27  ;;  %v10713_v27 = vld [vmem:[%s17003_s1 + $0x8] sm:$0xff] }
 0x226   : > { %2276 = vperm.xlu2 %8009, %v17671_v52  }
 0x227   : > { %2272 = vperm.xlu1 %8008, %v17672_v10   ;;  %2292 = vperm.xlu0 %8007, %v17597_v39  }
 0x228   : > { %v10702_v35 = vpop.permute.xlu2 %2144 }
 0x229   : > { %17673 = vst [vmem:[#allocation39_spill] sm:$0xff] %v10702_v35  ;;  %v10704_v36 = vpop.permute.xlu1 %2104  ;;  %v10706_v23 = vpop.permute.xlu0 %2124 }
 0x22a   : > { %17674 = vst [vmem:[#allocation40_spill] sm:$0xff] %v10704_v36  ;;  %v10822_v36 = vld [vmem:[%s17003_s1 + $0x50] sm:$0xff] }
 0x22b   : > { %17675 = vst [vmem:[#allocation188_spill] sm:$0xff] %v10706_v23  ;;  %v10774_v23 = vld [vmem:[%s17003_s1 + $0x20] sm:$0xff] }
 0x22e   : > { %2288 = vperm.xlu2 %8009, %v17592_v14  }
 0x22f   : > { %2284 = vperm.xlu1 %8008, %v17676_v13   ;;  %8011 = vset.pattern.permute.xlu0 %v9585_v4 }
 0x230   : > { %2375 = vperm.xlu0 %8011, %v10713_v27   ;;  %v10716_v15 = vpop.permute.xlu2 %2156 }
 0x231   : > { %17677 = vst [vmem:[#allocation46_spill] sm:$0xff] %v10716_v15  ;;  %v10718_v35 = vpop.permute.xlu1 %2116  ;;  %v10720_v61 = vpop.permute.xlu0 %2136 }
 0x232   : > { %17678 = vst [vmem:[#allocation189_spill] sm:$0xff] %v10718_v35 }
 0x233   : > { %17679 = vst [vmem:[#allocation190_spill] sm:$0xff] %v10720_v61 }
 0x236   : > { %8010 = vset.pattern.permute.xlu2 %v9585_v4 }
 0x237   : > { %2296 = vperm.xlu1 %8008, %v10248_v63   ;;  %2371 = vperm.xlu2 %8010, %v10726_v56  }
 0x238   : > { %2395 = vperm.xlu0 %8011, %v10732_v0   ;;  %v10735_v15 = vpop.permute.xlu2 %2168 }
 0x239   : > { %17681 = vst [vmem:[#allocation192_spill] sm:$0xff] %v10735_v15  ;;  %v10737_v61 = vpop.permute.xlu1 %2128  ;;  %v10739_v35 = vpop.permute.xlu0 %2148  ;;  %v10756_v15 = vld [vmem:[%s17003_s1 + $0x48] sm:$0xff] }
 0x23a   : > { %17682 = vst [vmem:[#allocation193_spill] sm:$0xff] %v10737_v61  ;;  %v10798_v61 = vld [vmem:[%s17003_s1 + $0x38] sm:$0xff] }
 0x23b   : > { %17683 = vst [vmem:[#allocation194_spill] sm:$0xff] %v10739_v35 }
 0x23f   : > { %8012 = vset.pattern.permute.xlu1 %v9585_v4  ;;  %2383 = vperm.xlu2 %8010, %v10744_v11  }
 0x240   : > { %2379 = vperm.xlu1 %8012, %v10750_v50   ;;  %2407 = vperm.xlu0 %8011, %v10756_v15   ;;  %v10759_v4 = vpop.permute.xlu2 %2180 }
 0x241   : > { %17684 = vst [vmem:[#allocation195_spill] sm:$0xff] %v10759_v4  ;;  %v10761_v35 = vpop.permute.xlu1 %2140  ;;  %v10763_v49 = vpop.permute.xlu0 %2160  ;;  %v10780_v4 = vld [vmem:[%s17003_s1 + $0x60] sm:$0xff] }
 0x242   : > { %17685 = vst [vmem:[#allocation196_spill] sm:$0xff] %v10761_v35 }
 0x243   : > { %17686 = vst [vmem:[#allocation197_spill] sm:$0xff] %v10763_v49 }
 0x247   : > { %2391 = vperm.xlu2 %8010, %v10768_v54  }
 0x248   : > { %2387 = vperm.xlu1 %8012, %v10774_v23   ;;  %2419 = vperm.xlu0 %8011, %v10780_v4   ;;  %v10783_v49 = vpop.permute.xlu2 %2192 }
 0x249   : > { %17688 = vst [vmem:[#allocation199_spill] sm:$0xff] %v10783_v49  ;;  %v10785_v35 = vpop.permute.xlu1 %2152  ;;  %v10787_v40 = vpop.permute.xlu0 %2172  ;;  %v10804_v49 = vld [vmem:[%s17003_s1 + $0x78] sm:$0xff] }
 0x24a   : > { %17689 = vst [vmem:[#allocation200_spill] sm:$0xff] %v10785_v35 }
 0x24b   : > { %17690 = vst [vmem:[#allocation201_spill] sm:$0xff] %v10787_v40 }
 0x24f   : > { %2403 = vperm.xlu2 %8010, %v10792_v42  }
 0x250   : > { %2399 = vperm.xlu1 %8012, %v10798_v61   ;;  %2431 = vperm.xlu0 %8011, %v10804_v49   ;;  %v10807_v40 = vpop.permute.xlu2 %2204 }
 0x251   : > { %17692 = vst [vmem:[#allocation203_spill] sm:$0xff] %v10807_v40  ;;  %v10809_v35 = vpop.permute.xlu1 %2164  ;;  %v10811_v43 = vpop.permute.xlu0 %2184  ;;  %v10828_v40 = vld [vmem:[%s17003_s1 + $0x90] sm:$0xff] }
 0x252   : > { %17693 = vst [vmem:[#allocation204_spill] sm:$0xff] %v10809_v35 }
 0x253   : > { %17694 = vst [vmem:[#allocation205_spill] sm:$0xff] %v10811_v43 }
 0x257   : > { %2415 = vperm.xlu2 %8010, %v10816_v30  }
 0x258   : > { %2411 = vperm.xlu1 %8012, %v10822_v36   ;;  %2443 = vperm.xlu0 %8011, %v10828_v40   ;;  %v10831_v43 = vpop.permute.xlu2 %2216 }
 0x259   : > { %17695 = vst [vmem:[#allocation206_spill] sm:$0xff] %v10831_v43  ;;  %v10833_v35 = vpop.permute.xlu1 %2176  ;;  %v10835_v53 = vpop.permute.xlu0 %2196  ;;  %v10852_v43 = vld [vmem:[%s17003_s1 + $0xa8] sm:$0xff] }
 0x25a   : > { %17696 = vst [vmem:[#allocation207_spill] sm:$0xff] %v10833_v35 }
 0x25b   : > { %17697 = vst [vmem:[#allocation208_spill] sm:$0xff] %v10835_v53 }
 0x25f   : > { %2427 = vperm.xlu2 %8010, %v10840_v31  }
 0x260   : > { %2423 = vperm.xlu1 %8012, %v10846_v16   ;;  %2455 = vperm.xlu0 %8011, %v10852_v43   ;;  %v10855_v53 = vpop.permute.xlu2 %2228 }
 0x261   : > { %17698 = vst [vmem:[#allocation209_spill] sm:$0xff] %v10855_v53  ;;  %v10857_v35 = vpop.permute.xlu1 %2188  ;;  %v10859_v51 = vpop.permute.xlu0 %2208  ;;  %v10876_v53 = vld [vmem:[%s17003_s1 + $0xc0] sm:$0xff] }
 0x262   : > { %17699 = vst [vmem:[#allocation210_spill] sm:$0xff] %v10857_v35 }
 0x263   : > { %17700 = vst [vmem:[#allocation211_spill] sm:$0xff] %v10859_v51 }
 0x267   : > { %2439 = vperm.xlu2 %8010, %v10864_v57  }
 0x268   : > { %2435 = vperm.xlu1 %8012, %v10870_v8   ;;  %2467 = vperm.xlu0 %8011, %v10876_v53   ;;  %v10879_v51 = vpop.permute.xlu2 %2240 }
 0x269   : > { %17701 = vst [vmem:[#allocation212_spill] sm:$0xff] %v10879_v51  ;;  %v10881_v35 = vpop.permute.xlu1 %2200  ;;  %v10883_v17 = vpop.permute.xlu0 %2220  ;;  %v10900_v51 = vld [vmem:[%s17003_s1 + $0xd8] sm:$0xff] }
 0x26a   : > { %17702 = vst [vmem:[#allocation213_spill] sm:$0xff] %v10881_v35 }
 0x26b   : > { %17703 = vst [vmem:[#allocation214_spill] sm:$0xff] %v10883_v17 }
 0x26f   : > { %2451 = vperm.xlu2 %8010, %v10888_v62  }
 0x270   : > { %2447 = vperm.xlu1 %8012, %v10894_v6   ;;  %2479 = vperm.xlu0 %8011, %v10900_v51   ;;  %v10903_v17 = vpop.permute.xlu2 %2252 }
 0x271   : > { %17704 = vst [vmem:[#allocation215_spill] sm:$0xff] %v10903_v17  ;;  %v10905_v35 = vpop.permute.xlu1 %2212  ;;  %v10907_v21 = vpop.permute.xlu0 %2232  ;;  %v10924_v17 = vld [vmem:[%s17003_s1 + $0xf0] sm:$0xff] }
 0x272   : > { %17705 = vst [vmem:[#allocation216_spill] sm:$0xff] %v10905_v35 }
 0x273   : > { %17706 = vst [vmem:[#allocation217_spill] sm:$0xff] %v10907_v21 }
 0x277   : > { %2463 = vperm.xlu2 %8010, %v10912_v22  }
 0x278   : > { %2459 = vperm.xlu1 %8012, %v10918_v1   ;;  %2491 = vperm.xlu0 %8011, %v10924_v17   ;;  %v10927_v21 = vpop.permute.xlu2 %2264 }
 0x279   : > { %17707 = vst [vmem:[#allocation218_spill] sm:$0xff] %v10927_v21  ;;  %v10929_v35 = vpop.permute.xlu1 %2224  ;;  %v10931_v44 = vpop.permute.xlu0 %2244  ;;  %v10948_v21 = vld [vmem:[%s17003_s1 + $0x108] sm:$0xff] }
 0x27a   : > { %17708 = vst [vmem:[#allocation219_spill] sm:$0xff] %v10929_v35 }
 0x27b   : > { %17709 = vst [vmem:[#allocation220_spill] sm:$0xff] %v10931_v44 }
 0x27f   : > { %2475 = vperm.xlu2 %8010, %v10936_v5  }
 0x280   : > { %2471 = vperm.xlu1 %8012, %v10942_v60   ;;  %2503 = vperm.xlu0 %8011, %v10948_v21   ;;  %v10951_v44 = vpop.permute.xlu2 %2276 }
 0x281   : > { %17710 = vst [vmem:[#allocation221_spill] sm:$0xff] %v10951_v44  ;;  %v10953_v35 = vpop.permute.xlu1 %2236  ;;  %v10955_v38 = vpop.permute.xlu0 %2256  ;;  %v10972_v44 = vld [vmem:[%s17003_s1 + $0x120] sm:$0xff] }
 0x282   : > { %17711 = vst [vmem:[#allocation222_spill] sm:$0xff] %v10953_v35 }
 0x283   : > { %17712 = vst [vmem:[#allocation223_spill] sm:$0xff] %v10955_v38 }
 0x287   : > { %2487 = vperm.xlu2 %8010, %v10960_v24  }
 0x288   : > { %2483 = vperm.xlu1 %8012, %v10966_v59   ;;  %2515 = vperm.xlu0 %8011, %v10972_v44   ;;  %v10975_v38 = vpop.permute.xlu2 %2288 }
 0x289   : > { %17713 = vst [vmem:[#allocation224_spill] sm:$0xff] %v10975_v38  ;;  %v10977_v35 = vpop.permute.xlu1 %2248  ;;  %v10979_v55 = vpop.permute.xlu0 %2268  ;;  %v10996_v38 = vld [vmem:[%s17003_s1 + $0x138] sm:$0xff] }
 0x28a   : > { %17714 = vst [vmem:[#allocation225_spill] sm:$0xff] %v10977_v35 }
 0x28b   : > { %17715 = vst [vmem:[#allocation226_spill] sm:$0xff] %v10979_v55 }
 0x28f   : > { %2499 = vperm.xlu2 %8010, %v10984_v46  }
 0x290   : > { %2495 = vperm.xlu1 %8012, %v10990_v41   ;;  %2527 = vperm.xlu0 %8011, %v10996_v38  }
 0x291   : > { %v10999_v55 = vpop.permute.xlu1 %2260  ;;  %v11001_v35 = vpop.permute.xlu2 %2371 }
 0x292   : > { %17716 = vst [vmem:[#allocation227_spill] sm:$0xff] %v10999_v55  ;;  %v11003_v26 = vpop.permute.xlu0 %2280 }
 0x293   : > { %17717 = vst [vmem:[#allocation228_spill] sm:$0xff] %v11001_v35  ;;  %v11020_v35 = vld [vmem:[%s17003_s1 + $0x150] sm:$0xff] }
 0x294   : > { %17718 = vst [vmem:[#allocation229_spill] sm:$0xff] %v11003_v26 }
 0x297   : > { %2511 = vperm.xlu2 %8010, %v11008_v37  }
 0x298   : > { %2507 = vperm.xlu1 %8012, %v11014_v12   ;;  %2539 = vperm.xlu0 %8011, %v11020_v35  }
 0x299   : > { %v11023_v26 = vpop.permute.xlu1 %2272  ;;  %v11025_v55 = vpop.permute.xlu2 %2383 }
 0x29a   : > { %17719 = vst [vmem:[#allocation230_spill] sm:$0xff] %v11023_v26  ;;  %v11027_v32 = vpop.permute.xlu0 %2292 }
 0x29b   : > { %17720 = vst [vmem:[#allocation231_spill] sm:$0xff] %v11025_v55 }
 0x29c   : > { %17721 = vst [vmem:[#allocation232_spill] sm:$0xff] %v11027_v32 }
 0x29f   : > { %2523 = vperm.xlu2 %8010, %v11032_v2  }
 0x2a0   : > { %2519 = vperm.xlu1 %8012, %v11038_v18   ;;  %2551 = vperm.xlu0 %8011, %v10106_v19  }
 0x2a1   : > { %v11042_v26 = vpop.permute.xlu1 %2284  ;;  %v11044_v55 = vpop.permute.xlu2 %2391 }
 0x2a2   : > { %17722 = vst [vmem:[#allocation233_spill] sm:$0xff] %v11042_v26  ;;  %v11046_v32 = vpop.permute.xlu0 %2375 }
 0x2a3   : > { %17723 = vst [vmem:[#allocation234_spill] sm:$0xff] %v11044_v55  ;;  %v11070_v55 = vld [vmem:[%s17003_s1 + $0x160] sm:$0xff] }
 0x2a4   : > { %17724 = vst [vmem:[#allocation235_spill] sm:$0xff] %v11046_v32 }
 0x2a7   : > { %2535 = vperm.xlu2 %8010, %v11051_v7  }
 0x2a8   : > { %2531 = vperm.xlu1 %8012, %v11057_v3   ;;  %2563 = vperm.xlu0 %8011, %v10134_v20  }
 0x2a9   : > { %v11061_v19 = vpop.permute.xlu1 %2296  ;;  %v11063_v26 = vpop.permute.xlu2 %2403 }
 0x2aa   : > { %17725 = vst [vmem:[#allocation236_spill] sm:$0xff] %v11061_v19  ;;  %v11065_v32 = vpop.permute.xlu0 %2395  ;;  %v11089_v19 = vld [vmem:[%s17003_s1 + $0x178] sm:$0xff] }
 0x2ab   : > { %17726 = vst [vmem:[#allocation237_spill] sm:$0xff] %v11063_v26 }
 0x2ac   : > { %17727 = vst [vmem:[#allocation238_spill] sm:$0xff] %v11065_v32 }
 0x2ad   : > { %17731 = vst [vmem:[#allocation242_spill] sm:$0xff] %v11089_v19 }
 0x2af   : > { %2547 = vperm.xlu2 %8010, %v11070_v55  }
 0x2b0   : > { %2543 = vperm.xlu1 %8012, %v11076_v28   ;;  %2575 = vperm.xlu0 %8011, %v17661_v47  }
 0x2b1   : > { %v11080_v20 = vpop.permute.xlu2 %2415 }
 0x2b2   : > { %17728 = vst [vmem:[#allocation239_spill] sm:$0xff] %v11080_v20  ;;  %v11082_v26 = vpop.permute.xlu1 %2379  ;;  %v11084_v32 = vpop.permute.xlu0 %2407  ;;  %v11108_v20 = vld [vmem:[%s17003_s1 + $0x190] sm:$0xff] }
 0x2b3   : > { %17729 = vst [vmem:[#allocation240_spill] sm:$0xff] %v11082_v26 }
 0x2b4   : > { %17730 = vst [vmem:[#allocation241_spill] sm:$0xff] %v11084_v32 }
 0x2b5   : > { %17735 = vst [vmem:[#allocation246_spill] sm:$0xff] %v11108_v20 }
 0x2b7   : > { %2559 = vperm.xlu2 %8010, %v11089_v19  }
 0x2b8   : > { %2555 = vperm.xlu1 %8012, %v11095_v58   ;;  %2587 = vperm.xlu0 %8011, %v17667_v9  }
 0x2b9   : > { %v11099_v47 = vpop.permute.xlu2 %2427 }
 0x2ba   : > { %17732 = vst [vmem:[#allocation243_spill] sm:$0xff] %v11099_v47  ;;  %v11101_v26 = vpop.permute.xlu1 %2387  ;;  %v11103_v32 = vpop.permute.xlu0 %2419 }
 0x2bb   : > { %17733 = vst [vmem:[#allocation244_spill] sm:$0xff] %v11101_v26 }
 0x2bc   : > { %17734 = vst [vmem:[#allocation245_spill] sm:$0xff] %v11103_v32 }
 0x2bf   : > { %2571 = vperm.xlu2 %8010, %v11108_v20  }
 0x2c0   : > { %2567 = vperm.xlu1 %8012, %v11114_v33   ;;  %2599 = vperm.xlu0 %8011, %v17672_v10  }
 0x2c1   : > { %v11118_v9 = vpop.permute.xlu2 %2439 }
 0x2c2   : > { %17736 = vst [vmem:[#allocation247_spill] sm:$0xff] %v11118_v9  ;;  %v11120_v47 = vpop.permute.xlu1 %2399  ;;  %v11122_v32 = vpop.permute.xlu0 %2431  ;;  %v9587_v9 = vmov 6  }
 0x2c3   : > { %17737 = vst [vmem:[#allocation248_spill] sm:$0xff] %v11120_v47  ;;  %v11348_v47 = vld [vmem:[%s17003_s1 + $0x1e8] sm:$0xff] }
 0x2c4   : > { %17738 = vst [vmem:[#allocation249_spill] sm:$0xff] %v11122_v32 }
 0x2c7   : > { %2583 = vperm.xlu2 %8010, %v10148_v29  }
 0x2c8   : > { %2579 = vperm.xlu1 %8012, %v17660_v34   ;;  %2611 = vperm.xlu0 %8011, %v17676_v13   ;;  %v9586_v13 = vmov 5  }
 0x2c9   : > { %v11127_v26 = vpop.permute.xlu2 %2451 }
 0x2ca   : > { %17739 = vst [vmem:[#allocation250_spill] sm:$0xff] %v11127_v26  ;;  %v11129_v20 = vpop.permute.xlu1 %2411  ;;  %v11131_v19 = vpop.permute.xlu0 %2443  ;;  %v11329_v26 = vld [vmem:[%s17003_s1 + $0x1d0] sm:$0xff] }
 0x2cb   : > { %17740 = vst [vmem:[#allocation251_spill] sm:$0xff] %v11129_v20  ;;  %v11385_v20 = vld [vmem:[%s17003_s1 + $0x1c0] sm:$0xff] }
 0x2cc   : > { %17741 = vst [vmem:[#allocation252_spill] sm:$0xff] %v11131_v19  ;;  %v17799_v19 = vld [vmem:[#allocation242_spill] sm:$0xff] }
 0x2cf   : > { %2595 = vperm.xlu2 %8010, %v17662_v25  }
 0x2d0   : > { %2591 = vperm.xlu1 %8012, %v17666_v48   ;;  %2623 = vperm.xlu0 %8011, %v10248_v63  }
 0x2d1   : > { %v11136_v10 = vpop.permute.xlu2 %2463 }
 0x2d2   : > { %17742 = vst [vmem:[#allocation253_spill] sm:$0xff] %v11136_v10  ;;  %v11138_v32 = vpop.permute.xlu1 %2423  ;;  %v11140_v29 = vpop.permute.xlu0 %2455 }
 0x2d3   : > { %17743 = vst [vmem:[#allocation254_spill] sm:$0xff] %v11138_v32  ;;  %v17803_v32 = vld [vmem:[#allocation246_spill] sm:$0xff] }
 0x2d4   : > { %17744 = vst [vmem:[#allocation255_spill] sm:$0xff] %v11140_v29  ;;  %v11341_v29 = vld [vmem:[%s17003_s1 + $0x198] sm:$0xff] }
 0x2d5   : > { %17804 = vst [vmem:[#allocation246_spill] sm:$0xff] %v11348_v47 }
 0x2d7   : > { %2607 = vperm.xlu2 %8010, %v17591_v45  }
 0x2d8   : > { %2603 = vperm.xlu1 %8012, %v17671_v52   ;;  %8015 = vset.pattern.permute.xlu0 %v9586_v13 }
 0x2d9   : > { %v11144_v34 = vpop.permute.xlu2 %2475  ;;  %2704 = vperm.xlu0 %8015, %v10750_v50  }
 0x2da   : > { %17745 = vst [vmem:[#allocation256_spill] sm:$0xff] %v11144_v34  ;;  %v11147_v25 = vpop.permute.xlu1 %2435  ;;  %v11149_v48 = vpop.permute.xlu0 %2467 }
 0x2db   : > { %17746 = vst [vmem:[#allocation257_spill] sm:$0xff] %v11147_v25  ;;  %v11379_v25 = vld [vmem:[%s17003_s1 + $0x1c8] sm:$0xff] }
 0x2dc   : > { %17747 = vst [vmem:[#allocation258_spill] sm:$0xff] %v11149_v48 }
 0x2dd   : > { %17811 = vst [vmem:[#allocation318_spill] sm:$0xff] %v11379_v25 }
 0x2df   : > { %2619 = vperm.xlu2 %8010, %v17597_v39  }
 0x2e0   : > { %2615 = vperm.xlu1 %8012, %v17592_v14  }
 0x2e1   : > { %v11153_v63 = vpop.permute.xlu2 %2487  ;;  %2724 = vperm.xlu0 %8015, %v10798_v61  }
 0x2e2   : > { %17748 = vst [vmem:[#allocation259_spill] sm:$0xff] %v11153_v63  ;;  %v11156_v45 = vpop.permute.xlu1 %2447  ;;  %v11158_v52 = vpop.permute.xlu0 %2479 }
 0x2e3   : > { %17749 = vst [vmem:[#allocation260_spill] sm:$0xff] %v11156_v45 }
 0x2e4   : > { %17750 = vst [vmem:[#allocation261_spill] sm:$0xff] %v11158_v52 }
 0x2e7   : > { %8014 = vset.pattern.permute.xlu2 %v9586_v13 }
 0x2e8   : > { %8013 = vset.pattern.permute.xlu1 %v9586_v13  ;;  %2700 = vperm.xlu2 %8014, %v10713_v27  }
 0x2e9   : > { %2696 = vperm.xlu1 %8013, %v10726_v56   ;;  %v11162_v34 = vpop.permute.xlu2 %2499  ;;  %2736 = vperm.xlu0 %8015, %v10822_v36  }
 0x2ea   : > { %17751 = vst [vmem:[#allocation262_spill] sm:$0xff] %v11162_v34  ;;  %v11165_v39 = vpop.permute.xlu1 %2459  ;;  %v11167_v14 = vpop.permute.xlu0 %2491 }
 0x2eb   : > { %17752 = vst [vmem:[#allocation263_spill] sm:$0xff] %v11165_v39 }
 0x2ec   : > { %17753 = vst [vmem:[#allocation264_spill] sm:$0xff] %v11167_v14 }
 0x2f0   : > { %2712 = vperm.xlu2 %8014, %v10774_v23  }
 0x2f1   : > { %2708 = vperm.xlu1 %8013, %v10744_v11   ;;  %v11171_v63 = vpop.permute.xlu2 %2511  ;;  %2748 = vperm.xlu0 %8015, %v10846_v16  }
 0x2f2   : > { %17754 = vst [vmem:[#allocation265_spill] sm:$0xff] %v11171_v63  ;;  %v11174_v13 = vpop.permute.xlu1 %2471  ;;  %v11176_v52 = vpop.permute.xlu0 %2503 }
 0x2f3   : > { %17755 = vst [vmem:[#allocation266_spill] sm:$0xff] %v11174_v13 }
 0x2f4   : > { %17756 = vst [vmem:[#allocation267_spill] sm:$0xff] %v11176_v52 }
 0x2f8   : > { %2720 = vperm.xlu2 %8014, %v10732_v0  }
 0x2f9   : > { %2716 = vperm.xlu1 %8013, %v10768_v54   ;;  %v11180_v34 = vpop.permute.xlu2 %2523  ;;  %2760 = vperm.xlu0 %8015, %v10870_v8  }
 0x2fa   : > { %17757 = vst [vmem:[#allocation268_spill] sm:$0xff] %v11180_v34  ;;  %v11183_v14 = vpop.permute.xlu1 %2483  ;;  %v11185_v48 = vpop.permute.xlu0 %2515 }
 0x2fb   : > { %17758 = vst [vmem:[#allocation269_spill] sm:$0xff] %v11183_v14 }
 0x2fc   : > { %17759 = vst [vmem:[#allocation270_spill] sm:$0xff] %v11185_v48 }
 0x300   : > { %2732 = vperm.xlu2 %8014, %v10756_v15  }
 0x301   : > { %2728 = vperm.xlu1 %8013, %v10792_v42   ;;  %v11189_v63 = vpop.permute.xlu2 %2535  ;;  %2772 = vperm.xlu0 %8015, %v10894_v6  }
 0x302   : > { %17760 = vst [vmem:[#allocation271_spill] sm:$0xff] %v11189_v63  ;;  %v11192_v52 = vpop.permute.xlu1 %2495  ;;  %v11194_v13 = vpop.permute.xlu0 %2527 }
 0x303   : > { %17761 = vst [vmem:[#allocation272_spill] sm:$0xff] %v11192_v52 }
 0x304   : > { %17762 = vst [vmem:[#allocation273_spill] sm:$0xff] %v11194_v13 }
 0x308   : > { %2744 = vperm.xlu2 %8014, %v10780_v4  }
 0x309   : > { %2740 = vperm.xlu1 %8013, %v10816_v30   ;;  %v11198_v34 = vpop.permute.xlu2 %2547  ;;  %2784 = vperm.xlu0 %8015, %v10918_v1  }
 0x30a   : > { %17763 = vst [vmem:[#allocation274_spill] sm:$0xff] %v11198_v34  ;;  %v11201_v48 = vpop.permute.xlu1 %2507  ;;  %v11203_v14 = vpop.permute.xlu0 %2539 }
 0x30b   : > { %17764 = vst [vmem:[#allocation275_spill] sm:$0xff] %v11201_v48 }
 0x30c   : > { %17765 = vst [vmem:[#allocation276_spill] sm:$0xff] %v11203_v14 }
 0x310   : > { %2756 = vperm.xlu2 %8014, %v10804_v49  }
 0x311   : > { %2752 = vperm.xlu1 %8013, %v10840_v31   ;;  %v11207_v63 = vpop.permute.xlu2 %2559  ;;  %2796 = vperm.xlu0 %8015, %v10942_v60  }
 0x312   : > { %17766 = vst [vmem:[#allocation277_spill] sm:$0xff] %v11207_v63  ;;  %v11210_v13 = vpop.permute.xlu1 %2519  ;;  %v11212_v52 = vpop.permute.xlu0 %2551 }
 0x313   : > { %17767 = vst [vmem:[#allocation278_spill] sm:$0xff] %v11210_v13 }
 0x314   : > { %17768 = vst [vmem:[#allocation279_spill] sm:$0xff] %v11212_v52 }
 0x318   : > { %2768 = vperm.xlu2 %8014, %v10828_v40  }
 0x319   : > { %2764 = vperm.xlu1 %8013, %v10864_v57   ;;  %v11216_v34 = vpop.permute.xlu2 %2571  ;;  %2808 = vperm.xlu0 %8015, %v10966_v59  }
 0x31a   : > { %17769 = vst [vmem:[#allocation280_spill] sm:$0xff] %v11216_v34  ;;  %v11219_v14 = vpop.permute.xlu1 %2531  ;;  %v11221_v48 = vpop.permute.xlu0 %2563 }
 0x31b   : > { %17770 = vst [vmem:[#allocation281_spill] sm:$0xff] %v11219_v14 }
 0x31c   : > { %17771 = vst [vmem:[#allocation282_spill] sm:$0xff] %v11221_v48 }
 0x320   : > { %2780 = vperm.xlu2 %8014, %v10852_v43  }
 0x321   : > { %2776 = vperm.xlu1 %8013, %v10888_v62   ;;  %v11225_v63 = vpop.permute.xlu2 %2583  ;;  %2820 = vperm.xlu0 %8015, %v10990_v41  }
 0x322   : > { %17772 = vst [vmem:[#allocation283_spill] sm:$0xff] %v11225_v63  ;;  %v11228_v52 = vpop.permute.xlu1 %2543  ;;  %v11230_v13 = vpop.permute.xlu0 %2575 }
 0x323   : > { %17773 = vst [vmem:[#allocation284_spill] sm:$0xff] %v11228_v52 }
 0x324   : > { %17774 = vst [vmem:[#allocation285_spill] sm:$0xff] %v11230_v13 }
 0x328   : > { %2792 = vperm.xlu2 %8014, %v10876_v53  }
 0x329   : > { %2788 = vperm.xlu1 %8013, %v10912_v22   ;;  %v11234_v34 = vpop.permute.xlu2 %2595  ;;  %2832 = vperm.xlu0 %8015, %v11014_v12  }
 0x32a   : > { %17775 = vst [vmem:[#allocation286_spill] sm:$0xff] %v11234_v34  ;;  %v11237_v48 = vpop.permute.xlu1 %2555  ;;  %v11239_v14 = vpop.permute.xlu0 %2587 }
 0x32b   : > { %17776 = vst [vmem:[#allocation287_spill] sm:$0xff] %v11237_v48 }
 0x32c   : > { %17777 = vst [vmem:[#allocation288_spill] sm:$0xff] %v11239_v14 }
 0x330   : > { %2804 = vperm.xlu2 %8014, %v10900_v51  }
 0x331   : > { %2800 = vperm.xlu1 %8013, %v10936_v5   ;;  %v11243_v63 = vpop.permute.xlu2 %2607  ;;  %2844 = vperm.xlu0 %8015, %v11038_v18  }
 0x332   : > { %17778 = vst [vmem:[#allocation289_spill] sm:$0xff] %v11243_v63  ;;  %v11246_v52 = vpop.permute.xlu1 %2567  ;;  %v11248_v13 = vpop.permute.xlu0 %2599 }
 0x333   : > { %17779 = vst [vmem:[#allocation290_spill] sm:$0xff] %v11246_v52 }
 0x334   : > { %17780 = vst [vmem:[#allocation291_spill] sm:$0xff] %v11248_v13 }
 0x338   : > { %2816 = vperm.xlu2 %8014, %v10924_v17  }
 0x339   : > { %2812 = vperm.xlu1 %8013, %v10960_v24   ;;  %v11252_v34 = vpop.permute.xlu2 %2619  ;;  %2856 = vperm.xlu0 %8015, %v11057_v3  }
 0x33a   : > { %17781 = vst [vmem:[#allocation292_spill] sm:$0xff] %v11252_v34  ;;  %v11255_v48 = vpop.permute.xlu1 %2579  ;;  %v11257_v14 = vpop.permute.xlu0 %2611 }
 0x33b   : > { %17782 = vst [vmem:[#allocation293_spill] sm:$0xff] %v11255_v48 }
 0x33c   : > { %17783 = vst [vmem:[#allocation294_spill] sm:$0xff] %v11257_v14 }
 0x340   : > { %2828 = vperm.xlu2 %8014, %v10948_v21  }
 0x341   : > { %2824 = vperm.xlu1 %8013, %v10984_v46   ;;  %2868 = vperm.xlu0 %8015, %v11076_v28  }
 0x342   : > { %v11262_v52 = vpop.permute.xlu1 %2591  ;;  %v11264_v63 = vpop.permute.xlu2 %2700 }
 0x343   : > { %17784 = vst [vmem:[#allocation295_spill] sm:$0xff] %v11262_v52  ;;  %v11266_v13 = vpop.permute.xlu0 %2623 }
 0x344   : > { %17785 = vst [vmem:[#allocation296_spill] sm:$0xff] %v11264_v63  ;;  %v11322_v63 = vld [vmem:[%s17003_s1 + $0x180] sm:$0xff] }
 0x345   : > { %17786 = vst [vmem:[#allocation297_spill] sm:$0xff] %v11266_v13 }
 0x348   : > { %2840 = vperm.xlu2 %8014, %v10972_v44  }
 0x349   : > { %2836 = vperm.xlu1 %8013, %v11008_v37   ;;  %2880 = vperm.xlu0 %8015, %v11095_v58  }
 0x34a   : > { %v11271_v34 = vpop.permute.xlu1 %2603  ;;  %v11273_v14 = vpop.permute.xlu2 %2712 }
 0x34b   : > { %17787 = vst [vmem:[#allocation298_spill] sm:$0xff] %v11271_v34  ;;  %v11275_v48 = vpop.permute.xlu0 %2704  ;;  %v11291_v34 = vld [vmem:[%s17003_s1 + $0x1a0] sm:$0xff] }
 0x34c   : > { %17788 = vst [vmem:[#allocation299_spill] sm:$0xff] %v11273_v14 }
 0x34d   : > { %17789 = vst [vmem:[#allocation300_spill] sm:$0xff] %v11275_v48  ;;  %v11366_v48 = vld [vmem:[%s17003_s1 + $0x1a8] sm:$0xff] }
 0x350   : > { %2852 = vperm.xlu2 %8014, %v10996_v38  }
 0x351   : > { %2848 = vperm.xlu1 %8013, %v11032_v2   ;;  %2892 = vperm.xlu0 %8015, %v11114_v33  }
 0x352   : > { %v11280_v52 = vpop.permute.xlu1 %2615  ;;  %v11282_v13 = vpop.permute.xlu2 %2720 }
 0x353   : > { %17790 = vst [vmem:[#allocation301_spill] sm:$0xff] %v11280_v52  ;;  %v11284_v10 = vpop.permute.xlu0 %2724 }
 0x354   : > { %17791 = vst [vmem:[#allocation302_spill] sm:$0xff] %v11282_v13  ;;  %v11310_v13 = vld [vmem:[%s17003_s1 + $0x1b8] sm:$0xff] }
 0x355   : > { %17792 = vst [vmem:[#allocation303_spill] sm:$0xff] %v11284_v10  ;;  %v11303_v10 = vld [vmem:[%s17003_s1 + $0x168] sm:$0xff] }
 0x358   : > { %2864 = vperm.xlu2 %8014, %v11020_v35  }
 0x359   : > { %2860 = vperm.xlu1 %8013, %v11051_v7   ;;  %2904 = vperm.xlu0 %8015, %v11291_v34  }
 0x35a   : > { %v11294_v39 = vpop.permute.xlu2 %2732 }
 0x35b   : > { %17793 = vst [vmem:[#allocation304_spill] sm:$0xff] %v11294_v39  ;;  %v11296_v14 = vpop.permute.xlu1 %2696  ;;  %v11298_v52 = vpop.permute.xlu0 %2736 }
 0x35c   : > { %17794 = vst [vmem:[#allocation305_spill] sm:$0xff] %v11296_v14 }
 0x35d   : > { %17795 = vst [vmem:[#allocation306_spill] sm:$0xff] %v11298_v52 }
 0x360   : > { %2876 = vperm.xlu2 %8014, %v11303_v10  }
 0x361   : > { %2872 = vperm.xlu1 %8013, %v11070_v55   ;;  %2916 = vperm.xlu0 %8015, %v11310_v13  }
 0x362   : > { %v11313_v39 = vpop.permute.xlu2 %2744 }
 0x363   : > { %17796 = vst [vmem:[#allocation307_spill] sm:$0xff] %v11313_v39  ;;  %v11315_v14 = vpop.permute.xlu1 %2708  ;;  %v11317_v52 = vpop.permute.xlu0 %2748 }
 0x364   : > { %17797 = vst [vmem:[#allocation308_spill] sm:$0xff] %v11315_v14  ;;  %v11360_v14 = vld [vmem:[%s17003_s1 + $0x1b0] sm:$0xff] }
 0x365   : > { %17798 = vst [vmem:[#allocation309_spill] sm:$0xff] %v11317_v52 }
 0x368   : > { %2888 = vperm.xlu2 %8014, %v11322_v63  }
 0x369   : > { %2884 = vperm.xlu1 %8013, %v17799_v19   ;;  %2928 = vperm.xlu0 %8015, %v11329_v26  }
 0x36a   : > { %v11332_v39 = vpop.permute.xlu2 %2756 }
 0x36b   : > { %17800 = vst [vmem:[#allocation242_spill] sm:$0xff] %v11332_v39  ;;  %v11334_v45 = vpop.permute.xlu1 %2716  ;;  %v11336_v52 = vpop.permute.xlu0 %2760 }
 0x36c   : > { %17801 = vst [vmem:[#allocation310_spill] sm:$0xff] %v11334_v45 }
 0x36d   : > { %17802 = vst [vmem:[#allocation311_spill] sm:$0xff] %v11336_v52 }
 0x370   : > { %2900 = vperm.xlu2 %8014, %v11341_v29  }
 0x371   : > { %2896 = vperm.xlu1 %8013, %v17803_v32   ;;  %2940 = vperm.xlu0 %8015, %v11348_v47   ;;  %v11404_v47 = vld [vmem:[%s17003_s1 + $0x1d8] sm:$0xff] }
 0x372   : > { %v11351_v39 = vpop.permute.xlu2 %2768 }
 0x373   : > { %17805 = vst [vmem:[#allocation312_spill] sm:$0xff] %v11351_v39  ;;  %v11353_v45 = vpop.permute.xlu1 %2728  ;;  %v11355_v52 = vpop.permute.xlu0 %2772 }
 0x374   : > { %17806 = vst [vmem:[#allocation313_spill] sm:$0xff] %v11353_v45 }
 0x375   : > { %17807 = vst [vmem:[#allocation314_spill] sm:$0xff] %v11355_v52 }
 0x378   : > { %2912 = vperm.xlu2 %8014, %v11360_v14  }
 0x379   : > { %2908 = vperm.xlu1 %8013, %v11366_v48   ;;  %8016 = vset.pattern.permute.xlu0 %v9587_v9 }
 0x37a   : > { %v11369_v39 = vpop.permute.xlu2 %2780  ;;  %3018 = vperm.xlu0 %8016, %v10726_v56   ;;  %v11398_v56 = vld [vmem:[%s17003_s1 + $0x1e0] sm:$0xff] }
 0x37b   : > { %17808 = vst [vmem:[#allocation315_spill] sm:$0xff] %v11369_v39  ;;  %v11372_v52 = vpop.permute.xlu1 %2740  ;;  %v11374_v45 = vpop.permute.xlu0 %2784 }
 0x37c   : > { %17809 = vst [vmem:[#allocation316_spill] sm:$0xff] %v11372_v52 }
 0x37d   : > { %17810 = vst [vmem:[#allocation317_spill] sm:$0xff] %v11374_v45 }
 0x37e   : > { %17815 = vst [vmem:[#allocation322_spill] sm:$0xff] %v11398_v56 }
 0x380   : > { %2924 = vperm.xlu2 %8014, %v11379_v25  }
 0x381   : > { %2920 = vperm.xlu1 %8013, %v11385_v20  }
 0x382   : > { %v11388_v39 = vpop.permute.xlu2 %2792  ;;  %3038 = vperm.xlu0 %8016, %v10768_v54   ;;  %v11417_v54 = vld [vmem:[%s17003_s1 + $0x1f8] sm:$0xff] }
 0x383   : > { %17812 = vst [vmem:[#allocation319_spill] sm:$0xff] %v11388_v39  ;;  %v11391_v52 = vpop.permute.xlu1 %2752  ;;  %v11393_v45 = vpop.permute.xlu0 %2796 }
 0x384   : > { %17813 = vst [vmem:[#allocation320_spill] sm:$0xff] %v11391_v52 }
 0x385   : > { %17814 = vst [vmem:[#allocation321_spill] sm:$0xff] %v11393_v45 }
 0x386   : > { %17819 = vst [vmem:[#allocation326_spill] sm:$0xff] %v11417_v54 }
 0x388   : > { %2936 = vperm.xlu2 %8014, %v11398_v56   ;;  %v11423_v56 = vld [vmem:[%s17003_s1 + $0x1f0] sm:$0xff] }
 0x389   : > { %2932 = vperm.xlu1 %8013, %v11404_v47   ;;  %17820 = vst [vmem:[#allocation327_spill] sm:$0xff] %v11423_v56 }
 0x38a   : > { %v11407_v39 = vpop.permute.xlu2 %2804  ;;  %3050 = vperm.xlu0 %8016, %v10792_v42  }
 0x38b   : > { %17816 = vst [vmem:[#allocation323_spill] sm:$0xff] %v11407_v39  ;;  %v11410_v52 = vpop.permute.xlu1 %2764  ;;  %v11412_v45 = vpop.permute.xlu0 %2808 }
 0x38c   : > { %17817 = vst [vmem:[#allocation324_spill] sm:$0xff] %v11410_v52 }
 0x38d   : > { %17818 = vst [vmem:[#allocation325_spill] sm:$0xff] %v11412_v45 }
 0x390   : > { %2948 = vperm.xlu2 %8014, %v11417_v54  }
 0x391   : > { %2944 = vperm.xlu1 %8013, %v11423_v56  }
 0x392   : > { %v11426_v39 = vpop.permute.xlu2 %2816  ;;  %3062 = vperm.xlu0 %8016, %v10816_v30  }
 0x393   : > { %17821 = vst [vmem:[#allocation328_spill] sm:$0xff] %v11426_v39  ;;  %v11429_v52 = vpop.permute.xlu1 %2776  ;;  %v11431_v45 = vpop.permute.xlu0 %2820 }
 0x394   : > { %17822 = vst [vmem:[#allocation329_spill] sm:$0xff] %v11429_v52 }
 0x395   : > { %17823 = vst [vmem:[#allocation330_spill] sm:$0xff] %v11431_v45 }
 0x398   : > { %8018 = vset.pattern.permute.xlu2 %v9587_v9 }
 0x399   : > { %8017 = vset.pattern.permute.xlu1 %v9587_v9  ;;  %3026 = vperm.xlu2 %8018, %v10750_v50  }
 0x39a   : > { %3022 = vperm.xlu1 %8017, %v10713_v27   ;;  %v11435_v42 = vpop.permute.xlu2 %2828  ;;  %3074 = vperm.xlu0 %8016, %v10840_v31  }
 0x39b   : > { %17824 = vst [vmem:[#allocation331_spill] sm:$0xff] %v11435_v42  ;;  %v11438_v54 = vpop.permute.xlu1 %2788  ;;  %v11440_v25 = vpop.permute.xlu0 %2832 }
 0x39c   : > { %17825 = vst [vmem:[#allocation332_spill] sm:$0xff] %v11438_v54 }
 0x39d   : > { %17826 = vst [vmem:[#allocation333_spill] sm:$0xff] %v11440_v25 }
 0x3a1   : > { %3034 = vperm.xlu2 %8018, %v10774_v23  }
 0x3a2   : > { %3030 = vperm.xlu1 %8017, %v10744_v11   ;;  %v11444_v39 = vpop.permute.xlu2 %2840  ;;  %3086 = vperm.xlu0 %8016, %v10864_v57  }
 0x3a3   : > { %17827 = vst [vmem:[#allocation334_spill] sm:$0xff] %v11444_v39  ;;  %v11447_v9 = vpop.permute.xlu1 %2800  ;;  %v11449_v45 = vpop.permute.xlu0 %2844 }
 0x3a4   : > { %17828 = vst [vmem:[#allocation335_spill] sm:$0xff] %v11447_v9 }
 0x3a5   : > { %17829 = vst [vmem:[#allocation336_spill] sm:$0xff] %v11449_v45 }
 0x3a9   : > { %3046 = vperm.xlu2 %8018, %v10798_v61  }
 0x3aa   : > { %3042 = vperm.xlu1 %8017, %v10732_v0   ;;  %v11453_v42 = vpop.permute.xlu2 %2852  ;;  %3098 = vperm.xlu0 %8016, %v10888_v62  }
 0x3ab   : > { %17830 = vst [vmem:[#allocation337_spill] sm:$0xff] %v11453_v42  ;;  %v11456_v25 = vpop.permute.xlu1 %2812  ;;  %v11458_v54 = vpop.permute.xlu0 %2856 }
 0x3ac   : > { %17831 = vst [vmem:[#allocation338_spill] sm:$0xff] %v11456_v25 }
 0x3ad   : > { %17832 = vst [vmem:[#allocation339_spill] sm:$0xff] %v11458_v54 }
 0x3b1   : > { %3058 = vperm.xlu2 %8018, %v10822_v36  }
 0x3b2   : > { %3054 = vperm.xlu1 %8017, %v10756_v15   ;;  %v11462_v39 = vpop.permute.xlu2 %2864  ;;  %3110 = vperm.xlu0 %8016, %v10912_v22  }
 0x3b3   : > { %17833 = vst [vmem:[#allocation340_spill] sm:$0xff] %v11462_v39  ;;  %v11465_v45 = vpop.permute.xlu1 %2824  ;;  %v11467_v9 = vpop.permute.xlu0 %2868 }
 0x3b4   : > { %17834 = vst [vmem:[#allocation341_spill] sm:$0xff] %v11465_v45 }
 0x3b5   : > { %17835 = vst [vmem:[#allocation342_spill] sm:$0xff] %v11467_v9 }
 0x3b9   : > { %3070 = vperm.xlu2 %8018, %v10846_v16  }
 0x3ba   : > { %3066 = vperm.xlu1 %8017, %v10780_v4   ;;  %v11471_v42 = vpop.permute.xlu2 %2876  ;;  %3122 = vperm.xlu0 %8016, %v10936_v5  }
 0x3bb   : > { %17836 = vst [vmem:[#allocation343_spill] sm:$0xff] %v11471_v42  ;;  %v11474_v54 = vpop.permute.xlu1 %2836  ;;  %v11476_v25 = vpop.permute.xlu0 %2880 }
 0x3bc   : > { %17837 = vst [vmem:[#allocation344_spill] sm:$0xff] %v11474_v54 }
 0x3bd   : > { %17838 = vst [vmem:[#allocation345_spill] sm:$0xff] %v11476_v25 }
 0x3c1   : > { %3082 = vperm.xlu2 %8018, %v10870_v8  }
 0x3c2   : > { %3078 = vperm.xlu1 %8017, %v10804_v49   ;;  %v11480_v39 = vpop.permute.xlu2 %2888  ;;  %3134 = vperm.xlu0 %8016, %v10960_v24  }
 0x3c3   : > { %17839 = vst [vmem:[#allocation346_spill] sm:$0xff] %v11480_v39  ;;  %v11483_v9 = vpop.permute.xlu1 %2848  ;;  %v11485_v45 = vpop.permute.xlu0 %2892 }
 0x3c4   : > { %17840 = vst [vmem:[#allocation347_spill] sm:$0xff] %v11483_v9 }
 0x3c5   : > { %17841 = vst [vmem:[#allocation348_spill] sm:$0xff] %v11485_v45 }
 0x3c9   : > { %3094 = vperm.xlu2 %8018, %v10894_v6  }
 0x3ca   : > { %3090 = vperm.xlu1 %8017, %v10828_v40   ;;  %v11489_v42 = vpop.permute.xlu2 %2900  ;;  %3146 = vperm.xlu0 %8016, %v10984_v46  }
 0x3cb   : > { %17842 = vst [vmem:[#allocation349_spill] sm:$0xff] %v11489_v42  ;;  %v11492_v25 = vpop.permute.xlu1 %2860  ;;  %v11494_v54 = vpop.permute.xlu0 %2904 }
 0x3cc   : > { %17843 = vst [vmem:[#allocation350_spill] sm:$0xff] %v11492_v25 }
 0x3cd   : > { %17844 = vst [vmem:[#allocation351_spill] sm:$0xff] %v11494_v54 }
 0x3d1   : > { %3106 = vperm.xlu2 %8018, %v10918_v1  }
 0x3d2   : > { %3102 = vperm.xlu1 %8017, %v10852_v43   ;;  %v11498_v39 = vpop.permute.xlu2 %2912  ;;  %3158 = vperm.xlu0 %8016, %v11008_v37  }
 0x3d3   : > { %17845 = vst [vmem:[#allocation352_spill] sm:$0xff] %v11498_v39  ;;  %v11501_v45 = vpop.permute.xlu1 %2872  ;;  %v11503_v9 = vpop.permute.xlu0 %2916 }
 0x3d4   : > { %17846 = vst [vmem:[#allocation353_spill] sm:$0xff] %v11501_v45 }
 0x3d5   : > { %17847 = vst [vmem:[#allocation354_spill] sm:$0xff] %v11503_v9 }
 0x3d9   : > { %3118 = vperm.xlu2 %8018, %v10942_v60  }
 0x3da   : > { %3114 = vperm.xlu1 %8017, %v10876_v53   ;;  %v11507_v42 = vpop.permute.xlu2 %2924  ;;  %3170 = vperm.xlu0 %8016, %v11032_v2  }
 0x3db   : > { %17848 = vst [vmem:[#allocation355_spill] sm:$0xff] %v11507_v42  ;;  %v11510_v54 = vpop.permute.xlu1 %2884  ;;  %v11512_v25 = vpop.permute.xlu0 %2928 }
 0x3dc   : > { %17849 = vst [vmem:[#allocation356_spill] sm:$0xff] %v11510_v54 }
 0x3dd   : > { %17850 = vst [vmem:[#allocation357_spill] sm:$0xff] %v11512_v25 }
 0x3e1   : > { %3130 = vperm.xlu2 %8018, %v10966_v59  }
 0x3e2   : > { %3126 = vperm.xlu1 %8017, %v10900_v51   ;;  %v11516_v39 = vpop.permute.xlu2 %2936  ;;  %3182 = vperm.xlu0 %8016, %v11051_v7  }
 0x3e3   : > { %17851 = vst [vmem:[#allocation358_spill] sm:$0xff] %v11516_v39  ;;  %v11519_v9 = vpop.permute.xlu1 %2896  ;;  %v11521_v45 = vpop.permute.xlu0 %2940 }
 0x3e4   : > { %17852 = vst [vmem:[#allocation359_spill] sm:$0xff] %v11519_v9 }
 0x3e5   : > { %17853 = vst [vmem:[#allocation360_spill] sm:$0xff] %v11521_v45 }
 0x3e9   : > { %3142 = vperm.xlu2 %8018, %v10990_v41  }
 0x3ea   : > { %3138 = vperm.xlu1 %8017, %v10924_v17   ;;  %v11525_v42 = vpop.permute.xlu2 %2948  ;;  %3194 = vperm.xlu0 %8016, %v11070_v55  }
 0x3eb   : > { %17854 = vst [vmem:[#allocation361_spill] sm:$0xff] %v11525_v42  ;;  %v11528_v25 = vpop.permute.xlu1 %2908 }
 0x3ec   : > { %17855 = vst [vmem:[#allocation362_spill] sm:$0xff] %v11528_v25  ;;  %v11530_v54 = vpop.permute.xlu0 %3018 }
 0x3ed   : > { %17856 = vst [vmem:[#allocation363_spill] sm:$0xff] %v11530_v54 }
 0x3f1   : > { %3154 = vperm.xlu2 %8018, %v11014_v12  }
 0x3f2   : > { %3150 = vperm.xlu1 %8017, %v10948_v21   ;;  %3206 = vperm.xlu0 %8016, %v17799_v19  }
 0x3f3   : > { %v11535_v39 = vpop.permute.xlu1 %2920  ;;  %v11537_v45 = vpop.permute.xlu2 %3026 }
 0x3f4   : > { %17857 = vst [vmem:[#allocation364_spill] sm:$0xff] %v11535_v39  ;;  %v11539_v9 = vpop.permute.xlu0 %3038 }
 0x3f5   : > { %17858 = vst [vmem:[#allocation365_spill] sm:$0xff] %v11537_v45 }
 0x3f6   : > { %17859 = vst [vmem:[#allocation366_spill] sm:$0xff] %v11539_v9 }
 0x3f9   : > { %3166 = vperm.xlu2 %8018, %v11038_v18  }
 0x3fa   : > { %3162 = vperm.xlu1 %8017, %v10972_v44   ;;  %3218 = vperm.xlu0 %8016, %v17803_v32  }
 0x3fb   : > { %v11544_v42 = vpop.permute.xlu1 %2932  ;;  %v11546_v25 = vpop.permute.xlu2 %3034 }
 0x3fc   : > { %17860 = vst [vmem:[#allocation367_spill] sm:$0xff] %v11544_v42  ;;  %v11548_v52 = vpop.permute.xlu0 %3050 }
 0x3fd   : > { %17861 = vst [vmem:[#allocation368_spill] sm:$0xff] %v11546_v25 }
 0x3fe   : > { %17862 = vst [vmem:[#allocation369_spill] sm:$0xff] %v11548_v52 }
 0x401   : > { %3178 = vperm.xlu2 %8018, %v11057_v3  }
 0x402   : > { %3174 = vperm.xlu1 %8017, %v10996_v38   ;;  %3230 = vperm.xlu0 %8016, %v11366_v48  }
 0x403   : > { %v11553_v39 = vpop.permute.xlu1 %2944  ;;  %v11555_v45 = vpop.permute.xlu2 %3046 }
 0x404   : > { %17863 = vst [vmem:[#allocation370_spill] sm:$0xff] %v11553_v39  ;;  %v11557_v54 = vpop.permute.xlu0 %3062 }
 0x405   : > { %17864 = vst [vmem:[#allocation371_spill] sm:$0xff] %v11555_v45 }
 0x406   : > { %17865 = vst [vmem:[#allocation372_spill] sm:$0xff] %v11557_v54 }
 0x409   : > { %3190 = vperm.xlu2 %8018, %v11076_v28  }
 0x40a   : > { %3186 = vperm.xlu1 %8017, %v11020_v35   ;;  %3242 = vperm.xlu0 %8016, %v11385_v20  }
 0x40b   : > { %v11562_v42 = vpop.permute.xlu2 %3058 }
 0x40c   : > { %17866 = vst [vmem:[#allocation373_spill] sm:$0xff] %v11562_v42  ;;  %v11564_v52 = vpop.permute.xlu1 %3022  ;;  %v11566_v25 = vpop.permute.xlu0 %3074 }
 0x40d   : > { %17867 = vst [vmem:[#allocation374_spill] sm:$0xff] %v11564_v52 }
 0x40e   : > { %17868 = vst [vmem:[#allocation375_spill] sm:$0xff] %v11566_v25 }
 0x411   : > { %3202 = vperm.xlu2 %8018, %v11095_v58  }
 0x412   : > { %3198 = vperm.xlu1 %8017, %v11303_v10   ;;  %3254 = vperm.xlu0 %8016, %v11404_v47  }
 0x413   : > { %v11571_v39 = vpop.permute.xlu2 %3070 }
 0x414   : > { %17869 = vst [vmem:[#allocation376_spill] sm:$0xff] %v11571_v39  ;;  %v11573_v45 = vpop.permute.xlu1 %3030  ;;  %v11575_v54 = vpop.permute.xlu0 %3086  ;;  %v9588_v39 = vmov 7  }
 0x415   : > { %17870 = vst [vmem:[#allocation377_spill] sm:$0xff] %v11573_v45 }
 0x416   : > { %17871 = vst [vmem:[#allocation378_spill] sm:$0xff] %v11575_v54 }
 0x419   : > { %3214 = vperm.xlu2 %8018, %v11114_v33  }
 0x41a   : > { %3210 = vperm.xlu1 %8017, %v11322_v63   ;;  %3266 = vperm.xlu0 %8016, %v11423_v56   ;;  %v17885_v56 = vld [vmem:[#allocation246_spill] sm:$0xff] }
 0x41b   : > { %v11580_v42 = vpop.permute.xlu2 %3082 }
 0x41c   : > { %17872 = vst [vmem:[#allocation379_spill] sm:$0xff] %v11580_v42  ;;  %v11582_v25 = vpop.permute.xlu1 %3042  ;;  %v11584_v52 = vpop.permute.xlu0 %3098 }
 0x41d   : > { %17873 = vst [vmem:[#allocation380_spill] sm:$0xff] %v11582_v25 }
 0x41e   : > { %17874 = vst [vmem:[#allocation381_spill] sm:$0xff] %v11584_v52 }
 0x421   : > { %3226 = vperm.xlu2 %8018, %v11291_v34  }
 0x422   : > { %3222 = vperm.xlu1 %8017, %v11341_v29   ;;  %8020 = vset.pattern.permute.xlu0 %v9588_v39 }
 0x423   : > { %v11588_v45 = vpop.permute.xlu2 %3094  ;;  %3342 = vperm.xlu0 %8020, %v10713_v27  }
 0x424   : > { %17875 = vst [vmem:[#allocation382_spill] sm:$0xff] %v11588_v45  ;;  %v11591_v54 = vpop.permute.xlu1 %3054  ;;  %v11593_v9 = vpop.permute.xlu0 %3110  ;;  %v17881_v45 = vld [vmem:[#allocation318_spill] sm:$0xff] }
 0x425   : > { %17876 = vst [vmem:[#allocation383_spill] sm:$0xff] %v11591_v54 }
 0x426   : > { %17877 = vst [vmem:[#allocation384_spill] sm:$0xff] %v11593_v9 }
 0x429   : > { %3238 = vperm.xlu2 %8018, %v11310_v13  }
 0x42a   : > { %3234 = vperm.xlu1 %8017, %v11360_v14  }
 0x42b   : > { %v11597_v42 = vpop.permute.xlu2 %3106  ;;  %3362 = vperm.xlu0 %8020, %v10732_v0  }
 0x42c   : > { %17878 = vst [vmem:[#allocation385_spill] sm:$0xff] %v11597_v42  ;;  %v11600_v52 = vpop.permute.xlu1 %3066  ;;  %v11602_v25 = vpop.permute.xlu0 %3122  ;;  %v17886_v42 = vld [vmem:[#allocation322_spill] sm:$0xff] }
 0x42d   : > { %17879 = vst [vmem:[#allocation386_spill] sm:$0xff] %v11600_v52 }
 0x42e   : > { %17880 = vst [vmem:[#allocation387_spill] sm:$0xff] %v11602_v25 }
 0x431   : > { %3250 = vperm.xlu2 %8018, %v11329_v26  }
 0x432   : > { %3246 = vperm.xlu1 %8017, %v17881_v45  }
 0x433   : > { %v11606_v27 = vpop.permute.xlu2 %3118  ;;  %3374 = vperm.xlu0 %8020, %v10756_v15   ;;  %v17891_v15 = vld [vmem:[#allocation191_spill] sm:$0xff] }
 0x434   : > { %17882 = vst [vmem:[#allocation318_spill] sm:$0xff] %v11606_v27  ;;  %v11609_v9 = vpop.permute.xlu1 %3078  ;;  %v11611_v54 = vpop.permute.xlu0 %3134  ;;  %v17890_v27 = vld [vmem:[#allocation326_spill] sm:$0xff] }
 0x435   : > { %17883 = vst [vmem:[#allocation388_spill] sm:$0xff] %v11609_v9 }
 0x436   : > { %17884 = vst [vmem:[#allocation389_spill] sm:$0xff] %v11611_v54 }
 0x439   : > { %3262 = vperm.xlu2 %8018, %v17885_v56  }
 0x43a   : > { %3258 = vperm.xlu1 %8017, %v17886_v42  }
 0x43b   : > { %v11615_v0 = vpop.permute.xlu2 %3130  ;;  %3386 = vperm.xlu0 %8020, %v10780_v4  }
 0x43c   : > { %17887 = vst [vmem:[#allocation322_spill] sm:$0xff] %v11615_v0  ;;  %v11618_v25 = vpop.permute.xlu1 %3090  ;;  %v11620_v52 = vpop.permute.xlu0 %3146  ;;  %v17958_v0 = vld [vmem:[#allocation246_spill] sm:$0xff] }
 0x43d   : > { %17888 = vst [vmem:[#allocation390_spill] sm:$0xff] %v11618_v25  ;;  %v9409_v25 = vld [vmem:[%s17003_s1 + $0x130] sm:$0xff] }
 0x43e   : > { %17889 = vst [vmem:[#allocation391_spill] sm:$0xff] %v11620_v52 }
 0x441   : > { %8019 = vset.pattern.permute.xlu2 %v9588_v39 }
 0x442   : > { %3270 = vperm.xlu1 %8017, %v17890_v27   ;;  %3338 = vperm.xlu2 %8019, %v17891_v15  }
 0x443   : > { %v11624_v9 = vpop.permute.xlu2 %3142  ;;  %3398 = vperm.xlu0 %8020, %v10804_v49  }
 0x444   : > { %17892 = vst [vmem:[#allocation326_spill] sm:$0xff] %v11624_v9  ;;  %v11627_v54 = vpop.permute.xlu1 %3102  ;;  %v11629_v56 = vpop.permute.xlu0 %3158  ;;  %v17898_v9 = vld [vmem:[#allocation198_spill] sm:$0xff] }
 0x445   : > { %17893 = vst [vmem:[#allocation191_spill] sm:$0xff] %v11627_v54  ;;  %v9407_v54 = vld [vmem:[%s17003_s1 + $0x118] sm:$0xff] }
 0x446   : > { %17894 = vst [vmem:[#allocation392_spill] sm:$0xff] %v11629_v56  ;;  %v17902_v56 = vld [vmem:[#allocation202_spill] sm:$0xff] }
 0x44a   : > { %8021 = vset.pattern.permute.xlu1 %v9588_v39  ;;  %3350 = vperm.xlu2 %8019, %v10744_v11  }
 0x44b   : > { %3346 = vperm.xlu1 %8021, %v10750_v50   ;;  %v11633_v4 = vpop.permute.xlu2 %3154  ;;  %3410 = vperm.xlu0 %8020, %v10828_v40  }
 0x44c   : > { %17895 = vst [vmem:[#allocation393_spill] sm:$0xff] %v11633_v4  ;;  %v11636_v52 = vpop.permute.xlu1 %3114  ;;  %v11638_v15 = vpop.permute.xlu0 %3170 }
 0x44d   : > { %17896 = vst [vmem:[#allocation394_spill] sm:$0xff] %v11636_v52 }
 0x44e   : > { %17897 = vst [vmem:[#allocation395_spill] sm:$0xff] %v11638_v15 }
 0x452   : > { %3358 = vperm.xlu2 %8019, %v17898_v9  }
 0x453   : > { %3354 = vperm.xlu1 %8021, %v10774_v23   ;;  %v11642_v49 = vpop.permute.xlu2 %3166  ;;  %3422 = vperm.xlu0 %8020, %v10852_v43  }
 0x454   : > { %17899 = vst [vmem:[#allocation198_spill] sm:$0xff] %v11642_v49  ;;  %v11645_v39 = vpop.permute.xlu1 %3126  ;;  %v11647_v11 = vpop.permute.xlu0 %3182 }
 0x455   : > { %17900 = vst [vmem:[#allocation396_spill] sm:$0xff] %v11645_v39 }
 0x456   : > { %17901 = vst [vmem:[#allocation397_spill] sm:$0xff] %v11647_v11 }
 0x45a   : > { %3370 = vperm.xlu2 %8019, %v17902_v56  }
 0x45b   : > { %3366 = vperm.xlu1 %8021, %v10798_v61   ;;  %v11651_v40 = vpop.permute.xlu2 %3178  ;;  %3434 = vperm.xlu0 %8020, %v10876_v53  }
 0x45c   : > { %17903 = vst [vmem:[#allocation202_spill] sm:$0xff] %v11651_v40  ;;  %v11654_v15 = vpop.permute.xlu1 %3138  ;;  %v11656_v9 = vpop.permute.xlu0 %3194 }
 0x45d   : > { %17904 = vst [vmem:[#allocation398_spill] sm:$0xff] %v11654_v15 }
 0x45e   : > { %17905 = vst [vmem:[#allocation399_spill] sm:$0xff] %v11656_v9 }
 0x462   : > { %3382 = vperm.xlu2 %8019, %v10816_v30  }
 0x463   : > { %3378 = vperm.xlu1 %8021, %v10822_v36   ;;  %v11660_v43 = vpop.permute.xlu2 %3190  ;;  %3446 = vperm.xlu0 %8020, %v10900_v51  }
 0x464   : > { %17906 = vst [vmem:[#allocation400_spill] sm:$0xff] %v11660_v43  ;;  %v11663_v23 = vpop.permute.xlu1 %3150  ;;  %v11665_v56 = vpop.permute.xlu0 %3206 }
 0x465   : > { %17907 = vst [vmem:[#allocation401_spill] sm:$0xff] %v11663_v23 }
 0x466   : > { %17908 = vst [vmem:[#allocation402_spill] sm:$0xff] %v11665_v56 }
 0x46a   : > { %3394 = vperm.xlu2 %8019, %v10840_v31  }
 0x46b   : > { %3390 = vperm.xlu1 %8021, %v10846_v16   ;;  %v11669_v53 = vpop.permute.xlu2 %3202  ;;  %3458 = vperm.xlu0 %8020, %v10924_v17  }
 0x46c   : > { %17909 = vst [vmem:[#allocation403_spill] sm:$0xff] %v11669_v53  ;;  %v11672_v9 = vpop.permute.xlu1 %3162  ;;  %v11674_v30 = vpop.permute.xlu0 %3218 }
 0x46d   : > { %17910 = vst [vmem:[#allocation404_spill] sm:$0xff] %v11672_v9 }
 0x46e   : > { %17911 = vst [vmem:[#allocation405_spill] sm:$0xff] %v11674_v30 }
 0x472   : > { %3406 = vperm.xlu2 %8019, %v10864_v57  }
 0x473   : > { %3402 = vperm.xlu1 %8021, %v10870_v8   ;;  %v11678_v51 = vpop.permute.xlu2 %3214  ;;  %3470 = vperm.xlu0 %8020, %v10948_v21  }
 0x474   : > { %17912 = vst [vmem:[#allocation406_spill] sm:$0xff] %v11678_v51  ;;  %v11681_v56 = vpop.permute.xlu1 %3174  ;;  %v11683_v31 = vpop.permute.xlu0 %3230 }
 0x475   : > { %17913 = vst [vmem:[#allocation407_spill] sm:$0xff] %v11681_v56  ;;  %v9589_v56 = vmov 8  }
 0x476   : > { %17914 = vst [vmem:[#allocation408_spill] sm:$0xff] %v11683_v31 }
 0x47a   : > { %3418 = vperm.xlu2 %8019, %v10888_v62  }
 0x47b   : > { %3414 = vperm.xlu1 %8021, %v10894_v6   ;;  %v11687_v17 = vpop.permute.xlu2 %3226  ;;  %3482 = vperm.xlu0 %8020, %v10972_v44  }
 0x47c   : > { %17915 = vst [vmem:[#allocation409_spill] sm:$0xff] %v11687_v17  ;;  %v11690_v53 = vpop.permute.xlu1 %3186  ;;  %v11692_v57 = vpop.permute.xlu0 %3242 }
 0x47d   : > { %17916 = vst [vmem:[#allocation410_spill] sm:$0xff] %v11690_v53 }
 0x47e   : > { %17917 = vst [vmem:[#allocation411_spill] sm:$0xff] %v11692_v57 }
 0x482   : > { %3430 = vperm.xlu2 %8019, %v10912_v22  }
 0x483   : > { %3426 = vperm.xlu1 %8021, %v10918_v1   ;;  %v11696_v21 = vpop.permute.xlu2 %3238  ;;  %3494 = vperm.xlu0 %8020, %v10996_v38  }
 0x484   : > { %17918 = vst [vmem:[#allocation412_spill] sm:$0xff] %v11696_v21  ;;  %v11699_v51 = vpop.permute.xlu1 %3198  ;;  %v11701_v62 = vpop.permute.xlu0 %3254 }
 0x485   : > { %17919 = vst [vmem:[#allocation413_spill] sm:$0xff] %v11699_v51 }
 0x486   : > { %17920 = vst [vmem:[#allocation414_spill] sm:$0xff] %v11701_v62 }
 0x48a   : > { %3442 = vperm.xlu2 %8019, %v10936_v5  }
 0x48b   : > { %3438 = vperm.xlu1 %8021, %v10942_v60   ;;  %v11705_v44 = vpop.permute.xlu2 %3250  ;;  %3506 = vperm.xlu0 %8020, %v11020_v35  }
 0x48c   : > { %17921 = vst [vmem:[#allocation415_spill] sm:$0xff] %v11705_v44  ;;  %v11708_v57 = vpop.permute.xlu1 %3210  ;;  %v11710_v22 = vpop.permute.xlu0 %3266 }
 0x48d   : > { %17922 = vst [vmem:[#allocation416_spill] sm:$0xff] %v11708_v57 }
 0x48e   : > { %17923 = vst [vmem:[#allocation417_spill] sm:$0xff] %v11710_v22 }
 0x492   : > { %3454 = vperm.xlu2 %8019, %v10960_v24  }
 0x493   : > { %3450 = vperm.xlu1 %8021, %v10966_v59   ;;  %v11714_v38 = vpop.permute.xlu2 %3262  ;;  %3518 = vperm.xlu0 %8020, %v11303_v10  }
 0x494   : > { %17924 = vst [vmem:[#allocation418_spill] sm:$0xff] %v11714_v38  ;;  %v11717_v62 = vpop.permute.xlu1 %3222 }
 0x495   : > { %17925 = vst [vmem:[#allocation419_spill] sm:$0xff] %v11717_v62  ;;  %v11719_v5 = vpop.permute.xlu0 %3342 }
 0x496   : > { %17926 = vst [vmem:[#allocation420_spill] sm:$0xff] %v11719_v5  ;;  %v18071_v5 = vld [vmem:[#allocation80_spill] sm:$0xff] }
 0x49a   : > { %3466 = vperm.xlu2 %8019, %v10984_v46  }
 0x49b   : > { %3462 = vperm.xlu1 %8021, %v10990_v41   ;;  %3530 = vperm.xlu0 %8020, %v11322_v63  }
 0x49c   : > { %v11724_v35 = vpop.permute.xlu1 %3234  ;;  %v11726_v22 = vpop.permute.xlu2 %3338 }
 0x49d   : > { %17927 = vst [vmem:[#allocation421_spill] sm:$0xff] %v11724_v35  ;;  %v11728_v24 = vpop.permute.xlu0 %3362 }
 0x49e   : > { %17928 = vst [vmem:[#allocation422_spill] sm:$0xff] %v11726_v22 }
 0x49f   : > { %17929 = vst [vmem:[#allocation423_spill] sm:$0xff] %v11728_v24 }
 0x4a2   : > { %3478 = vperm.xlu2 %8019, %v11008_v37  }
 0x4a3   : > { %3474 = vperm.xlu1 %8021, %v11014_v12   ;;  %3542 = vperm.xlu0 %8020, %v11341_v29  }
 0x4a4   : > { %v11733_v38 = vpop.permute.xlu1 %3246  ;;  %v11735_v44 = vpop.permute.xlu2 %3350 }
 0x4a5   : > { %17930 = vst [vmem:[#allocation424_spill] sm:$0xff] %v11733_v38  ;;  %v11737_v46 = vpop.permute.xlu0 %3374 }
 0x4a6   : > { %17931 = vst [vmem:[#allocation425_spill] sm:$0xff] %v11735_v44 }
 0x4a7   : > { %17932 = vst [vmem:[#allocation426_spill] sm:$0xff] %v11737_v46 }
 0x4aa   : > { %3490 = vperm.xlu2 %8019, %v11032_v2   ;;  %v11755_v2 = vpop.f32.mrf.mxu0 }
 0x4ab   : > { %3486 = vperm.xlu1 %8021, %v11038_v18   ;;  %3554 = vperm.xlu0 %8020, %v11360_v14  }
 0x4ac   : > { %v11742_v57 = vpop.permute.xlu1 %3258  ;;  %v11744_v21 = vpop.permute.xlu2 %3358 }
 0x4ad   : > { %17933 = vst [vmem:[#allocation427_spill] sm:$0xff] %v11742_v57  ;;  %v11746_v37 = vpop.permute.xlu0 %3386 }
 0x4ae   : > { %17934 = vst [vmem:[#allocation428_spill] sm:$0xff] %v11744_v21 }
 0x4af   : > { %17935 = vst [vmem:[#allocation429_spill] sm:$0xff] %v11746_v37 }
 0x4b2   : > { %3502 = vperm.xlu2 %8019, %v11051_v7   ;;  %v11768_v17 = vpop.f32.mrf.mxu0 }
 0x4b3   : > { %3498 = vperm.xlu1 %8021, %v11057_v3   ;;  %3566 = vperm.xlu0 %8020, %v17881_v45  }
 0x4b4   : > { %v11751_v38 = vpop.permute.xlu1 %3270  ;;  %v11753_v35 = vpop.permute.xlu2 %3370 }
 0x4b5   : > { %17936 = vst [vmem:[#allocation430_spill] sm:$0xff] %v11751_v38  ;;  %v11757_v51 = vpop.permute.xlu0 %3398 }
 0x4b6   : > { %17937 = vst [vmem:[#allocation431_spill] sm:$0xff] %v11753_v35 }
 0x4b7   : > { %17938 = vst [vmem:[#allocation432_spill] sm:$0xff] %v11757_v51 }
 0x4ba   : > { %3514 = vperm.xlu2 %8019, %v11070_v55   ;;  %v11779_v53 = vpop.f32.mrf.mxu0 }
 0x4bb   : > { %3510 = vperm.xlu1 %8021, %v11076_v28   ;;  %3578 = vperm.xlu0 %8020, %v17886_v42  }
 0x4bc   : > { %v11762_v57 = vpop.permute.xlu2 %3382 }
 0x4bd   : > { %17939 = vst [vmem:[#allocation433_spill] sm:$0xff] %v11762_v57  ;;  %v11764_v7 = vpop.permute.xlu1 %3346  ;;  %v11766_v31 = vpop.permute.xlu0 %3410 }
 0x4be   : > { %17940 = vst [vmem:[#allocation434_spill] sm:$0xff] %v11764_v7 }
 0x4bf   : > { %17941 = vst [vmem:[#allocation435_spill] sm:$0xff] %v11766_v31 }
 0x4c2   : > { %3526 = vperm.xlu2 %8019, %v17799_v19   ;;  %v11792_v9 = vpop.f32.mrf.mxu0 }
 0x4c3   : > { %3522 = vperm.xlu1 %8021, %v11095_v58   ;;  %3590 = vperm.xlu0 %8020, %v17890_v27  }
 0x4c4   : > { %v11773_v38 = vpop.permute.xlu2 %3394 }
 0x4c5   : > { %17942 = vst [vmem:[#allocation436_spill] sm:$0xff] %v11773_v38  ;;  %v11775_v55 = vpop.permute.xlu1 %3354  ;;  %v11777_v43 = vpop.permute.xlu0 %3422  ;;  %v18006_v38 = vld [vmem:[#allocation94_spill] sm:$0xff] }
 0x4c6   : > { %17943 = vst [vmem:[#allocation437_spill] sm:$0xff] %v11775_v55  ;;  %v1789_v51 = vmul.f32 0.0, %v18006_v38  ;;  %v9412_v38 = vld [vmem:[%s17003_s1 + $0x160] sm:$0xff] }
 0x4c7   : > { %17944 = vst [vmem:[#allocation438_spill] sm:$0xff] %v11777_v43  ;;  %v9406_v43 = vld [vmem:[%s17003_s1 + $0x120] sm:$0xff] }
 0x4ca   : > { %3538 = vperm.xlu2 %8019, %v17803_v32   ;;  %v11808_v11 = vpop.f32.mrf.mxu0 }
 0x4cb   : > { %3534 = vperm.xlu1 %8021, %v11114_v33   ;;  %8024 = vset.pattern.permute.xlu0 %v9589_v56 }
 0x4cc   : > { %v11783_v49 = vpop.permute.xlu2 %3406  ;;  %3666 = vperm.xlu0 %8024, %v10750_v50  }
 0x4cd   : > { %17945 = vst [vmem:[#allocation439_spill] sm:$0xff] %v11783_v49  ;;  %v11786_v58 = vpop.permute.xlu1 %3366  ;;  %v11788_v19 = vpop.permute.xlu0 %3434 }
 0x4ce   : > { %17946 = vst [vmem:[#allocation440_spill] sm:$0xff] %v11786_v58  ;;  %v18067_v58 = vld [vmem:[#allocation95_spill] sm:$0xff] }
 0x4cf   : > { %17947 = vst [vmem:[#allocation441_spill] sm:$0xff] %v11788_v19 }
 0x4d2   : > { %3550 = vperm.xlu2 %8019, %v11366_v48   ;;  %v11821_v15 = vpop.f32.mrf.mxu0 }
 0x4d3   : > { %3546 = vperm.xlu1 %8021, %v11291_v34  }
 0x4d4   : > { %v11794_v30 = vpop.permute.xlu2 %3418  ;;  %3686 = vperm.xlu0 %8024, %v10798_v61  }
 0x4d5   : > { %17948 = vst [vmem:[#allocation442_spill] sm:$0xff] %v11794_v30  ;;  %v11797_v33 = vpop.permute.xlu1 %3378  ;;  %v11799_v32 = vpop.permute.xlu0 %3446 }
 0x4d6   : > { %17949 = vst [vmem:[#allocation443_spill] sm:$0xff] %v11797_v33 }
 0x4d7   : > { %17950 = vst [vmem:[#allocation444_spill] sm:$0xff] %v11799_v32 }
 0x4da   : > { %3562 = vperm.xlu2 %8019, %v11385_v20  }
 0x4db   : > { %3558 = vperm.xlu1 %8021, %v11310_v13  }
 0x4dc   : > { %v11803_v50 = vpop.permute.xlu2 %3430  ;;  %3698 = vperm.xlu0 %8024, %v10822_v36   ;;  %v17957_v36 = vld [vmem:[#allocation327_spill] sm:$0xff] }
 0x4dd   : > { %17951 = vst [vmem:[#allocation445_spill] sm:$0xff] %v11803_v50  ;;  %v11806_v62 = vpop.permute.xlu1 %3390  ;;  %v11810_v40 = vpop.permute.xlu0 %3458 }
 0x4de   : > { %17952 = vst [vmem:[#allocation446_spill] sm:$0xff] %v11806_v62  ;;  %v18023_v62 = vld [vmem:[#allocation130_spill] sm:$0xff] }
 0x4df   : > { %17953 = vst [vmem:[#allocation447_spill] sm:$0xff] %v11810_v40 }
 0x4e2   : > { %3574 = vperm.xlu2 %8019, %v11404_v47  }
 0x4e3   : > { %3570 = vperm.xlu1 %8021, %v11329_v26  }
 0x4e4   : > { %v11814_v61 = vpop.permute.xlu2 %3442  ;;  %3710 = vperm.xlu0 %8024, %v10846_v16   ;;  %v9380_v16 = vld [vmem:[%s17003_s1 + $0x8] sm:$0xff] }
 0x4e5   : > { %17954 = vst [vmem:[#allocation448_spill] sm:$0xff] %v11814_v61  ;;  %v11817_v4 = vpop.permute.xlu1 %3402  ;;  %v11819_v23 = vpop.permute.xlu0 %3470 }
 0x4e6   : > { %17955 = vst [vmem:[#allocation449_spill] sm:$0xff] %v11817_v4  ;;  %v11832_v61 = vpop.f32.mrf.mxu0 }
 0x4e7   : > { %17956 = vst [vmem:[#allocation450_spill] sm:$0xff] %v11819_v23  ;;  %v9381_v23 = vld [vmem:[%s17003_s1] sm:$0xff] }
 0x4ea   : > { %3586 = vperm.xlu2 %8019, %v17957_v36  }
 0x4eb   : > { %3582 = vperm.xlu1 %8021, %v17958_v0  }
 0x4ec   : > { %v11825_v32 = vpop.permute.xlu2 %3454  ;;  %3722 = vperm.xlu0 %8024, %v10870_v8  }
 0x4ed   : > { %17959 = vst [vmem:[#allocation327_spill] sm:$0xff] %v11825_v32  ;;  %v11828_v40 = vpop.permute.xlu1 %3414  ;;  %v11830_v39 = vpop.permute.xlu0 %3482 }
 0x4ee   : > { %17960 = vst [vmem:[#allocation246_spill] sm:$0xff] %v11828_v40  ;;  %v11850_v19 = vpop.f32.mrf.mxu0  ;;  %v18010_v40 = vld [vmem:[#allocation71_spill] sm:$0xff] }
 0x4ef   : > { %17961 = vst [vmem:[#allocation451_spill] sm:$0xff] %v11830_v39 }
 0x4f2   : > { %8023 = vset.pattern.permute.xlu2 %v9589_v56 }
 0x4f3   : > { %8022 = vset.pattern.permute.xlu1 %v9589_v56  ;;  %3662 = vperm.xlu2 %8023, %v9380_v16   ;;  %v9382_v56 = vld [vmem:[%s17003_s1 + $0x20] sm:$0xff]  ;;  %v9383_v16 = vld [vmem:[%s17003_s1 + $0x18] sm:$0xff] }
 0x4f4   : > { %3658 = vperm.xlu1 %8022, %v9381_v23   ;;  %v11840_v32 = vpop.permute.xlu2 %3466  ;;  %3734 = vperm.xlu0 %8024, %v10894_v6  }
 0x4f5   : > { %17962 = vst [vmem:[#allocation452_spill] sm:$0xff] %v11840_v32  ;;  %v11843_v8 = vpop.permute.xlu1 %3426  ;;  %v11845_v39 = vpop.permute.xlu0 %3494 }
 0x4f6   : > { %17963 = vst [vmem:[#allocation453_spill] sm:$0xff] %v11843_v8 }
 0x4f7   : > { %17964 = vst [vmem:[#allocation454_spill] sm:$0xff] %v11845_v39  ;;  %v9384_v39 = vld [vmem:[%s17003_s1 + $0x30] sm:$0xff] }
 0x4fb   : > { %3674 = vperm.xlu2 %8023, %v9382_v56   ;;  %v9385_v56 = vld [vmem:[%s17003_s1 + $0x28] sm:$0xff] }
 0x4fc   : > { %3670 = vperm.xlu1 %8022, %v9383_v16   ;;  %v11855_v23 = vpop.permute.xlu2 %3478  ;;  %3746 = vperm.xlu0 %8024, %v10918_v1   ;;  %v11873_v1 = vpop.f32.mrf.mxu0 }
 0x4fd   : > { %17965 = vst [vmem:[#allocation455_spill] sm:$0xff] %v11855_v23  ;;  %v11858_v6 = vpop.permute.xlu1 %3438  ;;  %v11860_v32 = vpop.permute.xlu0 %3506 }
 0x4fe   : > { %17966 = vst [vmem:[#allocation456_spill] sm:$0xff] %v11858_v6 }
 0x4ff   : > { %17967 = vst [vmem:[#allocation457_spill] sm:$0xff] %v11860_v32  ;;  %v9386_v32 = vld [vmem:[%s17003_s1 + $0x48] sm:$0xff] }
 0x503   : > { %3682 = vperm.xlu2 %8023, %v9384_v39   ;;  %v9387_v39 = vld [vmem:[%s17003_s1 + $0x40] sm:$0xff] }
 0x504   : > { %3678 = vperm.xlu1 %8022, %v9385_v56   ;;  %v11868_v52 = vpop.permute.xlu2 %3490  ;;  %3758 = vperm.xlu0 %8024, %v10942_v60  }
 0x505   : > { %17968 = vst [vmem:[#allocation458_spill] sm:$0xff] %v11868_v52  ;;  %v11871_v16 = vpop.permute.xlu1 %3450  ;;  %v11875_v23 = vpop.permute.xlu0 %3518 }
 0x506   : > { %17969 = vst [vmem:[#allocation459_spill] sm:$0xff] %v11871_v16  ;;  %v11890_v16 = vpop.f32.mrf.mxu0 }
 0x507   : > { %17970 = vst [vmem:[#allocation460_spill] sm:$0xff] %v11875_v23  ;;  %v9388_v23 = vld [vmem:[%s17003_s1 + $0x60] sm:$0xff] }
 0x50b   : > { %3694 = vperm.xlu2 %8023, %v9386_v32   ;;  %v9389_v32 = vld [vmem:[%s17003_s1 + $0x58] sm:$0xff] }
 0x50c   : > { %3690 = vperm.xlu1 %8022, %v9387_v39   ;;  %v11883_v56 = vpop.permute.xlu2 %3502  ;;  %3770 = vperm.xlu0 %8024, %v10966_v59  }
 0x50d   : > { %17971 = vst [vmem:[#allocation461_spill] sm:$0xff] %v11883_v56  ;;  %v11886_v60 = vpop.permute.xlu1 %3462  ;;  %v11888_v52 = vpop.permute.xlu0 %3530 }
 0x50e   : > { %17972 = vst [vmem:[#allocation462_spill] sm:$0xff] %v11886_v60  ;;  %v9390_v60 = vld [vmem:[%s17003_s1 + $0x78] sm:$0xff] }
 0x50f   : > { %17973 = vst [vmem:[#allocation463_spill] sm:$0xff] %v11888_v52  ;;  %v11905_v52 = vpop.f32.mrf.mxu0 }
 0x513   : > { %3706 = vperm.xlu2 %8023, %v9388_v23   ;;  %v9391_v23 = vld [vmem:[%s17003_s1 + $0x70] sm:$0xff] }
 0x514   : > { %3702 = vperm.xlu1 %8022, %v9389_v32   ;;  %v11898_v39 = vpop.permute.xlu2 %3514  ;;  %3782 = vperm.xlu0 %8024, %v10990_v41  }
 0x515   : > { %17974 = vst [vmem:[#allocation464_spill] sm:$0xff] %v11898_v39  ;;  %v11901_v59 = vpop.permute.xlu1 %3474  ;;  %v11903_v56 = vpop.permute.xlu0 %3542 }
 0x516   : > { %17975 = vst [vmem:[#allocation465_spill] sm:$0xff] %v11901_v59 }
 0x517   : > { %17976 = vst [vmem:[#allocation466_spill] sm:$0xff] %v11903_v56  ;;  %v9392_v56 = vld [vmem:[%s17003_s1 + $0x90] sm:$0xff]  ;;  %v11923_v59 = vpop.f32.mrf.mxu0 }
 0x51b   : > { %3718 = vperm.xlu2 %8023, %v9390_v60   ;;  %v9393_v60 = vld [vmem:[%s17003_s1 + $0x88] sm:$0xff] }
 0x51c   : > { %3714 = vperm.xlu1 %8022, %v9391_v23   ;;  %v11913_v32 = vpop.permute.xlu2 %3526  ;;  %3794 = vperm.xlu0 %8024, %v11014_v12  }
 0x51d   : > { %17977 = vst [vmem:[#allocation467_spill] sm:$0xff] %v11913_v32  ;;  %v11916_v41 = vpop.permute.xlu1 %3486  ;;  %v11918_v39 = vpop.permute.xlu0 %3554 }
 0x51e   : > { %17978 = vst [vmem:[#allocation468_spill] sm:$0xff] %v11916_v41 }
 0x51f   : > { %17979 = vst [vmem:[#allocation469_spill] sm:$0xff] %v11918_v39  ;;  %v9394_v39 = vld [vmem:[%s17003_s1 + $0xa8] sm:$0xff] }
 0x523   : > { %3730 = vperm.xlu2 %8023, %v9392_v56   ;;  %v9395_v56 = vld [vmem:[%s17003_s1 + $0xa0] sm:$0xff] }
 0x524   : > { %3726 = vperm.xlu1 %8022, %v9393_v60   ;;  %v11928_v23 = vpop.permute.xlu2 %3538  ;;  %3806 = vperm.xlu0 %8024, %v11038_v18   ;;  %v11946_v18 = vpop.f32.mrf.mxu0 }
 0x525   : > { %17980 = vst [vmem:[#allocation470_spill] sm:$0xff] %v11928_v23  ;;  %v11931_v12 = vpop.permute.xlu1 %3498  ;;  %v11933_v32 = vpop.permute.xlu0 %3566 }
 0x526   : > { %17981 = vst [vmem:[#allocation471_spill] sm:$0xff] %v11931_v12 }
 0x527   : > { %17982 = vst [vmem:[#allocation472_spill] sm:$0xff] %v11933_v32  ;;  %v9396_v32 = vld [vmem:[%s17003_s1 + $0xc0] sm:$0xff] }
 0x52b   : > { %3742 = vperm.xlu2 %8023, %v9394_v39   ;;  %v9397_v39 = vld [vmem:[%s17003_s1 + $0xb8] sm:$0xff] }
 0x52c   : > { %3738 = vperm.xlu1 %8022, %v9395_v56   ;;  %v11941_v41 = vpop.permute.xlu2 %3550  ;;  %3818 = vperm.xlu0 %8024, %v11057_v3  }
 0x52d   : > { %17983 = vst [vmem:[#allocation473_spill] sm:$0xff] %v11941_v41  ;;  %v11944_v60 = vpop.permute.xlu1 %3510  ;;  %v11948_v23 = vpop.permute.xlu0 %3578 }
 0x52e   : > { %17984 = vst [vmem:[#allocation474_spill] sm:$0xff] %v11944_v60  ;;  %v11963_v60 = vpop.f32.mrf.mxu0 }
 0x52f   : > { %17985 = vst [vmem:[#allocation475_spill] sm:$0xff] %v11948_v23  ;;  %v9398_v23 = vld [vmem:[%s17003_s1 + $0xd8] sm:$0xff] }
 0x533   : > { %3754 = vperm.xlu2 %8023, %v9396_v32   ;;  %v9399_v32 = vld [vmem:[%s17003_s1 + $0xd0] sm:$0xff] }
 0x534   : > { %3750 = vperm.xlu1 %8022, %v9397_v39   ;;  %v11956_v56 = vpop.permute.xlu2 %3562  ;;  %3830 = vperm.xlu0 %8024, %v11076_v28   ;;  %v9400_v28 = vld [vmem:[%s17003_s1 + $0x170] sm:$0xff] }
 0x535   : > { %17986 = vst [vmem:[#allocation476_spill] sm:$0xff] %v11956_v56  ;;  %v11959_v3 = vpop.permute.xlu1 %3522  ;;  %v11961_v41 = vpop.permute.xlu0 %3590 }
 0x536   : > { %17987 = vst [vmem:[#allocation477_spill] sm:$0xff] %v11959_v3  ;;  %v11980_v3 = vpop.f32.mrf.mxu3  ;;  %v11982_v12 = vpop.f32.mrf.mxu0 }
 0x537   : > { %17988 = vst [vmem:[#allocation478_spill] sm:$0xff] %v11961_v41 }
 0x53b   : > { %3766 = vperm.xlu2 %8023, %v9398_v23   ;;  %v9401_v23 = vld [vmem:[%s17003_s1 + $0xf0] sm:$0xff] }
 0x53c   : > { %3762 = vperm.xlu1 %8022, %v9399_v32   ;;  %v11971_v39 = vpop.permute.xlu2 %3574  ;;  %3842 = vperm.xlu0 %8024, %v9400_v28   ;;  %v9402_v32 = vld [vmem:[%s17003_s1 + $0xe8] sm:$0xff] }
 0x53d   : > { %17989 = vst [vmem:[#allocation479_spill] sm:$0xff] %v11971_v39  ;;  %v11976_v41 = vpop.permute.xlu1 %3534  ;;  %v9403_v28 = vld [vmem:[%s17003_s1 + $0x188] sm:$0xff] }
 0x53e   : > { %17990 = vst [vmem:[#allocation480_spill] sm:$0xff] %v11976_v41  ;;  %v11978_v56 = vpop.permute.xlu0 %3666  ;;  %v11999_v50 = vpop.f32.mrf.mxu3 }
 0x53f   : > { %17991 = vst [vmem:[#allocation481_spill] sm:$0xff] %v11978_v56  ;;  %v12004_v8 = vpop.f32.mrf.mxu0 }
 0x543   : > { %3778 = vperm.xlu2 %8023, %v9401_v23   ;;  %v9404_v23 = vld [vmem:[%s17003_s1 + $0x108] sm:$0xff] }
 0x544   : > { %3774 = vperm.xlu1 %8022, %v9402_v32   ;;  %v11990_v39 = vpop.permute.xlu2 %3586  ;;  %3854 = vperm.xlu0 %8024, %v9403_v28   ;;  %v9405_v32 = vld [vmem:[%s17003_s1 + $0x100] sm:$0xff] }
 0x545   : > { %17992 = vst [vmem:[#allocation482_spill] sm:$0xff] %v11990_v39  ;;  %v11995_v41 = vpop.permute.xlu1 %3546 }
 0x546   : > { %17993 = vst [vmem:[#allocation483_spill] sm:$0xff] %v11995_v41  ;;  %v11997_v6 = vpop.permute.xlu0 %3686 }
 0x547   : > { %17994 = vst [vmem:[#allocation484_spill] sm:$0xff] %v11997_v6 }
 0x54b   : > { %3790 = vperm.xlu2 %8023, %v9404_v23   ;;  %v12019_v23 = vpop.f32.mrf.mxu3 }
 0x54c   : > { %3786 = vperm.xlu1 %8022, %v9405_v32   ;;  %3866 = vperm.xlu0 %8024, %v11291_v34  }
 0x54d   : > { %v12010_v28 = vpop.permute.xlu1 %3558  ;;  %v12012_v39 = vpop.permute.xlu2 %3662 }
 0x54e   : > { %17995 = vst [vmem:[#allocation485_spill] sm:$0xff] %v12010_v28  ;;  %v12014_v41 = vpop.permute.xlu0 %3698  ;;  %v12029_v28 = vpop.f32.mrf.mxu0 }
 0x54f   : > { %17996 = vst [vmem:[#allocation486_spill] sm:$0xff] %v12012_v39  ;;  %v18058_v39 = vld [vmem:[#allocation134_spill] sm:$0xff] }
 0x550   : > { %17997 = vst [vmem:[#allocation487_spill] sm:$0xff] %v12014_v41 }
 0x553   : > { %3802 = vperm.xlu2 %8023, %v9406_v43   ;;  %v9408_v43 = vld [vmem:[%s17003_s1 + $0x138] sm:$0xff] }
 0x554   : > { %3798 = vperm.xlu1 %8022, %v9407_v54   ;;  %3878 = vperm.xlu0 %8024, %v11310_v13  }
 0x555   : > { %v12025_v34 = vpop.permute.xlu1 %3570  ;;  %v12027_v32 = vpop.permute.xlu2 %3674 }
 0x556   : > { %17998 = vst [vmem:[#allocation488_spill] sm:$0xff] %v12025_v34  ;;  %v12031_v30 = vpop.permute.xlu0 %3710  ;;  %v12044_v34 = vpop.f32.mrf.mxu3 }
 0x557   : > { %17999 = vst [vmem:[#allocation489_spill] sm:$0xff] %v12027_v32  ;;  %v12048_v4 = vpop.f32.mrf.mxu0 }
 0x558   : > { %18000 = vst [vmem:[#allocation490_spill] sm:$0xff] %v12031_v30  ;;  %v18007_v30 = vld [vmem:[#allocation106_spill] sm:$0xff] }
 0x55b   : > { %3814 = vperm.xlu2 %8023, %v9408_v43   ;;  %v9410_v43 = vld [vmem:[%s17003_s1 + $0x150] sm:$0xff] }
 0x55c   : > { %3810 = vperm.xlu1 %8022, %v9409_v25   ;;  %3890 = vperm.xlu0 %8024, %v11329_v26   ;;  %v9411_v25 = vld [vmem:[%s17003_s1 + $0x148] sm:$0xff] }
 0x55d   : > { %v12040_v54 = vpop.permute.xlu1 %3582  ;;  %v12042_v13 = vpop.permute.xlu2 %3682 }
 0x55e   : > { %18001 = vst [vmem:[#allocation491_spill] sm:$0xff] %v12040_v54  ;;  %v12046_v49 = vpop.permute.xlu0 %3722  ;;  %v12070_v57 = vpop.f32.mrf.mxu3 }
 0x55f   : > { %18002 = vst [vmem:[#allocation492_spill] sm:$0xff] %v12042_v13  ;;  %v12074_v41 = vpop.f32.mrf.mxu0 }
 0x560   : > { %18003 = vst [vmem:[#allocation493_spill] sm:$0xff] %v12046_v49  ;;  %v12064_v49 = vld [vmem:[%s17005_s3] ss:$0 sm:$0xff] }
 0x561   : > { %v622_v33 = vadd.f32 %v12064_v49, %v18010_v40  ;;  %v18013_v40 = vld [vmem:[#allocation113_spill] sm:$0xff] }
 0x563   : > { %3826 = vperm.xlu2 %8023, %v9410_v43   ;;  %v1788_v43 = vmul.f32 0.0, %v18007_v30  ;;  %v12089_v35 = vmax.f32 %v622_v33, 0.0 }
 0x564   : > { %3822 = vperm.xlu1 %8022, %v9411_v25   ;;  %3902 = vperm.xlu0 %8024, %v17958_v0   ;;  %v18009_v25 = vld [vmem:[#allocation76_spill] sm:$0xff] }
 0x565   : > { %v12057_v26 = vpop.permute.xlu2 %3694  ;;  %v624_v0 = vadd.f32 %v12064_v49, %v18009_v25  ;;  %v8025_v46 = vpack.i.bf16 %v1789_v51, %v1788_v43  ;;  %v18015_v43 = vld [vmem:[#allocation103_spill] sm:$0xff] }
 0x566   : > { %18004 = vst [vmem:[#allocation494_spill] sm:$0xff] %v12057_v26  ;;  %v12059_v54 = vpop.permute.xlu1 %3658  ;;  %v12068_v31 = vpop.permute.xlu0 %3734  ;;  %v639_v6 = vadd.f32 %v12064_v49, %v18015_v43 }
 0x567   : > { %18005 = vst [vmem:[#allocation495_spill] sm:$0xff] %v12059_v54  ;;  %v12082_v30 = vmax.f32 %v624_v0, 0.0  ;;  %v18016_v0 = vld [vmem:[#allocation102_spill] sm:$0xff]  ;;  %v12099_v13 = vpop.f32.mrf.mxu3  ;;  %v12104_v33 = vpop.f32.mrf.mxu0 }
 0x568   : > { %18008 = vst [vmem:[#allocation94_spill] sm:$0xff] %v12068_v31 }
 0x569   : > { %v1795_v51 = vmul.f32 %v18013_v40, %v12082_v30  ;;  %v9413_v40 = vld [vmem:[%s17003_s1 + $0x178] sm:$0xff] }
 0x56b   : > { %3838 = vperm.xlu2 %8023, %v11303_v10  }
 0x56c   : > { %3834 = vperm.xlu1 %8022, %v9412_v38   ;;  %8026 = vrot.lane.b32.xlu0 %v8025_v46, %s9590_s19  ;;  %v1794_v38 = vmul.f32 %v18016_v0, %v12089_v35  ;;  %v18017_v46 = vld [vmem:[#allocation99_spill] sm:$0xff] }
 0x56d   : > { %v12085_v31 = vpop.permute.xlu2 %3706 }
 0x56e   : > { %18011 = vst [vmem:[#allocation106_spill] sm:$0xff] %v12085_v31  ;;  %v12087_v25 = vpop.permute.xlu1 %3670  ;;  %v12093_v10 = vpop.permute.xlu0 %3746  ;;  %v637_v31 = vadd.f32 %v12064_v49, %v18017_v46  ;;  %v8040_v37 = vpack.i.bf16 %v1795_v51, %v1794_v38  ;;  %v18020_v51 = vld [vmem:[#allocation121_spill] sm:$0xff]  ;;  %v18022_v46 = vld [vmem:[#allocation107_spill] sm:$0xff] }
 0x56f   : > { %18012 = vst [vmem:[#allocation76_spill] sm:$0xff] %v12087_v25 }
 0x570   : > { %18014 = vst [vmem:[#allocation71_spill] sm:$0xff] %v12093_v10  ;;  %v12109_v10 = vmax.f32 %v639_v6, 0.0  ;;  %v12116_v21 = vmax.f32 %v637_v31, 0.0  ;;  %v654_v6 = vadd.f32 %v12064_v49, %v18023_v62  ;;  %v9414_v31 = vld [vmem:[%s17003_s1 + $0x190] sm:$0xff]  ;;  %v12139_v62 = vpop.f32.mrf.mxu0 }
 0x572   : > { %v1800_v32 = vmul.f32 %v18022_v46, %v12116_v21 }
 0x573   : > { %3850 = vperm.xlu2 %8023, %v11322_v63   ;;  %v1801_v63 = vmul.f32 %v18020_v51, %v12109_v10  ;;  %v12132_v51 = vpop.f32.mrf.mxu3 }
 0x574   : > { %3846 = vperm.xlu1 %8022, %v9413_v40   ;;  %8041 = vrot.lane.b32.xlu0 %v8040_v37, %s9590_s19  ;;  %v18024_v40 = vld [vmem:[#allocation127_spill] sm:$0xff] }
 0x575   : > { %v12112_v43 = vpop.permute.xlu2 %3718  ;;  %v652_v37 = vadd.f32 %v12064_v49, %v18024_v40  ;;  %v8055_v55 = vpack.i.bf16 %v1801_v63, %v1800_v32 }
 0x576   : > { %18018 = vst [vmem:[#allocation113_spill] sm:$0xff] %v12112_v43  ;;  %v12114_v0 = vpop.permute.xlu1 %3678  ;;  %v12120_v38 = vpop.permute.xlu0 %3758 }
 0x577   : > { %18019 = vst [vmem:[#allocation103_spill] sm:$0xff] %v12114_v0  ;;  %v12143_v32 = vmax.f32 %v652_v37, 0.0 }
 0x578   : > { %18021 = vst [vmem:[#allocation102_spill] sm:$0xff] %v12120_v38  ;;  %v12134_v38 = vmax.f32 %v654_v6, 0.0  ;;  %v18032_v6 = vld [vmem:[#allocation152_spill] sm:$0xff] }
 0x579   : > { %18028 = vst [vmem:[#allocation130_spill] sm:$0xff] %v12143_v32  ;;  %v667_v44 = vadd.f32 %v12064_v49, %v18032_v6  ;;  %v18038_v6 = vld [vmem:[#allocation132_spill] sm:$0xff] }
 0x57a   : > { %18025 = vst [vmem:[#allocation99_spill] sm:$0xff] %v12134_v38 }
 0x57b   : > { %3862 = vperm.xlu2 %8023, %v11341_v29   ;;  %v18029_v29 = vld [vmem:[#allocation126_spill] sm:$0xff]  ;;  %v12157_v37 = vmax.f32 %v667_v44, 0.0  ;;  %v18040_v44 = vld [vmem:[#allocation123_spill] sm:$0xff] }
 0x57c   : > { %3858 = vperm.xlu1 %8022, %v9414_v31   ;;  %8056 = vrot.lane.b32.xlu0 %v8055_v55, %s9590_s19  ;;  %v1807_v63 = vmul.f32 %v18029_v29, %v12134_v38  ;;  %v18031_v31 = vld [vmem:[#allocation115_spill] sm:$0xff]  ;;  %v18033_v55 = vld [vmem:[#allocation156_spill] sm:$0xff] }
 0x57d   : > { %v12137_v46 = vpop.permute.xlu2 %3730  ;;  %v1806_v0 = vmul.f32 %v18031_v31, %v12143_v32  ;;  %18034 = vst [vmem:[#allocation126_spill] sm:$0xff] %v12157_v37 }
 0x57e   : > { %18026 = vst [vmem:[#allocation121_spill] sm:$0xff] %v12137_v46  ;;  %v12141_v43 = vpop.permute.xlu1 %3690  ;;  %v12147_v40 = vpop.permute.xlu0 %3770  ;;  %v669_v46 = vadd.f32 %v12064_v49, %v18033_v55 }
 0x57f   : > { %18027 = vst [vmem:[#allocation107_spill] sm:$0xff] %v12141_v43  ;;  %v8070_v7 = vpack.i.bf16 %v1807_v63, %v1806_v0  ;;  %v684_v0 = vadd.f32 %v12064_v49, %v11821_v15 }
 0x580   : > { %18030 = vst [vmem:[#allocation127_spill] sm:$0xff] %v12147_v40  ;;  %v12159_v26 = vmax.f32 %v669_v46, 0.0  ;;  %v1812_v46 = vmul.f32 %v18040_v44, %v12157_v37  ;;  %v699_v44 = vadd.f32 %v12064_v49, %v11923_v59 }
 0x582   : > { %18035 = vst [vmem:[#allocation115_spill] sm:$0xff] %v12159_v26  ;;  %v1813_v40 = vmul.f32 %v18038_v6, %v12159_v26 }
 0x583   : > { %3874 = vperm.xlu2 %8023, %v11360_v14   ;;  %v12172_v14 = vpop.f32.mrf.mxu3 }
 0x584   : > { %3870 = vperm.xlu1 %8022, %v11366_v48   ;;  %8071 = vrot.lane.b32.xlu0 %v8070_v7, %s9590_s19  ;;  %v12174_v48 = vpop.f32.mrf.mxu0  ;;  %v682_v7 = vadd.f32 %v12064_v49, %v11808_v11  ;;  %v8085_v55 = vpack.i.bf16 %v1813_v40, %v1812_v46  ;;  %v18046_v11 = vld [vmem:[#allocation140_spill] sm:$0xff] }
 0x585   : > { %v12162_v29 = vpop.permute.xlu2 %3742 }
 0x586   : > { %18036 = vst [vmem:[#allocation152_spill] sm:$0xff] %v12162_v29  ;;  %v12164_v31 = vpop.permute.xlu1 %3702  ;;  %v12170_v63 = vpop.permute.xlu0 %3782  ;;  %v12180_v29 = vmax.f32 %v684_v0, 0.0  ;;  %v12184_v15 = vmax.f32 %v682_v7, 0.0 }
 0x587   : > { %18037 = vst [vmem:[#allocation156_spill] sm:$0xff] %v12164_v31 }
 0x588   : > { %18039 = vst [vmem:[#allocation132_spill] sm:$0xff] %v12170_v63  ;;  %v1819_v40 = vmul.f32 %v18046_v11, %v12180_v29 }
 0x589   : > { %18041 = vst [vmem:[#allocation123_spill] sm:$0xff] %v12180_v29 }
 0x58a   : > { %18042 = vst [vmem:[#allocation496_spill] sm:$0xff] %v12184_v15 }
 0x58b   : > { %3886 = vperm.xlu2 %8023, %v17881_v45   ;;  %v697_v45 = vadd.f32 %v12064_v49, %v11905_v52  ;;  %v12201_v46 = vpop.f32.mrf.mxu3 }
 0x58c   : > { %3882 = vperm.xlu1 %8022, %v11385_v20   ;;  %8086 = vrot.lane.b32.xlu0 %v8085_v55, %s9590_s19  ;;  %v18047_v20 = vld [vmem:[#allocation44_spill] sm:$0xff]  ;;  %v726_v7 = vpop.f32.mrf.mxu0  ;;  %v12203_v55 = vmax.f32 %v699_v44, 0.0  ;;  %v714_v44 = vadd.f32 %v12064_v49, %v12048_v4 }
 0x58d   : > { %v12187_v6 = vpop.permute.xlu2 %3754  ;;  %v1818_v0 = vmul.f32 %v18047_v20, %v12184_v15  ;;  %v12207_v59 = vmax.f32 %v697_v45, 0.0  ;;  %v18091_v15 = vld [vmem:[#allocation114_spill] sm:$0xff] }
 0x58e   : > { %18043 = vst [vmem:[#allocation497_spill] sm:$0xff] %v12187_v6  ;;  %v12189_v63 = vpop.permute.xlu1 %3714  ;;  %v12193_v31 = vpop.permute.xlu0 %3794 }
 0x58f   : > { %18044 = vst [vmem:[#allocation498_spill] sm:$0xff] %v12189_v63  ;;  %v8100_v6 = vpack.i.bf16 %v1819_v40, %v1818_v0  ;;  %v18056_v0 = vld [vmem:[#allocation57_spill] sm:$0xff]  ;;  %v1824_v4 = vmul.f32 %v18058_v39, %v12207_v59  ;;  %v18060_v39 = vld [vmem:[#allocation112_spill] sm:$0xff] }
 0x590   : > { %18045 = vst [vmem:[#allocation499_spill] sm:$0xff] %v12193_v31  ;;  %v18052_v31 = vld [vmem:[#allocation65_spill] sm:$0xff] }
 0x591   : > { %18048 = vst [vmem:[#allocation140_spill] sm:$0xff] %v12203_v55  ;;  %v619_v20 = vadd.f32 %v12064_v49, %v18052_v31  ;;  %v712_v31 = vadd.f32 %v12064_v49, %v12029_v28 }
 0x592   : > { %18049 = vst [vmem:[#allocation44_spill] sm:$0xff] %v12207_v59 }
 0x593   : > { %3898 = vperm.xlu2 %8023, %v17886_v42   ;;  %v18054_v42 = vld [vmem:[#allocation147_spill] sm:$0xff]  ;;  %v12232_v43 = vmax.f32 %v619_v20, 0.0  ;;  %v12248_v24 = vmax.f32 %v712_v31, 0.0  ;;  %v18068_v31 = vld [vmem:[#allocation98_spill] sm:$0xff] }
 0x594   : > { %3894 = vperm.xlu1 %8022, %v11404_v47   ;;  %8101 = vrot.lane.b32.xlu0 %v8100_v6, %s9590_s19  ;;  %v1825_v40 = vmul.f32 %v18054_v42, %v12203_v55  ;;  %v18055_v47 = vld [vmem:[#allocation52_spill] sm:$0xff]  ;;  %v614_v6 = vadd.f32 %v12064_v49, %v18056_v0  ;;  %v12241_v0 = vpop.f32.mrf.mxu3 }
 0x595   : > { %v12210_v11 = vpop.permute.xlu2 %3766  ;;  %v612_v45 = vadd.f32 %v12064_v49, %v18055_v47  ;;  %v1793_v20 = vmul.f32 %v18060_v39, %v12232_v43  ;;  %18061 = vst [vmem:[#allocation52_spill] sm:$0xff] %v12248_v24  ;;  %v634_v39 = vadd.f32 %v12064_v49, %v18067_v58  ;;  %v18073_v58 = vld [vmem:[#allocation84_spill] sm:$0xff] }
 0x596   : > { %18050 = vst [vmem:[#allocation500_spill] sm:$0xff] %v12210_v11  ;;  %v12212_v52 = vpop.permute.xlu1 %3726  ;;  %v12218_v63 = vpop.permute.xlu0 %3806  ;;  %v18057_v11 = vld [vmem:[#allocation61_spill] sm:$0xff]  ;;  %v8115_v42 = vpack.i.bf16 %v1825_v40, %v1824_v4  ;;  %v12239_v54 = vmax.f32 %v614_v6, 0.0  ;;  %v629_v59 = vadd.f32 %v12064_v49, %v18073_v58  ;;  %v18085_v58 = vld [vmem:[#allocation122_spill] sm:$0xff] }
 0x597   : > { %18051 = vst [vmem:[#allocation501_spill] sm:$0xff] %v12212_v52  ;;  %v617_v52 = vadd.f32 %v12064_v49, %v18057_v11  ;;  %v12237_v47 = vmax.f32 %v612_v45, 0.0  ;;  %v728_v11 = vpop.f32.mrf.mxu0  ;;  %v18064_v45 = vld [vmem:[#allocation108_spill] sm:$0xff]  ;;  %v18065_v4 = vld [vmem:[#allocation109_spill] sm:$0xff] }
 0x598   : > { %18053 = vst [vmem:[#allocation65_spill] sm:$0xff] %v12218_v63  ;;  %v12234_v63 = vmax.f32 %v714_v44, 0.0  ;;  %v18063_v44 = vld [vmem:[#allocation91_spill] sm:$0xff]  ;;  %v1791_v6 = vmul.f32 %v18064_v45, %v12239_v54  ;;  %v627_v45 = vadd.f32 %v12064_v49, %v18071_v5 }
 0x599   : > { %v12244_v28 = vmax.f32 %v617_v52, 0.0  ;;  %v632_v40 = vadd.f32 %v12064_v49, %v18063_v44  ;;  %v18070_v44 = vld [vmem:[#allocation155_spill] sm:$0xff] }
 0x59a   : > { %18059 = vst [vmem:[#allocation147_spill] sm:$0xff] %v12234_v63  ;;  %v1831_v25 = vmul.f32 %v18070_v44, %v12234_v63  ;;  %v12284_v5 = vmax.f32 %v627_v45, 0.0 }
 0x59b   : > { %3910 = vperm.xlu2 %8023, %v17890_v27   ;;  %v1792_v56 = vmul.f32 %v18068_v31, %v12244_v28  ;;  %v12277_v29 = vmax.f32 %v632_v40, 0.0 }
 0x59c   : > { %3906 = vperm.xlu1 %8022, %v17957_v36   ;;  %8116 = vrot.lane.b32.xlu0 %v8115_v42, %s9590_s19  ;;  %v1790_v36 = vmul.f32 %v18065_v4, %v12237_v47  ;;  %v729_v42 = vadd.f32 %v12064_v49, %v728_v11  ;;  %v727_v4 = vadd.f32 %v12064_v49, %v726_v7  ;;  %v12279_v11 = vmax.f32 %v634_v39, 0.0 }
 0x59d   : > { %v12251_v27 = vpop.permute.xlu2 %3778  ;;  %v8035_v22 = vpack.i.bf16 %v1793_v20, %v1792_v56  ;;  %18074 = vst [vmem:[#allocation112_spill] sm:$0xff] %v12277_v29  ;;  %v18077_v56 = vld [vmem:[#allocation117_spill] sm:$0xff]  ;;  %v18078_v20 = vld [vmem:[#allocation120_spill] sm:$0xff] }
 0x59e   : > { %18062 = vst [vmem:[#allocation57_spill] sm:$0xff] %v12251_v27  ;;  %v12259_v52 = vpop.permute.xlu1 %3738  ;;  %v12266_v27 = vpop.permute.xlu0 %3818  ;;  %v8030_v31 = vpack.i.bf16 %v1791_v6, %v1790_v36  ;;  %v1798_v7 = vmul.f32 %v18077_v56, %v12277_v29  ;;  %v12291_v6 = vmax.f32 %v727_v4, 0.0  ;;  %v12296_v36 = vmax.f32 %v629_v59, 0.0 }
 0x59f   : > { %18066 = vst [vmem:[#allocation61_spill] sm:$0xff] %v12259_v52  ;;  %v18072_v52 = vld [vmem:[#allocation141_spill] sm:$0xff] }
 0x5a0   : > { %18069 = vst [vmem:[#allocation134_spill] sm:$0xff] %v12266_v27  ;;  %v1830_v55 = vmul.f32 %v18072_v52, %v12248_v24  ;;  %v12281_v27 = vmax.f32 %v729_v42, 0.0  ;;  %v1799_v52 = vmul.f32 %v18078_v20, %v12279_v11  ;;  %v18084_v42 = vld [vmem:[#allocation118_spill] sm:$0xff] }
 0x5a1   : > { %18076 = vst [vmem:[#allocation108_spill] sm:$0xff] %v12284_v5  ;;  %v647_v45 = vadd.f32 %v12064_v49, %v18084_v42  ;;  %v18088_v20 = vld [vmem:[#allocation110_spill] sm:$0xff]  ;;  %v18090_v42 = vld [vmem:[#allocation149_spill] sm:$0xff] }
 0x5a2   : > { %18075 = vst [vmem:[#allocation91_spill] sm:$0xff] %v12281_v27  ;;  %v8130_v44 = vpack.i.bf16 %v1831_v25, %v1830_v55  ;;  %v756_v25 = vpop.f32.mrf.mxu3  ;;  %v642_v59 = vadd.f32 %v12064_v49, %v18088_v20  ;;  %v1836_v24 = vmul.f32 %v18090_v42, %v12291_v6  ;;  %v18104_v42 = vld [vmem:[#allocation168_spill] sm:$0xff] }
 0x5a3   : > { %8036 = vrot.lane.b32.xlu2 %v8035_v22, %s9590_s19  ;;  %18079 = vst [vmem:[#allocation109_spill] sm:$0xff] %v12291_v6  ;;  %v18082_v22 = vld [vmem:[#allocation116_spill] sm:$0xff] }
 0x5a4   : > { %8031 = vrot.lane.b32.xlu1 %v8030_v31, %s9590_s19  ;;  %8131 = vrot.lane.b32.xlu0 %v8130_v44, %s9590_s19  ;;  %18081 = vst [vmem:[#allocation98_spill] sm:$0xff] %v12296_v36  ;;  %v1796_v55 = vmul.f32 %v18082_v22, %v12284_v5  ;;  %v649_v31 = vadd.f32 %v12064_v49, %v18085_v58  ;;  %v18087_v44 = vld [vmem:[#allocation162_spill] sm:$0xff] }
 0x5a5   : > { %v12294_v40 = vpop.permute.xlu2 %3790  ;;  %v1837_v56 = vmul.f32 %v18087_v44, %v12281_v27  ;;  %v744_v22 = vadd.f32 %v12064_v49, %v12099_v13  ;;  %v644_v58 = vadd.f32 %v12064_v49, %v18091_v15  ;;  %v742_v44 = vadd.f32 %v12064_v49, %v12070_v57 }
 0x5a6   : > { %18080 = vst [vmem:[#allocation95_spill] sm:$0xff] %v12294_v40  ;;  %v12300_v39 = vpop.permute.xlu1 %3750  ;;  %v12306_v4 = vpop.permute.xlu0 %3830  ;;  %v18089_v40 = vld [vmem:[#allocation105_spill] sm:$0xff]  ;;  %v12322_v27 = vmax.f32 %v647_v45, 0.0  ;;  %v12324_v20 = vmax.f32 %v649_v31, 0.0  ;;  %v18100_v45 = vld [vmem:[#allocation124_spill] sm:$0xff] }
 0x5a7   : > { %18083 = vst [vmem:[#allocation155_spill] sm:$0xff] %v12300_v39  ;;  %v1797_v63 = vmul.f32 %v18089_v40, %v12296_v36  ;;  %v8050_v39 = vpack.i.bf16 %v1799_v52, %v1798_v7  ;;  %v8145_v26 = vpack.i.bf16 %v1837_v56, %v1836_v24  ;;  %v12327_v40 = vmax.f32 %v642_v59, 0.0  ;;  %v18095_v7 = vld [vmem:[#allocation125_spill] sm:$0xff]  ;;  %v18103_v59 = vld [vmem:[#allocation148_spill] sm:$0xff] }
 0x5a8   : > { %18086 = vst [vmem:[#allocation80_spill] sm:$0xff] %v12306_v4  ;;  %v12330_v13 = vmax.f32 %v744_v22, 0.0  ;;  %v1804_v15 = vmul.f32 %v18095_v7, %v12322_v27  ;;  %v18099_v24 = vld [vmem:[#allocation133_spill] sm:$0xff]  ;;  %v12347_v56 = vmax.f32 %v742_v44, 0.0  ;;  %v664_v22 = vadd.f32 %v12064_v49, %v18103_v59 }
 0x5a9   : > { %v8045_v4 = vpack.i.bf16 %v1797_v63, %v1796_v55  ;;  %18092 = vst [vmem:[#allocation141_spill] sm:$0xff] %v12324_v20  ;;  %v18096_v63 = vld [vmem:[#allocation45_spill] sm:$0xff]  ;;  %v12339_v55 = vmax.f32 %v644_v58, 0.0  ;;  %v1802_v31 = vmul.f32 %v18100_v45, %v12327_v40 }
 0x5aa   : > { %18093 = vst [vmem:[#allocation84_spill] sm:$0xff] %v12327_v40  ;;  %v1805_v52 = vmul.f32 %v18096_v63, %v12324_v20  ;;  %v758_v58 = vpop.f32.mrf.mxu3  ;;  %v18106_v63 = vld [vmem:[#allocation111_spill] sm:$0xff]  ;;  %v18109_v59 = vld [vmem:[#allocation157_spill] sm:$0xff] }
 0x5ab   : > { %8051 = vrot.lane.b32.xlu2 %v8050_v39, %s9590_s19  ;;  %18094 = vst [vmem:[#allocation117_spill] sm:$0xff] %v12330_v13  ;;  %v657_v39 = vadd.f32 %v12064_v49, %v18099_v24  ;;  %v18107_v24 = vld [vmem:[#allocation137_spill] sm:$0xff]  ;;  %v759_v45 = vadd.f32 %v12064_v49, %v758_v58  ;;  %v1842_v20 = vmul.f32 %v18109_v59, %v12347_v56  ;;  %v18111_v58 = vld [vmem:[#allocation128_spill] sm:$0xff] }
 0x5ac   : > { %8046 = vrot.lane.b32.xlu1 %v8045_v4, %s9590_s19  ;;  %8146 = vrot.lane.b32.xlu0 %v8145_v26, %s9590_s19  ;;  %18098 = vst [vmem:[#allocation116_spill] sm:$0xff] %v12339_v55  ;;  %v1843_v26 = vmul.f32 %v18104_v42, %v12330_v13  ;;  %v659_v6 = vadd.f32 %v12064_v49, %v18107_v24  ;;  %v12367_v13 = vmax.f32 %v664_v22, 0.0 }
 0x5ad   : > { %v12337_v57 = vpop.permute.xlu2 %3802  ;;  %18102 = vst [vmem:[#allocation122_spill] sm:$0xff] %v12347_v56  ;;  %v8065_v37 = vpack.i.bf16 %v1805_v52, %v1804_v15  ;;  %v12364_v38 = vmax.f32 %v657_v39, 0.0  ;;  %v12375_v15 = vmax.f32 %v759_v45, 0.0 }
 0x5ae   : > { %18097 = vst [vmem:[#allocation120_spill] sm:$0xff] %v12337_v57  ;;  %v12345_v4 = vpop.permute.xlu1 %3762  ;;  %v12353_v7 = vpop.permute.xlu0 %3842  ;;  %v1803_v57 = vmul.f32 %v18106_v63, %v12339_v55  ;;  %v8160_v63 = vpack.i.bf16 %v1843_v26, %v1842_v20  ;;  %v12370_v24 = vmax.f32 %v659_v6, 0.0  ;;  %v18115_v6 = vld [vmem:[#allocation119_spill] sm:$0xff]  ;;  %v18118_v26 = vld [vmem:[#allocation129_spill] sm:$0xff] }
 0x5af   : > { %18101 = vst [vmem:[#allocation118_spill] sm:$0xff] %v12345_v4  ;;  %v18108_v4 = vld [vmem:[#allocation144_spill] sm:$0xff]  ;;  %v1808_v32 = vmul.f32 %v18111_v58, %v12364_v38 }
 0x5b0   : > { %18105 = vst [vmem:[#allocation162_spill] sm:$0xff] %v12353_v7  ;;  %v662_v44 = vadd.f32 %v12064_v49, %v18108_v4  ;;  %v8060_v42 = vpack.i.bf16 %v1803_v57, %v1802_v31  ;;  %v757_v7 = vadd.f32 %v12064_v49, %v756_v25  ;;  %v18113_v57 = vld [vmem:[#allocation131_spill] sm:$0xff]  ;;  %v679_v25 = vadd.f32 %v12064_v49, %v11792_v9 }
 0x5b1   : > { %18110 = vst [vmem:[#allocation110_spill] sm:$0xff] %v12370_v24  ;;  %v1811_v39 = vmul.f32 %v18113_v57, %v12367_v13  ;;  %v1809_v20 = vmul.f32 %v18115_v6, %v12370_v24  ;;  %v674_v31 = vadd.f32 %v12064_v49, %v11768_v17  ;;  %v677_v9 = vadd.f32 %v12064_v49, %v11779_v53 }
 0x5b2   : > { %18112 = vst [vmem:[#allocation105_spill] sm:$0xff] %v12375_v15  ;;  %v12377_v52 = vmax.f32 %v662_v44, 0.0  ;;  %v12392_v22 = vmax.f32 %v757_v7, 0.0  ;;  %v18119_v44 = vld [vmem:[#allocation173_spill] sm:$0xff]  ;;  %v672_v17 = vadd.f32 %v12064_v49, %v11755_v2  ;;  %v12404_v57 = vmax.f32 %v679_v25, 0.0  ;;  %v18122_v7 = vld [vmem:[#allocation163_spill] sm:$0xff] }
 0x5b3   : > { %8066 = vrot.lane.b32.xlu2 %v8065_v37, %s9590_s19  ;;  %v1849_v59 = vmul.f32 %v18119_v44, %v12375_v15  ;;  %v1855_v53 = vrot.slane %v12239_v54, 1  ;;  %v17090_v44 = vrot.slane %v12244_v28, 1 }
 0x5b4   : > { %8061 = vrot.lane.b32.xlu1 %v8060_v42, %s9590_s19  ;;  %8161 = vrot.lane.b32.xlu0 %v8160_v63, %s9590_s19  ;;  %18117 = vst [vmem:[#allocation125_spill] sm:$0xff] %v12392_v22  ;;  %v1810_v45 = vmul.f32 %v18118_v26, %v12377_v52  ;;  %v8075_v63 = vpack.i.bf16 %v1809_v20, %v1808_v32  ;;  %v17091_v26 = vrot.slane %v12237_v47, 1  ;;  %v18127_v20 = vld [vmem:[#allocation139_spill] sm:$0xff] }
 0x5b5   : > { %v12384_v37 = vpop.permute.xlu2 %3814  ;;  %18121 = vst [vmem:[#allocation133_spill] sm:$0xff] %v12404_v57  ;;  %v1848_v6 = vmul.f32 %v18122_v7, %v12392_v22  ;;  %v12419_v2 = vsel %vm1853_vm0, %v1855_v53, %v17090_v44  ;;  %v692_v7 = vadd.f32 %v12064_v49, %v11873_v1  ;;  %v18135_v44 = vld [vmem:[#allocation135_spill] sm:$0xff] }
 0x5b6   : > { %18114 = vst [vmem:[#allocation149_spill] sm:$0xff] %v12384_v37  ;;  %v12390_v4 = vpop.permute.xlu1 %3774  ;;  %v12400_v42 = vpop.permute.xlu0 %3854  ;;  %v8080_v58 = vpack.i.bf16 %v1811_v39, %v1810_v45  ;;  %v12408_v37 = vmax.f32 %v674_v31, 0.0  ;;  %v694_v39 = vadd.f32 %v12064_v49, %v11890_v16  ;;  %v1817_v31 = vmul.f32 %v18127_v20, %v12404_v57  ;;  %v18131_v16 = vld [vmem:[#allocation38_spill] sm:$0xff]  ;;  %v18137_v1 = vld [vmem:[#allocation171_spill] sm:$0xff] }
 0x5b7   : > { %18116 = vst [vmem:[#allocation114_spill] sm:$0xff] %v12390_v4  ;;  %v12413_v4 = vmax.f32 %v677_v9, 0.0  ;;  %v8175_v32 = vpack.i.bf16 %v1849_v59, %v1848_v6  ;;  %v12429_v45 = vmax.f32 %v672_v17, 0.0  ;;  %v689_v9 = vadd.f32 %v12064_v49, %v11850_v19  ;;  %v18132_v6 = vld [vmem:[#allocation182_spill] sm:$0xff]  ;;  %v18134_v19 = vld [vmem:[#allocation136_spill] sm:$0xff] }
 0x5b8   : > { %18120 = vst [vmem:[#allocation45_spill] sm:$0xff] %v12400_v42  ;;  %v12436_v59 = vsel %vm1853_vm0, %v17091_v26, %v1855_v53  ;;  %v2302_v17 = vmul.f32 %v18132_v6, %v12419_v2  ;;  %v687_v26 = vadd.f32 %v12064_v49, %v11832_v61  ;;  %v1867_v42 = vrot.slane %v12296_v36, 1 }
 0x5b9   : > { %18123 = vst [vmem:[#allocation124_spill] sm:$0xff] %v12408_v37  ;;  %v1816_v20 = vmul.f32 %v18134_v19, %v12413_v4  ;;  %v1814_v53 = vmul.f32 %v18135_v44, %v12429_v45  ;;  %v12459_v6 = vmax.f32 %v689_v9, 0.0  ;;  %v17095_v19 = vrot.slane %v12277_v29, 1 }
 0x5ba   : > { %18124 = vst [vmem:[#allocation148_spill] sm:$0xff] %v12413_v4  ;;  %v12463_v15 = vmax.f32 %v692_v7, 0.0  ;;  %v12466_v61 = vmax.f32 %v687_v26, 0.0  ;;  %v709_v9 = vadd.f32 %v12064_v49, %v12004_v8  ;;  %v18147_v8 = vld [vmem:[#allocation183_spill] sm:$0xff] }
 0x5bb   : > { %8081 = vrot.lane.b32.xlu2 %v8080_v58, %s9590_s19  ;;  %18125 = vst [vmem:[#allocation168_spill] sm:$0xff] %v12419_v2  ;;  %v1815_v58 = vmul.f32 %v18131_v16, %v12408_v37  ;;  %v12455_v16 = vmax.f32 %v694_v39, 0.0 }
 0x5bc   : > { %8076 = vrot.lane.b32.xlu1 %v8075_v63, %s9590_s19  ;;  %8176 = vrot.lane.b32.xlu0 %v8175_v32, %s9590_s19  ;;  %18128 = vst [vmem:[#allocation137_spill] sm:$0xff] %v12429_v45 }
 0x5bd   : > { %v12425_v25 = vpop.permute.xlu2 %3826  ;;  %18129 = vst [vmem:[#allocation144_spill] sm:$0xff] %v12436_v59  ;;  %v8090_v2 = vpack.i.bf16 %v1815_v58, %v1814_v53  ;;  %v704_v58 = vadd.f32 %v12064_v49, %v11963_v60  ;;  %v18148_v53 = vld [vmem:[#allocation28_spill] sm:$0xff]  ;;  %v702_v60 = vadd.f32 %v12064_v49, %v11946_v18 }
 0x5be   : > { %18126 = vst [vmem:[#allocation111_spill] sm:$0xff] %v12425_v25  ;;  %v12438_v63 = vpop.permute.xlu1 %3786  ;;  %v12446_v32 = vpop.permute.xlu0 %3866  ;;  %v2301_v25 = vmul.f32 %v18137_v1, %v12436_v59  ;;  %v18212_v59 = vrot.slane %v12237_v47, 1 }
 0x5bf   : > { %18130 = vst [vmem:[#allocation157_spill] sm:$0xff] %v12438_v63  ;;  %v8095_v63 = vpack.i.bf16 %v1817_v31, %v1816_v20  ;;  %v12476_v31 = vsel %vm1853_vm0, %v1867_v42, %v17095_v19  ;;  %v12516_v18 = vmax.f32 %v702_v60, 0.0 }
 0x5c0   : > { %18133 = vst [vmem:[#allocation128_spill] sm:$0xff] %v12446_v32  ;;  %v17096_v32 = vrot.slane %v12284_v5, 1  ;;  %v8190_v44 = vpack.i.bf16 %v2302_v17, %v2301_v25  ;;  %v18144_v25 = vld [vmem:[#allocation146_spill] sm:$0xff]  ;;  %v2308_v1 = vmul.f32 %v18148_v53, %v12476_v31  ;;  %v17102_v53 = vrot.slane %v12327_v40, 1 }
 0x5c1   : > { %18136 = vst [vmem:[#allocation131_spill] sm:$0xff] %v12455_v16 }
 0x5c2   : > { %18138 = vst [vmem:[#allocation119_spill] sm:$0xff] %v12459_v6  ;;  %v12471_v39 = vsel %vm1853_vm0, %v17096_v32, %v1867_v42  ;;  %v18146_v42 = vld [vmem:[#allocation14_spill] sm:$0xff]  ;;  %v1879_v32 = vrot.slane %v12339_v55, 1 }
 0x5c3   : > { %18139 = vst [vmem:[#allocation129_spill] sm:$0xff] %v12463_v15  ;;  %8096 = vrot.lane.b32.xlu2 %v8095_v63, %s9590_s19  ;;  %v1823_v63 = vmul.f32 %v18144_v25, %v12455_v16  ;;  %v1821_v17 = vmul.f32 %v18146_v42, %v12459_v6  ;;  %v2307_v20 = vmul.f32 %v18147_v8, %v12471_v39  ;;  %v18150_v25 = vld [vmem:[#allocation143_spill] sm:$0xff]  ;;  %v18151_v42 = vld [vmem:[#allocation142_spill] sm:$0xff]  ;;  %v12509_v8 = vmax.f32 %v704_v58, 0.0 }
 0x5c4   : > { %18140 = vst [vmem:[#allocation173_spill] sm:$0xff] %v12466_v61  ;;  %8091 = vrot.lane.b32.xlu1 %v8090_v2, %s9590_s19  ;;  %8191 = vrot.lane.b32.xlu0 %v8190_v44, %s9591_s17  ;;  %v707_v2 = vadd.f32 %v12064_v49, %v11982_v12  ;;  %v1822_v19 = vmul.f32 %v18150_v25, %v12463_v15  ;;  %v12507_v12 = vmax.f32 %v709_v9, 0.0  ;;  %v18159_v58 = vld [vmem:[#allocation154_spill] sm:$0xff] }
 0x5c5   : > { %18141 = vst [vmem:[#allocation163_spill] sm:$0xff] %v12471_v39  ;;  %v12482_v26 = vpop.permute.xlu2 %3838  ;;  %v8205_v25 = vpack.i.bf16 %v2308_v1, %v2307_v20  ;;  %v12521_v9 = vsel %vm1853_vm0, %v17102_v53, %v1879_v32  ;;  %v18166_v53 = vld [vmem:[#allocation150_spill] sm:$0xff] }
 0x5c6   : > { %18142 = vst [vmem:[#allocation139_spill] sm:$0xff] %v12476_v31  ;;  %v12488_v7 = vpop.permute.xlu1 %3798  ;;  %v12498_v44 = vpop.permute.xlu0 %3878  ;;  %v12513_v31 = vmax.f32 %v707_v2, 0.0 }
 0x5c7   : > { %18143 = vst [vmem:[#allocation38_spill] sm:$0xff] %v12482_v26  ;;  %v1820_v26 = vmul.f32 %v18151_v42, %v12466_v61  ;;  %v722_v42 = vadd.f32 %v12064_v49, %v12139_v62 }
 0x5c8   : > { %18145 = vst [vmem:[#allocation182_spill] sm:$0xff] %v12488_v7  ;;  %v8110_v7 = vpack.i.bf16 %v1823_v63, %v1822_v19 }
 0x5c9   : > { %18149 = vst [vmem:[#allocation136_spill] sm:$0xff] %v12498_v44  ;;  %v17101_v44 = vrot.slane %v12322_v27, 1  ;;  %v8105_v39 = vpack.i.bf16 %v1821_v17, %v1820_v26  ;;  %v724_v26 = vadd.f32 %v12064_v49, %v12174_v48  ;;  %v719_v17 = vadd.f32 %v12064_v49, %v12104_v33  ;;  %v18163_v48 = vld [vmem:[#allocation40_spill] sm:$0xff] }
 0x5ca   : > { %18152 = vst [vmem:[#allocation135_spill] sm:$0xff] %v12507_v12  ;;  %v717_v33 = vadd.f32 %v12064_v49, %v12074_v41  ;;  %v17108_v41 = vrot.slane %v12364_v38, 1 }
 0x5cb   : > { %18153 = vst [vmem:[#allocation171_spill] sm:$0xff] %v12509_v8  ;;  %8111 = vrot.lane.b32.xlu2 %v8110_v7, %s9590_s19  ;;  %v12526_v19 = vsel %vm1853_vm0, %v1879_v32, %v17101_v44  ;;  %v1829_v7 = vmul.f32 %v18159_v58, %v12507_v12  ;;  %v18161_v32 = vld [vmem:[#allocation138_spill] sm:$0xff]  ;;  %v18165_v58 = vld [vmem:[#allocation151_spill] sm:$0xff] }
 0x5cc   : > { %18154 = vst [vmem:[#allocation146_spill] sm:$0xff] %v12513_v31  ;;  %8106 = vrot.lane.b32.xlu1 %v8105_v39, %s9590_s19  ;;  %8206 = vrot.lane.b32.xlu0 %v8205_v25, %s9591_s17  ;;  %v1827_v20 = vmul.f32 %v18161_v32, %v12509_v8  ;;  %v18162_v39 = vld [vmem:[#allocation32_spill] sm:$0xff]  ;;  %v2314_v60 = vmul.f32 %v18163_v48, %v12526_v19  ;;  %v1891_v48 = vrot.slane %v12370_v24, 1 }
 0x5cd   : > { %18155 = vst [vmem:[#allocation14_spill] sm:$0xff] %v12516_v18  ;;  %v12532_v63 = vpop.permute.xlu2 %3850  ;;  %v2313_v1 = vmul.f32 %v18162_v39, %v12521_v9  ;;  %v1828_v44 = vmul.f32 %v18165_v58, %v12513_v31  ;;  %v1826_v32 = vmul.f32 %v18166_v53, %v12516_v18  ;;  %v12566_v58 = vmax.f32 %v717_v33, 0.0 }
 0x5ce   : > { %18156 = vst [vmem:[#allocation183_spill] sm:$0xff] %v12521_v9  ;;  %v12538_v2 = vpop.permute.xlu1 %3810  ;;  %v12548_v25 = vpop.permute.xlu0 %3890  ;;  %v12560_v9 = vmax.f32 %v719_v17, 0.0  ;;  %v12582_v17 = vsel %vm1853_vm0, %v17108_v41, %v1891_v48  ;;  %v18181_v41 = vld [vmem:[#allocation188_spill] sm:$0xff] }
 0x5cf   : > { %18157 = vst [vmem:[#allocation28_spill] sm:$0xff] %v12526_v19  ;;  %v8125_v39 = vpack.i.bf16 %v1829_v7, %v1828_v44  ;;  %v8120_v62 = vpack.i.bf16 %v1827_v20, %v1826_v32  ;;  %v12562_v19 = vmax.f32 %v722_v42, 0.0  ;;  %v739_v42 = vadd.f32 %v12064_v49, %v12044_v34 }
 0x5d0   : > { %18158 = vst [vmem:[#allocation143_spill] sm:$0xff] %v12532_v63  ;;  %v12556_v63 = vmax.f32 %v724_v26, 0.0  ;;  %v18173_v26 = vld [vmem:[#allocation161_spill] sm:$0xff]  ;;  %v2319_v34 = vmul.f32 %v18181_v41, %v12582_v17  ;;  %v1939_v24 = vrot.slane %v12560_v9, 1 }
 0x5d1   : > { %18160 = vst [vmem:[#allocation142_spill] sm:$0xff] %v12538_v2  ;;  %v17107_v2 = vrot.slane %v12377_v52, 1 }
 0x5d2   : > { %18164 = vst [vmem:[#allocation154_spill] sm:$0xff] %v12548_v25  ;;  %v8220_v25 = vpack.i.bf16 %v2314_v60, %v2313_v1  ;;  %v1835_v7 = vmul.f32 %v18173_v26, %v12556_v63  ;;  %v18176_v1 = vld [vmem:[#allocation145_spill] sm:$0xff]  ;;  %v18180_v26 = vld [vmem:[#allocation158_spill] sm:$0xff] }
 0x5d3   : > { %18167 = vst [vmem:[#allocation138_spill] sm:$0xff] %v12556_v63  ;;  %8126 = vrot.lane.b32.xlu2 %v8125_v39, %s9590_s19  ;;  %v12571_v44 = vsel %vm1853_vm0, %v1891_v48, %v17107_v2  ;;  %v1833_v60 = vmul.f32 %v18176_v1, %v12560_v9  ;;  %v18179_v39 = vld [vmem:[#allocation159_spill] sm:$0xff]  ;;  %v732_v48 = vadd.f32 %v12064_v49, %v11980_v3 }
 0x5d4   : > { %18168 = vst [vmem:[#allocation32_spill] sm:$0xff] %v12560_v9  ;;  %8121 = vrot.lane.b32.xlu1 %v8120_v62, %s9590_s19  ;;  %8221 = vrot.lane.b32.xlu0 %v8220_v25, %s9591_s17  ;;  %v18177_v25 = vld [vmem:[#allocation193_spill] sm:$0xff]  ;;  %v1834_v62 = vmul.f32 %v18179_v39, %v12562_v19  ;;  %v1832_v2 = vmul.f32 %v18180_v26, %v12566_v58  ;;  %v1903_v39 = vrot.slane %v12408_v37, 1 }
 0x5d5   : > { %18169 = vst [vmem:[#allocation40_spill] sm:$0xff] %v12562_v19  ;;  %v12575_v53 = vpop.permute.xlu2 %3862  ;;  %v2320_v33 = vmul.f32 %v18177_v25, %v12571_v44  ;;  %v737_v1 = vadd.f32 %v12064_v49, %v12019_v23  ;;  %v734_v25 = vadd.f32 %v12064_v49, %v11999_v50  ;;  %v12611_v26 = vmax.f32 %v732_v48, 0.0 }
 0x5d6   : > { %18170 = vst [vmem:[#allocation151_spill] sm:$0xff] %v12566_v58  ;;  %v12584_v20 = vpop.permute.xlu1 %3822  ;;  %v12592_v32 = vpop.permute.xlu0 %3902  ;;  %v17112_v23 = vrot.slane %v12429_v45, 1 }
 0x5d7   : > { %18171 = vst [vmem:[#allocation150_spill] sm:$0xff] %v12571_v44  ;;  %v12608_v44 = vmax.f32 %v739_v42, 0.0  ;;  %v8235_v3 = vpack.i.bf16 %v2320_v33, %v2319_v34  ;;  %v12620_v50 = vmax.f32 %v737_v1, 0.0  ;;  %v761_v42 = vpop.f32.mrf.mxu3  ;;  %v18189_v33 = vld [vmem:[#allocation164_spill] sm:$0xff]  ;;  %v754_v1 = vadd.f32 %v12064_v49, %v12241_v0  ;;  %v18192_v34 = vld [vmem:[#allocation165_spill] sm:$0xff]  ;;  %v18196_v0 = vld [vmem:[#allocation194_spill] sm:$0xff] }
 0x5d8   : > { %18172 = vst [vmem:[#allocation502_spill] sm:$0xff] %v12575_v53  ;;  %v8135_v53 = vpack.i.bf16 %v1833_v60, %v1832_v2  ;;  %v18186_v2 = vld [vmem:[#allocation167_spill] sm:$0xff]  ;;  %v12634_v48 = vsel %vm1853_vm0, %v17112_v23, %v1903_v39  ;;  %v752_v23 = vadd.f32 %v12064_v49, %v12201_v46  ;;  %v17125_v46 = vrot.slane %v12466_v61, 1 }
 0x5d9   : > { %18174 = vst [vmem:[#allocation161_spill] sm:$0xff] %v12582_v17  ;;  %v2325_v37 = vmul.f32 %v18196_v0, %v12634_v48 }
 0x5da   : > { %18175 = vst [vmem:[#allocation503_spill] sm:$0xff] %v12584_v20  ;;  %v8140_v20 = vpack.i.bf16 %v1835_v7, %v1834_v62  ;;  %v1841_v7 = vmul.f32 %v18186_v2, %v12608_v44  ;;  %v1838_v62 = vmul.f32 %v18189_v33, %v12611_v26  ;;  %v747_v33 = vadd.f32 %v12064_v49, %v12132_v51 }
 0x5db   : > { %18178 = vst [vmem:[#allocation145_spill] sm:$0xff] %v12592_v32  ;;  %v17111_v32 = vrot.slane %v12413_v4, 1 }
 0x5dc   : > { %18182 = vst [vmem:[#allocation193_spill] sm:$0xff] %v12608_v44  ;;  %8141 = vrot.lane.b32.xlu2 %v8140_v20, %s9590_s19  ;;  %8136 = vrot.lane.b32.xlu1 %v8135_v53, %s9590_s19  ;;  %v12627_v20 = vmax.f32 %v734_v25, 0.0  ;;  %v18193_v25 = vld [vmem:[#allocation200_spill] sm:$0xff] }
 0x5dd   : > { %18183 = vst [vmem:[#allocation159_spill] sm:$0xff] %v12611_v26  ;;  %v12617_v41 = vsel %vm1853_vm0, %v1903_v39, %v17111_v32  ;;  %8236 = vrot.lane.b32.xlu0 %v8235_v3, %s9591_s17  ;;  %v12625_v60 = vpop.permute.xlu2 %3874  ;;  %v1840_v3 = vmul.f32 %v18192_v34, %v12620_v50  ;;  %v749_v34 = vadd.f32 %v12064_v49, %v12172_v14  ;;  %v12670_v14 = vmax.f32 %v752_v23, 0.0  ;;  %v18207_v23 = vld [vmem:[#allocation170_spill] sm:$0xff] }
 0x5de   : > { %18184 = vst [vmem:[#allocation158_spill] sm:$0xff] %v12617_v41  ;;  %v12636_v53 = vpop.permute.xlu1 %3834  ;;  %v2326_v2 = vmul.f32 %v18193_v25, %v12617_v41  ;;  %v12644_v32 = vpop.permute.xlu0 %8026  ;;  %v17120_v25 = vrot.slane %v12463_v15, 1  ;;  %v12658_v41 = vmax.f32 %v754_v1, 0.0 }
 0x5df   : > { %18185 = vst [vmem:[#allocation188_spill] sm:$0xff] %v12620_v50  ;;  %v1846_v0 = vmul.f32 %v18207_v23, %v12670_v14  ;;  %v2042_v23 = vsel %vm1853_vm0, 0.0, %v18212_v59 }
 0x5e0   : > { %18187 = vst [vmem:[#allocation167_spill] sm:$0xff] %v12625_v60  ;;  %v18195_v60 = vld [vmem:[#allocation153_spill] sm:$0xff]  ;;  %v8250_v51 = vpack.i.bf16 %v2326_v2, %v2325_v37 }
 0x5e1   : > { %18188 = vst [vmem:[#allocation504_spill] sm:$0xff] %v12627_v20  ;;  %v1839_v39 = vmul.f32 %v18195_v60, %v12627_v20  ;;  %v12661_v60 = vmax.f32 %v747_v33, 0.0  ;;  %v18204_v2 = vld [vmem:[#allocation169_spill] sm:$0xff] }
 0x5e2   : > { %18190 = vst [vmem:[#allocation164_spill] sm:$0xff] %v12634_v48 }
 0x5e3   : > { %18191 = vst [vmem:[#allocation505_spill] sm:$0xff] %v12636_v53  ;;  %v8155_v53 = vpack.i.bf16 %v1841_v7, %v1840_v3  ;;  %v8150_v17 = vpack.i.bf16 %v1839_v39, %v1838_v62  ;;  %v18201_v62 = vld [vmem:[#allocation172_spill] sm:$0xff]  ;;  %v763_v3 = vpop.f32.mrf.mxu3  ;;  %v1844_v33 = vmul.f32 %v18204_v2, %v12661_v60 }
 0x5e4   : > { %18194 = vst [vmem:[#allocation165_spill] sm:$0xff] %v12644_v32  ;;  %v1915_v32 = vrot.slane %v12459_v6, 1  ;;  %v1847_v1 = vmul.f32 %v18201_v62, %v12658_v41  ;;  %v764_v6 = vadd.f32 %v12064_v49, %v763_v3  ;;  %v18215_v3 = vld [vmem:[#allocation177_spill] sm:$0xff] }
 0x5e5   : > { %18197 = vst [vmem:[#allocation200_spill] sm:$0xff] %v12658_v41  ;;  %8156 = vrot.lane.b32.xlu2 %v8155_v53, %s9590_s19  ;;  %8151 = vrot.lane.b32.xlu1 %v8150_v17, %s9590_s19  ;;  %v12675_v37 = vpop.permute.xlu2 %3886  ;;  %v12677_v53 = vmax.f32 %v749_v34, 0.0  ;;  %v762_v34 = vadd.f32 %v12064_v49, %v761_v42  ;;  %v2299_v59 = vmul.f32 0.0, %v18215_v3 }
 0x5e6   : > { %18198 = vst [vmem:[#allocation153_spill] sm:$0xff] %v12661_v60  ;;  %v12667_v7 = vsel %vm1853_vm0, %v1915_v32, %v17120_v25  ;;  %8251 = vrot.lane.b32.xlu0 %v8250_v51, %s9591_s17  ;;  %v12684_v39 = vsel %vm1853_vm0, %v17125_v46, %v1915_v32  ;;  %v12686_v17 = vpop.permute.xlu1 %3846  ;;  %v18208_v51 = vld [vmem:[#allocation207_spill] sm:$0xff]  ;;  %v12692_v25 = vpop.permute.xlu0 %8041  ;;  %v8170_v48 = vpack.i.bf16 %v1847_v1, %v1846_v0  ;;  %v18211_v32 = vld [vmem:[#allocation201_spill] sm:$0xff] }
 0x5e7   : > { %18199 = vst [vmem:[#allocation194_spill] sm:$0xff] %v12667_v7  ;;  %v2332_v62 = vmul.f32 %v18208_v51, %v12667_v7  ;;  %v2331_v46 = vmul.f32 %v18211_v32, %v12684_v39  ;;  %v17130_v51 = vrot.slane %v12513_v31, 1  ;;  %v12706_v42 = vmax.f32 %v762_v34, 0.0 }
 0x5e8   : > { %18200 = vst [vmem:[#allocation506_spill] sm:$0xff] %v12670_v14 }
 0x5e9   : > { %18202 = vst [vmem:[#allocation172_spill] sm:$0xff] %v12675_v37  ;;  %v18210_v37 = vld [vmem:[#allocation160_spill] sm:$0xff]  ;;  %v8265_v7 = vpack.i.bf16 %v2332_v62, %v2331_v46  ;;  %v18219_v62 = vld [vmem:[#allocation175_spill] sm:$0xff] }
 0x5ea   : > { %18203 = vst [vmem:[#allocation507_spill] sm:$0xff] %v12677_v53  ;;  %v1845_v2 = vmul.f32 %v18210_v37, %v12677_v53  ;;  %v17131_v37 = vrot.slane %v12516_v18, 1  ;;  %v1850_v34 = vmul.f32 %v18219_v62, %v12706_v42  ;;  %v1863_v62 = vrot.slane %v12082_v30, 1 }
 0x5eb   : > { %18205 = vst [vmem:[#allocation169_spill] sm:$0xff] %v12684_v39  ;;  %v17139_v39 = vrot.slane %v12562_v19, 1 }
 0x5ec   : > { %18206 = vst [vmem:[#allocation508_spill] sm:$0xff] %v12686_v17  ;;  %v8165_v17 = vpack.i.bf16 %v1845_v2, %v1844_v33  ;;  %v18216_v33 = vld [vmem:[#allocation179_spill] sm:$0xff] }
 0x5ed   : > { %18209 = vst [vmem:[#allocation170_spill] sm:$0xff] %v12692_v25  ;;  %v1927_v25 = vrot.slane %v12509_v8, 1  ;;  %8171 = vrot.lane.b32.xlu2 %v8170_v48, %s9590_s19  ;;  %v2300_v0 = vmul.f32 %v18216_v33, %v2042_v23  ;;  %v12718_v46 = vpop.permute.xlu2 %3898  ;;  %v12720_v48 = vmax.f32 %v764_v6, 0.0  ;;  %v1861_v23 = vrot.slane %v12089_v35, 1  ;;  %v18224_v6 = vld [vmem:[#allocation166_spill] sm:$0xff] }
 0x5ee   : > { %18213 = vst [vmem:[#allocation207_spill] sm:$0xff] %v12706_v42  ;;  %8166 = vrot.lane.b32.xlu1 %v8165_v17, %s9590_s19  ;;  %8266 = vrot.lane.b32.xlu0 %v8265_v7, %s9591_s17  ;;  %v12729_v32 = vpop.permute.xlu1 %3858  ;;  %v1859_v17 = vrot.slane %v12232_v43, 1  ;;  %v18222_v7 = vld [vmem:[#allocation213_spill] sm:$0xff]  ;;  %v12735_v33 = vpop.permute.xlu0 %8056 }
 0x5ef   : > { %v12712_v1 = vsel %vm1853_vm0, %v1927_v25, %v17130_v51  ;;  %18217 = vst [vmem:[#allocation201_spill] sm:$0xff] %v12718_v46  ;;  %v12727_v2 = vsel %vm1853_vm0, %v17131_v37, %v1927_v25  ;;  %v1851_v51 = vmul.f32 %v18224_v6, %v12720_v48  ;;  %v8185_v46 = vpack.i.bf16 %v2300_v0, %v2299_v59  ;;  %v18225_v25 = vld [vmem:[#allocation208_spill] sm:$0xff] }
 0x5f0   : > { %18214 = vst [vmem:[#allocation160_spill] sm:$0xff] %v12712_v1  ;;  %v2338_v3 = vmul.f32 %v18222_v7, %v12712_v1  ;;  %v2337_v37 = vmul.f32 %v18225_v25, %v12727_v2  ;;  %v18227_v7 = vrot.slane %v12244_v28, 1  ;;  %v12753_v6 = vsel %vm1853_vm0, %v1859_v17, %v1861_v23 }
 0x5f1   : > { %18218 = vst [vmem:[#allocation177_spill] sm:$0xff] %v12720_v48  ;;  %v8180_v8 = vpack.i.bf16 %v1851_v51, %v1850_v34  ;;  %v18228_v51 = vrot.slane %v12284_v5, 1  ;;  %v17146_v34 = vrot.slane %v12566_v58, 1  ;;  %v12765_v25 = vsel %vm1853_vm0, %v1939_v24, %v17139_v39  ;;  %v18258_v5 = vld [vmem:[#allocation220_spill] sm:$0xff] }
 0x5f2   : > { %18220 = vst [vmem:[#allocation179_spill] sm:$0xff] %v12727_v2  ;;  %v8280_v59 = vpack.i.bf16 %v2338_v3, %v2337_v37 }
 0x5f3   : > { %18221 = vst [vmem:[#allocation175_spill] sm:$0xff] %v12729_v32  ;;  %v12743_v32 = vsel %vm1853_vm0, %v1861_v23, %v1863_v62  ;;  %v12759_v0 = vsel %vm1853_vm0, %v1863_v62, %v18228_v51  ;;  %v18233_v62 = vld [vmem:[#allocation180_spill] sm:$0xff]  ;;  %v12780_v51 = vsel %vm1853_vm0, %v17146_v34, %v1939_v24  ;;  %v18239_v24 = vld [vmem:[#allocation214_spill] sm:$0xff] }
 0x5f4   : > { %18223 = vst [vmem:[#allocation213_spill] sm:$0xff] %v12735_v33  ;;  %v12750_v33 = vsel %vm1853_vm0, %v18227_v7, %v1859_v17  ;;  %v18230_v17 = vld [vmem:[#allocation185_spill] sm:$0xff]  ;;  %v2304_v7 = vmul.f32 %v18233_v62, %v12753_v6  ;;  %v1871_v62 = vrot.slane %v12279_v11, 1  ;;  %v2343_v34 = vmul.f32 %v18239_v24, %v12780_v51 }
 0x5f5   : > { %18226 = vst [vmem:[#allocation166_spill] sm:$0xff] %v12743_v32  ;;  %8186 = vrot.lane.b32.xlu2 %v8185_v46, %s9591_s17  ;;  %v2305_v23 = vmul.f32 %v18230_v17, %v12743_v32  ;;  %v12771_v37 = vpop.permute.xlu2 %3910  ;;  %v18232_v46 = vld [vmem:[#allocation174_spill] sm:$0xff]  ;;  %v1951_v32 = vrot.slane %v12627_v20, 1  ;;  %v18253_v20 = vld [vmem:[#allocation225_spill] sm:$0xff] }
 0x5f6   : > { %18229 = vst [vmem:[#allocation208_spill] sm:$0xff] %v12765_v25  ;;  %8181 = vrot.lane.b32.xlu1 %v8180_v8, %s9590_s19  ;;  %8281 = vrot.lane.b32.xlu0 %v8280_v59, %s9591_s17  ;;  %v2303_v3 = vmul.f32 %v18232_v46, %v12750_v33  ;;  %v12782_v39 = vpop.permute.xlu1 %3870  ;;  %v18236_v8 = vld [vmem:[#allocation176_spill] sm:$0xff]  ;;  %v1873_v59 = vrot.slane %v12116_v21, 1  ;;  %v12789_v2 = vpop.permute.xlu0 %8071  ;;  %v1875_v46 = vrot.slane %v12109_v10, 1 }
 0x5f7   : > { %18231 = vst [vmem:[#allocation185_spill] sm:$0xff] %v12771_v37  ;;  %v2306_v17 = vmul.f32 %v18236_v8, %v12759_v0  ;;  %v18237_v37 = vld [vmem:[#allocation219_spill] sm:$0xff]  ;;  %v17154_v8 = vrot.slane %v12620_v50, 1 }
 0x5f8   : > { %18234 = vst [vmem:[#allocation174_spill] sm:$0xff] %v12780_v51  ;;  %v2344_v9 = vmul.f32 %v18237_v37, %v12765_v25  ;;  %v8195_v55 = vpack.i.bf16 %v2304_v7, %v2303_v3  ;;  %v12801_v37 = vsel %vm1853_vm0, %v1871_v62, %v1873_v59  ;;  %v17166_v3 = vrot.slane %v12611_v26, 1  ;;  %v18252_v51 = vld [vmem:[#allocation130_spill] sm:$0xff] }
 0x5f9   : > { %18235 = vst [vmem:[#allocation180_spill] sm:$0xff] %v12782_v39  ;;  %v8200_v1 = vpack.i.bf16 %v2306_v17, %v2305_v23  ;;  %v12796_v39 = vsel %vm1853_vm0, %v1873_v59, %v1875_v46  ;;  %v12813_v7 = vsel %vm1853_vm0, %v1951_v32, %v17154_v8  ;;  %v18245_v17 = vrot.slane %v12277_v29, 1  ;;  %v766_v59 = vpop.f32.mrf.mxu3 }
 0x5fa   : > { %18238 = vst [vmem:[#allocation176_spill] sm:$0xff] %v12789_v2  ;;  %v8295_v25 = vpack.i.bf16 %v2344_v9, %v2343_v34  ;;  %v18242_v2 = vrot.slane %v12327_v40, 1 }
 0x5fb   : > { %18240 = vst [vmem:[#allocation219_spill] sm:$0xff] %v12796_v39  ;;  %v12819_v9 = vsel %vm1853_vm0, %v18245_v17, %v1871_v62  ;;  %v18251_v62 = vld [vmem:[#allocation181_spill] sm:$0xff] }
 0x5fc   : > { %18241 = vst [vmem:[#allocation214_spill] sm:$0xff] %v12801_v37  ;;  %v12807_v23 = vsel %vm1853_vm0, %v1875_v46, %v18242_v2  ;;  %v18248_v46 = vld [vmem:[#allocation186_spill] sm:$0xff] }
 0x5fd   : > { %8201 = vrot.lane.b32.xlu2 %v8200_v1, %s9591_s17  ;;  %18243 = vst [vmem:[#allocation509_spill] sm:$0xff] %v12807_v23  ;;  %v18246_v1 = vld [vmem:[#allocation34_spill] sm:$0xff]  ;;  %v12824_v2 = vpop.permute.xlu2 %8036  ;;  %v2310_v24 = vmul.f32 %v18248_v46, %v12801_v37  ;;  %v2312_v17 = vmul.f32 %v18251_v62, %v12807_v23  ;;  %v18256_v37 = vld [vmem:[#allocation99_spill] sm:$0xff] }
 0x5fe   : > { %18244 = vst [vmem:[#allocation510_spill] sm:$0xff] %v12813_v7  ;;  %8196 = vrot.lane.b32.xlu1 %v8195_v55, %s9591_s17  ;;  %v2311_v34 = vmul.f32 %v18246_v1, %v12796_v39  ;;  %8296 = vrot.lane.b32.xlu0 %v8295_v25, %s9591_s17  ;;  %v12831_v55 = vsel %vm1853_vm0, %v17166_v3, %v1951_v32  ;;  %v12833_v8 = vpop.permute.xlu1 %3882  ;;  %v1885_v1 = vrot.slane %v18252_v51, 1  ;;  %v12840_v39 = vpop.permute.xlu0 %8086  ;;  %v1887_v40 = vrot.slane %v18256_v37, 1  ;;  %v18257_v3 = vld [vmem:[#allocation141_spill] sm:$0xff] }
 0x5ff   : > { %18247 = vst [vmem:[#allocation34_spill] sm:$0xff] %v12824_v2  ;;  %v2350_v25 = vmul.f32 %v18253_v20, %v12813_v7  ;;  %v18255_v2 = vld [vmem:[#allocation178_spill] sm:$0xff]  ;;  %v767_v32 = vadd.f32 %v12064_v49, %v766_v59  ;;  %v1883_v29 = vrot.slane %v18257_v3, 1  ;;  %v2349_v62 = vmul.f32 %v18258_v5, %v12831_v55 }
 0x600   : > { %18249 = vst [vmem:[#allocation186_spill] sm:$0xff] %v12831_v55  ;;  %v2309_v46 = vmul.f32 %v18255_v2, %v12819_v9  ;;  %v12850_v36 = vsel %vm1853_vm0, %v1885_v1, %v1887_v40  ;;  %v17178_v20 = vrot.slane %v12670_v14, 1  ;;  %v1963_v7 = vrot.slane %v12677_v53, 1  ;;  %v18275_v53 = vld [vmem:[#allocation184_spill] sm:$0xff] }
 0x601   : > { %18250 = vst [vmem:[#allocation511_spill] sm:$0xff] %v12833_v8  ;;  %v8215_v8 = vpack.i.bf16 %v2312_v17, %v2311_v34  ;;  %v12855_v2 = vsel %vm1853_vm0, %v1883_v29, %v1885_v1  ;;  %v18261_v49 = vrot.slane %v12364_v38, 1  ;;  %v17186_v5 = vrot.slane %v12661_v60, 1  ;;  %v18266_v1 = vld [vmem:[#allocation189_spill] sm:$0xff] }
 0x602   : > { %18254 = vst [vmem:[#allocation181_spill] sm:$0xff] %v12840_v39  ;;  %v8210_v23 = vpack.i.bf16 %v2310_v24, %v2309_v46  ;;  %v8310_v39 = vpack.i.bf16 %v2350_v25, %v2349_v62  ;;  %v12867_v59 = vsel %vm1853_vm0, %v1963_v7, %v17178_v20  ;;  %v12869_v24 = vmax.f32 %v767_v32, 0.0  ;;  %v18268_v46 = vld [vmem:[#allocation187_spill] sm:$0xff] }
 0x603   : > { %18259 = vst [vmem:[#allocation130_spill] sm:$0xff] %v12850_v36  ;;  %v12861_v34 = vsel %vm1853_vm0, %v1887_v40, %v18261_v49  ;;  %v18265_v17 = vrot.slane %v12322_v27, 1  ;;  %v2317_v40 = vmul.f32 %v18266_v1, %v12850_v36  ;;  %v2316_v62 = vmul.f32 %v18268_v46, %v12855_v2  ;;  %v18273_v1 = vld [vmem:[#allocation230_spill] sm:$0xff] }
 0x604   : > { %18260 = vst [vmem:[#allocation225_spill] sm:$0xff] %v12855_v2  ;;  %v12887_v32 = vsel %vm1853_vm0, %v17186_v5, %v1963_v7  ;;  %v1895_v5 = vrot.slane %v12367_v13, 1  ;;  %v18277_v2 = vld [vmem:[#allocation226_spill] sm:$0xff]  ;;  %v18279_v7 = vrot.slane %v12429_v45, 1 }
 0x605   : > { %8216 = vrot.lane.b32.xlu2 %v8215_v8, %s9591_s17  ;;  %18262 = vst [vmem:[#allocation178_spill] sm:$0xff] %v12861_v34  ;;  %v12875_v8 = vsel %vm1853_vm0, %v18265_v17, %v1883_v29  ;;  %v12880_v25 = vpop.permute.xlu2 %8051  ;;  %v18271_v29 = vld [vmem:[#allocation27_spill] sm:$0xff]  ;;  %v18272_v17 = vld [vmem:[#allocation126_spill] sm:$0xff] }
 0x606   : > { %18263 = vst [vmem:[#allocation99_spill] sm:$0xff] %v12867_v59  ;;  %8211 = vrot.lane.b32.xlu1 %v8210_v23, %s9591_s17  ;;  %8311 = vrot.lane.b32.xlu0 %v8310_v39, %s9591_s17  ;;  %v12889_v23 = vpop.permute.xlu1 %3894  ;;  %v2318_v49 = vmul.f32 %v18271_v29, %v12861_v34  ;;  %v1897_v20 = vrot.slane %v18272_v17, 1  ;;  %v2356_v39 = vmul.f32 %v18273_v1, %v12867_v59  ;;  %v12896_v55 = vpop.permute.xlu0 %8101  ;;  %v1975_v1 = vrot.slane %v12720_v48, 1 }
 0x607   : > { %18264 = vst [vmem:[#allocation141_spill] sm:$0xff] %v12869_v24  ;;  %v2315_v46 = vmul.f32 %v18275_v53, %v12875_v8  ;;  %v2355_v29 = vmul.f32 %v18277_v2, %v12887_v32  ;;  %v18280_v2 = vrot.slane %v12869_v24, 1 }
 0x608   : > { %18267 = vst [vmem:[#allocation220_spill] sm:$0xff] %v12880_v25  ;;  %v18276_v25 = vld [vmem:[#allocation115_spill] sm:$0xff] }
 0x609   : > { %18269 = vst [vmem:[#allocation189_spill] sm:$0xff] %v12887_v32  ;;  %v1899_v36 = vrot.slane %v18276_v25, 1  ;;  %v8225_v34 = vpack.i.bf16 %v2316_v62, %v2315_v46  ;;  %v8325_v53 = vpack.i.bf16 %v2356_v39, %v2355_v29  ;;  %v12922_v62 = vsel %vm1853_vm0, %v1975_v1, %v18280_v2  ;;  %v18285_v46 = vld [vmem:[#allocation190_spill] sm:$0xff]  ;;  %v18292_v32 = vld [vmem:[#allocation33_spill] sm:$0xff] }
 0x60a   : > { %18270 = vst [vmem:[#allocation187_spill] sm:$0xff] %v12889_v23  ;;  %v8230_v23 = vpack.i.bf16 %v2318_v49, %v2317_v40  ;;  %v17203_v40 = vrot.slane %v12706_v42, 1 }
 0x60b   : > { %18274 = vst [vmem:[#allocation27_spill] sm:$0xff] %v12896_v55  ;;  %v12906_v17 = vsel %vm1853_vm0, %v1897_v20, %v1899_v36  ;;  %v12910_v55 = vsel %vm1853_vm0, %v1895_v5, %v1897_v20  ;;  %v12916_v59 = vsel %vm1853_vm0, %v1899_v36, %v18279_v7  ;;  %v18282_v20 = vrot.slane %v12377_v52, 1 }
 0x60c   : > { %18278 = vst [vmem:[#allocation230_spill] sm:$0xff] %v12906_v17  ;;  %v2322_v7 = vmul.f32 %v18285_v46, %v12910_v55  ;;  %v12940_v29 = vsel %vm1853_vm0, %v17203_v40, %v1975_v1  ;;  %v1907_v1 = vrot.slane %v12404_v57, 1 }
 0x60d   : > { %8231 = vrot.lane.b32.xlu2 %v8230_v23, %s9591_s17  ;;  %18281 = vst [vmem:[#allocation184_spill] sm:$0xff] %v12922_v62  ;;  %v12928_v49 = vsel %vm1853_vm0, %v18282_v20, %v1895_v5  ;;  %v18283_v23 = vld [vmem:[#allocation196_spill] sm:$0xff]  ;;  %v12933_v36 = vpop.permute.xlu2 %8066  ;;  %v18288_v5 = vld [vmem:[#allocation39_spill] sm:$0xff] }
 0x60e   : > { %8226 = vrot.lane.b32.xlu1 %v8225_v34, %s9591_s17  ;;  %v2323_v39 = vmul.f32 %v18283_v23, %v12906_v17  ;;  %8326 = vrot.lane.b32.xlu0 %v8325_v53, %s9591_s17  ;;  %18284 = vst [vmem:[#allocation226_spill] sm:$0xff] %v12933_v36  ;;  %v12942_v34 = vpop.permute.xlu1 %3906  ;;  %v2324_v2 = vmul.f32 %v18288_v5, %v12916_v59  ;;  %v18289_v20 = vld [vmem:[#allocation496_spill] sm:$0xff]  ;;  %v12949_v48 = vpop.permute.xlu0 %8116  ;;  %v18293_v36 = vld [vmem:[#allocation123_spill] sm:$0xff] }
 0x60f   : > { %18286 = vst [vmem:[#allocation196_spill] sm:$0xff] %v12940_v29  ;;  %v1909_v24 = vrot.slane %v18289_v20, 1  ;;  %v18290_v23 = vld [vmem:[#allocation236_spill] sm:$0xff]  ;;  %v2321_v46 = vmul.f32 %v18292_v32, %v12928_v49  ;;  %v1911_v45 = vrot.slane %v18293_v36, 1  ;;  %v905_v20 = vrot.slane %v12089_v35, 7 }
 0x610   : > { %18287 = vst [vmem:[#allocation190_spill] sm:$0xff] %v12942_v34  ;;  %v2362_v53 = vmul.f32 %v18290_v23, %v12922_v62  ;;  %v8245_v40 = vpack.i.bf16 %v2324_v2, %v2323_v39  ;;  %v18294_v34 = vld [vmem:[#allocation232_spill] sm:$0xff]  ;;  %v18297_v32 = vrot.slane %v12466_v61, 1  ;;  %v17214_v39 = vrot.slane %v12232_v43, 7 }
 0x611   : > { %18291 = vst [vmem:[#allocation39_spill] sm:$0xff] %v12949_v48  ;;  %v2361_v25 = vmul.f32 %v18294_v34, %v12940_v29  ;;  %v8240_v17 = vpack.i.bf16 %v2322_v7, %v2321_v46  ;;  %v12958_v5 = vsel %vm1853_vm0, %v1909_v24, %v1911_v45  ;;  %v12962_v23 = vsel %vm1853_vm0, %v1907_v1, %v1909_v24  ;;  %v18310_v61 = vld [vmem:[#allocation140_spill] sm:$0xff] }
 0x612   : > { %18295 = vst [vmem:[#allocation236_spill] sm:$0xff] %v12958_v5  ;;  %v12968_v62 = vsel %vm1853_vm0, %v1911_v45, %v18297_v32  ;;  %v18299_v34 = vrot.slane %v12413_v4, 1  ;;  %v18303_v45 = vld [vmem:[#allocation197_spill] sm:$0xff]  ;;  %v1923_v36 = vrot.slane %v18310_v61, 1  ;;  %v1919_v4 = vrot.slane %v12455_v16, 1  ;;  %v18328_v16 = vld [vmem:[#allocation147_spill] sm:$0xff] }
 0x613   : > { %18296 = vst [vmem:[#allocation33_spill] sm:$0xff] %v12962_v23  ;;  %v8340_v48 = vpack.i.bf16 %v2362_v53, %v2361_v25  ;;  %v18301_v25 = vld [vmem:[#allocation204_spill] sm:$0xff]  ;;  %v2328_v53 = vmul.f32 %v18303_v45, %v12962_v23 }
 0x614   : > { %18298 = vst [vmem:[#allocation232_spill] sm:$0xff] %v12968_v62  ;;  %v12976_v24 = vsel %vm1853_vm0, %v18299_v34, %v1907_v1  ;;  %v18305_v1 = vld [vmem:[#allocation192_spill] sm:$0xff] }
 0x615   : > { %8246 = vrot.lane.b32.xlu2 %v8245_v40, %s9591_s17  ;;  %18300 = vst [vmem:[#allocation512_spill] sm:$0xff] %v12976_v24  ;;  %v2329_v40 = vmul.f32 %v18301_v25, %v12958_v5  ;;  %v12981_v2 = vpop.permute.xlu2 %8081  ;;  %v2330_v32 = vmul.f32 %v18305_v1, %v12968_v62  ;;  %v18306_v34 = vld [vmem:[#allocation44_spill] sm:$0xff] }
 0x616   : > { %8241 = vrot.lane.b32.xlu1 %v8240_v17, %s9591_s17  ;;  %8341 = vrot.lane.b32.xlu0 %v8340_v48, %s9591_s17  ;;  %18302 = vst [vmem:[#allocation204_spill] sm:$0xff] %v12981_v2  ;;  %v12988_v17 = vsel %vm897_vm1, %v17214_v39, %v905_v20  ;;  %v12990_v46 = vpop.permute.xlu1 %8031  ;;  %v1921_v7 = vrot.slane %v18306_v34, 1  ;;  %v18307_v25 = vld [vmem:[#allocation244_spill] sm:$0xff]  ;;  %v12997_v29 = vpop.permute.xlu0 %8131  ;;  %v18309_v2 = vld [vmem:[#allocation46_spill] sm:$0xff]  ;;  %v18311_v39 = vrot.slane %v12082_v30, 7 }
 0x617   : > { %18304 = vst [vmem:[#allocation197_spill] sm:$0xff] %v12990_v46  ;;  %v2630_v48 = vmul.f32 %v18307_v25, %v12988_v17  ;;  %v2327_v45 = vmul.f32 %v18309_v2, %v12976_v24  ;;  %v8260_v1 = vpack.i.bf16 %v2330_v32, %v2329_v40  ;;  %v18312_v34 = vld [vmem:[#allocation234_spill] sm:$0xff]  ;;  %v18317_v32 = vrot.slane %v12463_v15, 1  ;;  %v18325_v40 = vld [vmem:[#allocation251_spill] sm:$0xff] }
 0x618   : > { %18308 = vst [vmem:[#allocation192_spill] sm:$0xff] %v12997_v29  ;;  %v13005_v57 = vsel %vm897_vm1, %v905_v20, %v18311_v39  ;;  %v13011_v25 = vsel %vm1853_vm0, %v1921_v7, %v1923_v36  ;;  %v917_v29 = vrot.slane %v12116_v21, 7  ;;  %v13015_v2 = vsel %vm1853_vm0, %v1919_v4, %v1921_v7 }
 0x619   : > { %v2631_v62 = vmul.f32 %v18312_v34, %v13005_v57  ;;  %v8255_v5 = vpack.i.bf16 %v2328_v53, %v2327_v45  ;;  %18313 = vst [vmem:[#allocation244_spill] sm:$0xff] %v13011_v25  ;;  %v18315_v20 = vrot.slane %v12516_v18, 1  ;;  %v17231_v53 = vrot.slane %v12279_v11, 7 }
 0x61a   : > { %18314 = vst [vmem:[#allocation46_spill] sm:$0xff] %v13015_v2  ;;  %v13029_v34 = vsel %vm1853_vm0, %v18317_v32, %v1919_v4  ;;  %v18323_v4 = vld [vmem:[#allocation199_spill] sm:$0xff]  ;;  %v18324_v32 = vld [vmem:[#allocation52_spill] sm:$0xff]  ;;  %v1935_v15 = vrot.slane %v18328_v16, 1 }
 0x61b   : > { %v8355_v61 = vpack.i.bf16 %v2631_v62, %v2630_v48  ;;  %v13021_v39 = vsel %vm1853_vm0, %v1923_v36, %v18315_v20  ;;  %18318 = vst [vmem:[#allocation513_spill] sm:$0xff] %v13029_v34  ;;  %v18319_v62 = vld [vmem:[#allocation210_spill] sm:$0xff]  ;;  %v18321_v36 = vld [vmem:[#allocation205_spill] sm:$0xff] }
 0x61c   : > { %18316 = vst [vmem:[#allocation234_spill] sm:$0xff] %v13021_v39  ;;  %v2335_v7 = vmul.f32 %v18319_v62, %v13011_v25  ;;  %v2334_v45 = vmul.f32 %v18321_v36, %v13015_v2  ;;  %v2336_v20 = vmul.f32 %v18323_v4, %v13021_v39  ;;  %v1933_v62 = vrot.slane %v18324_v32, 1  ;;  %v18330_v32 = vld [vmem:[#allocation239_spill] sm:$0xff] }
 0x61d   : > { %8261 = vrot.lane.b32.xlu2 %v8260_v1, %s9591_s17  ;;  %v13034_v48 = vpop.permute.xlu2 %8096 }
 0x61e   : > { %8256 = vrot.lane.b32.xlu1 %v8255_v5, %s9591_s17  ;;  %8356 = vrot.lane.b32.xlu0 %v8355_v61, %s9592_s29  ;;  %18320 = vst [vmem:[#allocation210_spill] sm:$0xff] %v13034_v48  ;;  %v13041_v5 = vsel %vm897_vm1, %v17231_v53, %v917_v29  ;;  %v13043_v1 = vpop.permute.xlu1 %8046  ;;  %v13050_v18 = vpop.permute.xlu0 %8146  ;;  %v18327_v48 = vld [vmem:[#allocation195_spill] sm:$0xff]  ;;  %v18329_v53 = vrot.slane %v12109_v10, 7  ;;  %v8275_v4 = vpack.i.bf16 %v2336_v20, %v2335_v7  ;;  %v18335_v20 = vrot.slane %v12513_v31, 1 }
 0x61f   : > { %18322 = vst [vmem:[#allocation205_spill] sm:$0xff] %v13043_v1  ;;  %v2636_v61 = vmul.f32 %v18325_v40, %v13041_v5  ;;  %v2333_v36 = vmul.f32 %v18327_v48, %v13029_v34  ;;  %v1931_v1 = vrot.slane %v12507_v12, 1  ;;  %v13064_v40 = vsel %vm1853_vm0, %v1933_v62, %v1935_v15  ;;  %v18347_v31 = vld [vmem:[#allocation91_spill] sm:$0xff]  ;;  %v18436_v34 = vld [vmem:[#allocation110_spill] sm:$0xff] }
 0x620   : > { %18326 = vst [vmem:[#allocation199_spill] sm:$0xff] %v13050_v18  ;;  %v13058_v25 = vsel %vm897_vm1, %v917_v29, %v18329_v53  ;;  %v929_v18 = vrot.slane %v18252_v51, 7  ;;  %v18333_v29 = vrot.slane %v12566_v58, 1  ;;  %v1947_v58 = vrot.slane %v18347_v31, 1 }
 0x621   : > { %v2637_v39 = vmul.f32 %v18330_v32, %v13058_v25  ;;  %v8270_v2 = vpack.i.bf16 %v2334_v45, %v2333_v36  ;;  %18331 = vst [vmem:[#allocation251_spill] sm:$0xff] %v13064_v40  ;;  %v13068_v48 = vsel %vm1853_vm0, %v1931_v1, %v1933_v62  ;;  %v17247_v45 = vrot.slane %v18257_v3, 7 }
 0x622   : > { %18332 = vst [vmem:[#allocation195_spill] sm:$0xff] %v13068_v48  ;;  %v13074_v53 = vsel %vm1853_vm0, %v1935_v15, %v18333_v29  ;;  %v13082_v32 = vsel %vm1853_vm0, %v18335_v20, %v1931_v1  ;;  %v18339_v15 = vld [vmem:[#allocation211_spill] sm:$0xff]  ;;  %v18342_v1 = vld [vmem:[#allocation206_spill] sm:$0xff]  ;;  %v18343_v20 = vld [vmem:[#allocation109_spill] sm:$0xff]  ;;  %v18353_v31 = vrot.slane %v12611_v26, 1 }
 0x623   : > { %v8370_v16 = vpack.i.bf16 %v2637_v39, %v2636_v61  ;;  %18334 = vst [vmem:[#allocation239_spill] sm:$0xff] %v13074_v53  ;;  %v18337_v39 = vld [vmem:[#allocation216_spill] sm:$0xff]  ;;  %v2340_v36 = vmul.f32 %v18339_v15, %v13068_v48  ;;  %v2342_v29 = vmul.f32 %v18342_v1, %v13074_v53  ;;  %v1945_v7 = vrot.slane %v18343_v20, 1  ;;  %v18350_v20 = vld [vmem:[#allocation247_spill] sm:$0xff] }
 0x624   : > { %18336 = vst [vmem:[#allocation514_spill] sm:$0xff] %v13082_v32  ;;  %v2341_v62 = vmul.f32 %v18337_v39, %v13064_v40  ;;  %v18344_v39 = vld [vmem:[#allocation257_spill] sm:$0xff] }
 0x625   : > { %8276 = vrot.lane.b32.xlu2 %v8275_v4, %s9591_s17  ;;  %v13087_v61 = vpop.permute.xlu2 %8111  ;;  %v13094_v4 = vsel %vm897_vm1, %v17247_v45, %v929_v18  ;;  %v18348_v45 = vrot.slane %v18256_v37, 7 }
 0x626   : > { %8271 = vrot.lane.b32.xlu1 %v8270_v2, %s9591_s17  ;;  %8371 = vrot.lane.b32.xlu0 %v8370_v16, %s9592_s29  ;;  %18338 = vst [vmem:[#allocation216_spill] sm:$0xff] %v13087_v61  ;;  %v13096_v2 = vpop.permute.xlu1 %8061  ;;  %v2642_v16 = vmul.f32 %v18344_v39, %v13094_v4  ;;  %v13103_v12 = vpop.permute.xlu0 %8161  ;;  %v18346_v61 = vld [vmem:[#allocation203_spill] sm:$0xff]  ;;  %v8290_v1 = vpack.i.bf16 %v2342_v29, %v2341_v62 }
 0x627   : > { %18340 = vst [vmem:[#allocation211_spill] sm:$0xff] %v13094_v4  ;;  %v2339_v15 = vmul.f32 %v18346_v61, %v13082_v32  ;;  %v13111_v40 = vsel %vm897_vm1, %v929_v18, %v18348_v45  ;;  %v13117_v39 = vsel %vm1853_vm0, %v1945_v7, %v1947_v58  ;;  %v13126_v18 = vsel %vm1853_vm0, %v1947_v58, %v18353_v31  ;;  %v18361_v31 = vld [vmem:[#allocation212_spill] sm:$0xff] }
 0x628   : > { %18341 = vst [vmem:[#allocation515_spill] sm:$0xff] %v13096_v2  ;;  %v1943_v2 = vrot.slane %v12556_v63, 1  ;;  %v2643_v53 = vmul.f32 %v18350_v20, %v13111_v40  ;;  %v18355_v45 = vrot.slane %v12562_v19, 1  ;;  %v2348_v58 = vmul.f32 %v18361_v31, %v13126_v18  ;;  %v18379_v63 = vld [vmem:[#allocation105_spill] sm:$0xff] }
 0x629   : > { %18345 = vst [vmem:[#allocation206_spill] sm:$0xff] %v13103_v12  ;;  %v8285_v48 = vpack.i.bf16 %v2340_v36, %v2339_v15  ;;  %v18357_v36 = vld [vmem:[#allocation222_spill] sm:$0xff]  ;;  %v8400_v31 = vpack.i.bf16 %v12239_v54, %v12237_v47  ;;  %v1967_v19 = vrot.slane %v12658_v41, 1 }
 0x62a   : > { %18349 = vst [vmem:[#allocation257_spill] sm:$0xff] %v13111_v40  ;;  %v13120_v12 = vsel %vm1853_vm0, %v1943_v2, %v1945_v7  ;;  %v8385_v61 = vpack.i.bf16 %v2643_v53, %v2642_v16  ;;  %v13132_v62 = vsel %vm1853_vm0, %v18355_v45, %v1943_v2  ;;  %v2347_v29 = vmul.f32 %v18357_v36, %v13117_v39  ;;  %v18359_v7 = vld [vmem:[#allocation217_spill] sm:$0xff] }
 0x62b   : > { %18351 = vst [vmem:[#allocation203_spill] sm:$0xff] %v13117_v39  ;;  %v2346_v20 = vmul.f32 %v18359_v7, %v13120_v12  ;;  %v18363_v2 = vld [vmem:[#allocation209_spill] sm:$0xff] }
 0x62c   : > { %18352 = vst [vmem:[#allocation247_spill] sm:$0xff] %v13120_v12  ;;  %v18364_v45 = vld [vmem:[#allocation117_spill] sm:$0xff] }
 0x62d   : > { %8291 = vrot.lane.b32.xlu2 %v8290_v1, %s9591_s17  ;;  %18354 = vst [vmem:[#allocation516_spill] sm:$0xff] %v13126_v18  ;;  %v13137_v53 = vpop.permute.xlu2 %8126  ;;  %v2345_v1 = vmul.f32 %v18363_v2, %v13132_v62  ;;  %v1959_v36 = vrot.slane %v18364_v45, 1 }
 0x62e   : > { %8286 = vrot.lane.b32.xlu1 %v8285_v48, %s9591_s17  ;;  %18356 = vst [vmem:[#allocation517_spill] sm:$0xff] %v13132_v62  ;;  %8386 = vrot.lane.b32.xlu0 %v8385_v61, %s9592_s29  ;;  %v13141_v16 = vpop.permute.xlu1 %8076  ;;  %v1957_v48 = vrot.slane %v12347_v56, 1  ;;  %v13146_v15 = vpop.permute.xlu0 %8176  ;;  %v1955_v61 = vrot.slane %v12608_v44, 1  ;;  %v1969_v62 = vrot.slane %v12392_v22, 1  ;;  %v18414_v56 = vrot.slane %v12082_v30, 7 }
 0x62f   : > { %18358 = vst [vmem:[#allocation222_spill] sm:$0xff] %v13137_v53  ;;  %v8305_v53 = vpack.i.bf16 %v2348_v58, %v2347_v29  ;;  %v8300_v39 = vpack.i.bf16 %v2346_v20, %v2345_v1  ;;  %v18369_v29 = vrot.slane %v12620_v50, 1  ;;  %v18371_v58 = vld [vmem:[#allocation227_spill] sm:$0xff] }
 0x630   : > { %18360 = vst [vmem:[#allocation217_spill] sm:$0xff] %v13141_v16  ;;  %v13153_v7 = vsel %vm1853_vm0, %v1957_v48, %v1959_v36  ;;  %v13156_v12 = vsel %vm1853_vm0, %v1955_v61, %v1957_v48  ;;  %v18373_v1 = vld [vmem:[#allocation223_spill] sm:$0xff]  ;;  %v13198_v22 = vsel %vm1853_vm0, %v1967_v19, %v1969_v62 }
 0x631   : > { %18362 = vst [vmem:[#allocation212_spill] sm:$0xff] %v13146_v15  ;;  %v18367_v15 = vrot.slane %v12661_v60, 1  ;;  %v13170_v20 = vsel %vm1853_vm0, %v18369_v29, %v1955_v61  ;;  %v2353_v48 = vmul.f32 %v18371_v58, %v13153_v7  ;;  %v2352_v18 = vmul.f32 %v18373_v1, %v13156_v12  ;;  %v18376_v61 = vld [vmem:[#allocation422_spill] sm:$0xff]  ;;  %v18378_v58 = vld [vmem:[#allocation215_spill] sm:$0xff] }
 0x632   : > { %18365 = vst [vmem:[#allocation209_spill] sm:$0xff] %v13153_v7  ;;  %v3593_v29 = vmul.f32 %v18376_v61, %v12244_v28  ;;  %v18422_v60 = vld [vmem:[#allocation366_spill] sm:$0xff] }
 0x633   : > { %18366 = vst [vmem:[#allocation518_spill] sm:$0xff] %v13156_v12  ;;  %v13164_v2 = vsel %vm1853_vm0, %v1959_v36, %v18367_v15 }
 0x634   : > { %18368 = vst [vmem:[#allocation519_spill] sm:$0xff] %v13164_v2 }
 0x635   : > { %8306 = vrot.lane.b32.xlu2 %v8305_v53, %s9591_s17  ;;  %18370 = vst [vmem:[#allocation520_spill] sm:$0xff] %v13170_v20 }
 0x636   : > { %8301 = vrot.lane.b32.xlu1 %v8300_v39, %s9591_s17  ;;  %8401 = vrot.lane.b32.xlu0 %v8400_v31, %s9593_s16  ;;  %v13175_v53 = vpop.permute.xlu2 %8141  ;;  %v13179_v15 = vpop.permute.xlu1 %8091  ;;  %v18375_v39 = vld [vmem:[#allocation218_spill] sm:$0xff]  ;;  %v2351_v31 = vmul.f32 %v18378_v58, %v13170_v20  ;;  %18382 = vst [vmem:[#allocation215_spill] sm:$0xff] %v13198_v22  ;;  %v18383_v58 = vrot.slane %v12706_v42, 1 }
 0x637   : > { %18372 = vst [vmem:[#allocation227_spill] sm:$0xff] %v13175_v53  ;;  %v2354_v36 = vmul.f32 %v18375_v39, %v13164_v2  ;;  %v13186_v26 = vpop.permute.xlu0 %8191  ;;  %v1971_v53 = vrot.slane %v18379_v63, 1 }
 0x638   : > { %18374 = vst [vmem:[#allocation223_spill] sm:$0xff] %v13179_v15  ;;  %v18380_v15 = vld [vmem:[#allocation420_spill] sm:$0xff]  ;;  %v8315_v16 = vpack.i.bf16 %v2352_v18, %v2351_v31 }
 0x639   : > { %18377 = vst [vmem:[#allocation218_spill] sm:$0xff] %v13186_v26  ;;  %v8320_v1 = vpack.i.bf16 %v2354_v36, %v2353_v48  ;;  %v3594_v12 = vmul.f32 %v18380_v15, %v12232_v43  ;;  %v13195_v39 = vsel %vm1853_vm0, %v1969_v62, %v1971_v53  ;;  %v13204_v63 = vsel %vm1853_vm0, %v1971_v53, %v18383_v58  ;;  %v18387_v15 = vld [vmem:[#allocation233_spill] sm:$0xff]  ;;  %v18393_v58 = vld [vmem:[#allocation308_spill] sm:$0xff] }
 0x63a   : > { %18381 = vst [vmem:[#allocation422_spill] sm:$0xff] %v13195_v39  ;;  %v18385_v48 = vrot.slane %v12670_v14, 1  ;;  %v2359_v36 = vmul.f32 %v18387_v15, %v13195_v39  ;;  %v18389_v62 = vld [vmem:[#allocation229_spill] sm:$0xff] }
 0x63b   : > { %v8415_v61 = vpack.i.bf16 %v3594_v12, %v3593_v29  ;;  %18384 = vst [vmem:[#allocation420_spill] sm:$0xff] %v13204_v63  ;;  %v2358_v29 = vmul.f32 %v18389_v62, %v13198_v22  ;;  %v898_v62 = vrot.slane %v12237_v47, 7  ;;  %v18398_v47 = vld [vmem:[#allocation240_spill] sm:$0xff] }
 0x63c   : > { %v13210_v18 = vsel %vm1853_vm0, %v18385_v48, %v1967_v19  ;;  %v2954_v48 = vmul.f32 %v18393_v58, %v12753_v6 }
 0x63d   : > { %8321 = vrot.lane.b32.xlu2 %v8320_v1, %s9591_s17  ;;  %18386 = vst [vmem:[#allocation521_spill] sm:$0xff] %v13210_v18  ;;  %v18392_v1 = vld [vmem:[#allocation300_spill] sm:$0xff]  ;;  %v13240_v58 = vsel %vm897_vm1, 0.0, %v898_v62 }
 0x63e   : > { %8316 = vrot.lane.b32.xlu1 %v8315_v16, %s9591_s17  ;;  %8416 = vrot.lane.b32.xlu0 %v8415_v61, %s9594_s21  ;;  %v13219_v53 = vpop.permute.xlu1 %8106  ;;  %v18391_v16 = vld [vmem:[#allocation224_spill] sm:$0xff]  ;;  %v2953_v19 = vmul.f32 %v18392_v1, %v12750_v33  ;;  %v18395_v61 = vld [vmem:[#allocation221_spill] sm:$0xff] }
 0x63f   : > { %v13215_v12 = vpop.permute.xlu2 %8156  ;;  %18390 = vst [vmem:[#allocation229_spill] sm:$0xff] %v13219_v53  ;;  %v2360_v31 = vmul.f32 %v18391_v16, %v13204_v63  ;;  %v13227_v15 = vpop.permute.xlu0 %8206  ;;  %v2357_v39 = vmul.f32 %v18395_v61, %v13210_v18  ;;  %v899_v53 = vrot.slane %v12239_v54, 7  ;;  %v18408_v63 = vld [vmem:[#allocation98_spill] sm:$0xff]  ;;  %v18409_v18 = vld [vmem:[#allocation108_spill] sm:$0xff] }
 0x640   : > { %18388 = vst [vmem:[#allocation233_spill] sm:$0xff] %v13215_v12  ;;  %v901_v12 = vrot.slane %v12244_v28, 7  ;;  %v8430_v16 = vpack.i.bf16 %v2954_v48, %v2953_v19  ;;  %v18405_v48 = vld [vmem:[#allocation231_spill] sm:$0xff]  ;;  %v909_v41 = vrot.slane %v18409_v18, 7 }
 0x641   : > { %18394 = vst [vmem:[#allocation224_spill] sm:$0xff] %v13227_v15  ;;  %v8335_v42 = vpack.i.bf16 %v2360_v31, %v2359_v36  ;;  %v8330_v22 = vpack.i.bf16 %v2358_v29, %v2357_v39  ;;  %v13243_v61 = vsel %vm897_vm1, %v898_v62, %v899_v53  ;;  %v18401_v29 = vrot.slane %v12232_v43, 7  ;;  %v18403_v31 = vld [vmem:[#allocation235_spill] sm:$0xff] }
 0x642   : > { %v13236_v1 = vsel %vm897_vm1, %v899_v53, %v901_v12  ;;  %18397 = vst [vmem:[#allocation308_spill] sm:$0xff] %v13243_v61  ;;  %v2627_v53 = vmul.f32 %v18403_v31, %v13243_v61  ;;  %v18412_v31 = vld [vmem:[#allocation112_spill] sm:$0xff] }
 0x643   : > { %18396 = vst [vmem:[#allocation300_spill] sm:$0xff] %v13236_v1  ;;  %v2628_v36 = vmul.f32 %v18398_v47, %v13236_v1  ;;  %v913_v7 = vrot.slane %v18412_v31, 7 }
 0x645   : > { %8336 = vrot.lane.b32.xlu2 %v8335_v42, %s9591_s17  ;;  %v18400_v42 = vld [vmem:[#allocation228_spill] sm:$0xff] }
 0x646   : > { %8331 = vrot.lane.b32.xlu1 %v8330_v22, %s9591_s17  ;;  %8431 = vrot.lane.b32.xlu0 %v8430_v16, %s9595_s23  ;;  %v2626_v39 = vmul.f32 %v18400_v42, %v13240_v58  ;;  %v13255_v22 = vsel %vm897_vm1, %v901_v12, %v18401_v29  ;;  %v13259_v19 = vpop.permute.xlu1 %8121  ;;  %v18406_v16 = vld [vmem:[#allocation76_spill] sm:$0xff]  ;;  %v911_v42 = vrot.slane %v18408_v63, 7  ;;  %v18410_v12 = vld [vmem:[#allocation166_spill] sm:$0xff]  ;;  %v18411_v29 = vld [vmem:[#allocation481_spill] sm:$0xff] }
 0x647   : > { %v13248_v54 = vpop.permute.xlu2 %8171  ;;  %18402 = vst [vmem:[#allocation240_spill] sm:$0xff] %v13255_v22  ;;  %v2629_v62 = vmul.f32 %v18405_v48, %v13255_v22  ;;  %v3916_v47 = vmul.f32 %v18406_v16, %v12759_v0  ;;  %v3915_v14 = vmul.f32 %v18411_v29, %v18410_v12  ;;  %v18413_v48 = vrot.slane %v12279_v11, 7 }
 0x648   : > { %18399 = vst [vmem:[#allocation221_spill] sm:$0xff] %v13248_v54  ;;  %v13265_v54 = vpop.permute.xlu0 %8221  ;;  %v8345_v2 = vpack.i.bf16 %v2627_v53, %v2626_v39  ;;  %v13287_v53 = vsel %vm897_vm1, %v909_v41, %v911_v42 }
 0x649   : > { %18404 = vst [vmem:[#allocation228_spill] sm:$0xff] %v13259_v19  ;;  %v8350_v20 = vpack.i.bf16 %v2629_v62, %v2628_v36  ;;  %v8445_v19 = vpack.i.bf16 %v3916_v47, %v3915_v14  ;;  %v13276_v16 = vsel %vm897_vm1, %v913_v7, %v18413_v48  ;;  %v13282_v36 = vsel %vm897_vm1, %v18414_v56, %v909_v41  ;;  %v18416_v62 = vld [vmem:[#allocation241_spill] sm:$0xff]  ;;  %v18419_v56 = vld [vmem:[#allocation248_spill] sm:$0xff] }
 0x64a   : > { %18407 = vst [vmem:[#allocation235_spill] sm:$0xff] %v13265_v54  ;;  %v2635_v39 = vmul.f32 %v18416_v62, %v13276_v16  ;;  %v2633_v29 = vmul.f32 %v18419_v56, %v13287_v53  ;;  %v18421_v62 = vld [vmem:[#allocation237_spill] sm:$0xff]  ;;  %v3278_v45 = vmul.f32 %v18422_v60, %v13287_v53  ;;  %v925_v56 = vrot.slane %v12322_v27, 7 }
 0x64b   : > { %18415 = vst [vmem:[#allocation231_spill] sm:$0xff] %v13282_v36 }
 0x64c   : > { %18417 = vst [vmem:[#allocation76_spill] sm:$0xff] %v13287_v53 }
 0x64d   : > { %8351 = vrot.lane.b32.xlu2 %v8350_v20, %s9592_s29  ;;  %v13293_v20 = vsel %vm897_vm1, %v911_v42, %v913_v7  ;;  %v18425_v42 = vld [vmem:[#allocation116_spill] sm:$0xff] }
 0x64e   : > { %8346 = vrot.lane.b32.xlu1 %v8345_v2, %s9592_s29  ;;  %8446 = vrot.lane.b32.xlu0 %v8445_v19, %s9596_s27  ;;  %v18418_v2 = vld [vmem:[#allocation238_spill] sm:$0xff]  ;;  %v13299_v48 = vpop.permute.xlu1 %8136  ;;  %v2634_v41 = vmul.f32 %v18421_v62, %v13293_v20  ;;  %v18423_v19 = vld [vmem:[#allocation368_spill] sm:$0xff]  ;;  %v923_v50 = vrot.slane %v18425_v42, 7  ;;  %v18427_v62 = vrot.slane %v18257_v3, 7 }
 0x64f   : > { %v13290_v14 = vpop.permute.xlu2 %8186  ;;  %v2632_v47 = vmul.f32 %v18418_v2, %v13282_v36  ;;  %18420 = vst [vmem:[#allocation98_spill] sm:$0xff] %v13299_v48  ;;  %v3277_v54 = vmul.f32 %v18423_v19, %v13282_v36  ;;  %v18426_v2 = vld [vmem:[#allocation84_spill] sm:$0xff]  ;;  %v18428_v19 = vrot.slane %v12109_v10, 7 }
 0x650   : > { %v13307_v44 = vpop.permute.xlu0 %8236  ;;  %v8365_v7 = vpack.i.bf16 %v2635_v39, %v2634_v41  ;;  %v921_v32 = vrot.slane %v18426_v2, 7  ;;  %v13316_v60 = vsel %vm897_vm1, %v925_v56, %v18427_v62  ;;  %v18429_v41 = vld [vmem:[#allocation249_spill] sm:$0xff] }
 0x651   : > { %18424 = vst [vmem:[#allocation108_spill] sm:$0xff] %v13307_v44  ;;  %v8360_v15 = vpack.i.bf16 %v2633_v29, %v2632_v47  ;;  %v8460_v48 = vpack.i.bf16 %v3278_v45, %v3277_v54  ;;  %v2641_v44 = vmul.f32 %v18429_v41, %v13316_v60  ;;  %v13333_v54 = vsel %vm897_vm1, %v923_v50, %v925_v56  ;;  %v18434_v41 = vld [vmem:[#allocation243_spill] sm:$0xff] }
 0x652   : > { %v13322_v39 = vsel %vm897_vm1, %v18428_v19, %v921_v32  ;;  %v13327_v47 = vsel %vm897_vm1, %v921_v32, %v923_v50  ;;  %v2640_v32 = vmul.f32 %v18434_v41, %v13333_v54  ;;  %v937_v50 = vrot.slane %v12377_v52, 7 }
 0x654   : > { %v8380_v36 = vpack.i.bf16 %v2641_v44, %v2640_v32  ;;  %v18438_v44 = vld [vmem:[#allocation255_spill] sm:$0xff] }
 0x655   : > { %8366 = vrot.lane.b32.xlu2 %v8365_v7, %s9592_s29  ;;  %v18432_v7 = vld [vmem:[#allocation254_spill] sm:$0xff] }
 0x656   : > { %8361 = vrot.lane.b32.xlu1 %v8360_v15, %s9592_s29  ;;  %8461 = vrot.lane.b32.xlu0 %v8460_v48, %s9597_s30  ;;  %v18431_v15 = vld [vmem:[#allocation245_spill] sm:$0xff]  ;;  %v2639_v62 = vmul.f32 %v18432_v7, %v13327_v47  ;;  %v17324_v48 = vrot.slane %v12367_v13, 7  ;;  %v8475_v7 = vpack.i.bf16 %v18408_v63, %v18409_v18 }
 0x657   : > { %v13330_v45 = vpop.permute.xlu2 %8201  ;;  %v2638_v29 = vmul.f32 %v18431_v15, %v13322_v39  ;;  %v13339_v19 = vpop.permute.xlu1 %8151  ;;  %v933_v15 = vrot.slane %v12364_v38, 7 }
 0x658   : > { %18430 = vst [vmem:[#allocation166_spill] sm:$0xff] %v13330_v45  ;;  %v13343_v53 = vpop.permute.xlu0 %8251  ;;  %v935_v45 = vrot.slane %v18436_v34, 7  ;;  %v13355_v41 = vsel %vm897_vm1, %v937_v50, %v17324_v48 }
 0x659   : > { %18433 = vst [vmem:[#allocation481_spill] sm:$0xff] %v13339_v19  ;;  %v8375_v56 = vpack.i.bf16 %v2639_v62, %v2638_v29  ;;  %v2647_v32 = vmul.f32 %v18438_v44, %v13355_v41  ;;  %v18442_v62 = vld [vmem:[#allocation260_spill] sm:$0xff]  ;;  %v18445_v44 = vrot.slane %v18256_v37, 7 }
 0x65a   : > { %18435 = vst [vmem:[#allocation112_spill] sm:$0xff] %v13343_v53  ;;  %v13361_v19 = vsel %vm897_vm1, %v933_v15, %v935_v45 }
 0x65b   : > { %18437 = vst [vmem:[#allocation241_spill] sm:$0xff] %v13355_v41  ;;  %v2645_v53 = vmul.f32 %v18442_v62, %v13361_v19  ;;  %v13378_v46 = vsel %vm897_vm1, %v18445_v44, %v933_v15  ;;  %v18450_v62 = vld [vmem:[#allocation423_spill] sm:$0xff]  ;;  %v18452_v44 = vld [vmem:[#allocation374_spill] sm:$0xff] }
 0x65c   : > { %18439 = vst [vmem:[#allocation238_spill] sm:$0xff] %v13361_v19  ;;  %v18451_v15 = vld [vmem:[#allocation363_spill] sm:$0xff] }
 0x65d   : > { %8381 = vrot.lane.b32.xlu2 %v8380_v36, %s9592_s29  ;;  %v13367_v36 = vsel %vm897_vm1, %v935_v45, %v937_v50  ;;  %18446 = vst [vmem:[#allocation368_spill] sm:$0xff] %v13378_v46  ;;  %v18449_v45 = vld [vmem:[#allocation252_spill] sm:$0xff] }
 0x65e   : > { %8376 = vrot.lane.b32.xlu1 %v8375_v56, %s9592_s29  ;;  %8476 = vrot.lane.b32.xlu0 %v8475_v7, %s9593_s16  ;;  %18441 = vst [vmem:[#allocation237_spill] sm:$0xff] %v13367_v36  ;;  %v18444_v56 = vld [vmem:[#allocation250_spill] sm:$0xff]  ;;  %v18447_v7 = vld [vmem:[#allocation440_spill] sm:$0xff]  ;;  %v2644_v50 = vmul.f32 %v18449_v45, %v13378_v46 }
 0x65f   : > { %v13364_v29 = vpop.permute.xlu2 %8216  ;;  %v2646_v26 = vmul.f32 %v18444_v56, %v13367_v36  ;;  %v3600_v23 = vmul.f32 %v18447_v7, %v12279_v11  ;;  %v3273_v56 = vmul.f32 %v18451_v15, %v13236_v1  ;;  %v3274_v7 = vmul.f32 %v18452_v44, %v13255_v22  ;;  %v18461_v15 = vld [vmem:[#allocation214_spill] sm:$0xff]  ;;  %v18462_v1 = vld [vmem:[#allocation304_spill] sm:$0xff] }
 0x660   : > { %18440 = vst [vmem:[#allocation248_spill] sm:$0xff] %v13364_v29  ;;  %v13371_v48 = vpop.permute.xlu1 %8166  ;;  %v13382_v29 = vpop.permute.xlu0 %8266  ;;  %v8390_v41 = vpack.i.bf16 %v2645_v53, %v2644_v50  ;;  %v18457_v53 = vld [vmem:[#allocation305_spill] sm:$0xff]  ;;  %v2960_v44 = vmul.f32 %v18462_v1, %v18461_v15 }
 0x661   : > { %18443 = vst [vmem:[#allocation366_spill] sm:$0xff] %v13371_v48  ;;  %v8395_v24 = vpack.i.bf16 %v2647_v32, %v2646_v26  ;;  %v3599_v48 = vmul.f32 %v18450_v62, %v18412_v31  ;;  %v18454_v26 = vld [vmem:[#allocation168_spill] sm:$0xff]  ;;  %v8410_v22 = vpack.i.bf16 %v3274_v7, %v3273_v56  ;;  %v18468_v56 = vld [vmem:[#allocation486_spill] sm:$0xff] }
 0x662   : > { %18448 = vst [vmem:[#allocation116_spill] sm:$0xff] %v13382_v29  ;;  %v18455_v32 = vld [vmem:[#allocation296_spill] sm:$0xff]  ;;  %v3914_v7 = vmul.f32 %v18468_v56, %v12753_v6  ;;  %v18473_v6 = vld [vmem:[#allocation377_spill] sm:$0xff] }
 0x663   : > { %v8490_v61 = vpack.i.bf16 %v3600_v23, %v3599_v48  ;;  %v2952_v45 = vmul.f32 %v18455_v32, %v18454_v26  ;;  %v18456_v62 = vld [vmem:[#allocation144_spill] sm:$0xff]  ;;  %v18464_v32 = vld [vmem:[#allocation495_spill] sm:$0xff] }
 0x664   : > { %v2951_v23 = vmul.f32 %v18457_v53, %v18456_v62  ;;  %v3913_v62 = vmul.f32 %v18464_v32, %v12750_v33  ;;  %v18471_v33 = vld [vmem:[#allocation434_spill] sm:$0xff]  ;;  %v3276_v32 = vmul.f32 %v18473_v6, %v13005_v57 }
 0x665   : > { %8396 = vrot.lane.b32.xlu2 %v8395_v24, %s9592_s29  ;;  %v18459_v24 = vld [vmem:[#allocation313_spill] sm:$0xff]  ;;  %v18479_v6 = vld [vmem:[#allocation310_spill] sm:$0xff] }
 0x666   : > { %8391 = vrot.lane.b32.xlu1 %v8390_v41, %s9592_s29  ;;  %8491 = vrot.lane.b32.xlu0 %v8490_v61, %s9594_s21  ;;  %v2959_v41 = vmul.f32 %v18459_v24, %v12819_v9  ;;  %v8405_v61 = vpack.i.bf16 %v2952_v45, %v2951_v23  ;;  %v18465_v24 = vld [vmem:[#allocation219_spill] sm:$0xff]  ;;  %v18470_v45 = vld [vmem:[#allocation494_spill] sm:$0xff] }
 0x667   : > { %v13395_v29 = vpop.permute.xlu2 %8231 }
 0x668   : > { %18453 = vst [vmem:[#allocation84_spill] sm:$0xff] %v13395_v29  ;;  %v13401_v48 = vpop.permute.xlu1 %8181  ;;  %v13405_v50 = vpop.permute.xlu0 %8281  ;;  %v8505_v36 = vpack.i.bf16 %v2960_v44, %v2959_v41  ;;  %v8420_v41 = vpack.i.bf16 %v3914_v7, %v3913_v62  ;;  %v18476_v7 = vld [vmem:[#allocation425_spill] sm:$0xff] }
 0x669   : > { %18458 = vst [vmem:[#allocation249_spill] sm:$0xff] %v13401_v48  ;;  %v18466_v48 = vld [vmem:[#allocation107_spill] sm:$0xff] }
 0x66a   : > { %18460 = vst [vmem:[#allocation245_spill] sm:$0xff] %v13405_v50  ;;  %v3921_v50 = vmul.f32 %v18466_v48, %v18465_v24  ;;  %v3595_v48 = vmul.f32 %v18471_v33, %v12089_v35 }
 0x66d   : > { %8411 = vrot.lane.b32.xlu2 %v8410_v22, %s9597_s30  ;;  %v18469_v22 = vld [vmem:[#allocation509_spill] sm:$0xff] }
 0x66e   : > { %8406 = vrot.lane.b32.xlu1 %v8405_v61, %s9595_s23  ;;  %8506 = vrot.lane.b32.xlu0 %v8505_v36, %s9595_s23  ;;  %v3922_v23 = vmul.f32 %v18470_v45, %v18469_v22  ;;  %v8425_v36 = vpack.i.bf16 %v12232_v43, %v12244_v28  ;;  %v18474_v43 = vld [vmem:[#allocation372_spill] sm:$0xff]  ;;  %v3596_v45 = vmul.f32 %v18476_v7, %v12082_v30 }
 0x66f   : > { %v13412_v26 = vpop.permute.xlu2 %8246  ;;  %v3284_v28 = vmul.f32 %v18474_v43, %v13327_v47  ;;  %v2956_v43 = vmul.f32 %v18479_v6, %v12759_v0  ;;  %v8550_v0 = vpack.i.bf16 %v18425_v42, %v18426_v2 }
 0x670   : > { %18463 = vst [vmem:[#allocation254_spill] sm:$0xff] %v13412_v26  ;;  %v13416_v53 = vpop.permute.xlu1 %8196  ;;  %v13420_v1 = vpop.permute.xlu0 %8296  ;;  %v8520_v44 = vpack.i.bf16 %v3922_v23, %v3921_v50  ;;  %v18475_v50 = vld [vmem:[#allocation373_spill] sm:$0xff] }
 0x671   : > { %18467 = vst [vmem:[#allocation243_spill] sm:$0xff] %v13420_v1  ;;  %v3283_v62 = vmul.f32 %v18475_v50, %v13322_v39 }
 0x673   : > { %v8535_v1 = vpack.i.bf16 %v3284_v28, %v3283_v62  ;;  %v18484_v28 = vld [vmem:[#allocation103_spill] sm:$0xff] }
 0x675   : > { %8426 = vrot.lane.b32.xlu2 %v8425_v36, %s9593_s16  ;;  %v18478_v36 = vld [vmem:[#allocation365_spill] sm:$0xff] }
 0x676   : > { %8421 = vrot.lane.b32.xlu1 %v8420_v41, %s9596_s27  ;;  %8521 = vrot.lane.b32.xlu0 %v8520_v44, %s9596_s27  ;;  %v3275_v41 = vmul.f32 %v18478_v36, %v12988_v17  ;;  %v8440_v44 = vpack.i.bf16 %v3596_v45, %v3595_v48 }
 0x677   : > { %v13433_v61 = vpop.permute.xlu2 %8261 }
 0x678   : > { %18472 = vst [vmem:[#allocation110_spill] sm:$0xff] %v13433_v61  ;;  %v13437_v56 = vpop.permute.xlu1 %8211  ;;  %v13445_v23 = vpop.permute.xlu0 %8311  ;;  %v8435_v33 = vpack.i.bf16 %v3276_v32, %v3275_v41  ;;  %v8450_v32 = vpack.i.bf16 %v12082_v30, %v12089_v35  ;;  %v18488_v35 = vld [vmem:[#allocation446_spill] sm:$0xff]  ;;  %v18489_v41 = vld [vmem:[#allocation163_spill] sm:$0xff] }
 0x679   : > { %18477 = vst [vmem:[#allocation255_spill] sm:$0xff] %v13445_v23  ;;  %v18481_v23 = vld [vmem:[#allocation299_spill] sm:$0xff]  ;;  %v3606_v30 = vmul.f32 %v18488_v35, %v18257_v3 }
 0x67a   : > { %v2955_v61 = vmul.f32 %v18481_v23, %v18410_v12  ;;  %v18486_v12 = vld [vmem:[#allocation437_spill] sm:$0xff] }
 0x67c   : > { %v8455_v48 = vpack.i.bf16 %v2956_v43, %v2955_v61  ;;  %v3597_v61 = vmul.f32 %v18486_v12, %v18409_v18  ;;  %v18492_v43 = vld [vmem:[#allocation428_spill] sm:$0xff] }
 0x67d   : > { %8441 = vrot.lane.b32.xlu2 %v8440_v44, %s9594_s21  ;;  %v18490_v44 = vld [vmem:[#allocation489_spill] sm:$0xff]  ;;  %v18494_v18 = vld [vmem:[#allocation380_spill] sm:$0xff] }
 0x67e   : > { %8436 = vrot.lane.b32.xlu1 %v8435_v33, %s9597_s30  ;;  %8536 = vrot.lane.b32.xlu0 %v8535_v1, %s9597_s30  ;;  %v18483_v1 = vld [vmem:[#allocation139_spill] sm:$0xff]  ;;  %v3917_v33 = vmul.f32 %v18490_v44, %v18489_v41  ;;  %v3279_v12 = vmul.f32 %v18494_v18, %v13293_v20  ;;  %v18496_v44 = vld [vmem:[#allocation302_spill] sm:$0xff] }
 0x67f   : > { %v13454_v50 = vpop.permute.xlu2 %8276  ;;  %v3918_v62 = vmul.f32 %v18484_v28, %v18483_v1 }
 0x680   : > { %18480 = vst [vmem:[#allocation260_spill] sm:$0xff] %v13454_v50  ;;  %v13456_v7 = vpop.permute.xlu1 %8226  ;;  %v13460_v36 = vpop.permute.xlu0 %8326 }
 0x681   : > { %18482 = vst [vmem:[#allocation250_spill] sm:$0xff] %v13460_v36  ;;  %v8470_v28 = vpack.i.bf16 %v3918_v62, %v3917_v33 }
 0x685   : > { %8456 = vrot.lane.b32.xlu2 %v8455_v48, %s9595_s23  ;;  %v3598_v48 = vmul.f32 %v18492_v43, %v18408_v63  ;;  %v2957_v63 = vmul.f32 %v18496_v44, %v18489_v41  ;;  %v18497_v43 = vld [vmem:[#allocation303_spill] sm:$0xff]  ;;  %v18504_v41 = vld [vmem:[#allocation492_spill] sm:$0xff] }
 0x686   : > { %8451 = vrot.lane.b32.xlu1 %v8450_v32, %s9593_s16  ;;  %8551 = vrot.lane.b32.xlu0 %v8550_v0, %s9593_s16  ;;  %v18493_v32 = vld [vmem:[#allocation429_spill] sm:$0xff]  ;;  %v3919_v44 = vmul.f32 %v18504_v41, %v12819_v9  ;;  %v18511_v9 = vld [vmem:[#allocation431_spill] sm:$0xff] }
 0x687   : > { %v13471_v45 = vpop.permute.xlu2 %8291  ;;  %v3605_v0 = vmul.f32 %v18493_v32, %v12322_v27  ;;  %v8465_v36 = vpack.i.bf16 %v3598_v48, %v3597_v61  ;;  %v2958_v32 = vmul.f32 %v18497_v43, %v18483_v1  ;;  %v18499_v61 = vld [vmem:[#allocation320_spill] sm:$0xff] }
 0x688   : > { %18485 = vst [vmem:[#allocation440_spill] sm:$0xff] %v13471_v45  ;;  %v13475_v23 = vpop.permute.xlu1 %8241  ;;  %v13481_v6 = vpop.permute.xlu0 %8341 }
 0x689   : > { %18487 = vst [vmem:[#allocation252_spill] sm:$0xff] %v13475_v23  ;;  %v8565_v45 = vpack.i.bf16 %v3606_v30, %v3605_v0  ;;  %v2965_v30 = vmul.f32 %v18499_v61, %v12875_v8  ;;  %v18501_v0 = vld [vmem:[#allocation225_spill] sm:$0xff]  ;;  %v18506_v61 = vld [vmem:[#allocation130_spill] sm:$0xff] }
 0x68a   : > { %18491 = vst [vmem:[#allocation423_spill] sm:$0xff] %v13481_v6  ;;  %v8480_v6 = vpack.i.bf16 %v2958_v32, %v2957_v63  ;;  %v18509_v32 = vld [vmem:[#allocation178_spill] sm:$0xff] }
 0x68d   : > { %8471 = vrot.lane.b32.xlu2 %v8470_v28, %s9596_s27 }
 0x68e   : > { %8466 = vrot.lane.b32.xlu1 %v8465_v36, %s9594_s21  ;;  %8566 = vrot.lane.b32.xlu0 %v8565_v45, %s9594_s21  ;;  %v18500_v36 = vld [vmem:[#allocation371_spill] sm:$0xff]  ;;  %v18502_v45 = vld [vmem:[#allocation242_spill] sm:$0xff] }
 0x68f   : > { %v13492_v35 = vpop.permute.xlu2 %8306  ;;  %v3280_v33 = vmul.f32 %v18500_v36, %v13276_v16  ;;  %v2966_v28 = vmul.f32 %v18502_v45, %v18501_v0  ;;  %v18507_v36 = vld [vmem:[#allocation498_spill] sm:$0xff] }
 0x690   : > { %18495 = vst [vmem:[#allocation363_spill] sm:$0xff] %v13492_v35  ;;  %v13498_v62 = vpop.permute.xlu1 %8256  ;;  %v13504_v48 = vpop.permute.xlu0 %8356  ;;  %v3927_v50 = vmul.f32 %v18507_v36, %v18506_v61 }
 0x691   : > { %18498 = vst [vmem:[#allocation374_spill] sm:$0xff] %v13498_v62  ;;  %v8485_v18 = vpack.i.bf16 %v3280_v33, %v3279_v12  ;;  %v8580_v35 = vpack.i.bf16 %v2966_v28, %v2965_v30  ;;  %v18508_v12 = vld [vmem:[#allocation484_spill] sm:$0xff]  ;;  %v18510_v30 = vld [vmem:[#allocation113_spill] sm:$0xff] }
 0x692   : > { %v3920_v63 = vmul.f32 %v18508_v12, %v18461_v15  ;;  %v18513_v15 = vld [vmem:[#allocation383_spill] sm:$0xff] }
 0x693   : > { %v3282_v36 = vmul.f32 %v18513_v15, %v13058_v25  ;;  %v18520_v15 = vld [vmem:[#allocation306_spill] sm:$0xff] }
 0x694   : > { %v8495_v33 = vpack.i.bf16 %v3920_v63, %v3919_v44  ;;  %v18517_v63 = vld [vmem:[#allocation426_spill] sm:$0xff] }
 0x695   : > { %8486 = vrot.lane.b32.xlu2 %v8485_v18, %s9597_s30  ;;  %v3601_v18 = vmul.f32 %v18511_v9, %v12116_v21 }
 0x696   : > { %8481 = vrot.lane.b32.xlu1 %v8480_v6, %s9595_s23  ;;  %8581 = vrot.lane.b32.xlu0 %v8580_v35, %s9595_s23  ;;  %v3928_v6 = vmul.f32 %v18510_v30, %v18509_v32  ;;  %v8500_v35 = vpack.i.bf16 %v12279_v11, %v18412_v31  ;;  %v18515_v11 = vld [vmem:[#allocation378_spill] sm:$0xff]  ;;  %v3602_v30 = vmul.f32 %v18517_v63, %v12109_v10 }
 0x697   : > { %v13511_v1 = vpop.permute.xlu2 %8321  ;;  %v3290_v31 = vmul.f32 %v18515_v11, %v13361_v19  ;;  %v2961_v11 = vmul.f32 %v18520_v15, %v18465_v24  ;;  %v8625_v24 = vpack.i.bf16 %v18436_v34, %v12364_v38 }
 0x698   : > { %18503 = vst [vmem:[#allocation168_spill] sm:$0xff] %v13511_v1  ;;  %v13515_v43 = vpop.permute.xlu1 %8271  ;;  %v13519_v45 = vpop.permute.xlu0 %8371  ;;  %v8595_v28 = vpack.i.bf16 %v3928_v6, %v3927_v50  ;;  %v18516_v50 = vld [vmem:[#allocation379_spill] sm:$0xff] }
 0x699   : > { %18505 = vst [vmem:[#allocation296_spill] sm:$0xff] %v13515_v43  ;;  %v3289_v44 = vmul.f32 %v18516_v50, %v13378_v46  ;;  %v18521_v50 = vld [vmem:[#allocation316_spill] sm:$0xff] }
 0x69a   : > { %v2962_v1 = vmul.f32 %v18521_v50, %v18469_v22  ;;  %v18523_v22 = vld [vmem:[#allocation28_spill] sm:$0xff]  ;;  %v18530_v50 = vld [vmem:[#allocation433_spill] sm:$0xff] }
 0x69d   : > { %8501 = vrot.lane.b32.xlu2 %v8500_v35, %s9593_s16  ;;  %v18519_v35 = vld [vmem:[#allocation369_spill] sm:$0xff] }
 0x69e   : > { %8496 = vrot.lane.b32.xlu1 %v8495_v33, %s9596_s27  ;;  %8596 = vrot.lane.b32.xlu0 %v8595_v28, %s9596_s27  ;;  %v3281_v33 = vmul.f32 %v18519_v35, %v13041_v5  ;;  %v8515_v28 = vpack.i.bf16 %v3602_v30, %v3601_v18  ;;  %v8530_v18 = vpack.i.bf16 %v2962_v1, %v2961_v11  ;;  %v18525_v30 = vld [vmem:[#allocation443_spill] sm:$0xff] }
 0x69f   : > { %v13532_v41 = vpop.permute.xlu2 %8336  ;;  %v3603_v1 = vmul.f32 %v18525_v30, %v18426_v2  ;;  %v18532_v2 = vld [vmem:[#allocation386_spill] sm:$0xff] }
 0x6a0   : > { %18512 = vst [vmem:[#allocation144_spill] sm:$0xff] %v13532_v41  ;;  %v13536_v12 = vpop.permute.xlu1 %8286  ;;  %v13544_v6 = vpop.permute.xlu0 %8386  ;;  %v8510_v9 = vpack.i.bf16 %v3282_v36, %v3281_v33  ;;  %v8610_v41 = vpack.i.bf16 %v3290_v31, %v3289_v44  ;;  %v8525_v36 = vpack.i.bf16 %v12109_v10, %v12116_v21  ;;  %v18524_v31 = vld [vmem:[#allocation156_spill] sm:$0xff]  ;;  %v18527_v21 = vld [vmem:[#allocation246_spill] sm:$0xff]  ;;  %v3285_v30 = vmul.f32 %v18532_v2, %v13333_v54 }
 0x6a1   : > { %18514 = vst [vmem:[#allocation305_spill] sm:$0xff] %v13536_v12  ;;  %v3612_v10 = vmul.f32 %v18527_v21, %v12367_v13 }
 0x6a2   : > { %18518 = vst [vmem:[#allocation313_spill] sm:$0xff] %v13544_v6 }
 0x6a5   : > { %8516 = vrot.lane.b32.xlu2 %v8515_v28, %s9594_s21  ;;  %v18528_v28 = vld [vmem:[#allocation183_spill] sm:$0xff] }
 0x6a6   : > { %8511 = vrot.lane.b32.xlu1 %v8510_v9, %s9597_s30  ;;  %8611 = vrot.lane.b32.xlu0 %v8610_v41, %s9597_s30  ;;  %v3924_v41 = vmul.f32 %v18524_v31, %v18523_v22  ;;  %v18529_v9 = vld [vmem:[#allocation487_spill] sm:$0xff] }
 0x6a7   : > { %v13555_v63 = vpop.permute.xlu2 %8351  ;;  %v3923_v15 = vmul.f32 %v18529_v9, %v18528_v28  ;;  %v18533_v9 = vld [vmem:[#allocation307_spill] sm:$0xff] }
 0x6a8   : > { %v13557_v12 = vpop.permute.xlu1 %8301  ;;  %v13559_v35 = vpop.permute.xlu0 %8401 }
 0x6a9   : > { %18522 = vst [vmem:[#allocation214_spill] sm:$0xff] %v13557_v12  ;;  %v8545_v31 = vpack.i.bf16 %v3924_v41, %v3923_v15 }
 0x6ad   : > { %8531 = vrot.lane.b32.xlu2 %v8530_v18, %s9595_s23  ;;  %v3604_v18 = vmul.f32 %v18530_v50, %v18425_v42  ;;  %v2963_v42 = vmul.f32 %v18533_v9, %v18528_v28  ;;  %v18534_v50 = vld [vmem:[#allocation309_spill] sm:$0xff]  ;;  %v18540_v28 = vld [vmem:[#allocation106_spill] sm:$0xff] }
 0x6ae   : > { %8526 = vrot.lane.b32.xlu1 %v8525_v36, %s9593_s16  ;;  %8626 = vrot.lane.b32.xlu0 %v8625_v24, %s9593_s16  ;;  %v18531_v36 = vld [vmem:[#allocation435_spill] sm:$0xff]  ;;  %v3925_v9 = vmul.f32 %v18540_v28, %v12875_v8  ;;  %v8575_v8 = vpack.i.bf16 %v18257_v3, %v12322_v27  ;;  %v18547_v3 = vld [vmem:[#allocation388_spill] sm:$0xff] }
 0x6af   : > { %v13570_v44 = vpop.permute.xlu2 %8366  ;;  %v3611_v24 = vmul.f32 %v18531_v36, %v12377_v52  ;;  %v8540_v12 = vpack.i.bf16 %v3604_v18, %v3603_v1  ;;  %v2964_v36 = vmul.f32 %v18534_v50, %v18523_v22  ;;  %v18536_v1 = vld [vmem:[#allocation329_spill] sm:$0xff] }
 0x6b0   : > { %v13574_v33 = vpop.permute.xlu1 %8316  ;;  %v13580_v11 = vpop.permute.xlu0 %8416 }
 0x6b1   : > { %18526 = vst [vmem:[#allocation304_spill] sm:$0xff] %v13574_v33  ;;  %v8640_v43 = vpack.i.bf16 %v3612_v10, %v3611_v24  ;;  %v2971_v10 = vmul.f32 %v18536_v1, %v12928_v49  ;;  %v8555_v2 = vpack.i.bf16 %v2964_v36, %v2963_v42  ;;  %v18541_v1 = vld [vmem:[#allocation230_spill] sm:$0xff]  ;;  %v6517_v36 = vld [vmem:[%s17006_s4 + $0x10] sm:$0x3] }
 0x6b5   : > { %8546 = vrot.lane.b32.xlu2 %v8545_v31, %s9596_s27 }
 0x6b6   : > { %8541 = vrot.lane.b32.xlu1 %v8540_v12, %s9594_s21  ;;  %8641 = vrot.lane.b32.xlu0 %v8640_v43, %s9594_s21  ;;  %v18537_v12 = vld [vmem:[#allocation376_spill] sm:$0xff]  ;;  %v18538_v43 = vld [vmem:[#allocation315_spill] sm:$0xff] }
 0x6b7   : > { %v13591_v21 = vpop.permute.xlu2 %8381  ;;  %v3286_v15 = vmul.f32 %v18537_v12, %v13316_v60  ;;  %v2972_v24 = vmul.f32 %v18538_v43, %v12910_v55  ;;  %v18542_v12 = vld [vmem:[#allocation61_spill] sm:$0xff] }
 0x6b8   : > { %v13597_v41 = vpop.permute.xlu1 %8331  ;;  %v13603_v18 = vpop.permute.xlu0 %8431 }
 0x6b9   : > { %18535 = vst [vmem:[#allocation495_spill] sm:$0xff] %v13597_v41  ;;  %v8560_v31 = vpack.i.bf16 %v3286_v15, %v3285_v30  ;;  %v8655_v33 = vpack.i.bf16 %v2972_v24, %v2971_v10  ;;  %v3933_v41 = vmul.f32 %v18542_v12, %v18541_v1  ;;  %v18543_v30 = vld [vmem:[#allocation490_spill] sm:$0xff]  ;;  %v6531_v15 = vunpack.c.l.b16 %v6517_v36  ;;  %v18546_v12 = vld [vmem:[#allocation436_spill] sm:$0xff] }
 0x6ba   : > { %v3926_v42 = vmul.f32 %v18543_v30, %v18501_v0  ;;  %v18545_v0 = vld [vmem:[#allocation432_spill] sm:$0xff]  ;;  %v3607_v30 = vmul.f32 %v18546_v12, %v18252_v51 }
 0x6bb   : > { %v3608_v28 = vmul.f32 %v18545_v0, %v18256_v37  ;;  %v18548_v36 = vld [vmem:[#allocation332_spill] sm:$0xff] }
 0x6bc   : > { %v8570_v24 = vpack.i.bf16 %v3926_v42, %v3925_v9  ;;  %v7912_v42 = vld [vmem:[%s17006_s4 + $0x8] sm:$0xff] }
 0x6bd   : > { %8561 = vrot.lane.b32.xlu2 %v8560_v31, %s9597_s30  ;;  %v8590_v0 = vpack.i.bf16 %v3608_v28, %v3607_v30  ;;  %v18552_v28 = vld [vmem:[#allocation311_spill] sm:$0xff] }
 0x6be   : > { %8556 = vrot.lane.b32.xlu1 %v8555_v2, %s9595_s23  ;;  %8656 = vrot.lane.b32.xlu0 %v8655_v33, %s9595_s23  ;;  %v18544_v33 = vld [vmem:[#allocation152_spill] sm:$0xff]  ;;  %v6534_v2 = vpack.c.b16 %v6531_v15, %v6531_v15  ;;  %v18549_v15 = vld [vmem:[#allocation375_spill] sm:$0xff]  ;;  %v2967_v30 = vmul.f32 %v18552_v28, %v18506_v61 }
 0x6bf   : > { %v13610_v22 = vpop.permute.xlu2 %8396  ;;  %v3934_v10 = vmul.f32 %v18544_v33, %v12916_v59 }
 0x6c0   : > { %18539 = vst [vmem:[#allocation219_spill] sm:$0xff] %v13610_v22  ;;  %v13614_v50 = vpop.permute.xlu1 %8346  ;;  %v13618_v43 = vpop.permute.xlu0 %8446  ;;  %v6636_v27 = vsel %vm6634_vm2, %v6534_v2, 0  ;;  %v18567_v22 = vld [vmem:[#allocation439_spill] sm:$0xff] }
 0x6c1   : > { %v8670_v31 = vpack.i.bf16 %v3934_v10, %v3933_v41  ;;  %v3288_v41 = vmul.f32 %v18547_v3, %v13111_v40  ;;  %6643 = vmatpush.bf16.msra.mxu1 %v6636_v27  ;;  %7931 = vmatpush.bf16.msrb.mxu3 %v6636_v27  ;;  %v2974_v10 = vmul.f32 %v18548_v36, %v12916_v59  ;;  %v7911_v3 = vld [vmem:[%s17006_s4] sm:$0xff]  ;;  %v18551_v59 = vld [vmem:[#allocation324_spill] sm:$0xff]  ;;  %v8348_v19 = vunpack.i.l.bf16 %v13614_v50 }
 0x6c2   : > { %v2968_v36 = vmul.f32 %v18551_v59, %v18509_v32  ;;  %v18558_v59 = vld [vmem:[#allocation501_spill] sm:$0xff] }
 0x6c5   : > { %8576 = vrot.lane.b32.xlu2 %v8575_v8, %s9593_s16  ;;  %6644 = vmatpush.bf16.msra.mxu1 %v7912_v42 }
 0x6c6   : > { %8571 = vrot.lane.b32.xlu1 %v8570_v24, %s9596_s27  ;;  %8671 = vrot.lane.b32.xlu0 %v8670_v31, %s9596_s27  ;;  %v3287_v24 = vmul.f32 %v18549_v15, %v13094_v4  ;;  %v18550_v31 = vld [vmem:[#allocation317_spill] sm:$0xff] }
 0x6c7   : > { %v13636_v33 = vpop.permute.xlu2 %8411  ;;  %v2973_v2 = vmul.f32 %v18550_v31, %v18541_v1  ;;  %7932 = vmatpush.bf16.msrb.mxu3 %v7912_v42  ;;  %v18554_v42 = vld [vmem:[#allocation155_spill] sm:$0xff]  ;;  %v8605_v31 = vpack.i.bf16 %v2968_v36, %v2967_v30  ;;  %v18559_v36 = vld [vmem:[#allocation449_spill] sm:$0xff] }
 0x6c8   : > { %v13641_v9 = vpop.permute.xlu1 %8361  ;;  %v13648_v8 = vpop.permute.xlu0 %8461  ;;  %v8585_v12 = vpack.i.bf16 %v3288_v41, %v3287_v24  ;;  %v18553_v41 = vld [vmem:[#allocation158_spill] sm:$0xff]  ;;  %v3609_v30 = vmul.f32 %v18559_v36, %v12364_v38  ;;  %v3610_v38 = vmul.f32 %v18567_v22, %v18436_v34  ;;  %v18568_v36 = vld [vmem:[#allocation165_spill] sm:$0xff]  ;;  %v18570_v34 = vld [vmem:[#allocation308_spill] sm:$0xff] }
 0x6c9   : > { %v8685_v27 = vpack.i.bf16 %v2974_v10, %v2973_v2  ;;  %6645 = vmatpush.bf16.msra.mxu1 %v7911_v3  ;;  %v3936_v10 = vmul.f32 %v18554_v42, %v18553_v41  ;;  %v18555_v2 = vld [vmem:[#allocation164_spill] sm:$0xff]  ;;  %v18571_v22 = vld [vmem:[#allocation22_spill] sm:$0xff] }
 0x6ca   : > { %v13711_v46 = vmul.f32 %v18571_v22, %v18570_v34  ;;  %v18576_v34 = vld [vmem:[#allocation241_spill] sm:$0xff]  ;;  %v18577_v22 = vld [vmem:[#allocation382_spill] sm:$0xff] }
 0x6cb   : > { %7933 = vmatpush.bf16.msrb.mxu3 %v7911_v3  ;;  %v18557_v3 = vld [vmem:[#allocation150_spill] sm:$0xff]  ;;  %v3292_v4 = vmul.f32 %v18577_v22, %v18576_v34  ;;  %v18582_v34 = vld [vmem:[#allocation33_spill] sm:$0xff] }
 0x6cc   : > { %v3930_v61 = vmul.f32 %v18558_v59, %v18557_v3 }
 0x6cd   : > { %8591 = vrot.lane.b32.xlu2 %v8590_v0, %s9594_s21  ;;  %v18556_v0 = vld [vmem:[#allocation71_spill] sm:$0xff] }
 0x6ce   : > { %8586 = vrot.lane.b32.xlu1 %v8585_v12, %s9597_s30  ;;  %8686 = vrot.lane.b32.xlu0 %v8685_v27, %s9595_s23  ;;  %v3935_v32 = vmul.f32 %v18556_v0, %v18555_v2  ;;  %v8600_v12 = vpack.i.bf16 %v18256_v37, %v18252_v51  ;;  %v18561_v0 = vld [vmem:[#allocation20_spill] sm:$0xff]  ;;  %v18562_v51 = vld [vmem:[#allocation319_spill] sm:$0xff] }
 0x6cf   : > { %v13662_v15 = vpop.permute.xlu2 %8426  ;;  %v1468_v62 = vmul.f32 0.0, %v18561_v0  ;;  %v2975_v37 = vmul.f32 %v18562_v51, %v18555_v2  ;;  %v8028_v0 = vunpack.i.l.bf16 %v18568_v36  ;;  %v8189_v2 = vunpack.i.h.bf16 %v13290_v14  ;;  %v18569_v51 = vld [vmem:[#allocation19_spill] sm:$0xff] }
 0x6d0   : > { %v13664_v1 = vpop.permute.xlu1 %8376  ;;  %v13670_v24 = vpop.permute.xlu0 %8476  ;;  %v8700_v27 = vpack.i.bf16 %v3936_v10, %v3935_v32  ;;  %v18563_v10 = vld [vmem:[#allocation321_spill] sm:$0xff] }
 0x6d1   : > { %v18564_v32 = vld [vmem:[#allocation161_spill] sm:$0xff] }
 0x6d5   : > { %8606 = vrot.lane.b32.xlu2 %v8605_v31, %s9595_s23  ;;  %v2976_v31 = vmul.f32 %v18563_v10, %v18553_v41  ;;  %v8188_v41 = vunpack.i.l.bf16 %v13290_v14  ;;  %v13705_v10 = vmul.f32 %v18569_v51, %v13240_v58  ;;  %v18574_v58 = vld [vmem:[#allocation237_spill] sm:$0xff]  ;;  %v18575_v51 = vld [vmem:[#allocation390_spill] sm:$0xff] }
 0x6d6   : > { %8601 = vrot.lane.b32.xlu1 %v8600_v12, %s9593_s16  ;;  %8701 = vrot.lane.b32.xlu0 %v8700_v27, %s9596_s27  ;;  %v18565_v12 = vld [vmem:[#allocation493_spill] sm:$0xff]  ;;  %v18566_v27 = vld [vmem:[#allocation23_spill] sm:$0xff] }
 0x6d7   : > { %v13681_v28 = vpop.permute.xlu2 %8441  ;;  %v3929_v59 = vmul.f32 %v18565_v12, %v18564_v32  ;;  %v1469_v23 = vmul.f32 0.0, %v18566_v27  ;;  %v8615_v12 = vpack.i.bf16 %v3610_v38, %v3609_v30  ;;  %v8349_v27 = vunpack.i.h.bf16 %v13614_v50 }
 0x6d8   : > { %v13685_v42 = vpop.permute.xlu1 %8391  ;;  %v13694_v26 = vpop.permute.xlu0 %8491  ;;  %v8715_v14 = vpack.i.bf16 %v2976_v31, %v2975_v37  ;;  %v3291_v30 = vmul.f32 %v18575_v51, %v18574_v58  ;;  %v5962_v50 = vsel %vm5961_vm3, %v1468_v62, %v8028_v0  ;;  %v18578_v37 = vld [vmem:[#allocation512_spill] sm:$0xff]  ;;  %v18579_v31 = vld [vmem:[#allocation497_spill] sm:$0xff]  ;;  %v18585_v51 = vld [vmem:[#allocation335_spill] sm:$0xff] }
 0x6d9   : > { %18560 = vst [vmem:[#allocation107_spill] sm:$0xff] %v13685_v42  ;;  %v8029_v42 = vunpack.i.h.bf16 %v18568_v36  ;;  %v8620_v29 = vpack.i.bf16 %v3930_v61, %v3929_v59  ;;  %v18572_v61 = vld [vmem:[#allocation312_spill] sm:$0xff]  ;;  %v18573_v36 = vld [vmem:[#allocation314_spill] sm:$0xff] }
 0x6da   : > { %v2969_v59 = vmul.f32 %v18572_v61, %v18564_v32  ;;  %v2970_v40 = vmul.f32 %v18573_v36, %v18557_v3  ;;  %v6027_v3 = vsel %vm6026_vm4, %v5962_v50, %v8188_v41 }
 0x6db   : > { %v5963_v38 = vsel %vm5961_vm3, %v1469_v23, %v8029_v42  ;;  %v3937_v23 = vmul.f32 %v18579_v31, %v18578_v37  ;;  %v6092_v42 = vsel %vm6091_vm5, %v6027_v3, %v8348_v19  ;;  %v8635_v31 = vpack.i.bf16 %v3292_v4, %v3291_v30 }
 0x6dc   : > { %v6028_v32 = vsel %vm6026_vm4, %v5963_v38, %v8189_v2  ;;  %v8403_v2 = vunpack.i.l.bf16 %v13559_v35  ;;  %v18581_v38 = vld [vmem:[#allocation115_spill] sm:$0xff]  ;;  %v8630_v22 = vpack.i.bf16 %v2970_v40, %v2969_v59  ;;  %v2977_v40 = vmul.f32 %v18585_v51, %v18578_v37  ;;  %v18589_v51 = vld [vmem:[#allocation218_spill] sm:$0xff] }
 0x6dd   : > { %8621 = vrot.lane.b32.xlu2 %v8620_v29, %s9596_s27  ;;  %v6093_v62 = vsel %vm6091_vm5, %v6028_v32, %v8349_v27  ;;  %v943_v50 = vrot.slane %v18581_v38, 7  ;;  %v18583_v27 = vld [vmem:[#allocation102_spill] sm:$0xff]  ;;  %v8414_v59 = vunpack.i.h.bf16 %v13636_v33  ;;  %v8413_v30 = vunpack.i.l.bf16 %v13636_v33 }
 0x6de   : > { %8616 = vrot.lane.b32.xlu1 %v8615_v12, %s9594_s21  ;;  %8716 = vrot.lane.b32.xlu0 %v8715_v14, %s9595_s23  ;;  %v8404_v12 = vunpack.i.h.bf16 %v13559_v35  ;;  %v18580_v14 = vld [vmem:[#allocation126_spill] sm:$0xff]  ;;  %v3938_v32 = vmul.f32 %v18583_v27, %v18582_v34  ;;  %v6157_v19 = vsel %vm6156_vm6, %v6092_v42, %v8403_v2  ;;  %v18584_v35 = vld [vmem:[#allocation323_spill] sm:$0xff]  ;;  %v18588_v2 = vld [vmem:[#allocation197_spill] sm:$0xff]  ;;  %v8650_v37 = vpack.i.bf16 %v12367_v13, %v12377_v52 }
 0x6df   : > { %v13728_v29 = vpop.permute.xlu2 %8456  ;;  %v2978_v58 = vmul.f32 %v18584_v35, %v18582_v34  ;;  %v18587_v34 = vld [vmem:[#allocation121_spill] sm:$0xff]  ;;  %v8193_v52 = vunpack.i.l.bf16 %v18589_v51 }
 0x6e0   : > { %v8407_v0 = vpop.permute.xlu1 %8406  ;;  %v13736_v61 = vpop.permute.xlu0 %8506  ;;  %v6158_v3 = vsel %vm6156_vm6, %v6093_v62, %v8404_v12  ;;  %v8730_v4 = vpack.i.bf16 %v3938_v32, %v3937_v23  ;;  %v18586_v62 = vld [vmem:[#allocation94_spill] sm:$0xff]  ;;  %v3931_v12 = vmul.f32 %v18587_v34, %v12928_v49  ;;  %v8033_v23 = vunpack.i.l.bf16 %v18588_v2 }
 0x6e1   : > { %v8409_v41 = vunpack.i.h.bf16 %v8407_v0  ;;  %v8408_v36 = vunpack.i.l.bf16 %v8407_v0  ;;  %v3932_v42 = vmul.f32 %v18586_v62, %v12910_v55  ;;  %v8194_v49 = vunpack.i.h.bf16 %v18589_v51 }
 0x6e2   : > { %v8354_v32 = vunpack.i.h.bf16 %v13555_v63 }
 0x6e3   : > { %v6222_v6 = vsel %vm6221_vm7, %v6157_v19, %v8408_v36  ;;  %v6223_v0 = vsel %vm6221_vm7, %v6158_v3, %v8409_v41  ;;  %v8034_v36 = vunpack.i.h.bf16 %v18588_v2  ;;  %v8645_v34 = vpack.i.bf16 %v3932_v42, %v3931_v12 }
 0x6e4   : > { %v6287_v41 = vsel %vm6286_vm8, %v6222_v6, %v8413_v30  ;;  %v6288_v55 = vsel %vm6286_vm8, %v6223_v0, %v8414_v59  ;;  %v8353_v6 = vunpack.i.l.bf16 %v13555_v63  ;;  %v8429_v59 = vunpack.i.h.bf16 %v13662_v15 }
 0x6e5   : > { %8636 = vrot.lane.b32.xlu2 %v8635_v31, %s9597_s30  ;;  %v8419_v31 = vunpack.i.h.bf16 %v13580_v11  ;;  %v5964_v2 = vsel %vm5961_vm3, %v13705_v10, %v8033_v23  ;;  %v5965_v63 = vsel %vm5961_vm3, %v13711_v46, %v8034_v36  ;;  %v18590_v46 = vrot.slane %v18580_v14, 7 }
 0x6e6   : > { %8631 = vrot.lane.b32.xlu1 %v8630_v22, %s9595_s23  ;;  %8731 = vrot.lane.b32.xlu0 %v8730_v4, %s9596_s27  ;;  %v8418_v22 = vunpack.i.l.bf16 %v13580_v11  ;;  %v8428_v11 = vunpack.i.l.bf16 %v13662_v15  ;;  %v18593_v23 = vrot.slane %v12367_v13, 7 }
 0x6e7   : > { %v13763_v33 = vpop.permute.xlu2 %8471  ;;  %v6353_v4 = vsel %vm6351_vm9, %v6288_v55, %v8419_v31  ;;  %v6029_v55 = vsel %vm6026_vm4, %v5964_v2, %v8193_v52  ;;  %v6030_v31 = vsel %vm6026_vm4, %v5965_v63, %v8194_v49  ;;  %v13797_v10 = vsel %vm897_vm1, %v18590_v46, %v943_v50 }
 0x6e8   : > { %v8422_v27 = vpop.permute.xlu1 %8421  ;;  %v13772_v19 = vpop.permute.xlu0 %8521  ;;  %v6352_v0 = vsel %vm6351_vm9, %v6287_v41, %v8418_v22  ;;  %v8745_v41 = vpack.i.bf16 %v2978_v58, %v2977_v40  ;;  %v6094_v15 = vsel %vm6091_vm5, %v6029_v55, %v8353_v6  ;;  %v6095_v22 = vsel %vm6091_vm5, %v6030_v31, %v8354_v32  ;;  %v18591_v58 = vld [vmem:[#allocation442_spill] sm:$0xff]  ;;  %v18600_v55 = vld [vmem:[#allocation500_spill] sm:$0xff] }
 0x6e9   : > { %v8424_v3 = vunpack.i.h.bf16 %v8422_v27  ;;  %v8423_v35 = vunpack.i.l.bf16 %v8422_v27  ;;  %v3613_v40 = vmul.f32 %v18591_v58, %v18580_v14  ;;  %v6159_v42 = vsel %vm6156_vm6, %v6094_v15, %v8428_v11  ;;  %v18594_v27 = vld [vmem:[#allocation191_spill] sm:$0xff]  ;;  %v18595_v6 = vld [vmem:[#allocation438_spill] sm:$0xff] }
 0x6ea   : > { %v6160_v12 = vsel %vm6156_vm6, %v6095_v22, %v8429_v59  ;;  %v3294_v52 = vmul.f32 %v18594_v27, %v13797_v10  ;;  %v8434_v32 = vunpack.i.h.bf16 %v13603_v18  ;;  %v18597_v59 = vld [vmem:[#allocation118_spill] sm:$0xff]  ;;  %v8444_v58 = vunpack.i.h.bf16 %v13681_v28  ;;  %v18601_v27 = vld [vmem:[#allocation300_spill] sm:$0xff] }
 0x6eb   : > { %v6417_v30 = vsel %vm6416_vm10, %v6352_v0, %v8423_v35  ;;  %v6418_v62 = vsel %vm6416_vm10, %v6353_v4, %v8424_v3  ;;  %v8433_v3 = vunpack.i.l.bf16 %v13603_v18  ;;  %v3614_v0 = vmul.f32 %v18595_v6, %v18581_v38  ;;  %v18596_v4 = vld [vmem:[#allocation236_spill] sm:$0xff] }
 0x6ec   : > { %v6481_v51 = vpack.c.bf16 %v6418_v62, %v6417_v30  ;;  %v3939_v11 = vmul.f32 %v18597_v59, %v18596_v4  ;;  %v18599_v18 = vld [vmem:[#allocation232_spill] sm:$0xff]  ;;  %v8449_v59 = vunpack.i.h.bf16 %v13618_v43 }
 0x6ed   : > { %8651 = vrot.lane.b32.xlu2 %v8650_v37, %s9593_s16  ;;  %v18592_v37 = vmov %v18590_v46  ;;  %v6224_v63 = vsel %vm6221_vm7, %v6159_v42, %v8433_v3  ;;  %v3940_v31 = vmul.f32 %v18600_v55, %v18599_v18  ;;  %v18602_v42 = vld [vmem:[#allocation15_spill] sm:$0xff] }
 0x6ee   : > { %8646 = vrot.lane.b32.xlu1 %v8645_v34, %s9596_s27  ;;  %7797 = vmatmul.msk.bf16.vlgmr.msra.gmra.mxu1 %vm6537_vm11, %v6481_v51  ;;  %v13811_v49 = vsel %vm897_vm1, %v18593_v23, %v18592_v37  ;;  %v18598_v34 = vld [vmem:[#allocation381_spill] sm:$0xff]  ;;  %v6225_v51 = vsel %vm6221_vm7, %v6160_v12, %v8434_v32  ;;  %v8443_v37 = vunpack.i.l.bf16 %v13681_v28  ;;  %v1472_v3 = vmul.f32 %v18602_v42, %v18601_v27  ;;  %v18603_v32 = vld [vmem:[#allocation240_spill] sm:$0xff] }
 0x6ef   : > { %8746 = vrot.lane.b32.xlu0 %v8745_v41, %s9595_s23  ;;  %v13804_v36 = vpop.permute.xlu2 %8486  ;;  %v3293_v2 = vmul.f32 %v18598_v34, %v13811_v49  ;;  %v8665_v41 = vpack.i.bf16 %v3614_v0, %v3613_v40  ;;  %v8760_v23 = vpack.i.bf16 %v3940_v31, %v3939_v11  ;;  %v8448_v28 = vunpack.i.l.bf16 %v13618_v43  ;;  %v18607_v34 = vld [vmem:[#allocation338_spill] sm:$0xff] }
 0x6f0   : > { %v8437_v35 = vpop.permute.xlu1 %8436  ;;  %v13821_v30 = vpop.permute.xlu0 %8536  ;;  %v8199_v31 = vunpack.i.h.bf16 %v13416_v53  ;;  %v8359_v27 = vunpack.i.h.bf16 %v13504_v48  ;;  %v8358_v42 = vunpack.i.l.bf16 %v13504_v48 }
 0x6f1   : > { %v8439_v13 = vunpack.i.h.bf16 %v8437_v35  ;;  %v8438_v62 = vunpack.i.l.bf16 %v8437_v35  ;;  %v8660_v46 = vpack.i.bf16 %v3294_v52, %v3293_v2  ;;  %v18604_v35 = vld [vmem:[#allocation16_spill] sm:$0xff]  ;;  %v18605_v52 = vld [vmem:[#allocation137_spill] sm:$0xff]  ;;  %v2980_v2 = vmul.f32 %v18607_v34, %v18599_v18 }
 0x6f2   : > { %v1473_v6 = vmul.f32 %v18604_v35, %v18603_v32  ;;  %v945_v0 = vrot.slane %v18605_v52, 7  ;;  %v18611_v32 = vld [vmem:[#allocation325_spill] sm:$0xff]  ;;  %v8680_v34 = vpack.i.bf16 %v18581_v38, %v18580_v14 }
 0x6f3   : > { %v6289_v15 = vsel %vm6286_vm8, %v6224_v63, %v8438_v62  ;;  %v6290_v22 = vsel %vm6286_vm8, %v6225_v51, %v8439_v13  ;;  %v18606_v13 = vld [vmem:[#allocation263_spill] sm:$0xff]  ;;  %v18608_v63 = vld [vmem:[#allocation34_spill] sm:$0xff]  ;;  %v2979_v35 = vmul.f32 %v18611_v32, %v18596_v4  ;;  %v18615_v38 = vld [vmem:[#allocation385_spill] sm:$0xff] }
 0x6f4   : > { %v6354_v40 = vsel %vm6351_vm9, %v6289_v15, %v8443_v37  ;;  %v6355_v12 = vsel %vm6351_vm9, %v6290_v22, %v8444_v58  ;;  %v2648_v62 = vmul.f32 %v18606_v13, %v13811_v49  ;;  %v8039_v51 = vunpack.i.h.bf16 %v18608_v63  ;;  %v18609_v58 = vld [vmem:[#allocation253_spill] sm:$0xff]  ;;  %v18619_v32 = vld [vmem:[#allocation114_spill] sm:$0xff] }
 0x6f5   : > { %8666 = vrot.lane.b32.xlu2 %v8665_v41, %s9594_s21  ;;  %v8038_v41 = vunpack.i.l.bf16 %v18608_v63  ;;  %v8198_v15 = vunpack.i.l.bf16 %v13416_v53  ;;  %v6419_v22 = vsel %vm6416_vm10, %v6354_v40, %v8448_v28  ;;  %v2649_v37 = vmul.f32 %v18609_v58, %v13797_v10 }
 0x6f6   : > { %8661 = vrot.lane.b32.xlu1 %v8660_v46, %s9597_s30  ;;  %v6420_v46 = vsel %vm6416_vm10, %v6355_v12, %v8449_v59  ;;  %v5967_v59 = vsel %vm5961_vm3, %v1473_v6, %v8039_v51  ;;  %v8775_v63 = vpack.i.bf16 %v2980_v2, %v2979_v35  ;;  %v13880_v14 = vsel %vm897_vm1, %v943_v50, %v945_v0 }
 0x6f7   : > { %8761 = vrot.lane.b32.xlu0 %v8760_v23, %s9596_s27  ;;  %v13845_v11 = vpop.permute.xlu2 %8501  ;;  %v18610_v23 = vld [vmem:[#allocation124_spill] sm:$0xff]  ;;  %v8675_v40 = vpack.i.bf16 %v2649_v37, %v2648_v62  ;;  %v5966_v12 = vsel %vm5961_vm3, %v1472_v3, %v8038_v41  ;;  %v6482_v28 = vpack.c.bf16 %v6420_v46, %v6419_v22  ;;  %v6032_v58 = vsel %vm6026_vm4, %v5967_v59, %v8199_v31  ;;  %v18612_v3 = vld [vmem:[#allocation453_spill] sm:$0xff]  ;;  %v18621_v59 = vld [vmem:[#allocation127_spill] sm:$0xff] }
 0x6f8   : > { %v8452_v55 = vpop.permute.xlu1 %8451  ;;  %v13855_v43 = vpop.permute.xlu0 %8551  ;;  %v6031_v18 = vsel %vm6026_vm4, %v5966_v12, %v8198_v15  ;;  %v6097_v4 = vsel %vm6091_vm5, %v6032_v58, %v8359_v27  ;;  %v3615_v6 = vmul.f32 %v18612_v3, %v18605_v52  ;;  %v18613_v41 = vrot.slane %v18610_v23, 7  ;;  %v18616_v46 = vld [vmem:[#allocation384_spill] sm:$0xff] }
 0x6f9   : > { %v8454_v13 = vunpack.i.h.bf16 %v8452_v55  ;;  %v8453_v53 = vunpack.i.l.bf16 %v8452_v55  ;;  %v6096_v48 = vsel %vm6091_vm5, %v6031_v18, %v8358_v42  ;;  %v3295_v50 = vmul.f32 %v18615_v38, %v13880_v14  ;;  %v18617_v18 = vld [vmem:[#allocation445_spill] sm:$0xff]  ;;  %v18618_v42 = vld [vmem:[#allocation194_spill] sm:$0xff] }
 0x6fa   : > { %v13892_v55 = vsel %vm897_vm1, %v945_v0, %v18613_v41  ;;  %v8459_v31 = vunpack.i.h.bf16 %v13728_v29  ;;  %v8458_v15 = vunpack.i.l.bf16 %v13728_v29  ;;  %v3616_v27 = vmul.f32 %v18617_v18, %v18610_v23  ;;  %v18620_v29 = vld [vmem:[#allocation169_spill] sm:$0xff] }
 0x6fb   : > { %v6162_v62 = vsel %vm6156_vm6, %v6097_v4, %v8454_v13  ;;  %v6161_v2 = vsel %vm6156_vm6, %v6096_v48, %v8453_v53  ;;  %18614 = vst [vmem:[#allocation486_spill] sm:$0xff] %v13892_v55  ;;  %v3296_v37 = vmul.f32 %v18616_v46, %v13892_v55  ;;  %v3942_v35 = vmul.f32 %v18619_v32, %v18618_v42 }
 0x6fc   : > { %v6227_v0 = vsel %vm6221_vm7, %v6162_v62, %v8459_v31  ;;  %v6226_v53 = vsel %vm6221_vm7, %v6161_v2, %v8458_v15  ;;  %v8695_v12 = vpack.i.bf16 %v3616_v27, %v3615_v6  ;;  %v8463_v58 = vunpack.i.l.bf16 %v13648_v8  ;;  %v18623_v15 = vld [vmem:[#allocation266_spill] sm:$0xff] }
 0x6fd   : > { %8681 = vrot.lane.b32.xlu2 %v8680_v34, %s9593_s16  ;;  %v8690_v48 = vpack.i.bf16 %v3296_v37, %v3295_v50  ;;  %v8474_v41 = vunpack.i.h.bf16 %v13763_v33  ;;  %v8473_v38 = vunpack.i.l.bf16 %v13763_v33  ;;  %v18622_v50 = vld [vmem:[#allocation26_spill] sm:$0xff]  ;;  %v18624_v37 = vld [vmem:[#allocation328_spill] sm:$0xff] }
 0x6fe   : > { %8676 = vrot.lane.b32.xlu1 %v8675_v40, %s9592_s29  ;;  %7798 = vmatmul.msk.bf16.gmra.mxu1 %vm6537_vm11, %v6482_v28  ;;  %v3941_v28 = vmul.f32 %v18621_v59, %v18620_v29  ;;  %v6291_v3 = vsel %vm6286_vm8, %v6226_v53, %v8463_v58  ;;  %v1474_v31 = vmul.f32 %v18622_v50, %v12988_v17  ;;  %v18625_v27 = vld [vmem:[#allocation330_spill] sm:$0xff]  ;;  %v18626_v53 = vld [vmem:[#allocation25_spill] sm:$0xff]  ;;  %v8479_v50 = vunpack.i.h.bf16 %v13670_v24 }
 0x6ff   : > { %8776 = vrot.lane.b32.xlu0 %v8775_v63, %s9595_s23  ;;  %v13887_v51 = vpop.permute.xlu2 %8516  ;;  %v8464_v63 = vunpack.i.h.bf16 %v13648_v8  ;;  %v2981_v18 = vmul.f32 %v18624_v37, %v18620_v29  ;;  %v2982_v32 = vmul.f32 %v18625_v27, %v18618_v42  ;;  %v18627_v17 = vld [vmem:[#allocation258_spill] sm:$0xff]  ;;  %v18629_v29 = vld [vmem:[#allocation148_spill] sm:$0xff] }
 0x700   : > { %v8467_v22 = vpop.permute.xlu1 %8466  ;;  %v13904_v13 = vpop.permute.xlu0 %8566  ;;  %v8790_v4 = vpack.i.bf16 %v3942_v35, %v3941_v28  ;;  %v18630_v58 = vld [vmem:[#allocation166_spill] sm:$0xff] }
 0x701   : > { %v8469_v34 = vunpack.i.h.bf16 %v8467_v22  ;;  %v8468_v40 = vunpack.i.l.bf16 %v8467_v22  ;;  %v6292_v62 = vsel %vm6286_vm8, %v6227_v0, %v8464_v63  ;;  %v2651_v22 = vmul.f32 %v18623_v15, %v13892_v55 }
 0x702   : > { %v949_v63 = vrot.slane %v18629_v29, 7  ;;  %v8204_v42 = vunpack.i.h.bf16 %v18630_v58  ;;  %v8478_v15 = vunpack.i.l.bf16 %v13670_v24 }
 0x703   : > { %v6356_v2 = vsel %vm6351_vm9, %v6291_v3, %v8468_v40  ;;  %v6357_v6 = vsel %vm6351_vm9, %v6292_v62, %v8469_v34  ;;  %v1475_v34 = vmul.f32 %v18626_v53, %v13005_v57  ;;  %v2650_v40 = vmul.f32 %v18627_v17, %v13880_v14  ;;  %v18637_v17 = vld [vmem:[#allocation57_spill] sm:$0xff] }
 0x704   : > { %v6421_v33 = vsel %vm6416_vm10, %v6356_v2, %v8473_v38  ;;  %v6422_v0 = vsel %vm6416_vm10, %v6357_v6, %v8474_v41  ;;  %v8364_v62 = vunpack.i.h.bf16 %v13641_v9  ;;  %v8363_v57 = vunpack.i.l.bf16 %v13641_v9  ;;  %v18631_v6 = vld [vmem:[#allocation133_spill] sm:$0xff] }
 0x705   : > { %8696 = vrot.lane.b32.xlu2 %v8695_v12, %s9594_s21  ;;  %v18628_v12 = vld [vmem:[#allocation170_spill] sm:$0xff]  ;;  %v8705_v3 = vpack.i.bf16 %v2651_v22, %v2650_v40  ;;  %v6483_v2 = vpack.c.bf16 %v6422_v0, %v6421_v33  ;;  %v17369_v41 = vrot.slane %v18631_v6, 7  ;;  %v8805_v38 = vpack.i.bf16 %v2982_v32, %v2981_v18  ;;  %v18634_v32 = vld [vmem:[#allocation456_spill] sm:$0xff] }
 0x706   : > { %8691 = vrot.lane.b32.xlu1 %v8690_v48, %s9597_s30  ;;  %v8044_v59 = vunpack.i.h.bf16 %v18628_v12  ;;  %v8043_v28 = vunpack.i.l.bf16 %v18628_v12  ;;  %v8203_v48 = vunpack.i.l.bf16 %v18630_v58  ;;  %v18632_v9 = vrot.slane %v18610_v23, 7  ;;  %v18639_v58 = vld [vmem:[#allocation441_spill] sm:$0xff] }
 0x707   : > { %8791 = vrot.lane.b32.xlu0 %v8790_v4, %s9596_s27  ;;  %v13921_v8 = vpop.permute.xlu2 %8531  ;;  %v8710_v4 = vpack.i.bf16 %v18610_v23, %v18605_v52  ;;  %v3618_v24 = vmul.f32 %v18634_v32, %v18631_v6  ;;  %v8489_v32 = vunpack.i.h.bf16 %v13804_v36 }
 0x708   : > { %v8482_v46 = vpop.permute.xlu1 %8481  ;;  %v13931_v35 = vpop.permute.xlu0 %8581  ;;  %v5968_v37 = vsel %vm5961_vm3, %v1474_v31, %v8043_v28  ;;  %v5969_v27 = vsel %vm5961_vm3, %v1475_v34, %v8044_v59  ;;  %v13959_v18 = vsel %vm897_vm1, %v18632_v9, %v949_v63  ;;  %v18636_v34 = vld [vmem:[#allocation513_spill] sm:$0xff]  ;;  %v13977_v28 = vsel %vm897_vm1, %v949_v63, %v17369_v41 }
 0x709   : > { %v8484_v52 = vunpack.i.h.bf16 %v8482_v46  ;;  %v8483_v22 = vunpack.i.l.bf16 %v8482_v46  ;;  %18633 = vst [vmem:[#allocation509_spill] sm:$0xff] %v13959_v18  ;;  %v6034_v33 = vsel %vm6026_vm4, %v5969_v27, %v8204_v42  ;;  %v6033_v31 = vsel %vm6026_vm4, %v5968_v37, %v8203_v48  ;;  %v18635_v46 = vld [vmem:[#allocation394_spill] sm:$0xff] }
 0x70a   : > { %v3297_v53 = vmul.f32 %v18635_v46, %v13959_v18  ;;  %v3943_v23 = vmul.f32 %v18637_v17, %v18636_v34  ;;  %v6099_v40 = vsel %vm6091_vm5, %v6034_v33, %v8364_v62  ;;  %v6098_v12 = vsel %vm6091_vm5, %v6033_v31, %v8363_v57  ;;  %18638 = vst [vmem:[#allocation494_spill] sm:$0xff] %v13977_v28  ;;  %v18642_v57 = vld [vmem:[#allocation132_spill] sm:$0xff] }
 0x70b   : > { %v3617_v42 = vmul.f32 %v18639_v58, %v18629_v29  ;;  %v6163_v48 = vsel %vm6156_vm6, %v6098_v12, %v8478_v15  ;;  %v8488_v33 = vunpack.i.l.bf16 %v13804_v36  ;;  %v18643_v12 = vld [vmem:[#allocation231_spill] sm:$0xff]  ;;  %v18644_v58 = vld [vmem:[#allocation17_spill] sm:$0xff]  ;;  %v18645_v36 = vld [vmem:[#allocation76_spill] sm:$0xff] }
 0x70c   : > { %v6228_v27 = vsel %vm6221_vm7, %v6163_v48, %v8483_v22  ;;  %v1476_v22 = vmul.f32 %v18644_v58, %v18643_v12  ;;  %v18648_v48 = vld [vmem:[#allocation261_spill] sm:$0xff] }
 0x70d   : > { %8711 = vrot.lane.b32.xlu2 %v8710_v4, %s9593_s16  ;;  %v6164_v4 = vsel %vm6156_vm6, %v6099_v40, %v8479_v50  ;;  %v8725_v9 = vpack.i.bf16 %v3618_v24, %v3617_v42  ;;  %v6293_v17 = vsel %vm6286_vm8, %v6228_v27, %v8488_v33  ;;  %v8493_v24 = vunpack.i.l.bf16 %v13694_v26  ;;  %v18647_v42 = vld [vmem:[#allocation123_spill] sm:$0xff]  ;;  %v18651_v33 = vld [vmem:[#allocation224_spill] sm:$0xff] }
 0x70e   : > { %8706 = vrot.lane.b32.xlu1 %v8705_v3, %s9592_s29  ;;  %7799 = vmatmul.msk.bf16.gmra.mxu1 %vm6537_vm11, %v6483_v2  ;;  %v18640_v2 = vld [vmem:[#allocation318_spill] sm:$0xff]  ;;  %v6229_v63 = vsel %vm6221_vm7, %v6164_v4, %v8484_v52  ;;  %v8494_v52 = vunpack.i.h.bf16 %v13694_v26  ;;  %v2653_v4 = vmul.f32 %v18648_v48, %v13977_v28  ;;  %v8208_v12 = vunpack.i.l.bf16 %v18651_v33  ;;  %v18653_v48 = vld [vmem:[#allocation496_spill] sm:$0xff] }
 0x70f   : > { %8806 = vrot.lane.b32.xlu0 %v8805_v38, %s9595_s23  ;;  %v13966_v0 = vpop.permute.xlu2 %8546  ;;  %v3298_v62 = vmul.f32 %v18640_v2, %v13977_v28  ;;  %v18641_v38 = vld [vmem:[#allocation46_spill] sm:$0xff]  ;;  %v6294_v40 = vsel %vm6286_vm8, %v6229_v63, %v8489_v32  ;;  %v18649_v2 = vld [vmem:[#allocation341_spill] sm:$0xff] }
 0x710   : > { %v8497_v59 = vpop.permute.xlu1 %8496  ;;  %v13983_v3 = vpop.permute.xlu0 %8596  ;;  %v3944_v37 = vmul.f32 %v18642_v57, %v18641_v38  ;;  %v6359_v32 = vsel %vm6351_vm9, %v6294_v40, %v8494_v52  ;;  %v18654_v40 = vld [vmem:[#allocation331_spill] sm:$0xff] }
 0x711   : > { %v8720_v15 = vpack.i.bf16 %v3298_v62, %v3297_v53  ;;  %v8499_v50 = vunpack.i.h.bf16 %v8497_v59  ;;  %v8498_v46 = vunpack.i.l.bf16 %v8497_v59  ;;  %v18646_v53 = vld [vmem:[#allocation31_spill] sm:$0xff]  ;;  %v17370_v59 = vrot.slane %v18647_v42, 7 }
 0x712   : > { %v8820_v31 = vpack.i.bf16 %v3944_v37, %v3943_v23  ;;  %v1477_v23 = vmul.f32 %v18646_v53, %v18645_v36  ;;  %v2983_v62 = vmul.f32 %v18649_v2, %v18636_v34  ;;  %v18650_v37 = vld [vmem:[#allocation205_spill] sm:$0xff]  ;;  %v18652_v36 = vld [vmem:[#allocation256_spill] sm:$0xff]  ;;  %v953_v2 = vrot.slane %v18653_v48, 7 }
 0x713   : > { %v8049_v27 = vunpack.i.h.bf16 %v18650_v37  ;;  %v8048_v26 = vunpack.i.l.bf16 %v18650_v37  ;;  %v2652_v53 = vmul.f32 %v18652_v36, %v13959_v18  ;;  %v8369_v37 = vunpack.i.h.bf16 %v13570_v44 }
 0x714   : > { %v2984_v52 = vmul.f32 %v18654_v40, %v18641_v38 }
 0x715   : > { %8726 = vrot.lane.b32.xlu2 %v8725_v9, %s9594_s21  ;;  %v6358_v9 = vsel %vm6351_vm9, %v6293_v17, %v8493_v24  ;;  %v8368_v17 = vunpack.i.l.bf16 %v13570_v44  ;;  %v8504_v24 = vunpack.i.h.bf16 %v13845_v11  ;;  %v14037_v44 = vsel %vm897_vm1, %v953_v2, %v17370_v59 }
 0x716   : > { %8721 = vrot.lane.b32.xlu1 %v8720_v15, %s9597_s30  ;;  %v8209_v15 = vunpack.i.h.bf16 %v18651_v33  ;;  %v6423_v34 = vsel %vm6416_vm10, %v6358_v9, %v8498_v46  ;;  %v8503_v33 = vunpack.i.l.bf16 %v13845_v11  ;;  %v8740_v46 = vpack.i.bf16 %v18631_v6, %v18629_v29  ;;  %18655 = vst [vmem:[#allocation434_spill] sm:$0xff] %v14037_v44  ;;  %v18656_v11 = vld [vmem:[#allocation448_spill] sm:$0xff] }
 0x717   : > { %8821 = vrot.lane.b32.xlu0 %v8820_v31, %s9596_s27  ;;  %v14009_v57 = vpop.permute.xlu2 %8561  ;;  %v6424_v31 = vsel %vm6416_vm10, %v6359_v32, %v8499_v50  ;;  %v8735_v50 = vpack.i.bf16 %v2653_v4, %v2652_v53  ;;  %v5971_v9 = vsel %vm5961_vm3, %v1477_v23, %v8049_v27  ;;  %v5970_v32 = vsel %vm5961_vm3, %v1476_v22, %v8048_v26 }
 0x718   : > { %v8512_v63 = vpop.permute.xlu1 %8511  ;;  %v14017_v58 = vpop.permute.xlu0 %8611  ;;  %v6484_v36 = vpack.c.bf16 %v6424_v31, %v6423_v34  ;;  %v8835_v41 = vpack.i.bf16 %v2984_v52, %v2983_v62  ;;  %v6035_v38 = vsel %vm6026_vm4, %v5970_v32, %v8208_v12  ;;  %v6036_v40 = vsel %vm6026_vm4, %v5971_v9, %v8209_v15  ;;  %v18657_v12 = vld [vmem:[#allocation396_spill] sm:$0xff]  ;;  %v18663_v9 = vld [vmem:[#allocation387_spill] sm:$0xff] }
 0x719   : > { %v3619_v29 = vmul.f32 %v18656_v11, %v18653_v48  ;;  %v6100_v23 = vsel %vm6091_vm5, %v6035_v38, %v8368_v17  ;;  %v6101_v22 = vsel %vm6091_vm5, %v6036_v40, %v8369_v37  ;;  %v8514_v27 = vunpack.i.h.bf16 %v8512_v63  ;;  %v18665_v40 = vld [vmem:[#allocation95_spill] sm:$0xff] }
 0x71a   : > { %v6165_v4 = vsel %vm6156_vm6, %v6100_v23, %v8503_v33  ;;  %v6166_v62 = vsel %vm6156_vm6, %v6101_v22, %v8504_v24  ;;  %v8513_v26 = vunpack.i.l.bf16 %v8512_v63  ;;  %v3300_v34 = vmul.f32 %v18657_v12, %v14037_v44  ;;  %v18660_v24 = vld [vmem:[#allocation444_spill] sm:$0xff] }
 0x71b   : > { %v8509_v31 = vunpack.i.h.bf16 %v13736_v61  ;;  %v8508_v53 = vunpack.i.l.bf16 %v13736_v61  ;;  %v18658_v17 = vrot.slane %v18631_v6, 7  ;;  %v3620_v63 = vmul.f32 %v18660_v24, %v18647_v42  ;;  %v18661_v33 = vld [vmem:[#allocation244_spill] sm:$0xff]  ;;  %v18664_v6 = vld [vmem:[#allocation234_spill] sm:$0xff] }
 0x71c   : > { %v8519_v12 = vunpack.i.h.bf16 %v13887_v51 }
 0x71d   : > { %8741 = vrot.lane.b32.xlu2 %v8740_v46, %s9593_s16  ;;  %v14060_v52 = vsel %vm897_vm1, %v18658_v17, %v953_v2  ;;  %v6231_v61 = vsel %vm6221_vm7, %v6166_v62, %v8509_v31  ;;  %v8755_v38 = vpack.i.bf16 %v3620_v63, %v3619_v29  ;;  %v3946_v2 = vmul.f32 %v18665_v40, %v18664_v6 }
 0x71e   : > { %8736 = vrot.lane.b32.xlu1 %v8735_v50, %s9592_s29  ;;  %7800 = vmatmul.msk.bf16.gmra.mxu1 %vm6537_vm11, %v6484_v36  ;;  %18659 = vst [vmem:[#allocation377_spill] sm:$0xff] %v14060_v52  ;;  %v3299_v32 = vmul.f32 %v18663_v9, %v14060_v52  ;;  %v6230_v36 = vsel %vm6221_vm7, %v6165_v4, %v8508_v53  ;;  %v8518_v17 = vunpack.i.l.bf16 %v13887_v51  ;;  %v18666_v4 = vld [vmem:[#allocation30_spill] sm:$0xff]  ;;  %v8524_v63 = vunpack.i.h.bf16 %v13772_v19  ;;  %v18670_v9 = vld [vmem:[#allocation344_spill] sm:$0xff] }
 0x71f   : > { %8836 = vrot.lane.b32.xlu0 %v8835_v41, %s9595_s23  ;;  %v14051_v15 = vpop.permute.xlu2 %8576  ;;  %v18662_v41 = vld [vmem:[#allocation157_spill] sm:$0xff]  ;;  %v6296_v11 = vsel %vm6286_vm8, %v6231_v61, %v8514_v27  ;;  %v6295_v23 = vsel %vm6286_vm8, %v6230_v36, %v8513_v26  ;;  %v1478_v53 = vmul.f32 %v18666_v4, %v13293_v20  ;;  %v18667_v27 = vld [vmem:[#allocation18_spill] sm:$0xff]  ;;  %v8523_v51 = vunpack.i.l.bf16 %v13772_v19  ;;  %v18671_v36 = vld [vmem:[#allocation220_spill] sm:$0xff] }
 0x720   : > { %v8527_v37 = vpop.permute.xlu1 %8526  ;;  %v3945_v46 = vmul.f32 %v18662_v41, %v18661_v33  ;;  %v14066_v50 = vpop.permute.xlu0 %8626  ;;  %v8750_v22 = vpack.i.bf16 %v3300_v34, %v3299_v32  ;;  %v6360_v29 = vsel %vm6351_vm9, %v6295_v23, %v8518_v17  ;;  %v6361_v62 = vsel %vm6351_vm9, %v6296_v11, %v8519_v12  ;;  %v18668_v34 = vld [vmem:[#allocation173_spill] sm:$0xff]  ;;  %v18673_v17 = vld [vmem:[#allocation119_spill] sm:$0xff] }
 0x721   : > { %v1479_v26 = vmul.f32 %v18667_v27, %v13276_v16  ;;  %v957_v31 = vrot.slane %v18668_v34, 7  ;;  %v18669_v20 = vld [vmem:[#allocation269_spill] sm:$0xff]  ;;  %v2986_v32 = vmul.f32 %v18670_v9, %v18664_v6  ;;  %v8054_v61 = vunpack.i.h.bf16 %v18671_v36 }
 0x722   : > { %v8850_v24 = vpack.i.bf16 %v3946_v2, %v3945_v46  ;;  %v2654_v46 = vmul.f32 %v18669_v20, %v14060_v52  ;;  %v8053_v16 = vunpack.i.l.bf16 %v18671_v36  ;;  %v8214_v40 = vunpack.i.h.bf16 %v13437_v56  ;;  %v18674_v27 = vld [vmem:[#allocation333_spill] sm:$0xff]  ;;  %v18752_v52 = vld [vmem:[#allocation280_spill] sm:$0xff] }
 0x723   : > { %v8213_v2 = vunpack.i.l.bf16 %v13437_v56  ;;  %v6425_v11 = vsel %vm6416_vm10, %v6360_v29, %v8523_v51  ;;  %v6426_v23 = vsel %vm6416_vm10, %v6361_v62, %v8524_v63  ;;  %v8373_v4 = vunpack.i.l.bf16 %v13519_v45 }
 0x724   : > { %v2985_v20 = vmul.f32 %v18674_v27, %v18661_v33  ;;  %v8529_v9 = vunpack.i.h.bf16 %v8527_v37  ;;  %v8528_v56 = vunpack.i.l.bf16 %v8527_v37  ;;  %v8770_v36 = vpack.i.bf16 %v18647_v42, %v18653_v48  ;;  %v18683_v27 = vld [vmem:[#allocation160_spill] sm:$0xff] }
 0x725   : > { %8756 = vrot.lane.b32.xlu2 %v8755_v38, %s9594_s21  ;;  %v5973_v62 = vsel %vm5961_vm3, %v1479_v26, %v8054_v61  ;;  %v5972_v63 = vsel %vm5961_vm3, %v1478_v53, %v8053_v16  ;;  %v6485_v51 = vpack.c.bf16 %v6426_v23, %v6425_v11  ;;  %v18675_v48 = vrot.slane %v18647_v42, 7  ;;  %v18677_v53 = vld [vmem:[#allocation459_spill] sm:$0xff]  ;;  %v18680_v42 = vld [vmem:[#allocation322_spill] sm:$0xff] }
 0x726   : > { %8751 = vrot.lane.b32.xlu1 %v8750_v22, %s9597_s30  ;;  %v18672_v22 = vld [vmem:[#allocation259_spill] sm:$0xff]  ;;  %v6038_v6 = vsel %vm6026_vm4, %v5973_v62, %v8214_v40  ;;  %v6037_v59 = vsel %vm6026_vm4, %v5972_v63, %v8213_v2  ;;  %v3621_v26 = vmul.f32 %v18677_v53, %v18668_v34  ;;  %v18678_v61 = vrot.slane %v18673_v17, 7 }
 0x727   : > { %8851 = vrot.lane.b32.xlu0 %v8850_v24, %s9596_s27  ;;  %v14090_v41 = vpop.permute.xlu2 %8591  ;;  %v2655_v12 = vmul.f32 %v18672_v22, %v14037_v44  ;;  %v8374_v24 = vunpack.i.h.bf16 %v13519_v45  ;;  %v8865_v22 = vpack.i.bf16 %v2986_v32, %v2985_v20  ;;  %v6102_v45 = vsel %vm6091_vm5, %v6037_v59, %v8373_v4  ;;  %v18684_v20 = vld [vmem:[#allocation182_spill] sm:$0xff]  ;;  %v18685_v63 = vld [vmem:[#allocation179_spill] sm:$0xff] }
 0x728   : > { %v8542_v38 = vpop.permute.xlu1 %8541  ;;  %v14100_v19 = vpop.permute.xlu0 %8641  ;;  %v14125_v33 = vsel %vm897_vm1, %v18675_v48, %v957_v31  ;;  %v6167_v32 = vsel %vm6156_vm6, %v6102_v45, %v8528_v56  ;;  %v14137_v16 = vsel %vm897_vm1, %v957_v31, %v18678_v61  ;;  %v8534_v2 = vunpack.i.h.bf16 %v13921_v8 }
 0x729   : > { %v8765_v29 = vpack.i.bf16 %v2655_v12, %v2654_v46  ;;  %v6103_v37 = vsel %vm6091_vm5, %v6038_v6, %v8374_v24  ;;  %18676 = vst [vmem:[#allocation372_spill] sm:$0xff] %v14125_v33  ;;  %v3301_v40 = vmul.f32 %v18680_v42, %v14125_v33  ;;  %v8533_v11 = vunpack.i.l.bf16 %v13921_v8  ;;  %v18681_v12 = vld [vmem:[#allocation389_spill] sm:$0xff]  ;;  %v18682_v24 = vld [vmem:[#allocation327_spill] sm:$0xff] }
 0x72a   : > { %v6168_v46 = vsel %vm6156_vm6, %v6103_v37, %v8529_v9  ;;  %18679 = vst [vmem:[#allocation373_spill] sm:$0xff] %v14137_v16  ;;  %v3302_v6 = vmul.f32 %v18681_v12, %v14137_v16  ;;  %v3622_v4 = vmul.f32 %v18682_v24, %v18673_v17  ;;  %v3948_v9 = vmul.f32 %v18684_v20, %v18683_v27  ;;  %v18689_v24 = vld [vmem:[#allocation334_spill] sm:$0xff]  ;;  %v18690_v20 = vld [vmem:[#allocation336_spill] sm:$0xff] }
 0x72b   : > { %v6233_v56 = vsel %vm6221_vm7, %v6168_v46, %v8534_v2  ;;  %v8543_v62 = vunpack.i.l.bf16 %v8542_v38  ;;  %v8539_v45 = vunpack.i.h.bf16 %v13821_v30  ;;  %v8538_v37 = vunpack.i.l.bf16 %v13821_v30 }
 0x72c   : > { %v8785_v8 = vpack.i.bf16 %v3622_v4, %v3621_v26  ;;  %v8780_v48 = vpack.i.bf16 %v3302_v6, %v3301_v40  ;;  %v8548_v42 = vunpack.i.l.bf16 %v13966_v0  ;;  %v18687_v40 = vld [vmem:[#allocation37_spill] sm:$0xff]  ;;  %v2987_v4 = vmul.f32 %v18689_v24, %v18685_v63 }
 0x72d   : > { %8771 = vrot.lane.b32.xlu2 %v8770_v36, %s9593_s16  ;;  %v6232_v36 = vsel %vm6221_vm7, %v6167_v32, %v8533_v11  ;;  %v6298_v46 = vsel %vm6286_vm8, %v6233_v56, %v8539_v45  ;;  %v8549_v32 = vunpack.i.h.bf16 %v13966_v0  ;;  %v1480_v2 = vmul.f32 %v18687_v40, %v13041_v5  ;;  %v18688_v11 = vld [vmem:[#allocation272_spill] sm:$0xff] }
 0x72e   : > { %8766 = vrot.lane.b32.xlu1 %v8765_v29, %s9592_s29  ;;  %7801 = vmatmul.msk.bf16.gmra.mxu1 %vm6537_vm11, %v6485_v51  ;;  %v8544_v29 = vunpack.i.h.bf16 %v8542_v38  ;;  %v18686_v51 = vld [vmem:[#allocation499_spill] sm:$0xff]  ;;  %v6297_v61 = vsel %vm6286_vm8, %v6232_v36, %v8538_v37  ;;  %v2657_v12 = vmul.f32 %v18688_v11, %v14137_v16  ;;  %v8554_v11 = vunpack.i.h.bf16 %v13855_v43 }
 0x72f   : > { %8866 = vrot.lane.b32.xlu0 %v8865_v22, %s9595_s23  ;;  %v14132_v59 = vpop.permute.xlu2 %8606  ;;  %v3947_v22 = vmul.f32 %v18686_v51, %v18685_v63  ;;  %v6362_v38 = vsel %vm6351_vm9, %v6297_v61, %v8543_v62  ;;  %v18692_v62 = vld [vmem:[#allocation264_spill] sm:$0xff]  ;;  %v18693_v51 = vld [vmem:[#allocation213_spill] sm:$0xff]  ;;  %v8800_v61 = vpack.i.bf16 %v18673_v17, %v18668_v34  ;;  %v8553_v24 = vunpack.i.l.bf16 %v13855_v43  ;;  %v18699_v43 = vld [vmem:[#allocation462_spill] sm:$0xff] }
 0x730   : > { %v14143_v23 = vpop.permute.xlu1 %8556  ;;  %v14151_v31 = vpop.permute.xlu0 %8656  ;;  %v6363_v26 = vsel %vm6351_vm9, %v6298_v46, %v8544_v29  ;;  %v6427_v0 = vsel %vm6416_vm10, %v6362_v38, %v8548_v42  ;;  %v18691_v29 = vld [vmem:[#allocation36_spill] sm:$0xff]  ;;  %v8058_v45 = vunpack.i.l.bf16 %v18693_v51  ;;  %v18694_v63 = vld [vmem:[#allocation129_spill] sm:$0xff]  ;;  %v8379_v38 = vunpack.i.h.bf16 %v13664_v1 }
 0x731   : > { %v8880_v53 = vpack.i.bf16 %v3948_v9, %v3947_v22  ;;  %v2988_v9 = vmul.f32 %v18690_v20, %v18683_v27  ;;  %v6428_v36 = vsel %vm6416_vm10, %v6363_v26, %v8549_v32  ;;  %v1481_v5 = vmul.f32 %v18691_v29, %v13058_v25  ;;  %v18696_v32 = vld [vmem:[#allocation131_spill] sm:$0xff] }
 0x732   : > { %v8059_v22 = vunpack.i.h.bf16 %v18693_v51  ;;  %v961_v37 = vrot.slane %v18694_v63, 7  ;;  %v8378_v25 = vunpack.i.l.bf16 %v13664_v1  ;;  %v6486_v26 = vpack.c.bf16 %v6428_v36, %v6427_v0 }
 0x733   : > { %v17371_v42 = vrot.slane %v18696_v32, 7  ;;  %v8895_v40 = vpack.i.bf16 %v2988_v9, %v2987_v4  ;;  %v5974_v29 = vsel %vm5961_vm3, %v1480_v2, %v8058_v45  ;;  %v8559_v34 = vunpack.i.h.bf16 %v14143_v23 }
 0x734   : > { %v5975_v20 = vsel %vm5961_vm3, %v1481_v5, %v8059_v22  ;;  %v18697_v1 = vrot.slane %v18673_v17, 7  ;;  %v3624_v9 = vmul.f32 %v18699_v43, %v18696_v32  ;;  %v8593_v16 = vunpack.i.l.bf16 %v14090_v41 }
 0x735   : > { %8786 = vrot.lane.b32.xlu2 %v8785_v8, %s9594_s21  ;;  %v2656_v8 = vmul.f32 %v18692_v62, %v14125_v33  ;;  %v18701_v62 = vld [vmem:[#allocation514_spill] sm:$0xff]  ;;  %v18751_v33 = vld [vmem:[#allocation313_spill] sm:$0xff] }
 0x736   : > { %8781 = vrot.lane.b32.xlu1 %v8780_v48, %s9597_s30  ;;  %v18695_v48 = vld [vmem:[#allocation248_spill] sm:$0xff]  ;;  %v14210_v4 = vsel %vm897_vm1, %v18697_v1, %v961_v37  ;;  %v8389_v44 = vunpack.i.h.bf16 %v18751_v33 }
 0x737   : > { %8881 = vrot.lane.b32.xlu0 %v8880_v53, %s9596_s27  ;;  %v14168_v30 = vpop.permute.xlu2 %8621  ;;  %v8219_v27 = vunpack.i.h.bf16 %v18695_v48  ;;  %v8218_v53 = vunpack.i.l.bf16 %v18695_v48  ;;  %v8795_v46 = vpack.i.bf16 %v2657_v12, %v2656_v8  ;;  %v8558_v12 = vunpack.i.l.bf16 %v14143_v23  ;;  %18698 = vst [vmem:[#allocation425_spill] sm:$0xff] %v14210_v4  ;;  %v18700_v23 = vld [vmem:[#allocation398_spill] sm:$0xff]  ;;  %v18702_v8 = vld [vmem:[#allocation120_spill] sm:$0xff] }
 0x738   : > { %v14174_v6 = vpop.permute.xlu1 %8571  ;;  %v14180_v56 = vpop.permute.xlu0 %8671  ;;  %v3303_v5 = vmul.f32 %v18700_v23, %v14210_v4  ;;  %v3949_v17 = vmul.f32 %v18702_v8, %v18701_v62  ;;  %v14230_v48 = vsel %vm897_vm1, %v961_v37, %v17371_v42 }
 0x739   : > { %v6040_v0 = vsel %vm6026_vm4, %v5975_v20, %v8219_v27  ;;  %v6039_v2 = vsel %vm6026_vm4, %v5974_v29, %v8218_v53  ;;  %18703 = vst [vmem:[#allocation365_spill] sm:$0xff] %v14230_v48  ;;  %v18704_v27 = vld [vmem:[#allocation447_spill] sm:$0xff]  ;;  %v18707_v20 = vld [vmem:[#allocation65_spill] sm:$0xff] }
 0x73a   : > { %v6105_v51 = vsel %vm6091_vm5, %v6040_v0, %v8379_v38  ;;  %v6104_v22 = vsel %vm6091_vm5, %v6039_v2, %v8378_v25  ;;  %v3623_v53 = vmul.f32 %v18704_v27, %v18694_v63  ;;  %v18705_v38 = vld [vmem:[#allocation326_spill] sm:$0xff]  ;;  %v18706_v25 = vld [vmem:[#allocation195_spill] sm:$0xff]  ;;  %v8564_v0 = vunpack.i.h.bf16 %v14009_v57 }
 0x73b   : > { %v3950_v29 = vmul.f32 %v18707_v20, %v18706_v25  ;;  %v8563_v2 = vunpack.i.l.bf16 %v14009_v57  ;;  %v8569_v57 = vunpack.i.h.bf16 %v13904_v13 }
 0x73c   : > { %v8815_v43 = vpack.i.bf16 %v3624_v9, %v3623_v53  ;;  %v18710_v53 = vld [vmem:[#allocation21_spill] sm:$0xff]  ;;  %v8384_v9 = vunpack.i.h.bf16 %v13591_v21 }
 0x73d   : > { %8801 = vrot.lane.b32.xlu2 %v8800_v61, %s9593_s16  ;;  %v6169_v61 = vsel %vm6156_vm6, %v6104_v22, %v8553_v24  ;;  %v18708_v24 = vld [vmem:[#allocation188_spill] sm:$0xff]  ;;  %v8910_v8 = vpack.i.bf16 %v3950_v29, %v3949_v17  ;;  %v8573_v22 = vunpack.i.l.bf16 %v14174_v6  ;;  %v18711_v17 = vld [vmem:[#allocation43_spill] sm:$0xff] }
 0x73e   : > { %8796 = vrot.lane.b32.xlu1 %v8795_v46, %s9592_s29  ;;  %7802 = vmatmul.msk.bf16.gmra.mxu1 %vm6537_vm11, %v6486_v26  ;;  %v6170_v46 = vsel %vm6156_vm6, %v6105_v51, %v8554_v11  ;;  %v6234_v1 = vsel %vm6221_vm7, %v6169_v61, %v8558_v12  ;;  %v8574_v51 = vunpack.i.h.bf16 %v14174_v6  ;;  %v1482_v61 = vmul.f32 %v18710_v53, %v13322_v39  ;;  %v18714_v29 = vld [vmem:[#allocation347_spill] sm:$0xff] }
 0x73f   : > { %8896 = vrot.lane.b32.xlu0 %v8895_v40, %s9595_s23  ;;  %v14217_v36 = vpop.permute.xlu2 %8636  ;;  %v3304_v40 = vmul.f32 %v18705_v38, %v14230_v48  ;;  %v6235_v37 = vsel %vm6221_vm7, %v6170_v46, %v8559_v34  ;;  %v6299_v27 = vsel %vm6286_vm8, %v6234_v1, %v8563_v2  ;;  %v18709_v34 = vld [vmem:[#allocation193_spill] sm:$0xff]  ;;  %v1483_v6 = vmul.f32 %v18711_v17, %v13327_v47  ;;  %v18712_v46 = vld [vmem:[#allocation140_spill] sm:$0xff] }
 0x740   : > { %v14225_v45 = vpop.permute.xlu1 %8586  ;;  %v14236_v26 = vpop.permute.xlu0 %8686  ;;  %v6300_v12 = vsel %vm6286_vm8, %v6235_v37, %v8564_v0  ;;  %v17373_v38 = vrot.slane %v18712_v46, 7  ;;  %v2989_v1 = vmul.f32 %v18714_v29, %v18701_v62  ;;  %v18715_v37 = vld [vmem:[#allocation515_spill] sm:$0xff]  ;;  %v18717_v29 = vld [vmem:[#allocation262_spill] sm:$0xff] }
 0x741   : > { %v8810_v11 = vpack.i.bf16 %v3304_v40, %v3303_v5  ;;  %v8568_v5 = vunpack.i.l.bf16 %v13904_v13  ;;  %v18713_v40 = vld [vmem:[#allocation267_spill] sm:$0xff]  ;;  %v8063_v13 = vunpack.i.l.bf16 %v18715_v37  ;;  %v6365_v2 = vsel %vm6351_vm9, %v6300_v12, %v8569_v57  ;;  %v18719_v12 = vld [vmem:[#allocation337_spill] sm:$0xff] }
 0x742   : > { %v2659_v20 = vmul.f32 %v18713_v40, %v14230_v48  ;;  %v2658_v42 = vmul.f32 %v18717_v29, %v14210_v4  ;;  %v2990_v57 = vmul.f32 %v18719_v12, %v18706_v25 }
 0x743   : > { %v6364_v47 = vsel %vm6351_vm9, %v6299_v27, %v8568_v5  ;;  %v8383_v27 = vunpack.i.l.bf16 %v13591_v21  ;;  %v8579_v5 = vunpack.i.h.bf16 %v14051_v15 }
 0x744   : > { %v6429_v62 = vsel %vm6416_vm10, %v6364_v47, %v8573_v22  ;;  %v8830_v22 = vpack.i.bf16 %v18696_v32, %v18694_v63  ;;  %v8925_v48 = vpack.i.bf16 %v2990_v57, %v2989_v1  ;;  %v8589_v1 = vunpack.i.h.bf16 %v14225_v45 }
 0x745   : > { %8816 = vrot.lane.b32.xlu2 %v8815_v43, %s9594_s21  ;;  %v8064_v43 = vunpack.i.h.bf16 %v18715_v37  ;;  %v18718_v37 = vld [vmem:[#allocation44_spill] sm:$0xff]  ;;  %v8583_v57 = vunpack.i.l.bf16 %v13931_v35 }
 0x746   : > { %8811 = vrot.lane.b32.xlu1 %v8810_v11, %s9597_s30  ;;  %v18716_v11 = vld [vmem:[#allocation235_spill] sm:$0xff]  ;;  %v965_v23 = vrot.slane %v18718_v37, 7 }
 0x747   : > { %8911 = vrot.lane.b32.xlu0 %v8910_v8, %s9596_s27  ;;  %v14266_v39 = vpop.permute.xlu2 %8651  ;;  %v8224_v53 = vunpack.i.h.bf16 %v18716_v11  ;;  %v8223_v17 = vunpack.i.l.bf16 %v18716_v11  ;;  %v6430_v8 = vsel %vm6416_vm10, %v6365_v2, %v8574_v51  ;;  %v8578_v11 = vunpack.i.l.bf16 %v14051_v15  ;;  %v18721_v15 = vld [vmem:[#allocation452_spill] sm:$0xff] }
 0x748   : > { %v14270_v0 = vpop.permute.xlu1 %8601  ;;  %v14276_v40 = vpop.permute.xlu0 %8701  ;;  %v8825_v51 = vpack.i.bf16 %v2659_v20, %v2658_v42  ;;  %v5977_v47 = vsel %vm5961_vm3, %v1483_v6, %v8064_v43  ;;  %v5976_v2 = vsel %vm5961_vm3, %v1482_v61, %v8063_v13  ;;  %v6487_v29 = vpack.c.bf16 %v6430_v8, %v6429_v62  ;;  %v18725_v62 = vld [vmem:[#allocation401_spill] sm:$0xff] }
 0x749   : > { %v14296_v21 = vsel %vm897_vm1, %v965_v23, %v17373_v38  ;;  %v6041_v25 = vsel %vm6026_vm4, %v5976_v2, %v8223_v17  ;;  %v6042_v12 = vsel %vm6026_vm4, %v5977_v47, %v8224_v53  ;;  %v3625_v63 = vmul.f32 %v18721_v15, %v18718_v37  ;;  %v18730_v2 = vld [vmem:[#allocation251_spill] sm:$0xff]  ;;  %v18732_v15 = vld [vmem:[#allocation117_spill] sm:$0xff] }
 0x74a   : > { %18720 = vst [vmem:[#allocation310_spill] sm:$0xff] %v14296_v21  ;;  %v6106_v42 = vsel %vm6091_vm5, %v6041_v25, %v8383_v27  ;;  %v6107_v61 = vsel %vm6091_vm5, %v6042_v12, %v8384_v9  ;;  %v8588_v43 = vunpack.i.l.bf16 %v14225_v45  ;;  %v18722_v53 = vrot.slane %v18709_v34, 7  ;;  %v18726_v45 = vld [vmem:[#allocation504_spill] sm:$0xff] }
 0x74b   : > { %v6171_v6 = vsel %vm6156_vm6, %v6106_v42, %v8578_v11  ;;  %v6172_v20 = vsel %vm6156_vm6, %v6107_v61, %v8579_v5  ;;  %v18723_v9 = vrot.slane %v18708_v24, 7  ;;  %v3306_v8 = vmul.f32 %v18725_v62, %v14296_v21  ;;  %v18735_v62 = vld [vmem:[#allocation149_spill] sm:$0xff] }
 0x74c   : > { %v8584_v27 = vunpack.i.h.bf16 %v13931_v35  ;;  %v18727_v11 = vrot.slane %v18696_v32, 7  ;;  %v18733_v35 = vld [vmem:[#allocation391_spill] sm:$0xff]  ;;  %v8594_v42 = vunpack.i.h.bf16 %v14090_v41  ;;  %v8604_v28 = vunpack.i.h.bf16 %v14270_v0 }
 0x74d   : > { %8831 = vrot.lane.b32.xlu2 %v8830_v22, %s9593_s16  ;;  %v14319_v17 = vsel %vm897_vm1, %v18723_v9, %v18722_v53  ;;  %v6236_v53 = vsel %vm6221_vm7, %v6171_v6, %v8583_v57  ;;  %v18738_v6 = vrot.slane %v18726_v45, 7 }
 0x74e   : > { %8826 = vrot.lane.b32.xlu1 %v8825_v51, %s9592_s29  ;;  %7803 = vmatmul.msk.bf16.gmra.mxu1 %vm6537_vm11, %v6487_v29  ;;  %18724 = vst [vmem:[#allocation299_spill] sm:$0xff] %v14319_v17  ;;  %v14331_v22 = vsel %vm897_vm1, %v18727_v11, %v965_v23  ;;  %v18729_v51 = vld [vmem:[#allocation450_spill] sm:$0xff]  ;;  %v6237_v32 = vsel %vm6221_vm7, %v6172_v20, %v8584_v27  ;;  %v18734_v23 = vld [vmem:[#allocation239_spill] sm:$0xff] }
 0x74f   : > { %8926 = vrot.lane.b32.xlu0 %v8925_v48, %s9595_s23  ;;  %v14312_v13 = vpop.permute.xlu2 %8666  ;;  %18728 = vst [vmem:[#allocation139_spill] sm:$0xff] %v14331_v22  ;;  %v3626_v47 = vmul.f32 %v18729_v51, %v18712_v46  ;;  %v18731_v29 = vld [vmem:[#allocation142_spill] sm:$0xff]  ;;  %v3305_v61 = vmul.f32 %v18733_v35, %v14331_v22  ;;  %v3952_v11 = vmul.f32 %v18735_v62, %v18734_v23  ;;  %v18737_v35 = vrot.slane %v18708_v24, 7  ;;  %v18744_v62 = vld [vmem:[#allocation171_spill] sm:$0xff] }
 0x750   : > { %v14325_v5 = vpop.permute.xlu1 %8616  ;;  %v3951_v25 = vmul.f32 %v18731_v29, %v18730_v2  ;;  %v14337_v12 = vpop.permute.xlu0 %8716  ;;  %v6302_v51 = vsel %vm6286_vm8, %v6237_v32, %v8589_v1  ;;  %v6301_v38 = vsel %vm6286_vm8, %v6236_v53, %v8588_v43  ;;  %v18736_v29 = vld [vmem:[#allocation153_spill] sm:$0xff]  ;;  %v18740_v20 = vld [vmem:[#allocation122_spill] sm:$0xff] }
 0x751   : > { %v8845_v9 = vpack.i.bf16 %v3626_v47, %v3625_v63  ;;  %v8840_v4 = vpack.i.bf16 %v3306_v8, %v3305_v61  ;;  %v14356_v63 = vsel %vm897_vm1, %v18738_v6, %v18737_v35  ;;  %v18741_v1 = vld [vmem:[#allocation42_spill] sm:$0xff]  ;;  %v18742_v8 = vld [vmem:[#allocation24_spill] sm:$0xff]  ;;  %v6366_v53 = vsel %vm6351_vm9, %v6301_v38, %v8593_v16  ;;  %v18745_v6 = vld [vmem:[#allocation275_spill] sm:$0xff] }
 0x752   : > { %18739 = vst [vmem:[#allocation103_spill] sm:$0xff] %v14356_v63  ;;  %v1484_v57 = vmul.f32 %v18741_v1, %v13333_v54  ;;  %v8940_v43 = vpack.i.bf16 %v3952_v11, %v3951_v25  ;;  %v1485_v47 = vmul.f32 %v18742_v8, %v13316_v60  ;;  %v18743_v61 = vld [vmem:[#allocation14_spill] sm:$0xff]  ;;  %v6367_v32 = vsel %vm6351_vm9, %v6302_v51, %v8594_v42  ;;  %v18746_v16 = vld [vmem:[#allocation285_spill] sm:$0xff] }
 0x753   : > { %v969_v41 = vrot.slane %v18743_v61, 7  ;;  %v2660_v27 = vmul.f32 %v18745_v6, %v14331_v22  ;;  %v8599_v54 = vunpack.i.h.bf16 %v13983_v3  ;;  %v8598_v25 = vunpack.i.l.bf16 %v13983_v3  ;;  %v18747_v42 = vld [vmem:[#allocation226_spill] sm:$0xff] }
 0x754   : > { %v2677_v38 = vmul.f32 %v18746_v16, %v14319_v17  ;;  %v8068_v11 = vunpack.i.l.bf16 %v18747_v42  ;;  %v8229_v3 = vunpack.i.h.bf16 %v13456_v7  ;;  %v18749_v16 = vld [vmem:[#allocation265_spill] sm:$0xff] }
 0x755   : > { %8846 = vrot.lane.b32.xlu2 %v8845_v9, %s9594_s21  ;;  %v8069_v9 = vunpack.i.h.bf16 %v18747_v42  ;;  %v6431_v6 = vsel %vm6416_vm10, %v6366_v53, %v8598_v25  ;;  %v6432_v48 = vsel %vm6416_vm10, %v6367_v32, %v8599_v54  ;;  %v2661_v35 = vmul.f32 %v18749_v16, %v14296_v21  ;;  %v18750_v42 = vld [vmem:[#allocation151_spill] sm:$0xff]  ;;  %v18753_v21 = vld [vmem:[#allocation32_spill] sm:$0xff] }
 0x756   : > { %8841 = vrot.lane.b32.xlu1 %v8840_v4, %s9597_s30  ;;  %v6903_v4 = vld [vmem:[%s17008_s6] sm:$0x3]  ;;  %v981_v22 = vrot.slane %v18750_v42, 7  ;;  %v8603_v53 = vunpack.i.l.bf16 %v14270_v0  ;;  %v8860_v32 = vpack.i.bf16 %v18712_v46, %v18718_v37  ;;  %v6488_v16 = vpack.c.bf16 %v6432_v48, %v6431_v6  ;;  %v18756_v37 = vld [vmem:[#allocation147_spill] sm:$0xff] }
 0x757   : > { %8941 = vrot.lane.b32.xlu0 %v8940_v43, %s9596_s27  ;;  %v14374_v60 = vpop.permute.xlu2 %8681  ;;  %v7005_v1 = vsel %vm6634_vm2, %v6903_v4, 0  ;;  %v8228_v43 = vunpack.i.l.bf16 %v13456_v7  ;;  %v8388_v4 = vunpack.i.l.bf16 %v18751_v33  ;;  %v2676_v7 = vmul.f32 %v18752_v52, %v14356_v63 }
 0x758   : > { %v14383_v51 = vpop.permute.xlu1 %8631  ;;  %v14388_v8 = vpop.permute.xlu0 %8731  ;;  %7014 = vmatpush.bf16.msra.mxu2 %v7005_v1  ;;  %7934 = vmatpush.bf16.msra.mxu3 %v7005_v1  ;;  %v8855_v54 = vpack.i.bf16 %v2661_v35, %v2660_v27  ;;  %v5979_v25 = vsel %vm5961_vm3, %v1485_v47, %v8069_v9  ;;  %v5978_v1 = vsel %vm5961_vm3, %v1484_v57, %v8068_v11  ;;  %v17386_v18 = vrot.slane %v18753_v21, 7 }
 0x759   : > { %18748 = vst [vmem:[#allocation437_spill] sm:$0xff] %v14388_v8  ;;  %v8955_v45 = vpack.i.bf16 %v2677_v38, %v2676_v7  ;;  %v6044_v33 = vsel %vm6026_vm4, %v5979_v25, %v8229_v3  ;;  %v6043_v52 = vsel %vm6026_vm4, %v5978_v1, %v8228_v43  ;;  %v18754_v0 = vrot.slane %v18712_v46, 7  ;;  %v18759_v46 = vld [vmem:[#allocation465_spill] sm:$0xff]  ;;  %v18765_v25 = vld [vmem:[#allocation455_spill] sm:$0xff] }
 0x75a   : > { %v17387_v27 = vrot.slane %v18756_v37, 7  ;;  %v6108_v47 = vsel %vm6091_vm5, %v6043_v52, %v8388_v4  ;;  %v6109_v48 = vsel %vm6091_vm5, %v6044_v33, %v8389_v44  ;;  %v18757_v57 = vrot.slane %v18744_v62, 7  ;;  %v18761_v43 = vld [vmem:[#allocation393_spill] sm:$0xff] }
 0x75b   : > { %v14412_v63 = vsel %vm897_vm1, %v18754_v0, %v969_v41  ;;  %v3627_v38 = vmul.f32 %v18759_v46, %v18743_v61  ;;  %v6174_v9 = vsel %vm6156_vm6, %v6109_v48, %v8604_v28  ;;  %v6173_v11 = vsel %vm6156_vm6, %v6108_v47, %v8603_v53  ;;  %v18767_v0 = vld [vmem:[#allocation397_spill] sm:$0xff] }
 0x75c   : > { %18755 = vst [vmem:[#allocation446_spill] sm:$0xff] %v14412_v63  ;;  %v14422_v35 = vsel %vm897_vm1, %v969_v41, %v18757_v57  ;;  %v14434_v44 = vsel %vm897_vm1, %v17387_v27, %v981_v22  ;;  %v3307_v41 = vmul.f32 %v18761_v43, %v14412_v63  ;;  %v8609_v6 = vunpack.i.h.bf16 %v14132_v59  ;;  %v18791_v27 = vld [vmem:[#allocation176_spill] sm:$0xff] }
 0x75d   : > { %8861 = vrot.lane.b32.xlu2 %v8860_v32, %s9593_s16  ;;  %18758 = vst [vmem:[#allocation163_spill] sm:$0xff] %v14422_v35  ;;  %v8608_v4 = vunpack.i.l.bf16 %v14132_v59  ;;  %v14445_v28 = vsel %vm897_vm1, %v981_v22, %v17386_v18  ;;  %v18764_v32 = vld [vmem:[#allocation202_spill] sm:$0xff]  ;;  %v3628_v1 = vmul.f32 %v18765_v25, %v18744_v62  ;;  %v8619_v52 = vunpack.i.h.bf16 %v14325_v5 }
 0x75e   : > { %8856 = vrot.lane.b32.xlu1 %v8855_v54, %s9592_s29  ;;  %7804 = vmatmul.msk.bf16.gmra.mxu1 %vm6537_vm11, %v6488_v16  ;;  %18760 = vst [vmem:[#allocation489_spill] sm:$0xff] %v14434_v44  ;;  %v3313_v54 = vmul.f32 %v18764_v32, %v14434_v44  ;;  %v6239_v59 = vsel %vm6221_vm7, %v6174_v9, %v8609_v6  ;;  %v8618_v22 = vunpack.i.l.bf16 %v14325_v5  ;;  %v8614_v57 = vunpack.i.h.bf16 %v14017_v58  ;;  %v18793_v44 = vld [vmem:[#allocation84_spill] sm:$0xff] }
 0x75f   : > { %8956 = vrot.lane.b32.xlu0 %v8955_v45, %s9592_s29  ;;  %v14429_v3 = vpop.permute.xlu2 %8696  ;;  %18762 = vst [vmem:[#allocation428_spill] sm:$0xff] %v14445_v28  ;;  %v18763_v45 = vld [vmem:[#allocation392_spill] sm:$0xff]  ;;  %v6238_v33 = vsel %vm6221_vm7, %v6173_v11, %v8608_v4  ;;  %v3314_v47 = vmul.f32 %v18767_v0, %v14445_v28  ;;  %v8875_v48 = vpack.i.bf16 %v3628_v1, %v3627_v38  ;;  %v8613_v46 = vunpack.i.l.bf16 %v14017_v58 }
 0x760   : > { %v14440_v7 = vpop.permute.xlu1 %8646  ;;  %v3308_v53 = vmul.f32 %v18763_v45, %v14422_v35  ;;  %v6304_v9 = vsel %vm6286_vm8, %v6239_v59, %v8614_v57  ;;  %v18768_v11 = vrot.slane %v18736_v29, 7  ;;  %v18769_v5 = vrot.slane %v18732_v15, 7  ;;  %v18777_v59 = vld [vmem:[#allocation211_spill] sm:$0xff]  ;;  %v18780_v57 = vld [vmem:[#allocation48_spill] sm:$0xff] }
 0x761   : > { %v14453_v16 = vpop.permute.xlu0 %8746  ;;  %v8970_v45 = vpack.i.bf16 %v3314_v47, %v3313_v54  ;;  %v6303_v32 = vsel %vm6286_vm8, %v6238_v33, %v8613_v46  ;;  %v18772_v4 = vrot.slane %v18740_v20, 7  ;;  %v18775_v25 = vrot.slane %v18709_v34, 7  ;;  %v18778_v33 = vld [vmem:[#allocation49_spill] sm:$0xff] }
 0x762   : > { %18766 = vst [vmem:[#allocation429_spill] sm:$0xff] %v14453_v16  ;;  %v8870_v43 = vpack.i.bf16 %v3308_v53, %v3307_v41  ;;  %v14471_v6 = vsel %vm897_vm1, %v18769_v5, %v18768_v11  ;;  %v18771_v38 = vmov %v18769_v5  ;;  %v6368_v41 = vsel %vm6351_vm9, %v6303_v32, %v8618_v22  ;;  %v18782_v32 = vld [vmem:[#allocation29_spill] sm:$0xff]  ;;  %v18783_v11 = vld [vmem:[#allocation238_spill] sm:$0xff] }
 0x763   : > { %18770 = vst [vmem:[#allocation380_spill] sm:$0xff] %v14471_v6  ;;  %v14478_v58 = vsel %vm897_vm1, %v18772_v4, %v18771_v38  ;;  %v6369_v53 = vsel %vm6351_vm9, %v6304_v9, %v8619_v52  ;;  %v18774_v54 = vmov %v18772_v4  ;;  %v1486_v0 = vmul.f32 %v18778_v33, %v18777_v59  ;;  %v18779_v52 = vld [vmem:[#allocation257_spill] sm:$0xff]  ;;  %v18785_v4 = vld [vmem:[#allocation278_spill] sm:$0xff]  ;;  %v18787_v59 = vld [vmem:[#allocation419_spill] sm:$0xff] }
 0x764   : > { %18773 = vst [vmem:[#allocation302_spill] sm:$0xff] %v14478_v58  ;;  %v14488_v1 = vsel %vm897_vm1, %v18775_v25, %v18774_v54  ;;  %v8624_v47 = vunpack.i.h.bf16 %v14168_v30  ;;  %v1487_v46 = vmul.f32 %v18780_v57, %v18779_v52  ;;  %v18784_v5 = vld [vmem:[#allocation53_spill] sm:$0xff]  ;;  %v2663_v54 = vmul.f32 %v18785_v4, %v14422_v35 }
 0x765   : > { %8876 = vrot.lane.b32.xlu2 %v8875_v48, %s9594_s21  ;;  %18776 = vst [vmem:[#allocation303_spill] sm:$0xff] %v14488_v1  ;;  %v8623_v48 = vunpack.i.l.bf16 %v14168_v30  ;;  %v14505_v38 = vmul.f32 %v18784_v5, %v18783_v11  ;;  %v18786_v30 = vld [vmem:[#allocation146_spill] sm:$0xff]  ;;  %v3324_v33 = vmul.f32 %v18787_v59, %v14478_v58  ;;  %v18790_v11 = vld [vmem:[#allocation135_spill] sm:$0xff]  ;;  %v8074_v4 = vunpack.i.h.bf16 %v18791_v27  ;;  %v18792_v16 = vld [vmem:[#allocation405_spill] sm:$0xff] }
 0x766   : > { %8871 = vrot.lane.b32.xlu1 %v8870_v43, %s9597_s30  ;;  %v18781_v43 = vld [vmem:[#allocation368_spill] sm:$0xff]  ;;  %v6434_v57 = vsel %vm6416_vm10, %v6369_v53, %v8624_v47  ;;  %v8073_v35 = vunpack.i.l.bf16 %v18791_v27  ;;  %v3323_v17 = vmul.f32 %v18792_v16, %v14488_v1  ;;  %v8234_v59 = vunpack.i.h.bf16 %v18793_v44  ;;  %v18794_v47 = vld [vmem:[#allocation107_spill] sm:$0xff] }
 0x767   : > { %8971 = vrot.lane.b32.xlu0 %v8970_v45, %s9597_s30  ;;  %v14495_v22 = vpop.permute.xlu2 %8711  ;;  %v14501_v9 = vmul.f32 %v18782_v32, %v18781_v43  ;;  %v973_v45 = vrot.slane %v18786_v30, 7  ;;  %v6433_v52 = vsel %vm6416_vm10, %v6368_v41, %v8623_v48  ;;  %v18789_v43 = vld [vmem:[#allocation270_spill] sm:$0xff]  ;;  %v8890_v41 = vpack.i.bf16 %v18744_v62, %v18743_v61 }
 0x768   : > { %v14509_v25 = vpop.permute.xlu1 %8661  ;;  %v2662_v32 = vmul.f32 %v18789_v43, %v14412_v63  ;;  %v8394_v48 = vunpack.i.h.bf16 %v18794_v47  ;;  %v8393_v43 = vunpack.i.l.bf16 %v18794_v47  ;;  %v6489_v5 = vpack.c.bf16 %v6434_v57, %v6433_v52 }
 0x769   : > { %v14514_v18 = vpop.permute.xlu0 %8761  ;;  %v18795_v63 = vrot.slane %v18744_v62, 7  ;;  %v8985_v16 = vpack.i.bf16 %v3324_v33, %v3323_v17  ;;  %v8629_v8 = vunpack.i.h.bf16 %v14066_v50  ;;  %v5981_v61 = vsel %vm5961_vm3, %v1487_v46, %v8074_v4  ;;  %v18799_v62 = vld [vmem:[#allocation468_spill] sm:$0xff]  ;;  %v18803_v4 = vld [vmem:[#allocation175_spill] sm:$0xff] }
 0x76a   : > { %18788 = vst [vmem:[#allocation320_spill] sm:$0xff] %v14514_v18  ;;  %v8233_v18 = vunpack.i.l.bf16 %v18793_v44  ;;  %v8885_v53 = vpack.i.bf16 %v2663_v54, %v2662_v32  ;;  %v8628_v44 = vunpack.i.l.bf16 %v14066_v50  ;;  %v5980_v54 = vsel %vm5961_vm3, %v1486_v0, %v8073_v35  ;;  %v18801_v33 = vld [vmem:[#allocation404_spill] sm:$0xff] }
 0x76b   : > { %v6647_v28 = vpop.f32.mrf.mxu1  ;;  %v14534_v27 = vsel %vm897_vm1, %v18795_v63, %v973_v45  ;;  %v8634_v32 = vunpack.i.h.bf16 %v14383_v51  ;;  %v8633_v52 = vunpack.i.l.bf16 %v14383_v51  ;;  %v14546_v63 = vld [vmem:[%s17007_s5] ss:$0 sm:$0xff]  ;;  %v18797_v50 = vrot.slane %v18790_v11, 7 }
 0x76c   : > { %18796 = vst [vmem:[#allocation371_spill] sm:$0xff] %v14534_v27  ;;  %v3630_v35 = vmul.f32 %v18799_v62, %v18790_v11  ;;  %v6046_v0 = vsel %vm6026_vm4, %v5981_v61, %v8234_v59  ;;  %v6045_v51 = vsel %vm6026_vm4, %v5980_v54, %v8233_v18  ;;  %v3309_v57 = vmul.f32 %v18801_v33, %v14534_v27  ;;  %v18804_v59 = vld [vmem:[#allocation198_spill] sm:$0xff]  ;;  %v18805_v18 = vld [vmem:[#allocation451_spill] sm:$0xff] }
 0x76d   : > { %8891 = vrot.lane.b32.xlu2 %v8890_v41, %s9593_s16  ;;  %v14553_v17 = vsel %vm897_vm1, %v973_v45, %v18797_v50  ;;  %v6111_v45 = vsel %vm6091_vm5, %v6046_v0, %v8394_v48  ;;  %v18807_v33 = vld [vmem:[#allocation519_spill] sm:$0xff]  ;;  %v6648_v0 = vadd.f32 %v14546_v63, %v6647_v28 }
 0x76e   : > { %8886 = vrot.lane.b32.xlu1 %v8885_v53, %s9592_s29  ;;  %7805 = vmatmul.msk.bf16.gmra.mxu1 %vm6537_vm11, %v6489_v5  ;;  %18798 = vst [vmem:[#allocation225_spill] sm:$0xff] %v14553_v17  ;;  %v18802_v5 = vld [vmem:[#allocation209_spill] sm:$0xff]  ;;  %v6110_v53 = vsel %vm6091_vm5, %v6045_v51, %v8393_v43  ;;  %v3310_v61 = vmul.f32 %v18804_v59, %v14553_v17  ;;  %v18810_v59 = vld [vmem:[#allocation51_spill] sm:$0xff] }
 0x76f   : > { %8986 = vrot.lane.b32.xlu0 %v8985_v16, %s9597_s30  ;;  %v14560_v46 = vpop.permute.xlu2 %8726  ;;  %v3963_v41 = vmul.f32 %v18803_v4, %v18802_v5  ;;  %v3629_v16 = vmul.f32 %v18805_v18, %v18786_v30  ;;  %v6175_v54 = vsel %vm6156_vm6, %v6110_v53, %v8628_v44  ;;  %v6176_v50 = vsel %vm6156_vm6, %v6111_v45, %v8629_v8  ;;  %v18808_v4 = vld [vmem:[#allocation502_spill] sm:$0xff]  ;;  %v18809_v51 = vld [vmem:[#allocation237_spill] sm:$0xff]  ;;  %v18811_v53 = vld [vmem:[#allocation52_spill] sm:$0xff] }
 0x770   : > { %18800 = vst [vmem:[#allocation242_spill] sm:$0xff] %v14560_v46  ;;  %v14568_v47 = vpop.permute.xlu1 %8676  ;;  %v3964_v5 = vmul.f32 %v18808_v4, %v18807_v33  ;;  %v6240_v48 = vsel %vm6221_vm7, %v6175_v54, %v8633_v52  ;;  %v6241_v43 = vsel %vm6221_vm7, %v6176_v50, %v8634_v32  ;;  %v14585_v55 = vmul.f32 %v18810_v59, %v18809_v51 }
 0x771   : > { %v14576_v62 = vpop.permute.xlu0 %8776  ;;  %v8905_v18 = vpack.i.bf16 %v3630_v35, %v3629_v16  ;;  %v8639_v44 = vunpack.i.h.bf16 %v14217_v36  ;;  %v8638_v8 = vunpack.i.l.bf16 %v14217_v36  ;;  %v8900_v46 = vpack.i.bf16 %v3310_v61, %v3309_v57  ;;  %v18815_v61 = vld [vmem:[#allocation293_spill] sm:$0xff] }
 0x772   : > { %18806 = vst [vmem:[#allocation492_spill] sm:$0xff] %v14576_v62  ;;  %v17402_v62 = vrot.slane %v18811_v53, 7  ;;  %v9000_v4 = vpack.i.bf16 %v3964_v5, %v3963_v41  ;;  %v8649_v54 = vunpack.i.h.bf16 %v14440_v7  ;;  %v8648_v50 = vunpack.i.l.bf16 %v14440_v7  ;;  %v18814_v41 = vld [vmem:[#allocation273_spill] sm:$0xff] }
 0x773   : > { %v6649_v45 = vpop.f32.mrf.mxu1  ;;  %v6305_v32 = vsel %vm6286_vm8, %v6240_v48, %v8638_v8  ;;  %v6306_v28 = vsel %vm6286_vm8, %v6241_v43, %v8639_v44  ;;  %v8644_v35 = vunpack.i.h.bf16 %v14100_v19  ;;  %v8643_v36 = vunpack.i.l.bf16 %v14100_v19  ;;  %v18816_v43 = vld [vmem:[#allocation217_spill] sm:$0xff] }
 0x774   : > { %v6650_v52 = vadd.f32 %v14546_v63, %v6649_v45  ;;  %v6807_v16 = vmax.f32 %v6648_v0, 0.0  ;;  %v18812_v57 = vrot.slane %v18756_v37, 7  ;;  %v2665_v7 = vmul.f32 %v18814_v41, %v14553_v17  ;;  %v18817_v45 = vld [vmem:[#allocation108_spill] sm:$0xff] }
 0x775   : > { %8906 = vrot.lane.b32.xlu2 %v8905_v18, %s9594_s21  ;;  %v2678_v48 = vmul.f32 %v18815_v61, %v14488_v1  ;;  %v8079_v59 = vunpack.i.h.bf16 %v18816_v43  ;;  %v6370_v44 = vsel %vm6351_vm9, %v6305_v32, %v8643_v36  ;;  %v6371_v8 = vsel %vm6351_vm9, %v6306_v28, %v8644_v35  ;;  %v18820_v1 = vld [vmem:[#allocation40_spill] sm:$0xff]  ;;  %v18822_v28 = vld [vmem:[#allocation283_spill] sm:$0xff] }
 0x776   : > { %v6808_v51 = vmax.f32 %v6650_v52, 0.0  ;;  %8901 = vrot.lane.b32.xlu1 %v8900_v46, %s9597_s30  ;;  %v14604_v5 = vsel %vm897_vm1, %v17402_v62, %v18812_v57  ;;  %v8078_v46 = vunpack.i.l.bf16 %v18816_v43  ;;  %v8239_v52 = vunpack.i.h.bf16 %v18817_v45  ;;  %v18819_v62 = vld [vmem:[#allocation268_spill] sm:$0xff] }
 0x777   : > { %18813 = vst [vmem:[#allocation130_spill] sm:$0xff] %v14604_v5  ;;  %9001 = vrot.lane.b32.xlu0 %v9000_v4, %s9596_s27  ;;  %v14612_v19 = vpop.permute.xlu2 %8741  ;;  %v8238_v57 = vunpack.i.l.bf16 %v18817_v45  ;;  %v6435_v61 = vsel %vm6416_vm10, %v6370_v44, %v8648_v50  ;;  %v6436_v4 = vsel %vm6416_vm10, %v6371_v8, %v8649_v54  ;;  %v2664_v43 = vmul.f32 %v18819_v62, %v14534_v27 }
 0x778   : > { %v14615_v0 = vpop.permute.xlu1 %8691  ;;  %v6871_v18 = vpack.c.bf16 %v6808_v51, %v6807_v16  ;;  %v985_v17 = vrot.slane %v18820_v1, 7  ;;  %v18821_v16 = vld [vmem:[#allocation219_spill] sm:$0xff]  ;;  %v2679_v35 = vmul.f32 %v18822_v28, %v14478_v58  ;;  %v8654_v36 = vunpack.i.h.bf16 %v14266_v39 }
 0x779   : > { %v14621_v41 = vpop.permute.xlu0 %8791  ;;  %v8399_v51 = vunpack.i.h.bf16 %v18821_v16  ;;  %v8398_v32 = vunpack.i.l.bf16 %v18821_v16  ;;  %v8653_v50 = vunpack.i.l.bf16 %v14266_v39  ;;  %v8920_v54 = vpack.i.bf16 %v18790_v11, %v18786_v30  ;;  %v18824_v39 = vld [vmem:[#allocation507_spill] sm:$0xff]  ;;  %v18825_v30 = vld [vmem:[#allocation458_spill] sm:$0xff] }
 0x77a   : > { %18818 = vst [vmem:[#allocation498_spill] sm:$0xff] %v14621_v41  ;;  %7829 = vmatmul.msk.bf16.vlgmr.msra.gmra.mxu2 %vm5961_vm3, %v6871_v18  ;;  %v8915_v62 = vpack.i.bf16 %v2665_v7, %v2664_v43  ;;  %v5983_v8 = vsel %vm5961_vm3, %v14505_v38, %v8079_v59  ;;  %v5982_v45 = vsel %vm5961_vm3, %v14501_v9, %v8078_v46  ;;  %v18823_v18 = vld [vmem:[#allocation138_spill] sm:$0xff]  ;;  %v8664_v46 = vunpack.i.h.bf16 %v14509_v25 }
 0x77b   : > { %v6652_v44 = vpop.f32.mrf.mxu1  ;;  %v6490_v16 = vpack.c.bf16 %v6436_v4, %v6435_v61  ;;  %v17408_v27 = vrot.slane %v18823_v18, 7  ;;  %v9015_v41 = vpack.i.bf16 %v2679_v35, %v2678_v48  ;;  %v6047_v28 = vsel %vm6026_vm4, %v5982_v45, %v8238_v57  ;;  %v18828_v4 = vld [vmem:[#allocation407_spill] sm:$0xff] }
 0x77c   : > { %v6048_v58 = vsel %vm6026_vm4, %v5983_v8, %v8239_v52  ;;  %v3631_v7 = vmul.f32 %v18825_v30, %v18811_v53  ;;  %v6112_v38 = vsel %vm6091_vm5, %v6047_v28, %v8398_v32  ;;  %v8663_v52 = vunpack.i.l.bf16 %v14509_v25  ;;  %v18834_v8 = vld [vmem:[#allocation454_spill] sm:$0xff] }
 0x77d   : > { %8921 = vrot.lane.b32.xlu2 %v8920_v54, %s9593_s16  ;;  %v6113_v59 = vsel %vm6091_vm5, %v6048_v58, %v8399_v51  ;;  %v6177_v9 = vsel %vm6156_vm6, %v6112_v38, %v8653_v50  ;;  %v18826_v61 = vrot.slane %v18753_v21, 7  ;;  %v3312_v43 = vmul.f32 %v18828_v4, %v14604_v5  ;;  %v18833_v54 = vld [vmem:[#allocation410_spill] sm:$0xff]  ;;  %v18836_v38 = vld [vmem:[#allocation400_spill] sm:$0xff] }
 0x77e   : > { %8916 = vrot.lane.b32.xlu1 %v8915_v62, %s9592_s29  ;;  %7806 = vmatmul.msk.bf16.gmra.mxu1 %vm6537_vm11, %v6490_v16  ;;  %v6178_v48 = vsel %vm6156_vm6, %v6113_v59, %v8654_v36  ;;  %v8659_v51 = vunpack.i.h.bf16 %v14151_v31  ;;  %v8658_v32 = vunpack.i.l.bf16 %v14151_v31  ;;  %v14673_v25 = vsel %vm897_vm1, %v985_v17, %v17408_v27  ;;  %v18835_v16 = vld [vmem:[#allocation395_spill] sm:$0xff]  ;;  %v18839_v27 = vld [vmem:[#allocation204_spill] sm:$0xff] }
 0x77f   : > { %9016 = vrot.lane.b32.xlu0 %v9015_v41, %s9592_s29  ;;  %v14657_v57 = vpop.permute.xlu2 %8756  ;;  %v14662_v58 = vsel %vm897_vm1, %v18826_v61, %v985_v17  ;;  %18829 = vst [vmem:[#allocation178_spill] sm:$0xff] %v14673_v25  ;;  %v18830_v41 = vrot.slane %v18811_v53, 7  ;;  %v18831_v36 = vrot.slane %v18790_v11, 7  ;;  %v3632_v31 = vmul.f32 %v18834_v8, %v18756_v37 }
 0x780   : > { %18827 = vst [vmem:[#allocation484_spill] sm:$0xff] %v14662_v58  ;;  %v14668_v35 = vpop.permute.xlu1 %8706  ;;  %v3315_v62 = vmul.f32 %v18833_v54, %v14662_v58  ;;  %v6242_v17 = vsel %vm6221_vm7, %v6177_v9, %v8658_v32  ;;  %v6243_v30 = vsel %vm6221_vm7, %v6178_v48, %v8659_v51  ;;  %v6653_v11 = vadd.f32 %v14546_v63, %v6652_v44  ;;  %v18837_v32 = vld [vmem:[#allocation241_spill] sm:$0xff]  ;;  %v18838_v48 = vld [vmem:[#allocation35_spill] sm:$0xff] }
 0x781   : > { %v14680_v50 = vsel %vm897_vm1, %v18831_v36, %v18830_v41  ;;  %v14686_v45 = vpop.permute.xlu0 %8806  ;;  %v3316_v59 = vmul.f32 %v18836_v38, %v14673_v25  ;;  %v8935_v61 = vpack.i.bf16 %v3632_v31, %v3631_v7  ;;  %v6308_v4 = vsel %vm6286_vm8, %v6243_v30, %v8664_v46  ;;  %v18840_v31 = vld [vmem:[#allocation252_spill] sm:$0xff] }
 0x782   : > { %18832 = vst [vmem:[#allocation113_spill] sm:$0xff] %v14680_v50  ;;  %v3311_v28 = vmul.f32 %v18835_v16, %v14680_v50  ;;  %v6307_v41 = vsel %vm6286_vm8, %v6242_v17, %v8663_v52  ;;  %v8669_v8 = vunpack.i.h.bf16 %v14312_v13  ;;  %v8668_v16 = vunpack.i.l.bf16 %v14312_v13 }
 0x783   : > { %v6654_v36 = vpop.f32.mrf.mxu1  ;;  %v1491_v51 = vmul.f32 %v18838_v48, %v18837_v32  ;;  %v9030_v44 = vpack.i.bf16 %v3316_v59, %v3315_v62  ;;  %v8084_v1 = vunpack.i.h.bf16 %v18839_v27  ;;  %v8083_v7 = vunpack.i.l.bf16 %v18839_v27 }
 0x784   : > { %v8930_v54 = vpack.i.bf16 %v3312_v43, %v3311_v28  ;;  %v6655_v9 = vadd.f32 %v14546_v63, %v6654_v36  ;;  %v6809_v46 = vmax.f32 %v6653_v11, 0.0  ;;  %v6372_v43 = vsel %vm6351_vm9, %v6307_v41, %v8668_v16  ;;  %v18841_v11 = vld [vmem:[#allocation281_spill] sm:$0xff] }
 0x785   : > { %8936 = vrot.lane.b32.xlu2 %v8935_v61, %s9594_s21  ;;  %v6373_v13 = vsel %vm6351_vm9, %v6308_v4, %v8669_v8  ;;  %v8244_v28 = vunpack.i.h.bf16 %v18840_v31  ;;  %v8243_v17 = vunpack.i.l.bf16 %v18840_v31  ;;  %v8674_v62 = vunpack.i.h.bf16 %v14180_v56  ;;  %v18842_v36 = vld [vmem:[#allocation409_spill] sm:$0xff] }
 0x786   : > { %v6810_v52 = vmax.f32 %v6655_v9, 0.0  ;;  %8931 = vrot.lane.b32.xlu1 %v8930_v54, %s9597_s30  ;;  %v8673_v30 = vunpack.i.l.bf16 %v14180_v56  ;;  %v2666_v38 = vmul.f32 %v18841_v11, %v14680_v50  ;;  %v8679_v59 = vunpack.i.h.bf16 %v14568_v47 }
 0x787   : > { %9031 = vrot.lane.b32.xlu0 %v9030_v44, %s9597_s30  ;;  %v14713_v27 = vpop.permute.xlu2 %8771  ;;  %v8678_v61 = vunpack.i.l.bf16 %v14568_v47  ;;  %v3325_v54 = vmul.f32 %v18842_v36, %v14471_v6  ;;  %v6438_v16 = vsel %vm6416_vm10, %v6373_v13, %v8674_v62  ;;  %v18843_v9 = vrot.slane %v18824_v39, 7  ;;  %v18846_v47 = vld [vmem:[#allocation271_spill] sm:$0xff] }
 0x788   : > { %v14719_v4 = vpop.permute.xlu1 %8721  ;;  %v6872_v41 = vpack.c.bf16 %v6810_v52, %v6809_v46  ;;  %v6437_v56 = vsel %vm6416_vm10, %v6372_v43, %v8673_v30  ;;  %v18844_v32 = vrot.slane %v18736_v29, 7  ;;  %v2667_v44 = vmul.f32 %v18846_v47, %v14604_v5  ;;  %v18847_v43 = vld [vmem:[#allocation408_spill] sm:$0xff]  ;;  %v18850_v47 = vld [vmem:[#allocation55_spill] sm:$0xff]  ;;  %v18888_v5 = vld [vmem:[#allocation242_spill] sm:$0xff] }
 0x789   : > { %v14723_v8 = vpop.permute.xlu0 %8821  ;;  %v5985_v46 = vsel %vm5961_vm3, %v1491_v51, %v8084_v1  ;;  %v5984_v52 = vsel %vm5961_vm3, %v14585_v55, %v8083_v7  ;;  %v8950_v11 = vpack.i.bf16 %v18756_v37, %v18811_v53  ;;  %v6491_v51 = vpack.c.bf16 %v6438_v16, %v6437_v56  ;;  %v18849_v16 = vld [vmem:[#allocation506_spill] sm:$0xff] }
 0x78a   : > { %v14732_v48 = vsel %vm897_vm1, %v18844_v32, %v18843_v9  ;;  %7830 = vmatmul.msk.bf16.gmra.mxu2 %vm5961_vm3, %v6872_v41  ;;  %v6050_v31 = vsel %vm6026_vm4, %v5985_v46, %v8244_v28  ;;  %v6049_v62 = vsel %vm6026_vm4, %v5984_v52, %v8243_v17  ;;  %v8945_v36 = vpack.i.bf16 %v2667_v44, %v2666_v38  ;;  %v18852_v52 = vld [vmem:[#allocation99_spill] sm:$0xff]  ;;  %v18867_v32 = vld [vmem:[#allocation349_spill] sm:$0xff] }
 0x78b   : > { %18845 = vst [vmem:[#allocation431_spill] sm:$0xff] %v14732_v48  ;;  %v3326_v13 = vmul.f32 %v18847_v43, %v14732_v48  ;;  %v6657_v30 = vpop.f32.mrf.mxu1  ;;  %v6115_v9 = vsel %vm6091_vm5, %v6050_v31, %v8679_v59  ;;  %v6114_v1 = vsel %vm6091_vm5, %v6049_v62, %v8678_v61  ;;  %v8684_v7 = vunpack.i.h.bf16 %v14374_v60  ;;  %v18853_v43 = vld [vmem:[#allocation180_spill] sm:$0xff] }
 0x78c   : > { %v8683_v41 = vunpack.i.l.bf16 %v14374_v60  ;;  %v8694_v53 = vunpack.i.h.bf16 %v14615_v0  ;;  %v8693_v17 = vunpack.i.l.bf16 %v14615_v0  ;;  %v18848_v60 = vld [vmem:[#allocation350_spill] sm:$0xff]  ;;  %v8689_v61 = vunpack.i.h.bf16 %v14236_v26  ;;  %v18851_v0 = vld [vmem:[#allocation56_spill] sm:$0xff] }
 0x78d   : > { %v9045_v55 = vpack.i.bf16 %v3326_v13, %v3325_v54  ;;  %8951 = vrot.lane.b32.xlu2 %v8950_v11, %s9593_s16  ;;  %v6180_v28 = vsel %vm6156_vm6, %v6115_v9, %v8684_v7  ;;  %v2992_v59 = vmul.f32 %v18848_v60, %v18734_v23  ;;  %v8688_v54 = vunpack.i.l.bf16 %v14236_v26  ;;  %v18854_v23 = vld [vmem:[#allocation339_spill] sm:$0xff]  ;;  %v18855_v9 = vld [vmem:[#allocation189_spill] sm:$0xff] }
 0x78e   : > { %8946 = vrot.lane.b32.xlu1 %v8945_v36, %s9592_s29  ;;  %7807 = vmatmul.msk.bf16.gmra.mxu1 %vm6537_vm11, %v6491_v51  ;;  %v6179_v37 = vsel %vm6156_vm6, %v6114_v1, %v8683_v41  ;;  %v1493_v44 = vmul.f32 %v18850_v47, %v13797_v10  ;;  %v1492_v46 = vmul.f32 %v18851_v0, %v13811_v49  ;;  %v18856_v1 = vld [vmem:[#allocation128_spill] sm:$0xff]  ;;  %v8729_v50 = vunpack.i.h.bf16 %v18888_v5 }
 0x78f   : > { %9046 = vrot.lane.b32.xlu0 %v9045_v55, %s9597_s30  ;;  %v14758_v38 = vpop.permute.xlu2 %8786  ;;  %v3966_v13 = vmul.f32 %v18853_v43, %v18852_v52  ;;  %v2991_v62 = vmul.f32 %v18854_v23, %v18730_v2  ;;  %v6244_v26 = vsel %vm6221_vm7, %v6179_v37, %v8688_v54  ;;  %v6245_v11 = vsel %vm6221_vm7, %v6180_v28, %v8689_v61  ;;  %v18858_v54 = vld [vmem:[#allocation181_spill] sm:$0xff]  ;;  %v18859_v43 = vld [vmem:[#allocation254_spill] sm:$0xff] }
 0x790   : > { %v14764_v56 = vpop.permute.xlu1 %8736  ;;  %v6658_v36 = vadd.f32 %v14546_v63, %v6657_v30  ;;  %v3965_v10 = vmul.f32 %v18856_v1, %v18855_v9  ;;  %v6309_v51 = vsel %vm6286_vm8, %v6244_v26, %v8693_v17  ;;  %v6310_v49 = vsel %vm6286_vm8, %v6245_v11, %v8694_v53  ;;  %v18857_v30 = vld [vmem:[#allocation471_spill] sm:$0xff] }
 0x791   : > { %v14773_v31 = vpop.permute.xlu0 %8836  ;;  %v8965_v7 = vpack.i.bf16 %v18709_v34, %v18708_v24  ;;  %v8960_v41 = vpack.i.bf16 %v2992_v59, %v2991_v62  ;;  %v8699_v2 = vunpack.i.h.bf16 %v14429_v3  ;;  %v8698_v37 = vunpack.i.l.bf16 %v14429_v3  ;;  %v18861_v1 = vld [vmem:[#allocation359_spill] sm:$0xff] }
 0x792   : > { %v3633_v60 = vmul.f32 %v18857_v30, %v18750_v42  ;;  %v9060_v61 = vpack.i.bf16 %v3966_v13, %v3965_v10  ;;  %v8089_v47 = vunpack.i.h.bf16 %v18858_v54  ;;  %v8088_v17 = vunpack.i.l.bf16 %v18858_v54  ;;  %v18865_v54 = vld [vmem:[#allocation91_spill] sm:$0xff] }
 0x793   : > { %v6659_v55 = vpop.f32.mrf.mxu1  ;;  %v6811_v53 = vmax.f32 %v6658_v36, 0.0  ;;  %v6374_v59 = vsel %vm6351_vm9, %v6309_v51, %v8698_v37  ;;  %v6375_v3 = vsel %vm6351_vm9, %v6310_v49, %v8699_v2  ;;  %v8249_v23 = vunpack.i.h.bf16 %v18859_v43  ;;  %v18860_v36 = vld [vmem:[#allocation520_spill] sm:$0xff]  ;;  %v18863_v37 = vld [vmem:[#allocation461_spill] sm:$0xff]  ;;  %v18891_v24 = vld [vmem:[#allocation223_spill] sm:$0xff] }
 0x794   : > { %v6660_v28 = vadd.f32 %v14546_v63, %v6659_v55  ;;  %v8248_v62 = vunpack.i.l.bf16 %v18859_v43  ;;  %v8704_v13 = vunpack.i.h.bf16 %v14276_v40  ;;  %v8703_v26 = vunpack.i.l.bf16 %v14276_v40 }
 0x795   : > { %8966 = vrot.lane.b32.xlu2 %v8965_v7, %s9593_s16  ;;  %v3001_v10 = vmul.f32 %v18861_v1, %v18860_v36  ;;  %v8709_v55 = vunpack.i.h.bf16 %v14668_v35  ;;  %v8708_v51 = vunpack.i.l.bf16 %v14668_v35  ;;  %v3634_v40 = vmul.f32 %v18863_v37, %v18753_v21  ;;  %v18866_v1 = vld [vmem:[#allocation518_spill] sm:$0xff] }
 0x796   : > { %v6812_v0 = vmax.f32 %v6660_v28, 0.0  ;;  %8961 = vrot.lane.b32.xlu1 %v8960_v41, %s9595_s23  ;;  %v18862_v41 = vld [vmem:[#allocation295_spill] sm:$0xff]  ;;  %v6439_v30 = vsel %vm6416_vm10, %v6374_v59, %v8703_v26  ;;  %v3002_v35 = vmul.f32 %v18867_v32, %v18866_v1  ;;  %v5987_v36 = vsel %vm5961_vm3, %v1493_v44, %v8089_v47  ;;  %v18869_v44 = vld [vmem:[#allocation109_spill] sm:$0xff] }
 0x797   : > { %9061 = vrot.lane.b32.xlu0 %v9060_v61, %s9596_s27  ;;  %v14802_v11 = vpop.permute.xlu2 %8801  ;;  %v2681_v2 = vmul.f32 %v18862_v41, %v14732_v48  ;;  %v6440_v61 = vsel %vm6416_vm10, %v6375_v3, %v8704_v13  ;;  %v8980_v37 = vpack.i.bf16 %v3634_v40, %v3633_v60  ;;  %v6052_v48 = vsel %vm6026_vm4, %v5987_v36, %v8249_v23  ;;  %v18870_v60 = vld [vmem:[#allocation200_spill] sm:$0xff] }
 0x798   : > { %v14808_v49 = vpop.permute.xlu1 %8751  ;;  %v6873_v7 = vpack.c.bf16 %v6812_v0, %v6811_v53  ;;  %v5986_v53 = vsel %vm5961_vm3, %v1492_v46, %v8088_v17  ;;  %v18868_v0 = vld [vmem:[#allocation288_spill] sm:$0xff]  ;;  %v8975_v13 = vpack.i.bf16 %v3002_v35, %v3001_v10  ;;  %v6117_v26 = vsel %vm6091_vm5, %v6052_v48, %v8709_v55  ;;  %v18874_v10 = vld [vmem:[#allocation470_spill] sm:$0xff] }
 0x799   : > { %v14814_v28 = vpop.permute.xlu0 %8851  ;;  %v2680_v41 = vmul.f32 %v18868_v0, %v14471_v6  ;;  %v6051_v59 = vsel %vm6026_vm4, %v5986_v53, %v8248_v62  ;;  %v6492_v43 = vpack.c.bf16 %v6440_v61, %v6439_v30  ;;  %v989_v47 = vrot.slane %v18869_v44, 7  ;;  %v18877_v53 = vld [vmem:[#allocation208_spill] sm:$0xff]  ;;  %v18878_v0 = vld [vmem:[#allocation503_spill] sm:$0xff] }
 0x79a   : > { %18864 = vst [vmem:[#allocation383_spill] sm:$0xff] %v14814_v28  ;;  %7831 = vmatmul.msk.bf16.gmra.mxu2 %vm5961_vm3, %v6873_v7  ;;  %v6116_v32 = vsel %vm6091_vm5, %v6051_v59, %v8708_v51  ;;  %v8714_v17 = vunpack.i.h.bf16 %v14495_v22  ;;  %v8713_v7 = vunpack.i.l.bf16 %v14495_v22  ;;  %v18871_v62 = vrot.slane %v18849_v16, 7 }
 0x79b   : > { %v6662_v3 = vpop.f32.mrf.mxu1  ;;  %v9075_v46 = vpack.i.bf16 %v2681_v2, %v2680_v41  ;;  %v18872_v36 = vrot.slane %v18824_v39, 7  ;;  %v3643_v55 = vmul.f32 %v18874_v10, %v18740_v20  ;;  %v8724_v2 = vunpack.i.h.bf16 %v14719_v4  ;;  %v18885_v10 = vld [vmem:[#allocation174_spill] sm:$0xff] }
 0x79c   : > { %v6182_v22 = vsel %vm6156_vm6, %v6117_v26, %v8714_v17  ;;  %v6181_v51 = vsel %vm6156_vm6, %v6116_v32, %v8713_v7  ;;  %v8723_v40 = vunpack.i.l.bf16 %v14719_v4  ;;  %v18875_v61 = vrot.slane %v18865_v54, 7  ;;  %v18879_v4 = vld [vmem:[#allocation41_spill] sm:$0xff]  ;;  %v18883_v7 = vld [vmem:[#allocation466_spill] sm:$0xff] }
 0x79d   : > { %8981 = vrot.lane.b32.xlu2 %v8980_v37, %s9594_s21  ;;  %v14840_v48 = vsel %vm897_vm1, %v18872_v36, %v18871_v62  ;;  %v8719_v41 = vunpack.i.h.bf16 %v14337_v12  ;;  %v8718_v37 = vunpack.i.l.bf16 %v14337_v12  ;;  %v18880_v26 = vrot.slane %v18823_v18, 7  ;;  %v18886_v12 = vld [vmem:[#allocation134_spill] sm:$0xff] }
 0x79e   : > { %18873 = vst [vmem:[#allocation378_spill] sm:$0xff] %v14840_v48  ;;  %8976 = vrot.lane.b32.xlu1 %v8975_v13, %s9595_s23  ;;  %7808 = vmatmul.msk.bf16.gmra.mxu1 %vm6537_vm11, %v6492_v43  ;;  %v14856_v35 = vsel %vm897_vm1, %v989_v47, %v18875_v61  ;;  %v3954_v43 = vmul.f32 %v18878_v0, %v18877_v53  ;;  %v8094_v34 = vunpack.i.h.bf16 %v18891_v24 }
 0x79f   : > { %9076 = vrot.lane.b32.xlu0 %v9075_v46, %s9592_s29  ;;  %v14851_v30 = vpop.permute.xlu2 %8816  ;;  %18876 = vst [vmem:[#allocation379_spill] sm:$0xff] %v14856_v35  ;;  %v1494_v13 = vmul.f32 %v18879_v4, %v13880_v14  ;;  %v14869_v32 = vsel %vm897_vm1, %v18880_v26, %v989_v47  ;;  %v18882_v46 = vld [vmem:[#allocation413_spill] sm:$0xff]  ;;  %v3644_v62 = vmul.f32 %v18883_v7, %v18732_v15  ;;  %v18887_v47 = vld [vmem:[#allocation399_spill] sm:$0xff] }
 0x7a0   : > { %v14862_v59 = vpop.permute.xlu1 %8766  ;;  %18881 = vst [vmem:[#allocation426_spill] sm:$0xff] %v14869_v32  ;;  %v3318_v17 = vmul.f32 %v18882_v46, %v14856_v35  ;;  %v3953_v61 = vmul.f32 %v18886_v12, %v18885_v10  ;;  %v6246_v0 = vsel %vm6221_vm7, %v6181_v51, %v8718_v37  ;;  %v6247_v14 = vsel %vm6221_vm7, %v6182_v22, %v8719_v41  ;;  %v18889_v37 = vld [vmem:[#allocation486_spill] sm:$0xff]  ;;  %v18890_v22 = vld [vmem:[#allocation60_spill] sm:$0xff] }
 0x7a1   : > { %v14875_v36 = vpop.permute.xlu0 %8866  ;;  %v6663_v4 = vadd.f32 %v14546_v63, %v6662_v3  ;;  %v3317_v26 = vmul.f32 %v18887_v47, %v14869_v32  ;;  %v8995_v23 = vpack.i.bf16 %v3644_v62, %v3643_v55  ;;  %v6311_v46 = vsel %vm6286_vm8, %v6246_v0, %v8723_v40 }
 0x7a2   : > { %18884 = vst [vmem:[#allocation369_spill] sm:$0xff] %v14875_v36  ;;  %v6312_v6 = vsel %vm6286_vm8, %v6247_v14, %v8724_v2  ;;  %v8990_v1 = vpack.i.bf16 %v3954_v43, %v3953_v61  ;;  %v8728_v12 = vunpack.i.l.bf16 %v18888_v5  ;;  %v1495_v41 = vmul.f32 %v18890_v22, %v18889_v37  ;;  %v18892_v5 = vld [vmem:[#allocation112_spill] sm:$0xff]  ;;  %v18893_v14 = vld [vmem:[#allocation437_spill] sm:$0xff] }
 0x7a3   : > { %v6664_v7 = vpop.f32.mrf.mxu1  ;;  %v9090_v3 = vpack.i.bf16 %v3318_v17, %v3317_v26  ;;  %v8093_v55 = vunpack.i.l.bf16 %v18891_v24  ;;  %v6377_v40 = vsel %vm6351_vm9, %v6312_v6, %v8729_v50  ;;  %v6813_v43 = vmax.f32 %v6663_v4, 0.0  ;;  %v18895_v26 = vld [vmem:[#allocation284_spill] sm:$0xff] }
 0x7a4   : > { %v6665_v51 = vadd.f32 %v14546_v63, %v6664_v7  ;;  %v6376_v2 = vsel %vm6351_vm9, %v6311_v46, %v8728_v12  ;;  %v8254_v61 = vunpack.i.h.bf16 %v18892_v5  ;;  %v8253_v0 = vunpack.i.l.bf16 %v18892_v5  ;;  %v18896_v7 = vld [vmem:[#allocation159_spill] sm:$0xff]  ;;  %v18930_v36 = vld [vmem:[#allocation136_spill] sm:$0xff] }
 0x7a5   : > { %8996 = vrot.lane.b32.xlu2 %v8995_v23, %s9594_s21  ;;  %v8734_v17 = vunpack.i.h.bf16 %v18893_v14  ;;  %v8733_v47 = vunpack.i.l.bf16 %v18893_v14  ;;  %v18894_v23 = vld [vmem:[#allocation428_spill] sm:$0xff]  ;;  %v8739_v6 = vunpack.i.h.bf16 %v14764_v56  ;;  %v8738_v50 = vunpack.i.l.bf16 %v14764_v56 }
 0x7a6   : > { %v6814_v62 = vmax.f32 %v6665_v51, 0.0  ;;  %8991 = vrot.lane.b32.xlu1 %v8990_v1, %s9596_s27  ;;  %v2669_v46 = vmul.f32 %v18895_v26, %v18894_v23  ;;  %v18897_v51 = vld [vmem:[#allocation421_spill] sm:$0xff]  ;;  %v18899_v14 = vrot.slane %v18870_v60, 7  ;;  %v18900_v26 = vrot.slane %v18849_v16, 7 }
 0x7a7   : > { %9091 = vrot.lane.b32.xlu0 %v9090_v3, %s9597_s30  ;;  %v14902_v24 = vpop.permute.xlu2 %8831  ;;  %v3327_v37 = vmul.f32 %v18897_v51, %v14840_v48  ;;  %v6441_v3 = vsel %vm6416_vm10, %v6376_v2, %v8733_v47  ;;  %v6442_v5 = vsel %vm6416_vm10, %v6377_v40, %v8734_v17  ;;  %v18902_v23 = vld [vmem:[#allocation489_spill] sm:$0xff]  ;;  %v5989_v12 = vsel %vm5961_vm3, %v1495_v41, %v8094_v34  ;;  %v18904_v2 = vld [vmem:[#allocation412_spill] sm:$0xff] }
 0x7a8   : > { %v14908_v1 = vpop.permute.xlu1 %8781  ;;  %v6874_v4 = vpack.c.bf16 %v6814_v62, %v6813_v43  ;;  %v14922_v56 = vsel %vm897_vm1, %v18900_v26, %v18899_v14  ;;  %v18903_v43 = vld [vmem:[#allocation276_spill] sm:$0xff]  ;;  %v5988_v51 = vsel %vm5961_vm3, %v1494_v13, %v8093_v55  ;;  %v6054_v17 = vsel %vm6026_vm4, %v5989_v12, %v8254_v61  ;;  %v18908_v12 = vld [vmem:[#allocation103_spill] sm:$0xff] }
 0x7a9   : > { %v14913_v22 = vpop.permute.xlu0 %8881  ;;  %18901 = vst [vmem:[#allocation316_spill] sm:$0xff] %v14922_v56  ;;  %v2668_v62 = vmul.f32 %v18903_v43, %v18902_v23  ;;  %v3328_v47 = vmul.f32 %v18904_v2, %v14922_v56  ;;  %v6053_v40 = vsel %vm6026_vm4, %v5988_v51, %v8253_v0  ;;  %v9010_v14 = vpack.i.bf16 %v18753_v21, %v18750_v42  ;;  %v18905_v0 = vld [vmem:[#allocation299_spill] sm:$0xff]  ;;  %v18906_v51 = vld [vmem:[#allocation77_spill] sm:$0xff]  ;;  %v18911_v42 = vld [vmem:[#allocation504_spill] sm:$0xff] }
 0x7aa   : > { %18898 = vst [vmem:[#allocation306_spill] sm:$0xff] %v14913_v22  ;;  %7832 = vmatmul.msk.bf16.gmra.mxu2 %vm5961_vm3, %v6874_v4  ;;  %v6119_v43 = vsel %vm6091_vm5, %v6054_v17, %v8739_v6  ;;  %v6118_v34 = vsel %vm6091_vm5, %v6053_v40, %v8738_v50  ;;  %v6493_v41 = vpack.c.bf16 %v6442_v5, %v6441_v3  ;;  %v8744_v55 = vunpack.i.h.bf16 %v14612_v19  ;;  %v18909_v2 = vld [vmem:[#allocation89_spill] sm:$0xff]  ;;  %v18916_v17 = vld [vmem:[#allocation340_spill] sm:$0xff] }
 0x7ab   : > { %v6667_v22 = vpop.f32.mrf.mxu1  ;;  %v9005_v26 = vpack.i.bf16 %v2669_v46, %v2668_v62  ;;  %v9105_v13 = vpack.i.bf16 %v3328_v47, %v3327_v37  ;;  %v8743_v4 = vunpack.i.l.bf16 %v14612_v19  ;;  %v14942_v61 = vmul.f32 %v18906_v51, %v18905_v0  ;;  %v18914_v37 = vld [vmem:[#allocation125_spill] sm:$0xff]  ;;  %v18917_v51 = vld [vmem:[#allocation342_spill] sm:$0xff] }
 0x7ac   : > { %v14946_v21 = vmul.f32 %v18909_v2, %v18908_v12  ;;  %v18912_v46 = vrot.slane %v18911_v42, 7  ;;  %v18913_v6 = vrot.slane %v18896_v7, 7  ;;  %v6184_v19 = vsel %vm6156_vm6, %v6119_v43, %v8744_v55  ;;  %v18918_v2 = vld [vmem:[#allocation429_spill] sm:$0xff] }
 0x7ad   : > { %9011 = vrot.lane.b32.xlu2 %v9010_v14, %s9593_s16  ;;  %18907 = vst [vmem:[#allocation28_spill] sm:$0xff] %v14942_v61  ;;  %v6183_v5 = vsel %vm6156_vm6, %v6118_v34, %v8743_v4  ;;  %v8754_v62 = vunpack.i.h.bf16 %v14808_v49  ;;  %v8753_v47 = vunpack.i.l.bf16 %v14808_v49  ;;  %v2993_v14 = vmul.f32 %v18916_v17, %v18885_v10  ;;  %v18919_v34 = vld [vmem:[#allocation90_spill] sm:$0xff]  ;;  %v18921_v49 = vld [vmem:[#allocation105_spill] sm:$0xff]  ;;  %v18925_v10 = vld [vmem:[#allocation167_spill] sm:$0xff] }
 0x7ae   : > { %18910 = vst [vmem:[#allocation156_spill] sm:$0xff] %v14946_v21  ;;  %v14953_v50 = vsel %vm897_vm1, %v18913_v6, %v18912_v46  ;;  %9006 = vrot.lane.b32.xlu1 %v9005_v26, %s9592_s29  ;;  %7809 = vmatmul.msk.bf16.gmra.mxu1 %vm6537_vm11, %v6493_v41  ;;  %v2994_v26 = vmul.f32 %v18917_v51, %v18877_v53  ;;  %v8749_v41 = vunpack.i.h.bf16 %v18918_v2  ;;  %v8748_v43 = vunpack.i.l.bf16 %v18918_v2  ;;  %v18922_v46 = vld [vmem:[#allocation509_spill] sm:$0xff]  ;;  %v18923_v6 = vld [vmem:[#allocation59_spill] sm:$0xff]  ;;  %v18927_v53 = vld [vmem:[#allocation494_spill] sm:$0xff] }
 0x7af   : > { %9106 = vrot.lane.b32.xlu0 %v9105_v13, %s9597_s30  ;;  %v14963_v40 = vpop.permute.xlu2 %8846  ;;  %v14975_v4 = vmul.f32 %v18919_v34, %v14953_v50  ;;  %v1496_v3 = vmul.f32 %v18923_v6, %v18922_v46  ;;  %v18924_v23 = vld [vmem:[#allocation521_spill] sm:$0xff]  ;;  %v18928_v51 = vld [vmem:[#allocation47_spill] sm:$0xff]  ;;  %v6668_v34 = vadd.f32 %v14546_v63, %v6667_v22  ;;  %v18931_v22 = vld [vmem:[#allocation474_spill] sm:$0xff] }
 0x7b0   : > { %18915 = vst [vmem:[#allocation443_spill] sm:$0xff] %v14963_v40  ;;  %v14971_v55 = vpop.permute.xlu1 %8796  ;;  %v3967_v17 = vmul.f32 %v18925_v10, %v18924_v23  ;;  %v1497_v61 = vmul.f32 %v18928_v51, %v18927_v53  ;;  %v6248_v2 = vsel %vm6221_vm7, %v6183_v5, %v8748_v43  ;;  %v6249_v42 = vsel %vm6221_vm7, %v6184_v19, %v8749_v41 }
 0x7b1   : > { %18920 = vst [vmem:[#allocation246_spill] sm:$0xff] %v14975_v4  ;;  %v14982_v21 = vpop.permute.xlu0 %8896  ;;  %v18929_v4 = vld [vmem:[#allocation215_spill] sm:$0xff]  ;;  %v6313_v28 = vsel %vm6286_vm8, %v6248_v2, %v8753_v47  ;;  %v6314_v46 = vsel %vm6286_vm8, %v6249_v42, %v8754_v62  ;;  %v9025_v10 = vpack.i.bf16 %v18732_v15, %v18740_v20  ;;  %v8759_v53 = vunpack.i.h.bf16 %v14657_v57  ;;  %v18934_v2 = vld [vmem:[#allocation320_spill] sm:$0xff] }
 0x7b2   : > { %18926 = vst [vmem:[#allocation183_spill] sm:$0xff] %v14982_v21  ;;  %v3968_v13 = vmul.f32 %v18930_v36, %v18929_v4  ;;  %v9020_v21 = vpack.i.bf16 %v2994_v26, %v2993_v14  ;;  %v8758_v5 = vunpack.i.l.bf16 %v14657_v57  ;;  %v3636_v41 = vmul.f32 %v18931_v22, %v18823_v18  ;;  %v18932_v36 = vld [vmem:[#allocation210_spill] sm:$0xff]  ;;  %v18938_v22 = vld [vmem:[#allocation40_spill] sm:$0xff]  ;;  %v18942_v4 = vld [vmem:[#allocation209_spill] sm:$0xff] }
 0x7b3   : > { %v6669_v6 = vpop.f32.mrf.mxu1  ;;  %v8099_v51 = vunpack.i.h.bf16 %v18932_v36  ;;  %v8098_v47 = vunpack.i.l.bf16 %v18932_v36  ;;  %v6379_v15 = vsel %vm6351_vm9, %v6314_v46, %v8759_v53  ;;  %v6815_v20 = vmax.f32 %v6668_v34, 0.0  ;;  %v18933_v57 = vld [vmem:[#allocation374_spill] sm:$0xff]  ;;  %v18939_v36 = vld [vmem:[#allocation457_spill] sm:$0xff] }
 0x7b4   : > { %v6670_v19 = vadd.f32 %v14546_v63, %v6669_v6  ;;  %v9120_v43 = vpack.i.bf16 %v3968_v13, %v3967_v17  ;;  %v6378_v42 = vsel %vm6351_vm9, %v6313_v28, %v8758_v5  ;;  %v8259_v14 = vunpack.i.h.bf16 %v18933_v57  ;;  %v18936_v28 = vld [vmem:[#allocation362_spill] sm:$0xff]  ;;  %v18937_v5 = vld [vmem:[#allocation291_spill] sm:$0xff] }
 0x7b5   : > { %9026 = vrot.lane.b32.xlu2 %v9025_v10, %s9593_s16  ;;  %v8258_v26 = vunpack.i.l.bf16 %v18933_v57  ;;  %v8764_v13 = vunpack.i.h.bf16 %v18934_v2  ;;  %v8763_v17 = vunpack.i.l.bf16 %v18934_v2  ;;  %v3004_v10 = vmul.f32 %v18936_v28, %v18807_v33  ;;  %v18941_v33 = vld [vmem:[#allocation207_spill] sm:$0xff] }
 0x7b6   : > { %v6816_v62 = vmax.f32 %v6670_v19, 0.0  ;;  %9021 = vrot.lane.b32.xlu1 %v9020_v21, %s9595_s23  ;;  %v8769_v34 = vunpack.i.h.bf16 %v14862_v59  ;;  %v8768_v46 = vunpack.i.l.bf16 %v14862_v59  ;;  %v2683_v19 = vmul.f32 %v18937_v5, %v14922_v56 }
 0x7b7   : > { %9121 = vrot.lane.b32.xlu0 %v9120_v43, %s9596_s27  ;;  %v15011_v6 = vpop.permute.xlu2 %8861  ;;  %v3635_v57 = vmul.f32 %v18939_v36, %v18938_v22  ;;  %v6443_v43 = vsel %vm6416_vm10, %v6378_v42, %v8763_v17  ;;  %v6444_v23 = vsel %vm6416_vm10, %v6379_v15, %v8764_v13  ;;  %v17422_v28 = vrot.slane %v18941_v33, 7 }
 0x7b8   : > { %18935 = vst [vmem:[#allocation487_spill] sm:$0xff] %v15011_v6  ;;  %v15017_v21 = vpop.permute.xlu1 %8811  ;;  %v6875_v53 = vpack.c.bf16 %v6816_v62, %v6815_v20  ;;  %v18943_v6 = vld [vmem:[#allocation351_spill] sm:$0xff]  ;;  %v5991_v40 = vsel %vm5961_vm3, %v1497_v61, %v8099_v51  ;;  %v5990_v20 = vsel %vm5961_vm3, %v1496_v3, %v8098_v47  ;;  %v18944_v62 = vld [vmem:[#allocation286_spill] sm:$0xff]  ;;  %v18945_v61 = vrot.slane %v18914_v37, 7 }
 0x7b9   : > { %v15023_v2 = vpop.permute.xlu0 %8911  ;;  %v3003_v59 = vmul.f32 %v18943_v6, %v18942_v4  ;;  %v2682_v5 = vmul.f32 %v18944_v62, %v14840_v48  ;;  %v9040_v36 = vpack.i.bf16 %v3636_v41, %v3635_v57  ;;  %v6056_v56 = vsel %vm6026_vm4, %v5991_v40, %v8259_v14  ;;  %v18967_v48 = vld [vmem:[#allocation402_spill] sm:$0xff]  ;;  %v18970_v37 = vld [vmem:[#allocation27_spill] sm:$0xff] }
 0x7ba   : > { %18940 = vst [vmem:[#allocation433_spill] sm:$0xff] %v15023_v2  ;;  %7833 = vmatmul.msk.bf16.gmra.mxu2 %vm5961_vm3, %v6875_v53  ;;  %v6055_v42 = vsel %vm6026_vm4, %v5990_v20, %v8258_v26  ;;  %v6121_v17 = vsel %vm6091_vm5, %v6056_v56, %v8769_v34  ;;  %v6494_v6 = vpack.c.bf16 %v6444_v23, %v6443_v43  ;;  %v18946_v3 = vrot.slane %v18870_v60, 7  ;;  %v18952_v34 = vld [vmem:[#allocation483_spill] sm:$0xff] }
 0x7bb   : > { %v6672_v15 = vpop.f32.mrf.mxu1  ;;  %v9035_v13 = vpack.i.bf16 %v3004_v10, %v3003_v59  ;;  %v6120_v4 = vsel %vm6091_vm5, %v6055_v42, %v8768_v46  ;;  %v9135_v47 = vpack.i.bf16 %v2683_v19, %v2682_v5  ;;  %v8774_v41 = vunpack.i.h.bf16 %v14713_v27  ;;  %v18956_v5 = vld [vmem:[#allocation517_spill] sm:$0xff] }
 0x7bc   : > { %v15044_v51 = vsel %vm897_vm1, %v18946_v3, %v18945_v61  ;;  %v8773_v40 = vunpack.i.l.bf16 %v14713_v27  ;;  %v18948_v14 = vrot.slane %v18921_v49, 7  ;;  %v18949_v56 = vmov %v18945_v61  ;;  %v18960_v3 = vld [vmem:[#allocation377_spill] sm:$0xff] }
 0x7bd   : > { %18947 = vst [vmem:[#allocation435_spill] sm:$0xff] %v15044_v51  ;;  %9041 = vrot.lane.b32.xlu2 %v9040_v36, %s9594_s21  ;;  %v3645_v46 = vmul.f32 %v18952_v34, %v18736_v29  ;;  %v6186_v27 = vsel %vm6156_vm6, %v6121_v17, %v8774_v41  ;;  %v8784_v19 = vunpack.i.h.bf16 %v14908_v1  ;;  %v8783_v57 = vunpack.i.l.bf16 %v14908_v1  ;;  %v18957_v36 = vld [vmem:[#allocation111_spill] sm:$0xff]  ;;  %v18959_v1 = vld [vmem:[#allocation177_spill] sm:$0xff] }
 0x7be   : > { %v15054_v23 = vsel %vm897_vm1, %v18949_v56, %v18948_v14  ;;  %v18951_v26 = vmov %v18948_v14  ;;  %9036 = vrot.lane.b32.xlu1 %v9035_v13, %s9595_s23  ;;  %7810 = vmatmul.msk.bf16.gmra.mxu1 %vm6537_vm11, %v6494_v6  ;;  %v6185_v53 = vsel %vm6156_vm6, %v6120_v4, %v8773_v40  ;;  %v18954_v59 = vrot.slane %v18896_v7, 7  ;;  %v18958_v13 = vld [vmem:[#allocation492_spill] sm:$0xff]  ;;  %v18962_v40 = vld [vmem:[#allocation403_spill] sm:$0xff]  ;;  %v18963_v56 = vld [vmem:[#allocation473_spill] sm:$0xff] }
 0x7bf   : > { %18950 = vst [vmem:[#allocation386_spill] sm:$0xff] %v15054_v23  ;;  %v15061_v10 = vsel %vm897_vm1, %v18951_v26, %v17422_v28  ;;  %9136 = vrot.lane.b32.xlu0 %v9135_v47, %s9592_s29  ;;  %v15072_v43 = vpop.permute.xlu2 %8876  ;;  %v18955_v20 = vrot.slane %v18865_v54, 7  ;;  %v3955_v42 = vmul.f32 %v18957_v36, %v18956_v5  ;;  %v8779_v17 = vunpack.i.h.bf16 %v18958_v13  ;;  %v18961_v47 = vld [vmem:[#allocation64_spill] sm:$0xff] }
 0x7c0   : > { %18953 = vst [vmem:[#allocation307_spill] sm:$0xff] %v15072_v43  ;;  %v8778_v4 = vunpack.i.l.bf16 %v18958_v13  ;;  %v15085_v6 = vpop.permute.xlu1 %8826  ;;  %v1498_v41 = vmul.f32 %v18961_v47, %v18960_v3  ;;  %v3646_v26 = vmul.f32 %v18963_v56, %v18824_v39  ;;  %v6673_v61 = vadd.f32 %v14546_v63, %v6672_v15 }
 0x7c1   : > { %v15079_v62 = vsel %vm897_vm1, %v18955_v20, %v18954_v59  ;;  %v15094_v34 = vpop.permute.xlu0 %8926  ;;  %v18965_v59 = vld [vmem:[#allocation247_spill] sm:$0xff]  ;;  %v18966_v20 = vld [vmem:[#allocation80_spill] sm:$0xff]  ;;  %v6251_v28 = vsel %vm6221_vm7, %v6186_v27, %v8779_v17  ;;  %v3320_v3 = vmul.f32 %v18967_v48, %v14953_v50  ;;  %v8104_v43 = vunpack.i.h.bf16 %v18970_v37 }
 0x7c2   : > { %v3319_v14 = vmul.f32 %v18962_v40, %v15079_v62  ;;  %18964 = vst [vmem:[#allocation309_spill] sm:$0xff] %v15094_v34  ;;  %v3956_v36 = vmul.f32 %v18966_v20, %v18965_v59  ;;  %v6250_v13 = vsel %vm6221_vm7, %v6185_v53, %v8778_v4  ;;  %v9055_v47 = vpack.i.bf16 %v3646_v26, %v3645_v46  ;;  %v18968_v4 = vld [vmem:[#allocation434_spill] sm:$0xff]  ;;  %v18969_v27 = vld [vmem:[#allocation63_spill] sm:$0xff] }
 0x7c3   : > { %v6315_v40 = vsel %vm6286_vm8, %v6250_v13, %v8783_v57  ;;  %v6316_v2 = vsel %vm6286_vm8, %v6251_v28, %v8784_v19  ;;  %v6674_v56 = vpop.f32.mrf.mxu1  ;;  %v8789_v34 = vunpack.i.h.bf16 %v14758_v38  ;;  %v8788_v20 = vunpack.i.l.bf16 %v14758_v38  ;;  %v18971_v38 = vld [vmem:[#allocation110_spill] sm:$0xff] }
 0x7c4   : > { %v9050_v49 = vpack.i.bf16 %v3956_v36, %v3955_v42  ;;  %v6675_v53 = vadd.f32 %v14546_v63, %v6674_v56  ;;  %v1499_v17 = vmul.f32 %v18969_v27, %v18968_v4  ;;  %v9150_v15 = vpack.i.bf16 %v3320_v3, %v3319_v14  ;;  %v18972_v36 = vld [vmem:[#allocation498_spill] sm:$0xff]  ;;  %v18973_v3 = vld [vmem:[#allocation279_spill] sm:$0xff] }
 0x7c5   : > { %v8103_v48 = vunpack.i.l.bf16 %v18970_v37  ;;  %9056 = vrot.lane.b32.xlu2 %v9055_v47, %s9594_s21  ;;  %v6380_v28 = vsel %vm6351_vm9, %v6315_v40, %v8788_v20  ;;  %v6381_v46 = vsel %vm6351_vm9, %v6316_v2, %v8789_v34  ;;  %v6817_v19 = vmax.f32 %v6673_v61, 0.0 }
 0x7c6   : > { %v6818_v57 = vmax.f32 %v6675_v53, 0.0  ;;  %9051 = vrot.lane.b32.xlu1 %v9050_v49, %s9596_s27  ;;  %v8264_v42 = vunpack.i.h.bf16 %v18971_v38  ;;  %v8263_v26 = vunpack.i.l.bf16 %v18971_v38  ;;  %v8794_v14 = vunpack.i.h.bf16 %v18972_v36  ;;  %v18976_v53 = vld [vmem:[#allocation424_spill] sm:$0xff] }
 0x7c7   : > { %v8793_v13 = vunpack.i.l.bf16 %v18972_v36  ;;  %9151 = vrot.lane.b32.xlu0 %v9150_v15, %s9597_s30  ;;  %v15121_v37 = vpop.permute.xlu2 %8891  ;;  %v2671_v47 = vmul.f32 %v18973_v3, %v14673_v25  ;;  %v8799_v2 = vunpack.i.h.bf16 %v14971_v55  ;;  %v8798_v61 = vunpack.i.l.bf16 %v14971_v55  ;;  %v18977_v55 = vld [vmem:[#allocation372_spill] sm:$0xff]  ;;  %v18978_v36 = vld [vmem:[#allocation50_spill] sm:$0xff] }
 0x7c8   : > { %v15127_v49 = vpop.permute.xlu1 %8841  ;;  %v6876_v34 = vpack.c.bf16 %v6818_v57, %v6817_v19  ;;  %v18974_v40 = vrot.slane %v18959_v1, 7  ;;  %v18975_v56 = vrot.slane %v18941_v33, 7  ;;  %v3330_v4 = vmul.f32 %v18976_v53, %v15054_v23  ;;  %v18979_v19 = vld [vmem:[#allocation274_spill] sm:$0xff] }
 0x7c9   : > { %v15138_v27 = vpop.permute.xlu0 %8941  ;;  %v6445_v15 = vsel %vm6416_vm10, %v6380_v28, %v8793_v13  ;;  %v6446_v38 = vsel %vm6416_vm10, %v6381_v46, %v8794_v14  ;;  %v15144_v3 = vmul.f32 %v18978_v36, %v18977_v55  ;;  %v2670_v57 = vmul.f32 %v18979_v19, %v14662_v58 }
 0x7ca   : > { %v15134_v20 = vsel %vm897_vm1, %v18975_v56, %v18974_v40  ;;  %v5993_v25 = vsel %vm5961_vm3, %v1499_v17, %v8104_v43  ;;  %v5992_v40 = vsel %vm5961_vm3, %v1498_v41, %v8103_v48  ;;  %7834 = vmatmul.msk.bf16.gmra.mxu2 %vm5961_vm3, %v6876_v34  ;;  %v18980_v56 = vld [vmem:[#allocation411_spill] sm:$0xff]  ;;  %v9070_v13 = vpack.i.bf16 %v18823_v18, %v18938_v22  ;;  %v18981_v41 = vld [vmem:[#allocation373_spill] sm:$0xff]  ;;  %v18982_v48 = vld [vmem:[#allocation68_spill] sm:$0xff] }
 0x7cb   : > { %v3329_v53 = vmul.f32 %v18980_v56, %v15044_v51  ;;  %v6058_v28 = vsel %vm6026_vm4, %v5993_v25, %v8264_v42  ;;  %v6057_v46 = vsel %vm6026_vm4, %v5992_v40, %v8263_v26  ;;  %v6677_v14 = vpop.f32.mrf.mxu1  ;;  %v9065_v55 = vpack.i.bf16 %v2671_v47, %v2670_v57  ;;  %v18983_v42 = vld [vmem:[#allocation425_spill] sm:$0xff]  ;;  %v18984_v26 = vld [vmem:[#allocation67_spill] sm:$0xff]  ;;  %v18986_v47 = vld [vmem:[#allocation54_spill] sm:$0xff] }
 0x7cc   : > { %v6123_v36 = vsel %vm6091_vm5, %v6058_v28, %v8799_v2  ;;  %v6122_v43 = vsel %vm6091_vm5, %v6057_v46, %v8798_v61  ;;  %v6495_v17 = vpack.c.bf16 %v6446_v38, %v6445_v15  ;;  %v15161_v34 = vmul.f32 %v18982_v48, %v18981_v41  ;;  %v18985_v22 = vld [vmem:[#allocation365_spill] sm:$0xff]  ;;  %v18987_v61 = vld [vmem:[#allocation139_spill] sm:$0xff]  ;;  %v18988_v15 = vld [vmem:[#allocation72_spill] sm:$0xff] }
 0x7cd   : > { %v9165_v19 = vpack.i.bf16 %v3330_v4, %v3329_v53  ;;  %v8804_v56 = vunpack.i.h.bf16 %v14802_v11  ;;  %v8803_v25 = vunpack.i.l.bf16 %v14802_v11  ;;  %9071 = vrot.lane.b32.xlu2 %v9070_v13, %s9593_s16  ;;  %v15168_v18 = vmul.f32 %v18984_v26, %v18983_v42  ;;  %v18989_v28 = vld [vmem:[#allocation310_spill] sm:$0xff] }
 0x7ce   : > { %v15172_v2 = vmul.f32 %v18986_v47, %v18985_v22  ;;  %v15176_v38 = vmul.f32 %v18988_v15, %v18987_v61  ;;  %9066 = vrot.lane.b32.xlu1 %v9065_v55, %s9592_s29  ;;  %7811 = vmatmul.msk.bf16.gmra.mxu1 %vm6537_vm11, %v6495_v17  ;;  %v8814_v57 = vunpack.i.h.bf16 %v15017_v21  ;;  %v8813_v40 = vunpack.i.l.bf16 %v15017_v21  ;;  %v18990_v46 = vld [vmem:[#allocation70_spill] sm:$0xff]  ;;  %v18991_v55 = vld [vmem:[#allocation353_spill] sm:$0xff] }
 0x7cf   : > { %v6188_v11 = vsel %vm6156_vm6, %v6123_v36, %v8804_v56  ;;  %v6187_v4 = vsel %vm6156_vm6, %v6122_v43, %v8803_v25  ;;  %9166 = vrot.lane.b32.xlu0 %v9165_v19, %s9597_s30  ;;  %v15185_v53 = vpop.permute.xlu2 %8906  ;;  %v15189_v13 = vmul.f32 %v18990_v46, %v18989_v28  ;;  %v2995_v41 = vmul.f32 %v18991_v55, %v18956_v5  ;;  %v18992_v48 = vld [vmem:[#allocation446_spill] sm:$0xff]  ;;  %v18994_v19 = vld [vmem:[#allocation163_spill] sm:$0xff] }
 0x7d0   : > { %v8809_v17 = vunpack.i.h.bf16 %v14686_v45  ;;  %v8808_v36 = vunpack.i.l.bf16 %v14686_v45  ;;  %v15195_v43 = vpop.permute.xlu1 %8856  ;;  %v18993_v56 = vld [vmem:[#allocation58_spill] sm:$0xff]  ;;  %v18995_v25 = vld [vmem:[#allocation75_spill] sm:$0xff] }
 0x7d1   : > { %v15199_v21 = vmul.f32 %v18993_v56, %v18992_v48  ;;  %v15203_v42 = vmul.f32 %v18995_v25, %v18994_v19  ;;  %v18996_v26 = vld [vmem:[#allocation298_spill] sm:$0xff]  ;;  %v18998_v5 = vld [vmem:[#allocation511_spill] sm:$0xff]  ;;  %v15211_v15 = vpop.permute.xlu0 %8956  ;;  %v9085_v48 = vpack.i.bf16 %v18824_v39, %v18736_v29  ;;  %v19000_v56 = vld [vmem:[#allocation420_spill] sm:$0xff] }
 0x7d2   : > { %v15207_v22 = vmul.f32 %v18996_v26, %v15044_v51  ;;  %v18997_v47 = vld [vmem:[#allocation422_spill] sm:$0xff]  ;;  %v18999_v45 = vld [vmem:[#allocation343_spill] sm:$0xff]  ;;  %v6252_v46 = vsel %vm6221_vm7, %v6187_v4, %v8808_v36  ;;  %v6253_v55 = vsel %vm6221_vm7, %v6188_v11, %v8809_v17  ;;  %v19001_v19 = vld [vmem:[#allocation172_spill] sm:$0xff]  ;;  %v8819_v4 = vunpack.i.h.bf16 %v14851_v30 }
 0x7d3   : > { %v3969_v61 = vmul.f32 %v18998_v5, %v18997_v47  ;;  %v2996_v28 = vmul.f32 %v18999_v45, %v18965_v59  ;;  %v3970_v25 = vmul.f32 %v19001_v19, %v19000_v56  ;;  %v6317_v26 = vsel %vm6286_vm8, %v6252_v46, %v8813_v40  ;;  %v6679_v58 = vpop.f32.mrf.mxu1  ;;  %v19002_v59 = vld [vmem:[#allocation464_spill] sm:$0xff]  ;;  %v19003_v29 = vld [vmem:[#allocation229_spill] sm:$0xff] }
 0x7d4   : > { %v6318_v51 = vsel %vm6286_vm8, %v6253_v55, %v8814_v57  ;;  %v6678_v5 = vadd.f32 %v14546_v63, %v6677_v14  ;;  %v3637_v45 = vmul.f32 %v19002_v59, %v18869_v44  ;;  %v8818_v11 = vunpack.i.l.bf16 %v14851_v30  ;;  %v19004_v57 = vld [vmem:[#allocation116_spill] sm:$0xff] }
 0x7d5   : > { %v9080_v33 = vpack.i.bf16 %v2996_v28, %v2995_v41  ;;  %v9180_v17 = vpack.i.bf16 %v3970_v25, %v3969_v61  ;;  %v8109_v39 = vunpack.i.h.bf16 %v19003_v29  ;;  %v8108_v36 = vunpack.i.l.bf16 %v19003_v29  ;;  %9086 = vrot.lane.b32.xlu2 %v9085_v48, %s9593_s16  ;;  %v19006_v25 = vld [vmem:[#allocation354_spill] sm:$0xff] }
 0x7d6   : > { %v6680_v40 = vadd.f32 %v14546_v63, %v6679_v58  ;;  %v8269_v14 = vunpack.i.h.bf16 %v19004_v57  ;;  %v8268_v41 = vunpack.i.l.bf16 %v19004_v57  ;;  %v6382_v28 = vsel %vm6351_vm9, %v6317_v26, %v8818_v11  ;;  %v19005_v58 = vld [vmem:[#allocation352_spill] sm:$0xff] }
 0x7d7   : > { %v6383_v46 = vsel %vm6351_vm9, %v6318_v51, %v8819_v4  ;;  %9081 = vrot.lane.b32.xlu1 %v9080_v33, %s9595_s23  ;;  %v8824_v30 = vunpack.i.h.bf16 %v14723_v8  ;;  %v8823_v61 = vunpack.i.l.bf16 %v14723_v8  ;;  %v6819_v55 = vmax.f32 %v6678_v5, 0.0  ;;  %9181 = vrot.lane.b32.xlu0 %v9180_v17, %s9596_s27  ;;  %v15240_v63 = vpop.permute.xlu2 %8921  ;;  %v19007_v8 = vld [vmem:[#allocation460_spill] sm:$0xff] }
 0x7d8   : > { %v6820_v19 = vmax.f32 %v6680_v40, 0.0  ;;  %v3005_v48 = vmul.f32 %v19005_v58, %v18855_v9  ;;  %v3006_v26 = vmul.f32 %v19006_v25, %v18852_v52  ;;  %v8829_v51 = vunpack.i.h.bf16 %v15085_v6  ;;  %v15248_v59 = vpop.permute.xlu1 %8871  ;;  %v19009_v9 = vld [vmem:[#allocation371_spill] sm:$0xff]  ;;  %v19010_v40 = vld [vmem:[#allocation74_spill] sm:$0xff]  ;;  %v19011_v52 = vld [vmem:[#allocation225_spill] sm:$0xff] }
 0x7d9   : > { %v8828_v33 = vunpack.i.l.bf16 %v15085_v6  ;;  %v3638_v5 = vmul.f32 %v19007_v8, %v18865_v54  ;;  %v15252_v4 = vpop.permute.xlu0 %8971  ;;  %v6447_v17 = vsel %vm6416_vm10, %v6382_v28, %v8823_v61  ;;  %v6448_v29 = vsel %vm6416_vm10, %v6383_v46, %v8824_v30  ;;  %v19012_v58 = vld [vmem:[#allocation62_spill] sm:$0xff]  ;;  %v768_v6 = vpop.f32.mrf.mxu3 }
 0x7da   : > { %19008 = vst [vmem:[#allocation329_spill] sm:$0xff] %v15252_v4  ;;  %v6877_v11 = vpack.c.bf16 %v6820_v19, %v6819_v55  ;;  %v15258_v57 = vmul.f32 %v19010_v40, %v19009_v9  ;;  %v15262_v25 = vmul.f32 %v19012_v58, %v19011_v52  ;;  %v5995_v1 = vsel %vm5961_vm3, %v15161_v34, %v8109_v39  ;;  %v19013_v55 = vld [vmem:[#allocation289_spill] sm:$0xff] }
 0x7db   : > { %v5994_v8 = vsel %vm5961_vm3, %v15144_v3, %v8108_v36  ;;  %v2685_v28 = vmul.f32 %v19013_v55, %v15054_v23  ;;  %v9100_v61 = vpack.i.bf16 %v3638_v5, %v3637_v45  ;;  %v6060_v30 = vsel %vm6026_vm4, %v5995_v1, %v8269_v14  ;;  %v6682_v19 = vpop.f32.mrf.mxu1  ;;  %v9415_v3 = vld [vmem:[%s17005_s3] ss:$0 sm:$0xff]  ;;  %v19014_v14 = vld [vmem:[#allocation277_spill] sm:$0xff] }
 0x7dc   : > { %v6059_v46 = vsel %vm6026_vm4, %v5994_v8, %v8268_v41  ;;  %7835 = vmatmul.msk.bf16.gmra.mxu2 %vm5961_vm3, %v6877_v11  ;;  %v9095_v9 = vpack.i.bf16 %v3006_v26, %v3005_v48  ;;  %v6125_v40 = vsel %vm6091_vm5, %v6060_v30, %v8829_v51  ;;  %v6496_v34 = vpack.c.bf16 %v6448_v29, %v6447_v17  ;;  %v19015_v48 = vld [vmem:[#allocation73_spill] sm:$0xff]  ;;  %v19017_v29 = vld [vmem:[#allocation282_spill] sm:$0xff]  ;;  %v19020_v30 = vld [vmem:[#allocation287_spill] sm:$0xff] }
 0x7dd   : > { %v6124_v52 = vsel %vm6091_vm5, %v6059_v46, %v8828_v33  ;;  %v769_v39 = vadd.f32 %v9415_v3, %v768_v6  ;;  %v9195_v45 = vpack.i.bf16 %v2685_v28, %v15207_v22  ;;  %v8834_v36 = vunpack.i.h.bf16 %v14902_v24  ;;  %9101 = vrot.lane.b32.xlu2 %v9100_v61, %s9594_s21  ;;  %v19016_v51 = vld [vmem:[#allocation485_spill] sm:$0xff]  ;;  %v19018_v6 = vld [vmem:[#allocation203_spill] sm:$0xff]  ;;  %v19023_v3 = vld [vmem:[#allocation516_spill] sm:$0xff] }
 0x7de   : > { %v8833_v1 = vunpack.i.l.bf16 %v14902_v24  ;;  %v15284_v41 = vmul.f32 %v19014_v14, %v14856_v35  ;;  %v15288_v26 = vmul.f32 %v19015_v48, %v15079_v62  ;;  %v3648_v33 = vmul.f32 %v19016_v51, %v18870_v60  ;;  %7812 = vmatmul.msk.bf16.gmra.mxu1 %vm6537_vm11, %v6496_v34  ;;  %v19019_v8 = vld [vmem:[#allocation505_spill] sm:$0xff]  ;;  %v15328_v14 = vld [vmem:[%s17007_s5] ss:$0 sm:$0xff] }
 0x7df   : > { %9096 = vrot.lane.b32.xlu1 %v9095_v9, %s9595_s23  ;;  %v6190_v22 = vsel %vm6156_vm6, %v6125_v40, %v8834_v36  ;;  %v8844_v5 = vunpack.i.h.bf16 %v15127_v49  ;;  %v8843_v11 = vunpack.i.l.bf16 %v15127_v49  ;;  %9196 = vrot.lane.b32.xlu0 %v9195_v45, %s9592_s29  ;;  %v15299_v17 = vpop.permute.xlu2 %8936  ;;  %v15303_v58 = vmul.f32 %v19017_v29, %v15079_v62  ;;  %v19021_v40 = vld [vmem:[#allocation416_spill] sm:$0xff]  ;;  %v19022_v62 = vld [vmem:[#allocation469_spill] sm:$0xff]  ;;  %v19024_v45 = vld [vmem:[#allocation38_spill] sm:$0xff] }
 0x7e0   : > { %v6189_v24 = vsel %vm6156_vm6, %v6124_v52, %v8833_v1  ;;  %v3957_v55 = vmul.f32 %v19019_v8, %v19018_v6  ;;  %v8839_v28 = vunpack.i.h.bf16 %v14773_v31  ;;  %v8838_v61 = vunpack.i.l.bf16 %v14773_v31  ;;  %v15309_v46 = vpop.permute.xlu1 %8886  ;;  %v19025_v48 = vld [vmem:[#allocation406_spill] sm:$0xff] }
 0x7e1   : > { %v15313_v49 = vmul.f32 %v19020_v30, %v14869_v32  ;;  %v15315_v9 = vmax.f32 %v769_v39, 0.0  ;;  %v3321_v52 = vmul.f32 %v19021_v40, %v18908_v12  ;;  %v3647_v34 = vmul.f32 %v19022_v62, %v18849_v16  ;;  %v15335_v30 = vpop.permute.xlu0 %8986 }
 0x7e2   : > { %v3958_v36 = vmul.f32 %v19024_v45, %v19023_v3  ;;  %v6254_v1 = vsel %vm6221_vm7, %v6189_v24, %v8838_v61  ;;  %v6255_v31 = vsel %vm6221_vm7, %v6190_v22, %v8839_v28  ;;  %v6683_v39 = vadd.f32 %v15328_v14, %v6682_v19  ;;  %v19026_v22 = vld [vmem:[#allocation443_spill] sm:$0xff] }
 0x7e3   : > { %v3322_v12 = vmul.f32 %v19025_v48, %v18905_v0  ;;  %v9115_v51 = vpack.i.bf16 %v3648_v33, %v3647_v34  ;;  %v6319_v29 = vsel %vm6286_vm8, %v6254_v1, %v8843_v11  ;;  %v6320_v8 = vsel %vm6286_vm8, %v6255_v31, %v8844_v5  ;;  %v6684_v24 = vpop.f32.mrf.mxu1  ;;  %v19027_v0 = vld [vmem:[#allocation216_spill] sm:$0xff] }
 0x7e4   : > { %v9110_v61 = vpack.i.bf16 %v3958_v36, %v3957_v55  ;;  %v8849_v28 = vunpack.i.h.bf16 %v19026_v22  ;;  %v8848_v40 = vunpack.i.l.bf16 %v19026_v22  ;;  %v6685_v62 = vadd.f32 %v15328_v14, %v6684_v24  ;;  %v19028_v1 = vld [vmem:[#allocation296_spill] sm:$0xff]  ;;  %v19032_v22 = vld [vmem:[#allocation186_spill] sm:$0xff] }
 0x7e5   : > { %v9125_v19 = vpack.i.bf16 %v15284_v41, %v15313_v49  ;;  %v9210_v45 = vpack.i.bf16 %v3322_v12, %v3321_v52  ;;  %v8114_v33 = vunpack.i.h.bf16 %v19027_v0  ;;  %v8113_v11 = vunpack.i.l.bf16 %v19027_v0  ;;  %9116 = vrot.lane.b32.xlu2 %v9115_v51, %s9594_s21  ;;  %v19029_v41 = vld [vmem:[#allocation383_spill] sm:$0xff]  ;;  %v19031_v51 = vld [vmem:[#allocation290_spill] sm:$0xff] }
 0x7e6   : > { %v6384_v5 = vsel %vm6351_vm9, %v6319_v29, %v8848_v40  ;;  %v6385_v55 = vsel %vm6351_vm9, %v6320_v8, %v8849_v28  ;;  %v6821_v34 = vmax.f32 %v6683_v39, 0.0  ;;  %v6822_v36 = vmax.f32 %v6685_v62, 0.0  ;;  %v19033_v28 = vld [vmem:[#allocation346_spill] sm:$0xff]  ;;  %v19034_v62 = vld [vmem:[#allocation415_spill] sm:$0xff] }
 0x7e7   : > { %9111 = vrot.lane.b32.xlu1 %v9110_v61, %s9596_s27  ;;  %v8274_v31 = vunpack.i.h.bf16 %v19028_v1  ;;  %v8273_v48 = vunpack.i.l.bf16 %v19028_v1  ;;  %v8854_v49 = vunpack.i.h.bf16 %v19029_v41  ;;  %v8853_v52 = vunpack.i.l.bf16 %v19029_v41  ;;  %9211 = vrot.lane.b32.xlu0 %v9210_v45, %s9597_s30  ;;  %v15353_v12 = vpop.permute.xlu2 %8951  ;;  %v19036_v41 = vld [vmem:[#allocation348_spill] sm:$0xff] }
 0x7e8   : > { %19030 = vst [vmem:[#allocation376_spill] sm:$0xff] %v15353_v12  ;;  %v15357_v29 = vmul.f32 %v19031_v51, %v14953_v50  ;;  %v8859_v39 = vunpack.i.h.bf16 %v15195_v43  ;;  %v8858_v8 = vunpack.i.l.bf16 %v15195_v43  ;;  %v15361_v24 = vpop.permute.xlu1 %8901  ;;  %v6878_v61 = vpack.c.bf16 %v6822_v36, %v6821_v34  ;;  %v19035_v50 = vld [vmem:[#allocation510_spill] sm:$0xff] }
 0x7e9   : > { %v15365_v40 = vmul.f32 %v19033_v28, %v19032_v22  ;;  %v3331_v45 = vmul.f32 %v19034_v62, %v15061_v10  ;;  %v6449_v0 = vsel %vm6416_vm10, %v6384_v5, %v8853_v52  ;;  %v6450_v1 = vsel %vm6416_vm10, %v6385_v55, %v8854_v49  ;;  %v19037_v28 = vld [vmem:[#allocation414_spill] sm:$0xff]  ;;  %v19038_v52 = vld [vmem:[#allocation356_spill] sm:$0xff] }
 0x7ea   : > { %v15373_v51 = vmul.f32 %v19036_v41, %v19035_v50  ;;  %v2690_v43 = vrot.slane %v15315_v9, 1  ;;  %v5997_v34 = vsel %vm5961_vm3, %v15172_v2, %v8114_v33  ;;  %v5996_v36 = vsel %vm5961_vm3, %v15168_v18, %v8113_v11  ;;  %v19039_v11 = vld [vmem:[#allocation141_spill] sm:$0xff] }
 0x7eb   : > { %v3332_v23 = vmul.f32 %v19037_v28, %v15134_v20  ;;  %v6062_v62 = vsel %vm6026_vm4, %v5997_v34, %v8274_v31  ;;  %v6061_v5 = vsel %vm6026_vm4, %v5996_v36, %v8273_v48  ;;  %v6687_v55 = vpop.f32.mrf.mxu1  ;;  %v9130_v49 = vpack.i.bf16 %v18865_v54, %v18869_v44  ;;  %v19040_v31 = vld [vmem:[#allocation487_spill] sm:$0xff]  ;;  %v19041_v44 = vld [vmem:[#allocation345_spill] sm:$0xff]  ;;  %v19052_v28 = vld [vmem:[#allocation364_spill] sm:$0xff] }
 0x7ec   : > { %7836 = vmatmul.msk.bf16.gmra.mxu2 %vm5961_vm3, %v6878_v61  ;;  %v2998_v41 = vmul.f32 %v19038_v52, %v19023_v3  ;;  %v6127_v2 = vsel %vm6091_vm5, %v6062_v62, %v8859_v39  ;;  %v6126_v18 = vsel %vm6091_vm5, %v6061_v5, %v8858_v8  ;;  %v6497_v33 = vpack.c.bf16 %v6450_v1, %v6449_v0  ;;  %v15394_v61 = vpop.permute.xlu0 %9001  ;;  %v19042_v36 = vld [vmem:[#allocation215_spill] sm:$0xff] }
 0x7ed   : > { %v9225_v32 = vpack.i.bf16 %v3332_v23, %v3331_v45  ;;  %v8864_v34 = vunpack.i.h.bf16 %v19040_v31  ;;  %v8863_v48 = vunpack.i.l.bf16 %v19040_v31  ;;  %9131 = vrot.lane.b32.xlu2 %v9130_v49, %s9593_s16  ;;  %v2997_v3 = vmul.f32 %v19041_v44, %v19018_v6  ;;  %v19043_v62 = vld [vmem:[#allocation355_spill] sm:$0xff]  ;;  %v19046_v31 = vld [vmem:[#allocation358_spill] sm:$0xff] }
 0x7ee   : > { %v15404_v8 = vsel %vm1853_vm0, %v2690_v43, 0.0  ;;  %7813 = vmatmul.msk.bf16.gmra.mxu1 %vm6537_vm11, %v6497_v33  ;;  %v8874_v0 = vunpack.i.h.bf16 %v15248_v59  ;;  %v8873_v1 = vunpack.i.l.bf16 %v15248_v59  ;;  %v15417_v5 = vmul.f32 %v19043_v62, %v19042_v36  ;;  %v19047_v59 = vld [vmem:[#allocation184_spill] sm:$0xff]  ;;  %v19051_v62 = vld [vmem:[#allocation521_spill] sm:$0xff] }
 0x7ef   : > { %9126 = vrot.lane.b32.xlu1 %v9125_v19, %s9592_s29  ;;  %v6192_v23 = vsel %vm6156_vm6, %v6127_v2, %v8864_v34  ;;  %v6191_v45 = vsel %vm6156_vm6, %v6126_v18, %v8863_v48  ;;  %9226 = vrot.lane.b32.xlu0 %v9225_v32, %s9597_s30  ;;  %v15413_v6 = vpop.permute.xlu2 %8966  ;;  %v9140_v49 = vpack.i.bf16 %v2998_v41, %v2997_v3  ;;  %v19044_v19 = vld [vmem:[#allocation369_spill] sm:$0xff]  ;;  %v19045_v18 = vld [vmem:[#allocation196_spill] sm:$0xff]  ;;  %v19049_v44 = vrot.slane %v19039_v11, 1  ;;  %v19050_v41 = vld [vmem:[#allocation187_spill] sm:$0xff] }
 0x7f0   : > { %v8869_v52 = vunpack.i.h.bf16 %v19044_v19  ;;  %v8868_v33 = vunpack.i.l.bf16 %v19044_v19  ;;  %v15421_v2 = vpop.permute.xlu1 %8916  ;;  %v15425_v34 = vmul.f32 %v19046_v31, %v19045_v18  ;;  %v19048_v48 = vld [vmem:[#allocation360_spill] sm:$0xff]  ;;  %v3972_v3 = vmul.f32 %v19050_v41, %v19047_v59  ;;  %v19054_v41 = vld [vmem:[#allocation370_spill] sm:$0xff] }
 0x7f1   : > { %v15429_v32 = vmul.f32 %v19048_v48, %v19047_v59  ;;  %v2691_v36 = vsel %vm1853_vm0, %v19049_v44, %v2690_v43  ;;  %v15438_v19 = vmul.f32 %v19052_v28, %v19051_v62  ;;  %v9145_v54 = vpack.i.bf16 %v18870_v60, %v18849_v16  ;;  %v19053_v48 = vld [vmem:[#allocation154_spill] sm:$0xff]  ;;  %v19057_v62 = vld [vmem:[#allocation39_spill] sm:$0xff] }
 0x7f2   : > { %v6256_v39 = vsel %vm6221_vm7, %v6191_v45, %v8868_v33  ;;  %v6257_v31 = vsel %vm6221_vm7, %v6192_v23, %v8869_v52  ;;  %v3971_v35 = vmul.f32 %v19053_v48, %v19045_v18  ;;  %v6688_v59 = vadd.f32 %v15328_v14, %v6687_v55  ;;  %v19055_v45 = vld [vmem:[#allocation477_spill] sm:$0xff]  ;;  %v19056_v23 = vld [vmem:[#allocation307_spill] sm:$0xff]  ;;  %v19058_v55 = vld [vmem:[#allocation260_spill] sm:$0xff] }
 0x7f3   : > { %v6321_v4 = vsel %vm6286_vm8, %v6256_v39, %v8873_v1  ;;  %v6322_v43 = vsel %vm6286_vm8, %v6257_v31, %v8874_v0  ;;  %v6689_v44 = vpop.f32.mrf.mxu1  ;;  %v15450_v28 = vmul.f32 %v19054_v41, %v2691_v36  ;;  %v3639_v33 = vmul.f32 %v19055_v45, %v18896_v7  ;;  %v19059_v45 = vld [vmem:[#allocation306_spill] sm:$0xff] }
 0x7f4   : > { %v8879_v52 = vunpack.i.h.bf16 %v19056_v23  ;;  %v8878_v16 = vunpack.i.l.bf16 %v19056_v23  ;;  %v9240_v60 = vpack.i.bf16 %v3972_v3, %v3971_v35  ;;  %v8119_v18 = vunpack.i.h.bf16 %v19057_v62 }
 0x7f5   : > { %v8118_v39 = vunpack.i.l.bf16 %v19057_v62  ;;  %v6690_v0 = vadd.f32 %v15328_v14, %v6689_v44  ;;  %9146 = vrot.lane.b32.xlu2 %v9145_v54, %s9593_s16  ;;  %v8279_v1 = vunpack.i.h.bf16 %v19058_v55  ;;  %v8278_v31 = vunpack.i.l.bf16 %v19058_v55  ;;  %v15467_v62 = vpop.permute.xlu0 %9016 }
 0x7f6   : > { %v6386_v48 = vsel %vm6351_vm9, %v6321_v4, %v8878_v16  ;;  %v6387_v41 = vsel %vm6351_vm9, %v6322_v43, %v8879_v52  ;;  %v8884_v35 = vunpack.i.h.bf16 %v19059_v45  ;;  %v8883_v3 = vunpack.i.l.bf16 %v19059_v45  ;;  %19060 = vst [vmem:[#allocation315_spill] sm:$0xff] %v15467_v62  ;;  %v19062_v4 = vld [vmem:[#allocation361_spill] sm:$0xff]  ;;  %v19064_v45 = vld [vmem:[#allocation467_spill] sm:$0xff] }
 0x7f7   : > { %9141 = vrot.lane.b32.xlu1 %v9140_v49, %s9595_s23  ;;  %v6823_v23 = vmax.f32 %v6688_v59, 0.0  ;;  %v6824_v44 = vmax.f32 %v6690_v0, 0.0  ;;  %9241 = vrot.lane.b32.xlu0 %v9240_v60, %s9596_s27  ;;  %v15470_v54 = vpop.permute.xlu2 %8981  ;;  %v9255_v55 = vpack.i.bf16 %v15429_v32, %v15425_v34  ;;  %v15476_v43 = vmul.f32 %v19062_v4, %v15404_v8  ;;  %v19063_v59 = vld [vmem:[#allocation504_spill] sm:$0xff]  ;;  %v19065_v32 = vld [vmem:[#allocation367_spill] sm:$0xff] }
 0x7f8   : > { %19061 = vst [vmem:[#allocation106_spill] sm:$0xff] %v15470_v54  ;;  %v8889_v49 = vunpack.i.h.bf16 %v15309_v46  ;;  %v8888_v52 = vunpack.i.l.bf16 %v15309_v46  ;;  %v15480_v16 = vpop.permute.xlu1 %8931  ;;  %v3640_v0 = vmul.f32 %v19064_v45, %v19063_v59  ;;  %v6451_v60 = vsel %vm6416_vm10, %v6386_v48, %v8883_v3  ;;  %v19069_v45 = vld [vmem:[#allocation201_spill] sm:$0xff] }
 0x7f9   : > { %v6879_v62 = vpack.c.bf16 %v6824_v44, %v6823_v23  ;;  %v6452_v54 = vsel %vm6416_vm10, %v6387_v41, %v8884_v35  ;;  %v9155_v34 = vpack.i.bf16 %v15417_v5, %v15438_v19  ;;  %v15490_v4 = vmul.f32 %v19065_v32, %v19000_v56  ;;  %v19066_v19 = vld [vmem:[#allocation125_spill] sm:$0xff]  ;;  %v19067_v56 = vld [vmem:[#allocation476_spill] sm:$0xff] }
 0x7fa   : > { %v5999_v46 = vsel %vm5961_vm3, %v15189_v13, %v8119_v18  ;;  %v5998_v12 = vsel %vm5961_vm3, %v15176_v38, %v8118_v39  ;;  %v9285_v23 = vpack.i.bf16 %v15476_v43, %v15450_v28  ;;  %v9160_v44 = vpack.i.bf16 %v3640_v0, %v3639_v33  ;;  %v19068_v38 = vld [vmem:[#allocation508_spill] sm:$0xff]  ;;  %v19070_v0 = vld [vmem:[#allocation105_spill] sm:$0xff] }
 0x7fb   : > { %v6064_v48 = vsel %vm6026_vm4, %v5999_v46, %v8279_v1  ;;  %v6063_v41 = vsel %vm6026_vm4, %v5998_v12, %v8278_v31  ;;  %v6692_v5 = vpop.f32.mrf.mxu1  ;;  %v3649_v35 = vmul.f32 %v19067_v56, %v19066_v19  ;;  %v6498_v18 = vpack.c.bf16 %v6452_v54, %v6451_v60  ;;  %v19072_v54 = vld [vmem:[#allocation162_spill] sm:$0xff]  ;;  %v19075_v56 = vld [vmem:[#allocation480_spill] sm:$0xff] }
 0x7fc   : > { %7837 = vmatmul.msk.bf16.gmra.mxu2 %vm5961_vm3, %v6879_v62  ;;  %v6129_v3 = vsel %vm6091_vm5, %v6064_v48, %v8889_v49  ;;  %v6128_v13 = vsel %vm6091_vm5, %v6063_v41, %v8888_v52  ;;  %v3960_v39 = vmul.f32 %v19068_v38, %v19035_v50  ;;  %v3973_v33 = vmul.f32 %v19069_v45, %v2691_v36  ;;  %v19071_v49 = vld [vmem:[#allocation472_spill] sm:$0xff]  ;;  %v19073_v50 = vld [vmem:[#allocation145_spill] sm:$0xff] }
 0x7fd   : > { %v8894_v1 = vunpack.i.h.bf16 %v15121_v37  ;;  %v8893_v12 = vunpack.i.l.bf16 %v15121_v37  ;;  %v15510_v31 = vpop.f32.mrf.mxu2  ;;  %9161 = vrot.lane.b32.xlu2 %v9160_v44, %s9594_s21  ;;  %v3650_v32 = vmul.f32 %v19071_v49, %v19070_v0  ;;  %v3959_v52 = vmul.f32 %v19072_v54, %v19032_v22  ;;  %v19074_v41 = vld [vmem:[#allocation193_spill] sm:$0xff] }
 0x7fe   : > { %v3974_v60 = vmul.f32 %v19073_v50, %v15404_v8  ;;  %7814 = vmatmul.msk.bf16.gmra.mxu1 %vm6537_vm11, %v6498_v18  ;;  %v8904_v46 = vunpack.i.h.bf16 %v15361_v24  ;;  %v8903_v44 = vunpack.i.l.bf16 %v15361_v24  ;;  %v15531_v8 = vmul.f32 %v19075_v56, %v19074_v41  ;;  %v19078_v50 = vld [vmem:[#allocation190_spill] sm:$0xff] }
 0x7ff   : > { %9156 = vrot.lane.b32.xlu1 %v9155_v34, %s9595_s23  ;;  %v6194_v37 = vsel %vm6156_vm6, %v6129_v3, %v8894_v1  ;;  %v6193_v36 = vsel %vm6156_vm6, %v6128_v13, %v8893_v12  ;;  %9256 = vrot.lane.b32.xlu0 %v9255_v55, %s9595_s23  ;;  %v15527_v48 = vpop.permute.xlu2 %8996  ;;  %v9175_v22 = vpack.i.bf16 %v3650_v32, %v3649_v35  ;;  %v19076_v34 = vld [vmem:[#allocation183_spill] sm:$0xff]  ;;  %v15537_v1 = vpop.permute.xlu0 %9031  ;;  %v19077_v35 = vld [vmem:[#allocation185_spill] sm:$0xff]  ;;  %v8909_v56 = vunpack.i.h.bf16 %v15185_v53 }
 0x800   : > { %v8899_v38 = vunpack.i.h.bf16 %v19076_v34  ;;  %v8898_v18 = vunpack.i.l.bf16 %v19076_v34  ;;  %v15535_v3 = vpop.permute.xlu1 %8946  ;;  %v9170_v13 = vpack.i.bf16 %v3960_v39, %v3959_v52  ;;  %v9270_v45 = vpack.i.bf16 %v3974_v60, %v3973_v33  ;;  %v19079_v33 = vld [vmem:[#allocation228_spill] sm:$0xff]  ;;  %v19080_v34 = vld [vmem:[#allocation481_spill] sm:$0xff] }
 0x801   : > { %v9190_v24 = vpack.i.bf16 %v19063_v59, %v18896_v7  ;;  %v15544_v12 = vmul.f32 0.0, %v19077_v35  ;;  %v6693_v54 = vadd.f32 %v15328_v14, %v6692_v5  ;;  %v15550_v39 = vmul.f32 0.0, %v19078_v50 }
 0x802   : > { %v6258_v49 = vsel %vm6221_vm7, %v6193_v36, %v8898_v18  ;;  %v6259_v32 = vsel %vm6221_vm7, %v6194_v37, %v8899_v38  ;;  %v8124_v52 = vunpack.i.h.bf16 %v19079_v33  ;;  %v8123_v41 = vunpack.i.l.bf16 %v19079_v33  ;;  %v19081_v18 = vld [vmem:[#allocation245_spill] sm:$0xff] }
 0x803   : > { %v6323_v60 = vsel %vm6286_vm8, %v6258_v49, %v8903_v44  ;;  %v6324_v7 = vsel %vm6286_vm8, %v6259_v32, %v8904_v46  ;;  %v6694_v59 = vpop.f32.mrf.mxu1  ;;  %v8908_v36 = vunpack.i.l.bf16 %v15185_v53  ;;  %v8154_v5 = vunpack.i.h.bf16 %v19080_v34  ;;  %v19082_v33 = vld [vmem:[#allocation433_spill] sm:$0xff] }
 0x804   : > { %v6695_v37 = vadd.f32 %v15328_v14, %v6694_v59  ;;  %v8153_v38 = vunpack.i.l.bf16 %v19080_v34  ;;  %v8284_v35 = vunpack.i.h.bf16 %v19081_v18  ;;  %v8283_v50 = vunpack.i.l.bf16 %v19081_v18 }
 0x805   : > { %v15563_v44 = vpop.f32.mrf.mxu2  ;;  %9176 = vrot.lane.b32.xlu2 %v9175_v22, %s9594_s21  ;;  %v6388_v46 = vsel %vm6351_vm9, %v6323_v60, %v8908_v36  ;;  %v6389_v49 = vsel %vm6351_vm9, %v6324_v7, %v8909_v56  ;;  %v6825_v32 = vmax.f32 %v6693_v54, 0.0  ;;  %v8914_v59 = vunpack.i.h.bf16 %v19082_v33  ;;  %v19083_v56 = vld [vmem:[#allocation255_spill] sm:$0xff] }
 0x806   : > { %v6826_v53 = vmax.f32 %v6695_v37, 0.0  ;;  %v8913_v34 = vunpack.i.l.bf16 %v19082_v33  ;;  %v8919_v62 = vunpack.i.h.bf16 %v15421_v2  ;;  %v8918_v18 = vunpack.i.l.bf16 %v15421_v2  ;;  %v19084_v33 = vld [vmem:[#allocation246_spill] sm:$0xff] }
 0x807   : > { %9171 = vrot.lane.b32.xlu1 %v9170_v13, %s9596_s27  ;;  %9271 = vrot.lane.b32.xlu0 %v9270_v45, %s9596_s27  ;;  %v15574_v55 = vpop.permute.xlu2 %9011  ;;  %v6001_v54 = vsel %vm5961_vm3, %v15203_v42, %v8124_v52  ;;  %v6000_v13 = vsel %vm5961_vm3, %v15199_v21, %v8123_v41  ;;  %v8314_v36 = vunpack.i.h.bf16 %v19083_v56  ;;  %v8313_v2 = vunpack.i.l.bf16 %v19083_v56 }
 0x808   : > { %v15582_v60 = vpop.permute.xlu1 %8961  ;;  %v6880_v7 = vpack.c.bf16 %v6826_v53, %v6825_v32  ;;  %v6453_v45 = vsel %vm6416_vm10, %v6388_v46, %v8913_v34  ;;  %v6454_v37 = vsel %vm6416_vm10, %v6389_v49, %v8914_v59  ;;  %v6013_v22 = vsel %vm5961_vm3, %v19084_v33, %v8154_v5  ;;  %v15598_v34 = vpop.permute.xlu0 %9046  ;;  %v19085_v59 = vld [vmem:[#allocation309_spill] sm:$0xff] }
 0x809   : > { %v6012_v42 = vsel %vm5961_vm3, %v15288_v26, %v8153_v38  ;;  %v6065_v52 = vsel %vm6026_vm4, %v6000_v13, %v8283_v50  ;;  %v6066_v21 = vsel %vm6026_vm4, %v6001_v54, %v8284_v35  ;;  %v8959_v41 = vunpack.i.h.bf16 %v15211_v15 }
 0x80a   : > { %v8958_v32 = vunpack.i.l.bf16 %v15211_v15  ;;  %v6131_v53 = vsel %vm6091_vm5, %v6066_v21, %v8919_v62  ;;  %v6130_v46 = vsel %vm6091_vm5, %v6065_v52, %v8918_v18  ;;  %v8924_v49 = vunpack.i.h.bf16 %v15240_v63 }
 0x80b   : > { %v6697_v5 = vpop.f32.mrf.mxu1  ;;  %v8923_v26 = vunpack.i.l.bf16 %v15240_v63  ;;  %v8968_v38 = vunpack.i.l.bf16 %v15413_v6  ;;  %v6499_v35 = vpack.c.bf16 %v6454_v37, %v6453_v45  ;;  %v6077_v50 = vsel %vm6026_vm4, %v6012_v42, %v8313_v2 }
 0x80c   : > { %7838 = vmatmul.msk.bf16.gmra.mxu2 %vm5961_vm3, %v6880_v7  ;;  %v6078_v15 = vsel %vm6026_vm4, %v6013_v22, %v8314_v36  ;;  %v8929_v62 = vunpack.i.h.bf16 %v19085_v59  ;;  %v8969_v18 = vunpack.i.h.bf16 %v15413_v6  ;;  %v6196_v13 = vsel %vm6156_vm6, %v6131_v53, %v8924_v49 }
 0x80d   : > { %v15608_v54 = vpop.f32.mrf.mxu2  ;;  %9191 = vrot.lane.b32.xlu2 %v9190_v24, %s9593_s16  ;;  %v6195_v7 = vsel %vm6156_vm6, %v6130_v46, %v8923_v26  ;;  %v8934_v63 = vunpack.i.h.bf16 %v15480_v16  ;;  %v8933_v56 = vunpack.i.l.bf16 %v15480_v16  ;;  %v19086_v22 = vpack.i.bf16 %v15357_v29, %v15303_v58 }
 0x80e   : > { %7815 = vmatmul.msk.bf16.gmra.mxu1 %vm6537_vm11, %v6499_v35  ;;  %v8928_v6 = vunpack.i.l.bf16 %v19085_v59  ;;  %v6142_v36 = vsel %vm6091_vm5, %v6077_v50, %v8958_v32  ;;  %v6143_v24 = vsel %vm6091_vm5, %v6078_v15, %v8959_v41  ;;  %v8939_v2 = vunpack.i.h.bf16 %v15299_v17 }
 0x80f   : > { %9186 = vrot.lane.b32.xlu1 %v19086_v22, %s9592_s29  ;;  %9286 = vrot.lane.b32.xlu0 %v9285_v23, %s9595_s23  ;;  %v15628_v16 = vpop.permute.xlu2 %9026  ;;  %v8938_v58 = vunpack.i.l.bf16 %v15299_v17  ;;  %v8989_v29 = vunpack.i.h.bf16 %v15335_v30  ;;  %v8988_v45 = vunpack.i.l.bf16 %v15335_v30  ;;  %v6207_v37 = vsel %vm6156_vm6, %v6142_v36, %v8968_v38 }
 0x810   : > { %v8977_v33 = vpop.permute.xlu1 %8976  ;;  %v6260_v42 = vsel %vm6221_vm7, %v6195_v7, %v8928_v6  ;;  %v6261_v52 = vsel %vm6221_vm7, %v6196_v13, %v8929_v62  ;;  %v6208_v28 = vsel %vm6156_vm6, %v6143_v24, %v8969_v18  ;;  %v8999_v17 = vunpack.i.h.bf16 %v15527_v48  ;;  %v15649_v59 = vpop.permute.xlu0 %9061 }
 0x811   : > { %v8979_v21 = vunpack.i.h.bf16 %v8977_v33  ;;  %v8978_v41 = vunpack.i.l.bf16 %v8977_v33  ;;  %v6325_v43 = vsel %vm6286_vm8, %v6260_v42, %v8933_v56  ;;  %v6326_v23 = vsel %vm6286_vm8, %v6261_v52, %v8934_v63  ;;  %v19093_v33 = vld [vmem:[#allocation305_spill] sm:$0xff] }
 0x812   : > { %v8998_v32 = vunpack.i.l.bf16 %v15527_v48  ;;  %v6698_v30 = vadd.f32 %v15328_v14, %v6697_v5  ;;  %v9004_v26 = vunpack.i.h.bf16 %v15394_v61  ;;  %v9003_v38 = vunpack.i.l.bf16 %v15394_v61 }
 0x813   : > { %v6273_v53 = vsel %vm6221_vm7, %v6208_v28, %v8979_v21  ;;  %v6272_v46 = vsel %vm6221_vm7, %v6207_v37, %v8978_v41  ;;  %v6699_v49 = vpop.f32.mrf.mxu1  ;;  %v8944_v15 = vunpack.i.h.bf16 %v15138_v27  ;;  %v19087_v62 = vpack.i.bf16 %v19070_v0, %v19066_v19  ;;  %v19094_v41 = vld [vmem:[#allocation113_spill] sm:$0xff]  ;;  %v19095_v28 = vld [vmem:[#allocation79_spill] sm:$0xff] }
 0x814   : > { %v6338_v35 = vsel %vm6286_vm8, %v6273_v53, %v8989_v29  ;;  %v6337_v50 = vsel %vm6286_vm8, %v6272_v46, %v8988_v45  ;;  %v6700_v48 = vadd.f32 %v15328_v14, %v6699_v49  ;;  %v6390_v13 = vsel %vm6351_vm9, %v6325_v43, %v8938_v58  ;;  %v19090_v58 = vld [vmem:[#allocation188_spill] sm:$0xff]  ;;  %v19091_v29 = vld [vmem:[#allocation463_spill] sm:$0xff]  ;;  %v19097_v53 = vld [vmem:[#allocation130_spill] sm:$0xff] }
 0x815   : > { %v15652_v5 = vpop.f32.mrf.mxu2  ;;  %9206 = vrot.lane.b32.xlu2 %v19087_v62, %s9593_s16  ;;  %v6402_v18 = vsel %vm6351_vm9, %v6337_v50, %v8998_v32  ;;  %v6403_v61 = vsel %vm6351_vm9, %v6338_v35, %v8999_v17  ;;  %v6391_v7 = vsel %vm6351_vm9, %v6326_v23, %v8939_v2  ;;  %v19088_v63 = vpack.i.bf16 %v15373_v51, %v15365_v40  ;;  %v19092_v51 = vld [vmem:[#allocation222_spill] sm:$0xff]  ;;  %v19096_v23 = vld [vmem:[#allocation357_spill] sm:$0xff] }
 0x816   : > { %v6467_v56 = vsel %vm6416_vm10, %v6402_v18, %v9003_v38  ;;  %v6468_v22 = vsel %vm6416_vm10, %v6403_v61, %v9004_v26  ;;  %v8943_v19 = vunpack.i.l.bf16 %v15138_v27  ;;  %v6827_v0 = vmax.f32 %v6698_v30, 0.0  ;;  %v19098_v46 = vld [vmem:[#allocation78_spill] sm:$0xff]  ;;  %v19100_v38 = vld [vmem:[#allocation177_spill] sm:$0xff] }
 0x817   : > { %9201 = vrot.lane.b32.xlu1 %v19088_v63, %s9595_s23  ;;  %v6828_v6 = vmax.f32 %v6700_v48, 0.0  ;;  %v19089_v36 = vpack.i.bf16 %v15544_v12, %v15550_v39  ;;  %v15673_v24 = vpop.permute.xlu2 %9041  ;;  %v6506_v2 = vpack.c.bf16 %v6468_v22, %v6467_v56  ;;  %v3641_v40 = vmul.f32 %v19091_v29, %v19090_v58  ;;  %v19107_v29 = vld [vmem:[#allocation207_spill] sm:$0xff] }
 0x818   : > { %v8129_v45 = vunpack.i.h.bf16 %v19092_v51  ;;  %v8128_v37 = vunpack.i.l.bf16 %v19092_v51  ;;  %v8289_v42 = vunpack.i.h.bf16 %v19093_v33  ;;  %v15680_v27 = vpop.permute.xlu1 %8991  ;;  %v8288_v52 = vunpack.i.l.bf16 %v19093_v33 }
 0x819   : > { %9301 = vrot.lane.b32.xlu0 %v19089_v36, %s9596_s27  ;;  %7822 = vmatmul.msk.bf16.vlgmr.msrb.gmra.mxu3 %vm6537_vm11, %v6506_v2  ;;  %v6881_v12 = vpack.c.bf16 %v6828_v6, %v6827_v0  ;;  %v6455_v39 = vsel %vm6416_vm10, %v6390_v13, %v8943_v19  ;;  %v6456_v21 = vsel %vm6416_vm10, %v6391_v7, %v8944_v15  ;;  %v8949_v32 = vunpack.i.h.bf16 %v15535_v3  ;;  %v19102_v15 = vld [vmem:[#allocation301_spill] sm:$0xff]  ;;  %v19103_v7 = vld [vmem:[#allocation294_spill] sm:$0xff]  ;;  %v19106_v2 = vld [vmem:[#allocation427_spill] sm:$0xff] }
 0x81a   : > { %v15688_v43 = vmul.f32 %v19095_v28, %v19094_v41  ;;  %v3009_v17 = vmul.f32 %v19096_v23, %v18997_v47  ;;  %v8948_v30 = vunpack.i.l.bf16 %v15535_v3  ;;  %v15696_v49 = vmul.f32 %v19098_v46, %v19097_v53  ;;  %v19112_v28 = vld [vmem:[#allocation520_spill] sm:$0xff]  ;;  %v19113_v23 = vld [vmem:[#allocation143_spill] sm:$0xff] }
 0x81b   : > { %v19099_v26 = vrot.slane %v19039_v11, 7  ;;  %v19101_v35 = vrot.slane %v19100_v38, 7  ;;  %v15707_v48 = vmul.f32 %v19102_v15, %v15134_v20  ;;  %v9220_v47 = vpack.i.bf16 %v15531_v8, %v3641_v40  ;;  %v6702_v3 = vpop.f32.mrf.mxu1  ;;  %v19108_v40 = vld [vmem:[#allocation488_spill] sm:$0xff]  ;;  %v19115_v46 = vld [vmem:[#allocation479_spill] sm:$0xff] }
 0x81c   : > { %7839 = vmatmul.msk.bf16.gmra.mxu2 %vm5961_vm3, %v6881_v12  ;;  %v9215_v62 = vpack.i.bf16 %v15490_v4, %v3009_v17  ;;  %v6003_v18 = vsel %vm5961_vm3, %v15262_v25, %v8129_v45  ;;  %v6002_v61 = vsel %vm5961_vm3, %v15258_v57, %v8128_v37  ;;  %v6500_v13 = vpack.c.bf16 %v6456_v21, %v6455_v39  ;;  %v19109_v45 = vld [vmem:[#allocation376_spill] sm:$0xff]  ;;  %v19110_v12 = vld [vmem:[#allocation418_spill] sm:$0xff]  ;;  %v19111_v21 = vld [vmem:[#allocation491_spill] sm:$0xff] }
 0x81d   : > { %v15703_v50 = vsel %vm897_vm1, %v19101_v35, %v19099_v26  ;;  %v15718_v63 = vmul.f32 %v19103_v7, %v15061_v10  ;;  %v19104_v56 = vrot.slane %v15315_v9, 7  ;;  %v19105_v8 = vmov %v19099_v26  ;;  %v15729_v25 = vpop.f32.mrf.mxu2  ;;  %9221 = vrot.lane.b32.xlu2 %v9220_v47, %s9594_s21  ;;  %v19116_v47 = vld [vmem:[#allocation518_spill] sm:$0xff] }
 0x81e   : > { %v6068_v4 = vsel %vm6026_vm4, %v6003_v18, %v8289_v42  ;;  %v6067_v19 = vsel %vm6026_vm4, %v6002_v61, %v8288_v52  ;;  %v8964_v6 = vunpack.i.h.bf16 %v15582_v60  ;;  %v8963_v36 = vunpack.i.l.bf16 %v15582_v60  ;;  %7816 = vmatmul.msk.bf16.gmra.mxu1 %vm6537_vm11, %v6500_v13  ;;  %v15746_v42 = vpop.permute.xlu0 %9076 }
 0x81f   : > { %v15725_v22 = vsel %vm897_vm1, %v19105_v8, %v19104_v56  ;;  %v6133_v57 = vsel %vm6091_vm5, %v6068_v4, %v8949_v32  ;;  %v6132_v0 = vsel %vm6091_vm5, %v6067_v19, %v8948_v30  ;;  %9216 = vrot.lane.b32.xlu1 %v9215_v62, %s9595_s23  ;;  %v15740_v58 = vmul.f32 %v19106_v2, %v15703_v50  ;;  %v15748_v52 = vpop.permute.xlu2 %9056  ;;  %v19114_v30 = vld [vmem:[#allocation475_spill] sm:$0xff]  ;;  %v19117_v62 = vld [vmem:[#allocation45_spill] sm:$0xff]  ;;  %s9532_s23 = scalar_lea.hbm %s17014_s12, 1024 }
 0x820   : > { %v3651_v51 = vmul.f32 %v19108_v40, %v19107_v29  ;;  %v8954_v37 = vunpack.i.h.bf16 %v19109_v45  ;;  %v8953_v33 = vunpack.i.l.bf16 %v19109_v45  ;;  %v9245_v60 = vpack.i.bf16 %v15707_v48, %v15718_v63  ;;  %v15762_v32 = vpop.permute.xlu1 %9006  ;;  %v19118_v4 = vld [vmem:[#allocation329_spill] sm:$0xff]  ;;  %v19119_v45 = vld [vmem:[#allocation192_spill] sm:$0xff] }
 0x821   : > { %v15754_v39 = vmul.f32 %v19110_v12, %v15725_v22  ;;  %v15758_v41 = vmul.f32 %v19111_v21, %v15315_v9  ;;  %v3961_v17 = vmul.f32 %v19113_v23, %v19112_v28  ;;  %v15766_v53 = vmul.f32 %v19114_v30, %v19039_v11  ;;  %v19120_v21 = vld [vmem:[#allocation106_spill] sm:$0xff] }
 0x822   : > { %v3652_v26 = vmul.f32 %v19115_v46, %v19100_v38  ;;  %v6197_v35 = vsel %vm6156_vm6, %v6132_v0, %v8953_v33  ;;  %v6198_v15 = vsel %vm6156_vm6, %v6133_v57, %v8954_v37  ;;  %v3962_v18 = vmul.f32 %v19117_v62, %v19116_v47  ;;  %v19122_v47 = vld [vmem:[#allocation440_spill] sm:$0xff] }
 0x823   : > { %v6262_v61 = vsel %vm6221_vm7, %v6197_v35, %v8963_v36  ;;  %v6263_v13 = vsel %vm6221_vm7, %v6198_v15, %v8964_v6  ;;  %v6703_v7 = vadd.f32 %v15328_v14, %v6702_v3  ;;  %v9260_v56 = vpack.i.bf16 %v15754_v39, %v15740_v58  ;;  %v6704_v0 = vpop.f32.mrf.mxu1 }
 0x824   : > { %v9235_v8 = vpack.i.bf16 %v3652_v26, %v3651_v51  ;;  %v8974_v19 = vunpack.i.h.bf16 %v19118_v4  ;;  %v8973_v2 = vunpack.i.l.bf16 %v19118_v4  ;;  %v9265_v57 = vpack.i.bf16 %v15758_v41, %v15766_v53  ;;  %v19121_v26 = vld [vmem:[#allocation233_spill] sm:$0xff]  ;;  %v19123_v4 = vld [vmem:[#allocation304_spill] sm:$0xff] }
 0x825   : > { %v9230_v40 = vpack.i.bf16 %v3962_v18, %v3961_v17  ;;  %v8134_v37 = vunpack.i.h.bf16 %v19119_v45  ;;  %v6705_v36 = vadd.f32 %v15328_v14, %v6704_v0  ;;  %v8994_v33 = vunpack.i.h.bf16 %v15680_v27  ;;  %v15789_v12 = vpop.f32.mrf.mxu2 }
 0x826   : > { %v6327_v6 = vsel %vm6286_vm8, %v6262_v61, %v8973_v2  ;;  %v6328_v3 = vsel %vm6286_vm8, %v6263_v13, %v8974_v19  ;;  %v8993_v51 = vunpack.i.l.bf16 %v15680_v27  ;;  %9236 = vrot.lane.b32.xlu2 %v9235_v8, %s9594_s21  ;;  %v8984_v28 = vunpack.i.h.bf16 %v19120_v21  ;;  %v15806_v0 = vpop.permute.xlu0 %9091 }
 0x827   : > { %v8983_v23 = vunpack.i.l.bf16 %v19120_v21  ;;  %v6829_v17 = vmax.f32 %v6703_v7, 0.0  ;;  %v6830_v30 = vmax.f32 %v6705_v36, 0.0  ;;  %9231 = vrot.lane.b32.xlu1 %v9230_v40, %s9596_s27  ;;  %v8133_v46 = vunpack.i.l.bf16 %v19119_v45  ;;  %v15799_v62 = vpop.permute.xlu2 %9071  ;;  %v19124_v21 = vld [vmem:[#allocation315_spill] sm:$0xff]  ;;  %s16741_s27 = scalar_lea.vmem [#allocation5], %s7755_s15  ;;  %s7922_s15 = sshll.u32 %s9686_s25, 9 }
 0x828   : > { %v8159_v35 = vunpack.i.h.bf16 %v19121_v26  ;;  %v8158_v15 = vunpack.i.l.bf16 %v19121_v26  ;;  %v8294_v27 = vunpack.i.h.bf16 %v19122_v47  ;;  %v8293_v18 = vunpack.i.l.bf16 %v19122_v47  ;;  %v9022_v7 = vpop.permute.xlu1 %9021  ;;  %s7670_s28 = scalar_lea.hbm %s17014_s12, %s7922_s15  ;;  %s7671_s19 = sshll.u32 %s16741_s27, 4  ;;  %s7672_s19 = int_to_ptr.vmem [resolvable:$true] %s7671_s19 }
 0x829   : > { %v6392_v61 = vsel %vm6351_vm9, %v6327_v6, %v8983_v23  ;;  %v6393_v13 = vsel %vm6351_vm9, %v6328_v3, %v8984_v28  ;;  %v6882_v8 = vpack.c.bf16 %v6830_v30, %v6829_v17  ;;  %v8319_v19 = vunpack.i.h.bf16 %v19123_v4  ;;  %v19125_v23 = vld [vmem:[#allocation28_spill] sm:$0xff] }
 0x82a   : > { %v8318_v2 = vunpack.i.l.bf16 %v19123_v4  ;;  %v6457_v40 = vsel %vm6416_vm10, %v6392_v61, %v8993_v51  ;;  %v6458_v45 = vsel %vm6416_vm10, %v6393_v13, %v8994_v33  ;;  %v6005_v36 = vsel %vm5961_vm3, %v15696_v49, %v8134_v37  ;;  %v19126_v37 = vld [vmem:[#allocation156_spill] sm:$0xff] }
 0x82b   : > { %v9019_v26 = vunpack.i.h.bf16 %v19124_v21  ;;  %v9018_v6 = vunpack.i.l.bf16 %v19124_v21  ;;  %v9250_v3 = vpack.i.bf16 %v19100_v38, %v19107_v29  ;;  %v6004_v28 = vsel %vm5961_vm3, %v15688_v43, %v8133_v46  ;;  %v6707_v49 = vpop.f32.mrf.mxu1 }
 0x82c   : > { %v6015_v17 = vsel %vm5961_vm3, %v19125_v23, %v8159_v35  ;;  %v9009_v51 = vunpack.i.h.bf16 %v15762_v32  ;;  %v9008_v33 = vunpack.i.l.bf16 %v15762_v32  ;;  %7840 = vmatmul.msk.bf16.gmra.mxu2 %vm5961_vm3, %v6882_v8  ;;  %v6014_v30 = vsel %vm5961_vm3, %v19126_v37, %v8158_v15 }
 0x82d   : > { %v6070_v47 = vsel %vm6026_vm4, %v6005_v36, %v8294_v27  ;;  %v6069_v38 = vsel %vm6026_vm4, %v6004_v28, %v8293_v18  ;;  %v6501_v29 = vpack.c.bf16 %v6458_v45, %v6457_v40  ;;  %v6080_v43 = vsel %vm6026_vm4, %v6015_v17, %v8319_v19  ;;  %v15831_v32 = vpop.f32.mrf.mxu2 }
 0x82e   : > { %v6079_v46 = vsel %vm6026_vm4, %v6014_v30, %v8318_v2  ;;  %v9029_v35 = vunpack.i.h.bf16 %v15628_v16  ;;  %v9028_v61 = vunpack.i.l.bf16 %v15628_v16  ;;  %9251 = vrot.lane.b32.xlu2 %v9250_v3, %s9593_s16  ;;  %v6145_v15 = vsel %vm6091_vm5, %v6080_v43, %v9019_v26  ;;  %v15857_v17 = vpop.permute.xlu0 %9106 }
 0x82f   : > { %v6144_v13 = vsel %vm6091_vm5, %v6079_v46, %v9018_v6  ;;  %v9033_v27 = vunpack.i.l.bf16 %v15537_v1  ;;  %v9049_v18 = vunpack.i.h.bf16 %v15598_v34  ;;  %9246 = vrot.lane.b32.xlu1 %v9245_v60, %s9592_s29  ;;  %7817 = vmatmul.msk.bf16.gmra.mxu1 %vm6537_vm11, %v6501_v29  ;;  %v9048_v16 = vunpack.i.l.bf16 %v15598_v34  ;;  %v15846_v2 = vpop.permute.xlu2 %9086 }
 0x830   : > { %v6135_v8 = vsel %vm6091_vm5, %v6070_v47, %v9009_v51  ;;  %v6134_v4 = vsel %vm6091_vm5, %v6069_v38, %v9008_v33  ;;  %v9023_v19 = vunpack.i.l.bf16 %v9022_v7  ;;  %v9014_v40 = vunpack.i.h.bf16 %v15574_v55  ;;  %v9037_v48 = vpop.permute.xlu1 %9036 }
 0x831   : > { %v9013_v45 = vunpack.i.l.bf16 %v15574_v55  ;;  %v9064_v36 = vunpack.i.h.bf16 %v15649_v59  ;;  %v9024_v21 = vunpack.i.h.bf16 %v9022_v7  ;;  %v6209_v63 = vsel %vm6156_vm6, %v6144_v13, %v9028_v61 }
 0x832   : > { %v6210_v60 = vsel %vm6156_vm6, %v6145_v15, %v9029_v35  ;;  %v9039_v34 = vunpack.i.h.bf16 %v9037_v48  ;;  %v9038_v26 = vunpack.i.l.bf16 %v9037_v48  ;;  %v9059_v6 = vunpack.i.h.bf16 %v15748_v52 }
 0x833   : > { %v9058_v3 = vunpack.i.l.bf16 %v15748_v52  ;;  %v6199_v28 = vsel %vm6156_vm6, %v6134_v4, %v9013_v45  ;;  %v6200_v23 = vsel %vm6156_vm6, %v6135_v8, %v9014_v40  ;;  %v6708_v7 = vadd.f32 %v15328_v14, %v6707_v49  ;;  %v6709_v37 = vpop.f32.mrf.mxu1 }
 0x834   : > { %v6264_v55 = vsel %vm6221_vm7, %v6199_v28, %v9023_v19  ;;  %v6275_v51 = vsel %vm6221_vm7, %v6210_v60, %v9039_v34  ;;  %v6274_v33 = vsel %vm6221_vm7, %v6209_v63, %v9038_v26  ;;  %v9063_v30 = vunpack.i.l.bf16 %v15649_v59  ;;  %v19128_v19 = vld [vmem:[#allocation292_spill] sm:$0xff] }
 0x835   : > { %v6265_v47 = vsel %vm6221_vm7, %v6200_v23, %v9024_v21  ;;  %v6340_v52 = vsel %vm6286_vm8, %v6275_v51, %v9049_v18  ;;  %v6339_v38 = vsel %vm6286_vm8, %v6274_v33, %v9048_v16  ;;  %v9034_v29 = vunpack.i.h.bf16 %v15537_v1  ;;  %v15869_v46 = vpop.f32.mrf.mxu2  ;;  %v19127_v18 = vld [vmem:[#allocation297_spill] sm:$0xff]  ;;  %v19132_v51 = vld [vmem:[#allocation478_spill] sm:$0xff] }
 0x836   : > { %v6710_v43 = vadd.f32 %v15328_v14, %v6709_v37  ;;  %9266 = vrot.lane.b32.xlu2 %v9265_v57, %s9594_s21  ;;  %v6404_v49 = vsel %vm6351_vm9, %v6339_v38, %v9058_v3  ;;  %v6405_v59 = vsel %vm6351_vm9, %v6340_v52, %v9059_v6  ;;  %v6329_v35 = vsel %vm6286_vm8, %v6264_v55, %v9033_v27  ;;  %v15901_v34 = vpop.permute.xlu0 %9121  ;;  %v19130_v3 = vld [vmem:[#allocation482_spill] sm:$0xff]  ;;  %v19133_v37 = vld [vmem:[#allocation417_spill] sm:$0xff] }
 0x837   : > { %9261 = vrot.lane.b32.xlu1 %v9260_v56, %s9597_s30  ;;  %v6469_v1 = vsel %vm6416_vm10, %v6404_v49, %v9063_v30  ;;  %v6470_v61 = vsel %vm6416_vm10, %v6405_v59, %v9064_v36  ;;  %v6330_v13 = vsel %vm6286_vm8, %v6265_v47, %v9034_v29  ;;  %v6831_v15 = vmax.f32 %v6708_v7, 0.0  ;;  %v15885_v53 = vpop.permute.xlu2 %9101 }
 0x838   : > { %v6832_v41 = vmax.f32 %v6710_v43, 0.0  ;;  %v6507_v57 = vpack.c.bf16 %v6470_v61, %v6469_v1  ;;  %v2689_v16 = vmul.f32 %v19127_v18, %v15725_v22  ;;  %v9044_v27 = vunpack.i.h.bf16 %v15673_v24  ;;  %v9052_v58 = vpop.permute.xlu1 %9051  ;;  %v19135_v61 = vld [vmem:[#allocation98_spill] sm:$0xff]  ;;  %v19136_v18 = vld [vmem:[#allocation243_spill] sm:$0xff] }
 0x839   : > { %v9043_v8 = vunpack.i.l.bf16 %v15673_v24  ;;  %v9054_v56 = vunpack.i.h.bf16 %v9052_v58  ;;  %v9053_v4 = vunpack.i.l.bf16 %v9052_v58  ;;  %v2688_v40 = vmul.f32 %v19128_v19, %v15703_v50  ;;  %v19137_v58 = vld [vmem:[#allocation489_spill] sm:$0xff]  ;;  %v19140_v19 = vld [vmem:[#allocation83_spill] sm:$0xff] }
 0x83a   : > { %v6883_v39 = vpack.c.bf16 %v6832_v41, %v6831_v15  ;;  %7823 = vmatmul.msk.bf16.gmra.mxu3 %vm6537_vm11, %v6507_v57  ;;  %v6395_v36 = vsel %vm6351_vm9, %v6330_v13, %v9044_v27  ;;  %v9280_v48 = vpack.i.bf16 %v15315_v9, %v19039_v11  ;;  %v19129_v50 = vrot.slane %v15315_v9, 7  ;;  %v19131_v11 = vld [vmem:[#allocation430_spill] sm:$0xff] }
 0x83b   : > { %v6394_v45 = vsel %vm6351_vm9, %v6329_v35, %v9043_v8  ;;  %v6460_v22 = vsel %vm6416_vm10, %v6395_v36, %v9054_v56  ;;  %v6712_v24 = vpop.f32.mrf.mxu1  ;;  %v9275_v63 = vpack.i.bf16 %v2689_v16, %v2688_v40  ;;  %v3655_v28 = vmul.f32 0.0, %v19130_v3  ;;  %v19134_v35 = vld [vmem:[#allocation206_spill] sm:$0xff] }
 0x83c   : > { %v6459_v21 = vsel %vm6416_vm10, %v6394_v45, %v9053_v4  ;;  %7841 = vmatmul.msk.bf16.gmra.mxu2 %vm5961_vm3, %v6883_v39  ;;  %v3016_v6 = vsel %vm897_vm1, %v19129_v50, 0.0  ;;  %v3336_v55 = vmul.f32 0.0, %v19131_v11  ;;  %v3656_v33 = vmul.f32 0.0, %v19132_v51  ;;  %v19138_v39 = vld [vmem:[#allocation66_spill] sm:$0xff]  ;;  %v19139_v4 = vld [vmem:[#allocation428_spill] sm:$0xff]  ;;  %v19145_v50 = vld [vmem:[#allocation93_spill] sm:$0xff] }
 0x83d   : > { %v6502_v60 = vpack.c.bf16 %v6460_v22, %v6459_v21  ;;  %v15903_v26 = vpop.f32.mrf.mxu2  ;;  %v3335_v30 = vmul.f32 %v19133_v37, %v3016_v6  ;;  %v6713_v47 = vadd.f32 %v15328_v14, %v6712_v24  ;;  %v8164_v1 = vunpack.i.h.bf16 %v19134_v35  ;;  %v19141_v45 = vld [vmem:[#allocation168_spill] sm:$0xff]  ;;  %v19142_v24 = vld [vmem:[#allocation302_spill] sm:$0xff] }
 0x83e   : > { %9281 = vrot.lane.b32.xlu2 %v9280_v48, %s9593_s16  ;;  %v9295_v52 = vpack.i.bf16 %v3656_v33, %v3655_v28  ;;  %v8139_v13 = vunpack.i.h.bf16 %v19135_v61  ;;  %v8138_v15 = vunpack.i.l.bf16 %v19135_v61  ;;  %v15926_v41 = vpop.permute.xlu0 %9136  ;;  %v8163_v57 = vunpack.i.l.bf16 %v19134_v35  ;;  %v19143_v48 = vld [vmem:[#allocation92_spill] sm:$0xff] }
 0x83f   : > { %9276 = vrot.lane.b32.xlu1 %v9275_v63, %s9592_s29  ;;  %7818 = vmatmul.msk.bf16.gmra.mxu1 %vm6537_vm11, %v6502_v60  ;;  %v15912_v23 = vpop.permute.xlu2 %9116  ;;  %v9290_v29 = vpack.i.bf16 %v3336_v55, %v3335_v30  ;;  %v6833_v49 = vmax.f32 %v6713_v47, 0.0  ;;  %v8298_v16 = vunpack.i.l.bf16 %v19136_v18  ;;  %v1512_v56 = vmul.f32 %v19138_v39, %v19137_v58  ;;  %v19144_v60 = vld [vmem:[#allocation303_spill] sm:$0xff] }
 0x840   : > { %v9067_v7 = vpop.permute.xlu1 %9066  ;;  %v1513_v40 = vmul.f32 %v19140_v19, %v19139_v4  ;;  %v8324_v36 = vunpack.i.h.bf16 %v19141_v45  ;;  %v8323_v21 = vunpack.i.l.bf16 %v19141_v45  ;;  %v1523_v63 = vmul.f32 %v19143_v48, %v19142_v24 }
 0x841   : > { %v1522_v6 = vmul.f32 %v19145_v50, %v19144_v60  ;;  %v9079_v3 = vunpack.i.h.bf16 %v15746_v42  ;;  %v9078_v28 = vunpack.i.l.bf16 %v15746_v42  ;;  %v6006_v55 = vsel %vm5961_vm3, %v1512_v56, %v8138_v15 }
 0x842   : > { %v6007_v11 = vsel %vm5961_vm3, %v1513_v40, %v8139_v13  ;;  %v9069_v51 = vunpack.i.h.bf16 %v9067_v7  ;;  %v9068_v33 = vunpack.i.l.bf16 %v9067_v7  ;;  %v6017_v30 = vsel %vm5961_vm3, %v1523_v63, %v8164_v1 }
 0x843   : > { %v6714_v38 = vpop.f32.mrf.mxu1  ;;  %v6016_v47 = vsel %vm5961_vm3, %v1522_v6, %v8163_v57  ;;  %v9093_v1 = vunpack.i.l.bf16 %v15806_v0  ;;  %v9109_v61 = vunpack.i.h.bf16 %v15857_v17  ;;  %v9108_v13 = vunpack.i.l.bf16 %v15857_v17 }
 0x844   : > { %v6715_v9 = vadd.f32 %v15328_v14, %v6714_v38  ;;  %v8299_v14 = vunpack.i.h.bf16 %v19136_v18  ;;  %v6081_v42 = vsel %vm6026_vm4, %v6016_v47, %v8323_v21  ;;  %v9119_v40 = vunpack.i.h.bf16 %v15912_v23 }
 0x845   : > { %v15919_v43 = vpop.f32.mrf.mxu2  ;;  %v6146_v35 = vsel %vm6091_vm5, %v6081_v42, %v9078_v28  ;;  %v9118_v45 = vunpack.i.l.bf16 %v15912_v23  ;;  %v9123_v50 = vunpack.i.l.bf16 %v15901_v34 }
 0x846   : > { %9296 = vrot.lane.b32.xlu2 %v9295_v52, %s9594_s21  ;;  %v6834_v59 = vmax.f32 %v6715_v9, 0.0  ;;  %v6071_v52 = vsel %vm6026_vm4, %v6006_v55, %v8298_v16  ;;  %v6072_v38 = vsel %vm6026_vm4, %v6007_v11, %v8299_v14  ;;  %v9089_v9 = vunpack.i.h.bf16 %v15846_v2  ;;  %v15970_v4 = vpop.permute.xlu0 %9151 }
 0x847   : > { %9291 = vrot.lane.b32.xlu1 %v9290_v29, %s9597_s30  ;;  %v15937_v22 = vpop.permute.xlu2 %9131  ;;  %v6082_v29 = vsel %vm6026_vm4, %v6017_v30, %v8324_v36  ;;  %v6137_v15 = vsel %vm6091_vm5, %v6072_v38, %v9069_v51  ;;  %v6136_v57 = vsel %vm6091_vm5, %v6071_v52, %v9068_v33  ;;  %v9074_v14 = vunpack.i.h.bf16 %v15799_v62 }
 0x848   : > { %v6884_v27 = vpack.c.bf16 %v6834_v59, %v6833_v49  ;;  %v9088_v49 = vunpack.i.l.bf16 %v15846_v2  ;;  %v6147_v59 = vsel %vm6091_vm5, %v6082_v29, %v9079_v3  ;;  %v9073_v2 = vunpack.i.l.bf16 %v15799_v62 }
 0x849   : > { %v9082_v8 = vpop.permute.xlu1 %9081  ;;  %v9124_v16 = vunpack.i.h.bf16 %v15901_v34  ;;  %v6212_v56 = vsel %vm6156_vm6, %v6147_v59, %v9089_v9  ;;  %v6202_v62 = vsel %vm6156_vm6, %v6137_v15, %v9074_v14  ;;  %v9094_v11 = vunpack.i.h.bf16 %v15806_v0 }
 0x84a   : > { %v9083_v18 = vunpack.i.l.bf16 %v9082_v8  ;;  %v6211_v39 = vsel %vm6156_vm6, %v6146_v35, %v9088_v49  ;;  %v6201_v36 = vsel %vm6156_vm6, %v6136_v57, %v9073_v2  ;;  %v9104_v0 = vunpack.i.h.bf16 %v15885_v53 }
 0x84b   : > { %v6717_v37 = vpop.f32.mrf.mxu1  ;;  %v9103_v9 = vunpack.i.l.bf16 %v15885_v53 }
 0x84c   : > { %7842 = vmatmul.msk.bf16.gmra.mxu2 %vm5961_vm3, %v6884_v27  ;;  %v9084_v27 = vunpack.i.h.bf16 %v9082_v8  ;;  %v6266_v21 = vsel %vm6221_vm7, %v6201_v36, %v9083_v18  ;;  %v15980_v8 = vld [vmem:[%s17007_s5] ss:$0 sm:$0xff]  ;;  %v19146_v36 = vld [vmem:[#allocation380_spill] sm:$0xff] }
 0x84d   : > { %v15956_v7 = vpop.f32.mrf.mxu2  ;;  %v6718_v24 = vadd.f32 %v15980_v8, %v6717_v37  ;;  %v6331_v30 = vsel %vm6286_vm8, %v6266_v21, %v9093_v1 }
 0x84e   : > { %v6267_v6 = vsel %vm6221_vm7, %v6202_v62, %v9084_v27  ;;  %v6396_v1 = vsel %vm6351_vm9, %v6331_v30, %v9103_v9  ;;  %v16006_v15 = vpop.permute.xlu0 %9166  ;;  %v19147_v62 = vld [vmem:[#allocation81_spill] sm:$0xff]  ;;  %v19151_v30 = vld [vmem:[#allocation431_spill] sm:$0xff] }
 0x84f   : > { %v15983_v48 = vpop.permute.xlu2 %9146  ;;  %v6332_v52 = vsel %vm6286_vm8, %v6267_v6, %v9094_v11  ;;  %v6835_v38 = vmax.f32 %v6718_v24, 0.0  ;;  %v1524_v21 = vmul.f32 %v19147_v62, %v19146_v36  ;;  %v19148_v24 = vld [vmem:[#allocation227_spill] sm:$0xff] }
 0x850   : > { %v9149_v36 = vunpack.i.h.bf16 %v15983_v48  ;;  %v9148_v62 = vunpack.i.l.bf16 %v15983_v48 }
 0x851   : > { %v9097_v58 = vpop.permute.xlu1 %9096 }
 0x852   : > { %v9099_v17 = vunpack.i.h.bf16 %v9097_v58  ;;  %v9098_v19 = vunpack.i.l.bf16 %v9097_v58 }
 0x853   : > { %v6719_v23 = vpop.f32.mrf.mxu1 }
 0x854   : > { %v6277_v63 = vsel %vm6221_vm7, %v6212_v56, %v9099_v17  ;;  %v6276_v60 = vsel %vm6221_vm7, %v6211_v39, %v9098_v19  ;;  %v6720_v55 = vadd.f32 %v15980_v8, %v6719_v23 }
 0x855   : > { %v6342_v3 = vsel %vm6286_vm8, %v6277_v63, %v9109_v61  ;;  %v6341_v28 = vsel %vm6286_vm8, %v6276_v60, %v9108_v13  ;;  %v15993_v51 = vpop.f32.mrf.mxu2  ;;  %v6397_v13 = vsel %vm6351_vm9, %v6332_v52, %v9104_v0  ;;  %v8144_v63 = vunpack.i.h.bf16 %v19148_v24  ;;  %v19149_v60 = vld [vmem:[#allocation366_spill] sm:$0xff] }
 0x856   : > { %v6406_v33 = vsel %vm6351_vm9, %v6341_v28, %v9118_v45  ;;  %v6407_v37 = vsel %vm6351_vm9, %v6342_v3, %v9119_v40  ;;  %v6836_v29 = vmax.f32 %v6720_v55, 0.0  ;;  %v16018_v17 = vpop.permute.xlu0 %9181  ;;  %v8169_v23 = vunpack.i.h.bf16 %v19149_v60  ;;  %v19150_v28 = vld [vmem:[#allocation250_spill] sm:$0xff] }
 0x857   : > { %v6471_v34 = vsel %vm6416_vm10, %v6406_v33, %v9123_v50  ;;  %v6472_v47 = vsel %vm6416_vm10, %v6407_v37, %v9124_v16  ;;  %v16011_v2 = vpop.permute.xlu2 %9161  ;;  %v8168_v50 = vunpack.i.l.bf16 %v19149_v60  ;;  %v8143_v3 = vunpack.i.l.bf16 %v19148_v24  ;;  %v19153_v52 = vld [vmem:[#allocation178_spill] sm:$0xff] }
 0x858   : > { %v6508_v42 = vpack.c.bf16 %v6472_v47, %v6471_v34  ;;  %v6885_v59 = vpack.c.bf16 %v6836_v29, %v6835_v38  ;;  %v8329_v11 = vunpack.i.h.bf16 %v19150_v28  ;;  %v8328_v55 = vunpack.i.l.bf16 %v19150_v28  ;;  %v19152_v34 = vld [vmem:[#allocation97_spill] sm:$0xff] }
 0x859   : > { %v9112_v49 = vpop.permute.xlu1 %9111  ;;  %v1525_v47 = vmul.f32 %v19152_v34, %v19151_v30  ;;  %v19154_v38 = vld [vmem:[#allocation69_spill] sm:$0xff]  ;;  %v9168_v60 = vunpack.i.l.bf16 %v16006_v15  ;;  %v9184_v48 = vunpack.i.h.bf16 %v16018_v17 }
 0x85a   : > { %v9114_v35 = vunpack.i.h.bf16 %v9112_v49  ;;  %v9113_v61 = vunpack.i.l.bf16 %v9112_v49  ;;  %7824 = vmatmul.msk.bf16.gmra.mxu3 %vm6537_vm11, %v6508_v42  ;;  %v1515_v29 = vmul.f32 %v19154_v38, %v19153_v52  ;;  %v19155_v42 = vld [vmem:[#allocation214_spill] sm:$0xff]  ;;  %v19156_v49 = vld [vmem:[#allocation484_spill] sm:$0xff] }
 0x85b   : > { %v6722_v14 = vpop.f32.mrf.mxu1  ;;  %v8304_v0 = vunpack.i.h.bf16 %v19155_v42  ;;  %v8303_v9 = vunpack.i.l.bf16 %v19155_v42 }
 0x85c   : > { %v6461_v57 = vsel %vm6416_vm10, %v6396_v1, %v9113_v61  ;;  %v6462_v18 = vsel %vm6416_vm10, %v6397_v13, %v9114_v35  ;;  %7843 = vmatmul.msk.bf16.gmra.mxu2 %vm5961_vm3, %v6885_v59  ;;  %v6723_v58 = vadd.f32 %v15980_v8, %v6722_v14  ;;  %v19157_v59 = vld [vmem:[#allocation82_spill] sm:$0xff]  ;;  %v9139_v61 = vunpack.i.h.bf16 %v15926_v41 }
 0x85d   : > { %v6503_v53 = vpack.c.bf16 %v6462_v18, %v6461_v57  ;;  %v1514_v35 = vmul.f32 %v19157_v59, %v19156_v49  ;;  %v9138_v1 = vunpack.i.l.bf16 %v15926_v41  ;;  %v6009_v13 = vsel %vm5961_vm3, %v1515_v29, %v8144_v63 }
 0x85e   : > { %v6837_v19 = vmax.f32 %v6723_v58, 0.0  ;;  %v6019_v57 = vsel %vm5961_vm3, %v1525_v47, %v8169_v23  ;;  %v6018_v18 = vsel %vm5961_vm3, %v1524_v21, %v8168_v50  ;;  %v9169_v63 = vunpack.i.h.bf16 %v16006_v15 }
 0x85f   : > { %v16013_v16 = vpop.f32.mrf.mxu2  ;;  %7819 = vmatmul.msk.bf16.gmra.mxu1 %vm6537_vm11, %v6503_v53  ;;  %v16027_v6 = vpop.permute.xlu2 %9176  ;;  %v6008_v58 = vsel %vm5961_vm3, %v1514_v35, %v8143_v3  ;;  %v9133_v50 = vunpack.i.l.bf16 %v15937_v22 }
 0x860   : > { %v6073_v41 = vsel %vm6026_vm4, %v6008_v58, %v8303_v9  ;;  %v16061_v3 = vpop.permute.xlu0 %9196  ;;  %v9179_v29 = vunpack.i.h.bf16 %v16027_v6  ;;  %v9178_v42 = vunpack.i.l.bf16 %v16027_v6 }
 0x861   : > { %v9127_v27 = vpop.permute.xlu1 %9126 }
 0x862   : > { %v9128_v14 = vunpack.i.l.bf16 %v9127_v27 }
 0x863   : > { %v6724_v39 = vpop.f32.mrf.mxu1 }
 0x864   : > { %v6725_v56 = vadd.f32 %v15980_v8, %v6724_v39  ;;  %v6083_v39 = vsel %vm6026_vm4, %v6018_v18, %v8328_v55  ;;  %v6138_v28 = vsel %vm6091_vm5, %v6073_v41, %v9128_v14  ;;  %v9183_v55 = vunpack.i.l.bf16 %v16018_v17 }
 0x865   : > { %v6148_v21 = vsel %vm6091_vm5, %v6083_v39, %v9138_v1  ;;  %v9153_v18 = vunpack.i.l.bf16 %v15970_v4 }
 0x866   : > { %v6838_v40 = vmax.f32 %v6725_v56, 0.0  ;;  %v6084_v56 = vsel %vm6026_vm4, %v6019_v57, %v8329_v11  ;;  %v6213_v15 = vsel %vm6156_vm6, %v6148_v21, %v9148_v62  ;;  %v9154_v57 = vunpack.i.h.bf16 %v15970_v4 }
 0x867   : > { %v16020_v45 = vpop.f32.mrf.mxu2  ;;  %v6149_v24 = vsel %vm6091_vm5, %v6084_v56, %v9139_v61  ;;  %v16069_v52 = vpop.permute.xlu2 %9191  ;;  %v9164_v21 = vunpack.i.h.bf16 %v16011_v2  ;;  %v9163_v4 = vunpack.i.l.bf16 %v16011_v2 }
 0x868   : > { %v6886_v33 = vpack.c.bf16 %v6838_v40, %v6837_v19  ;;  %v9129_v19 = vunpack.i.h.bf16 %v9127_v27  ;;  %v6074_v40 = vsel %vm6026_vm4, %v6009_v13, %v8304_v0  ;;  %v9134_v27 = vunpack.i.h.bf16 %v15937_v22 }
 0x869   : > { %v9142_v37 = vpop.permute.xlu1 %9141  ;;  %v6214_v47 = vsel %vm6156_vm6, %v6149_v24, %v9149_v36  ;;  %v6203_v0 = vsel %vm6156_vm6, %v6138_v28, %v9133_v50 }
 0x86a   : > { %v9143_v11 = vunpack.i.l.bf16 %v9142_v37  ;;  %v9144_v30 = vunpack.i.h.bf16 %v9142_v37 }
 0x86b   : > { %v6727_v53 = vpop.f32.mrf.mxu1 }
 0x86c   : > { %7844 = vmatmul.msk.bf16.gmra.mxu2 %vm5961_vm3, %v6886_v33  ;;  %v6139_v33 = vsel %vm6091_vm5, %v6074_v40, %v9129_v19  ;;  %v6728_v17 = vadd.f32 %v15980_v8, %v6727_v53  ;;  %v6268_v37 = vsel %vm6221_vm7, %v6203_v0, %v9143_v11 }
 0x86d   : > { %v6204_v9 = vsel %vm6156_vm6, %v6139_v33, %v9134_v27  ;;  %v6333_v41 = vsel %vm6286_vm8, %v6268_v37, %v9153_v18  ;;  %v19158_v37 = vld [vmem:[#allocation316_spill] sm:$0xff]  ;;  %v19162_v18 = vld [vmem:[#allocation363_spill] sm:$0xff] }
 0x86e   : > { %v6269_v61 = vsel %vm6221_vm7, %v6204_v9, %v9144_v30  ;;  %v6839_v58 = vmax.f32 %v6728_v17, 0.0  ;;  %v6398_v28 = vsel %vm6351_vm9, %v6333_v41, %v9163_v4  ;;  %v19167_v4 = vld [vmem:[#allocation495_spill] sm:$0xff] }
 0x86f   : > { %v16057_v23 = vpop.f32.mrf.mxu2  ;;  %v6334_v36 = vsel %vm6286_vm8, %v6269_v61, %v9154_v57 }
 0x870   : > { %v6399_v11 = vsel %vm6351_vm9, %v6334_v36, %v9164_v21  ;;  %v19165_v36 = vld [vmem:[#allocation426_spill] sm:$0xff] }
 0x871   : > { %v9157_v34 = vpop.permute.xlu1 %9156 }
 0x872   : > { %v9159_v22 = vunpack.i.h.bf16 %v9157_v34  ;;  %v9158_v38 = vunpack.i.l.bf16 %v9157_v34 }
 0x873   : > { %v6729_v35 = vpop.f32.mrf.mxu1 }
 0x874   : > { %v6279_v49 = vsel %vm6221_vm7, %v6214_v47, %v9159_v22  ;;  %v6278_v59 = vsel %vm6221_vm7, %v6213_v15, %v9158_v38  ;;  %v6730_v6 = vadd.f32 %v15980_v8, %v6729_v35  ;;  %v19160_v35 = vld [vmem:[#allocation199_spill] sm:$0xff] }
 0x875   : > { %v6344_v1 = vsel %vm6286_vm8, %v6279_v49, %v9169_v63  ;;  %v6343_v13 = vsel %vm6286_vm8, %v6278_v59, %v9168_v60  ;;  %v16095_v60 = vpop.permute.xlu0 %9211  ;;  %v19159_v49 = vld [vmem:[#allocation85_spill] sm:$0xff]  ;;  %v8149_v61 = vunpack.i.h.bf16 %v19160_v35 }
 0x876   : > { %v6408_v14 = vsel %vm6351_vm9, %v6343_v13, %v9178_v42  ;;  %v6409_v53 = vsel %vm6351_vm9, %v6344_v1, %v9179_v29  ;;  %v6840_v39 = vmax.f32 %v6730_v6, 0.0  ;;  %v1527_v59 = vmul.f32 %v19159_v49, %v19158_v37  ;;  %v19161_v13 = vld [vmem:[#allocation221_spill] sm:$0xff] }
 0x877   : > { %v16087_v56 = vpop.f32.mrf.mxu2  ;;  %v6473_v19 = vsel %vm6416_vm10, %v6408_v14, %v9183_v55  ;;  %v6474_v40 = vsel %vm6416_vm10, %v6409_v53, %v9184_v48  ;;  %v16100_v48 = vpop.permute.xlu2 %9206  ;;  %v8148_v1 = vunpack.i.l.bf16 %v19160_v35  ;;  %v8174_v6 = vunpack.i.h.bf16 %v19161_v13 }
 0x878   : > { %v6509_v62 = vpack.c.bf16 %v6474_v40, %v6473_v19  ;;  %v6887_v24 = vpack.c.bf16 %v6840_v39, %v6839_v58  ;;  %v8173_v57 = vunpack.i.l.bf16 %v19161_v13  ;;  %v8309_v14 = vunpack.i.h.bf16 %v19162_v18  ;;  %v19163_v19 = vld [vmem:[#allocation379_spill] sm:$0xff]  ;;  %v19164_v40 = vld [vmem:[#allocation86_spill] sm:$0xff] }
 0x879   : > { %v9172_v63 = vpop.permute.xlu1 %9171  ;;  %v8308_v53 = vunpack.i.l.bf16 %v19162_v18  ;;  %v1517_v41 = vmul.f32 %v19164_v40, %v19163_v19 }
 0x87a   : > { %v9174_v27 = vunpack.i.h.bf16 %v9172_v63  ;;  %v9173_v50 = vunpack.i.l.bf16 %v9172_v63  ;;  %7825 = vmatmul.msk.bf16.gmra.mxu3 %vm6537_vm11, %v6509_v62  ;;  %v19166_v62 = vld [vmem:[#allocation87_spill] sm:$0xff]  ;;  %v8333_v63 = vunpack.i.l.bf16 %v19167_v4 }
 0x87b   : > { %v6732_v2 = vpop.f32.mrf.mxu1  ;;  %v1516_v21 = vmul.f32 %v19166_v62, %v19165_v36 }
 0x87c   : > { %v6463_v55 = vsel %vm6416_vm10, %v6398_v28, %v9173_v50  ;;  %v6464_v33 = vsel %vm6416_vm10, %v6399_v11, %v9174_v27  ;;  %7845 = vmatmul.msk.bf16.gmra.mxu2 %vm5961_vm3, %v6887_v24  ;;  %v6733_v47 = vadd.f32 %v15980_v8, %v6732_v2  ;;  %v8334_v24 = vunpack.i.h.bf16 %v19167_v4  ;;  %v19168_v27 = vld [vmem:[#allocation378_spill] sm:$0xff]  ;;  %v19169_v50 = vld [vmem:[#allocation96_spill] sm:$0xff] }
 0x87d   : > { %v6504_v30 = vpack.c.bf16 %v6464_v33, %v6463_v55  ;;  %v16109_v22 = vpop.permute.xlu0 %9226  ;;  %v1526_v28 = vmul.f32 %v19169_v50, %v19168_v27  ;;  %v9199_v11 = vunpack.i.h.bf16 %v16061_v3  ;;  %v9198_v55 = vunpack.i.l.bf16 %v16061_v3 }
 0x87e   : > { %v6841_v0 = vmax.f32 %v6733_v47, 0.0  ;;  %v6011_v33 = vsel %vm5961_vm3, %v1517_v41, %v8149_v61  ;;  %v6010_v2 = vsel %vm5961_vm3, %v1516_v21, %v8148_v1  ;;  %v9209_v61 = vunpack.i.h.bf16 %v16100_v48 }
 0x87f   : > { %v16105_v34 = vpop.f32.mrf.mxu2  ;;  %7820 = vmatmul.msk.bf16.gmra.mxu1 %vm6537_vm11, %v6504_v30  ;;  %v16112_v42 = vpop.permute.xlu2 %9221  ;;  %v6021_v30 = vsel %vm5961_vm3, %v1527_v59, %v8174_v6  ;;  %v9208_v59 = vunpack.i.l.bf16 %v16100_v48  ;;  %v9229_v6 = vunpack.i.h.bf16 %v16109_v22 }
 0x880   : > { %v6086_v49 = vsel %vm6026_vm4, %v6021_v30, %v8334_v24 }
 0x881   : > { %v9187_v15 = vpop.permute.xlu1 %9186  ;;  %v6151_v13 = vsel %vm6091_vm5, %v6086_v49, %v9199_v11 }
 0x882   : > { %v9188_v47 = vunpack.i.l.bf16 %v9187_v15  ;;  %v9189_v37 = vunpack.i.h.bf16 %v9187_v15  ;;  %v9194_v15 = vunpack.i.h.bf16 %v16069_v52 }
 0x883   : > { %v6734_v38 = vpop.f32.mrf.mxu1 }
 0x884   : > { %v6735_v29 = vadd.f32 %v15980_v8, %v6734_v38 }
 0x885   : > { %v9242_v35 = vpop.permute.xlu0 %9241 }
 0x886   : > { %v6842_v17 = vmax.f32 %v6735_v29, 0.0  ;;  %v6020_v29 = vsel %vm5961_vm3, %v1526_v28, %v8173_v57  ;;  %v9228_v57 = vunpack.i.l.bf16 %v16109_v22  ;;  %v9244_v40 = vunpack.i.h.bf16 %v9242_v35 }
 0x887   : > { %v16114_v9 = vpop.f32.mrf.mxu2  ;;  %v6085_v3 = vsel %vm6026_vm4, %v6020_v29, %v8333_v63  ;;  %v9243_v48 = vunpack.i.l.bf16 %v9242_v35  ;;  %v6216_v22 = vsel %vm6156_vm6, %v6151_v13, %v9209_v61 }
 0x888   : > { %v6888_v58 = vpack.c.bf16 %v6842_v17, %v6841_v0  ;;  %v6076_v0 = vsel %vm6026_vm4, %v6011_v33, %v8309_v14  ;;  %v6075_v17 = vsel %vm6026_vm4, %v6010_v2, %v8308_v53  ;;  %v6150_v1 = vsel %vm6091_vm5, %v6085_v3, %v9198_v55  ;;  %v9237_v53 = vpop.permute.xlu2 %9236 }
 0x889   : > { %v9202_v39 = vpop.permute.xlu1 %9201  ;;  %v9193_v14 = vunpack.i.l.bf16 %v16069_v52  ;;  %v6141_v41 = vsel %vm6091_vm5, %v6076_v0, %v9189_v37  ;;  %v6215_v21 = vsel %vm6156_vm6, %v6150_v1, %v9208_v59  ;;  %v9239_v63 = vunpack.i.h.bf16 %v9237_v53 }
 0x88a   : > { %v9203_v19 = vunpack.i.l.bf16 %v9202_v39  ;;  %v9204_v36 = vunpack.i.h.bf16 %v9202_v39  ;;  %v9238_v27 = vunpack.i.l.bf16 %v9237_v53  ;;  %v6206_v28 = vsel %vm6156_vm6, %v6141_v41, %v9194_v15 }
 0x88b   : > { %v6737_v38 = vpop.f32.mrf.mxu1  ;;  %v9214_v0 = vunpack.i.h.bf16 %v16095_v60 }
 0x88c   : > { %7846 = vmatmul.msk.bf16.gmra.mxu2 %vm5961_vm3, %v6888_v58  ;;  %v6140_v58 = vsel %vm6091_vm5, %v6075_v17, %v9188_v47  ;;  %v6738_v50 = vadd.f32 %v15980_v8, %v6737_v38  ;;  %v6271_v2 = vsel %vm6221_vm7, %v6206_v28, %v9204_v36  ;;  %v9213_v38 = vunpack.i.l.bf16 %v16095_v60  ;;  %v19172_v28 = vld [vmem:[#allocation386_spill] sm:$0xff] }
 0x88d   : > { %v6205_v52 = vsel %vm6156_vm6, %v6140_v58, %v9193_v14  ;;  %v6336_v13 = vsel %vm6286_vm8, %v6271_v2, %v9214_v0  ;;  %v9223_v60 = vunpack.i.l.bf16 %v16112_v42  ;;  %v9257_v41 = vpop.permute.xlu0 %9256 }
 0x88e   : > { %v6270_v11 = vsel %vm6221_vm7, %v6205_v52, %v9203_v19  ;;  %v6843_v49 = vmax.f32 %v6738_v50, 0.0 }
 0x88f   : > { %v16149_v18 = vpop.f32.mrf.mxu2  ;;  %v6335_v1 = vsel %vm6286_vm8, %v6270_v11, %v9213_v38  ;;  %v19173_v11 = vld [vmem:[#allocation100_spill] sm:$0xff] }
 0x890   : > { %v9252_v53 = vpop.permute.xlu2 %9251 }
 0x891   : > { %v9217_v62 = vpop.permute.xlu1 %9216 }
 0x892   : > { %v9219_v4 = vunpack.i.h.bf16 %v9217_v62  ;;  %v9218_v24 = vunpack.i.l.bf16 %v9217_v62 }
 0x893   : > { %v6739_v33 = vpop.f32.mrf.mxu1 }
 0x894   : > { %v6281_v55 = vsel %vm6221_vm7, %v6216_v22, %v9219_v4  ;;  %v6280_v39 = vsel %vm6221_vm7, %v6215_v21, %v9218_v24  ;;  %v6740_v29 = vadd.f32 %v15980_v8, %v6739_v33  ;;  %v19170_v22 = vld [vmem:[#allocation212_spill] sm:$0xff]  ;;  %v19175_v33 = vld [vmem:[#allocation101_spill] sm:$0xff] }
 0x895   : > { %v6346_v30 = vsel %vm6286_vm8, %v6281_v55, %v9229_v6  ;;  %v6345_v47 = vsel %vm6286_vm8, %v6280_v39, %v9228_v57  ;;  %v9224_v57 = vunpack.i.h.bf16 %v16112_v42  ;;  %v8179_v4 = vunpack.i.h.bf16 %v19170_v22  ;;  %v19174_v39 = vld [vmem:[#allocation435_spill] sm:$0xff] }
 0x896   : > { %v6410_v17 = vsel %vm6351_vm9, %v6345_v47, %v9238_v27  ;;  %v6411_v37 = vsel %vm6351_vm9, %v6346_v30, %v9239_v63  ;;  %v6844_v3 = vmax.f32 %v6740_v29, 0.0  ;;  %v8178_v24 = vunpack.i.l.bf16 %v19170_v22  ;;  %v19171_v27 = vld [vmem:[#allocation144_spill] sm:$0xff] }
 0x897   : > { %v16171_v35 = vpop.f32.mrf.mxu2  ;;  %v6475_v61 = vsel %vm6416_vm10, %v6410_v17, %v9243_v48  ;;  %v6476_v59 = vsel %vm6416_vm10, %v6411_v37, %v9244_v40  ;;  %v6400_v48 = vsel %vm6351_vm9, %v6335_v1, %v9223_v60  ;;  %v6401_v40 = vsel %vm6351_vm9, %v6336_v13, %v9224_v57 }
 0x898   : > { %v6510_v6 = vpack.c.bf16 %v6476_v59, %v6475_v61  ;;  %v6889_v15 = vpack.c.bf16 %v6844_v3, %v6843_v49  ;;  %v8339_v52 = vunpack.i.h.bf16 %v19171_v27  ;;  %v8338_v50 = vunpack.i.l.bf16 %v19171_v27  ;;  %v9267_v3 = vpop.permute.xlu2 %9266  ;;  %v9272_v59 = vpop.permute.xlu0 %9271 }
 0x899   : > { %v9232_v14 = vpop.permute.xlu1 %9231  ;;  %v1529_v55 = vmul.f32 %v19173_v11, %v19172_v28  ;;  %v1528_v2 = vmul.f32 %v19175_v33, %v19174_v39  ;;  %v9254_v57 = vunpack.i.h.bf16 %v9252_v53  ;;  %v9253_v60 = vunpack.i.l.bf16 %v9252_v53 }
 0x89a   : > { %v9234_v58 = vunpack.i.h.bf16 %v9232_v14  ;;  %v9233_v19 = vunpack.i.l.bf16 %v9232_v14  ;;  %7826 = vmatmul.msk.bf16.gmra.mxu3 %vm6537_vm11, %v6510_v6  ;;  %v9273_v28 = vunpack.i.l.bf16 %v9272_v59 }
 0x89b   : > { %v6742_v21 = vpop.f32.mrf.mxu1  ;;  %v6023_v0 = vsel %vm5961_vm3, %v1529_v55, %v8179_v4  ;;  %v6022_v38 = vsel %vm5961_vm3, %v1528_v2, %v8178_v24  ;;  %v9269_v4 = vunpack.i.h.bf16 %v9267_v3  ;;  %v9268_v24 = vunpack.i.l.bf16 %v9267_v3 }
 0x89c   : > { %v6465_v36 = vsel %vm6416_vm10, %v6400_v48, %v9233_v19  ;;  %v6466_v62 = vsel %vm6416_vm10, %v6401_v40, %v9234_v58  ;;  %7847 = vmatmul.msk.bf16.gmra.mxu2 %vm5961_vm3, %v6889_v15  ;;  %v6743_v17 = vadd.f32 %v15980_v8, %v6742_v21  ;;  %v6088_v37 = vsel %vm6026_vm4, %v6023_v0, %v8339_v52  ;;  %v16208_v27 = vpop.f32.mrf.mxu3 }
 0x89d   : > { %v6505_v42 = vpack.c.bf16 %v6466_v62, %v6465_v36  ;;  %v6087_v49 = vsel %vm6026_vm4, %v6022_v38, %v8338_v50  ;;  %v9259_v40 = vunpack.i.h.bf16 %v9257_v41  ;;  %v9258_v36 = vunpack.i.l.bf16 %v9257_v41 }
 0x89e   : > { %v6845_v15 = vmax.f32 %v6743_v17, 0.0  ;;  %v9274_v50 = vunpack.i.h.bf16 %v9272_v59 }
 0x89f   : > { %v16187_v63 = vpop.f32.mrf.mxu2  ;;  %7821 = vmatmul.msk.bf16.gmra.mxu1 %vm6537_vm11, %v6505_v42 }
 0x8a0   : > { %v9282_v2 = vpop.permute.xlu2 %9281  ;;  %v9287_v17 = vpop.permute.xlu0 %9286 }
 0x8a1   : > { %v9247_v30 = vpop.permute.xlu1 %9246 }
 0x8a2   : > { %v9249_v47 = vunpack.i.h.bf16 %v9247_v30  ;;  %v9248_v29 = vunpack.i.l.bf16 %v9247_v30 }
 0x8a3   : > { %v6744_v61 = vpop.f32.mrf.mxu1 }
 0x8a4   : > { %v6153_v1 = vsel %vm6091_vm5, %v6088_v37, %v9249_v47  ;;  %v6152_v13 = vsel %vm6091_vm5, %v6087_v49, %v9248_v29  ;;  %v6745_v6 = vadd.f32 %v15980_v8, %v6744_v61  ;;  %v19176_v29 = vld [vmem:[#allocation249_spill] sm:$0xff]  ;;  %v19177_v49 = vld [vmem:[#allocation423_spill] sm:$0xff] }
 0x8a5   : > { %v6218_v19 = vsel %vm6156_vm6, %v6153_v1, %v9254_v57  ;;  %v6217_v48 = vsel %vm6156_vm6, %v6152_v13, %v9253_v60  ;;  %v8184_v0 = vunpack.i.h.bf16 %v19176_v29  ;;  %v8183_v38 = vunpack.i.l.bf16 %v19176_v29  ;;  %v19178_v1 = vld [vmem:[#allocation104_spill] sm:$0xff] }
 0x8a6   : > { %v6846_v14 = vmax.f32 %v6745_v6, 0.0  ;;  %v6282_v53 = vsel %vm6221_vm7, %v6217_v48, %v9258_v36  ;;  %v6283_v52 = vsel %vm6221_vm7, %v6218_v19, %v9259_v40  ;;  %v8344_v3 = vunpack.i.h.bf16 %v19177_v49  ;;  %v19179_v6 = vld [vmem:[#allocation88_spill] sm:$0xff] }
 0x8a7   : > { %v16204_v58 = vpop.f32.mrf.mxu2  ;;  %v8343_v61 = vunpack.i.l.bf16 %v19177_v49  ;;  %v1531_v13 = vmul.f32 %v19178_v1, %v15134_v20  ;;  %v1530_v57 = vmul.f32 %v19179_v6, %v15061_v10  ;;  %v16235_v20 = vpop.f32.mrf.mxu3 }
 0x8a8   : > { %v6890_v62 = vpack.c.bf16 %v6846_v14, %v6845_v15 }
 0x8a9   : > { %v9262_v21 = vpop.permute.xlu1 %9261  ;;  %v6025_v19 = vsel %vm5961_vm3, %v1531_v13, %v8184_v0  ;;  %v6024_v48 = vsel %vm5961_vm3, %v1530_v57, %v8183_v38 }
 0x8aa   : > { %v9264_v42 = vunpack.i.h.bf16 %v9262_v21  ;;  %v9263_v22 = vunpack.i.l.bf16 %v9262_v21  ;;  %v6089_v36 = vsel %vm6026_vm4, %v6024_v48, %v8343_v61 }
 0x8ac   : > { %v6347_v11 = vsel %vm6286_vm8, %v6282_v53, %v9263_v22  ;;  %v6348_v55 = vsel %vm6286_vm8, %v6283_v52, %v9264_v42  ;;  %7848 = vmatmul.msk.bf16.gmra.mxu2 %vm5961_vm3, %v6890_v62  ;;  %v6747_v41 = vpop.f32.mrf.mxu1  ;;  %v6090_v62 = vsel %vm6026_vm4, %v6025_v19, %v8344_v3 }
 0x8ad   : > { %v6412_v39 = vsel %vm6351_vm9, %v6347_v11, %v9268_v24  ;;  %v6413_v33 = vsel %vm6351_vm9, %v6348_v55, %v9269_v4  ;;  %v6748_v40 = vadd.f32 %v15980_v8, %v6747_v41  ;;  %v9284_v4 = vunpack.i.h.bf16 %v9282_v2 }
 0x8ae   : > { %v6477_v30 = vsel %vm6416_vm10, %v6412_v39, %v9273_v28  ;;  %v6478_v47 = vsel %vm6416_vm10, %v6413_v33, %v9274_v50  ;;  %v9283_v24 = vunpack.i.l.bf16 %v9282_v2  ;;  %v9297_v50 = vpop.permute.xlu2 %9296  ;;  %v9289_v55 = vunpack.i.h.bf16 %v9287_v17  ;;  %v9302_v39 = vpop.permute.xlu0 %9301 }
 0x8af   : > { %v6511_v37 = vpack.c.bf16 %v6478_v47, %v6477_v30  ;;  %v16223_v59 = vpop.f32.mrf.mxu2  ;;  %v6847_v53 = vmax.f32 %v6748_v40, 0.0  ;;  %v9288_v41 = vunpack.i.l.bf16 %v9287_v17  ;;  %v9299_v38 = vunpack.i.h.bf16 %v9297_v50 }
 0x8b0   : > { %v9304_v3 = vunpack.i.h.bf16 %v9302_v39  ;;  %v9303_v61 = vunpack.i.l.bf16 %v9302_v39 }
 0x8b1   : > { %v9277_v60 = vpop.permute.xlu1 %9276  ;;  %7827 = vmatmul.msk.bf16.gmra.mxu3 %vm6537_vm11, %v6511_v37  ;;  %v9298_v37 = vunpack.i.l.bf16 %v9297_v50 }
 0x8b2   : > { %v9279_v15 = vunpack.i.h.bf16 %v9277_v60  ;;  %v9278_v14 = vunpack.i.l.bf16 %v9277_v60 }
 0x8b4   : > { %v6749_v21 = vpop.f32.mrf.mxu1  ;;  %v6155_v10 = vsel %vm6091_vm5, %v6090_v62, %v9279_v15  ;;  %v6154_v42 = vsel %vm6091_vm5, %v6089_v36, %v9278_v14 }
 0x8b5   : > { %v6750_v22 = vadd.f32 %v15980_v8, %v6749_v21  ;;  %v6220_v28 = vsel %vm6156_vm6, %v6155_v10, %v9284_v4  ;;  %v6219_v11 = vsel %vm6156_vm6, %v6154_v42, %v9283_v24 }
 0x8b6   : > { %v6284_v2 = vsel %vm6221_vm7, %v6219_v11, %v9288_v41  ;;  %v6285_v49 = vsel %vm6221_vm7, %v6220_v28, %v9289_v55 }
 0x8b7   : > { %v6848_v52 = vmax.f32 %v6750_v22, 0.0  ;;  %v16242_v47 = vpop.f32.mrf.mxu2 }
 0x8b9   : > { %v6891_v33 = vpack.c.bf16 %v6848_v52, %v6847_v53  ;;  %v9292_v30 = vpop.permute.xlu1 %9291 }
 0x8ba   : > { %v9294_v29 = vunpack.i.h.bf16 %v9292_v30  ;;  %v9293_v0 = vunpack.i.l.bf16 %v9292_v30 }
 0x8bc   : > { %v6349_v1 = vsel %vm6286_vm8, %v6284_v2, %v9293_v0  ;;  %v6350_v13 = vsel %vm6286_vm8, %v6285_v49, %v9294_v29  ;;  %7849 = vmatmul.msk.bf16.gmra.mxu2 %vm5961_vm3, %v6891_v33  ;;  %v6752_v17 = vpop.f32.mrf.mxu1 }
 0x8bd   : > { %v6414_v6 = vsel %vm6351_vm9, %v6349_v1, %v9298_v37  ;;  %v6415_v57 = vsel %vm6351_vm9, %v6350_v13, %v9299_v38  ;;  %v6777_v60 = vpop.f32.mrf.mxu3  ;;  %v6753_v48 = vadd.f32 %v15980_v8, %v6752_v17 }
 0x8be   : > { %v6479_v15 = vsel %vm6416_vm10, %v6414_v6, %v9303_v61  ;;  %v6480_v14 = vsel %vm6416_vm10, %v6415_v57, %v9304_v3  ;;  %v6778_v4 = vadd.f32 %v15980_v8, %v6777_v60 }
 0x8bf   : > { %v6512_v19 = vpack.c.bf16 %v6480_v14, %v6479_v15  ;;  %v16255_v40 = vpop.f32.mrf.mxu2  ;;  %v6849_v10 = vmax.f32 %v6753_v48, 0.0 }
 0x8c0   : > { %v6859_v52 = vmax.f32 %v6778_v4, 0.0 }
 0x8c1   : > { %7828 = vmatmul.msk.bf16.gmra.mxu3 %vm6537_vm11, %v6512_v19 }
 0x8c4   : > { %v6754_v36 = vpop.f32.mrf.mxu1 }
 0x8c5   : > { %v6755_v62 = vadd.f32 %v15980_v8, %v6754_v36  ;;  %v6779_v21 = vpop.f32.mrf.mxu3 }
 0x8c6   : > { %v6780_v22 = vadd.f32 %v15980_v8, %v6779_v21 }
 0x8c7   : > { %v6850_v42 = vmax.f32 %v6755_v62, 0.0  ;;  %v16261_v50 = vpop.f32.mrf.mxu2 }
 0x8c8   : > { %v6860_v53 = vmax.f32 %v6780_v22, 0.0 }
 0x8c9   : > { %v6892_v24 = vpack.c.bf16 %v6850_v42, %v6849_v10 }
 0x8ca   : > { %v6897_v28 = vpack.c.bf16 %v6860_v53, %v6859_v52 }
 0x8cc   : > { %7850 = vmatmul.msk.bf16.gmra.mxu2 %vm5961_vm3, %v6892_v24 }
 0x8cf   : > { %v16264_v11 = vpop.f32.mrf.mxu2 }
 0x8d1   : > { %7855 = vmatmul.msk.bf16.vlgmr.msra.gmra.mxu3 %vm5961_vm3, %v6897_v28 }
 0x8d7   : > { %v16266_v39 = vpop.f32.mrf.mxu2 }
 0x8dc   : > { %v6757_v55 = vpop.f32.mrf.mxu1 }
 0x8dd   : > { %v6782_v41 = vpop.f32.mrf.mxu3  ;;  %v6758_v33 = vadd.f32 %v15980_v8, %v6757_v55 }
 0x8de   : > { %v6783_v30 = vadd.f32 %v15980_v8, %v6782_v41 }
 0x8df   : > { %v6851_v2 = vmax.f32 %v6758_v33, 0.0  ;;  %v16273_v17 = vpop.f32.mrf.mxu2 }
 0x8e0   : > { %v6861_v3 = vmax.f32 %v6783_v30, 0.0 }
 0x8e4   : > { %v6759_v29 = vpop.f32.mrf.mxu1 }
 0x8e5   : > { %v6760_v0 = vadd.f32 %v15980_v8, %v6759_v29  ;;  %v6784_v38 = vpop.f32.mrf.mxu3 }
 0x8e6   : > { %v6785_v37 = vadd.f32 %v15980_v8, %v6784_v38 }
 0x8e7   : > { %v6852_v49 = vmax.f32 %v6760_v0, 0.0  ;;  %v16276_v6 = vpop.f32.mrf.mxu2 }
 0x8e8   : > { %v6862_v61 = vmax.f32 %v6785_v37, 0.0 }
 0x8e9   : > { %v6893_v1 = vpack.c.bf16 %v6852_v49, %v6851_v2 }
 0x8ea   : > { %v6898_v13 = vpack.c.bf16 %v6862_v61, %v6861_v3 }
 0x8eb   : > { %7851 = vmatmul.msk.bf16.gmra.mxu2 %vm5961_vm3, %v6893_v1 }
 0x8ec   : > { %7856 = vmatmul.msk.bf16.gmra.mxu3 %vm5961_vm3, %v6898_v13 }
 0x8ef   : > { %v16278_v15 = vpop.f32.mrf.mxu2 }
 0x8f7   : > { %v16284_v53 = vpop.f32.mrf.mxu2 }
 0x8fc   : > { %v6762_v57 = vpop.f32.mrf.mxu1 }
 0x8fd   : > { %v6787_v60 = vpop.f32.mrf.mxu3  ;;  %v6763_v14 = vadd.f32 %v15980_v8, %v6762_v57 }
 0x8fe   : > { %v6788_v19 = vadd.f32 %v15980_v8, %v6787_v60 }
 0x8ff   : > { %v6853_v10 = vmax.f32 %v6763_v14, 0.0  ;;  %v16288_v28 = vpop.f32.mrf.mxu2  ;;  %v6775_v14 = vadd.f32 %v15980_v8, %v16235_v20 }
 0x900   : > { %v6863_v22 = vmax.f32 %v6788_v19, 0.0 }
 0x904   : > { %v6764_v48 = vpop.f32.mrf.mxu1 }
 0x905   : > { %v6765_v36 = vadd.f32 %v15980_v8, %v6764_v48  ;;  %v6789_v62 = vpop.f32.mrf.mxu3  ;;  %v6773_v48 = vadd.f32 %v15980_v8, %v16208_v27 }
 0x906   : > { %v6790_v21 = vadd.f32 %v15980_v8, %v6789_v62  ;;  %v6858_v62 = vmax.f32 %v6775_v14, 0.0 }
 0x907   : > { %v6854_v42 = vmax.f32 %v6765_v36, 0.0  ;;  %v16290_v33 = vpop.f32.mrf.mxu2 }
 0x908   : > { %v6864_v4 = vmax.f32 %v6790_v21, 0.0  ;;  %v6857_v21 = vmax.f32 %v6773_v48, 0.0 }
 0x909   : > { %v6894_v24 = vpack.c.bf16 %v6854_v42, %v6853_v10 }
 0x90a   : > { %v6899_v52 = vpack.c.bf16 %v6864_v4, %v6863_v22  ;;  %v6896_v10 = vpack.c.bf16 %v6858_v62, %v6857_v21  ;;  %v16344_v21 = vld [vmem:[%s17009_s7] ss:$0 sm:$0xff] }
 0x90b   : > { %7852 = vmatmul.msk.bf16.gmra.mxu2 %vm5961_vm3, %v6894_v24 }
 0x90c   : > { %7857 = vmatmul.msk.bf16.gmra.mxu3 %vm5961_vm3, %v6899_v52 }
 0x90f   : > { %v16296_v61 = vpop.f32.mrf.mxu2 }
 0x917   : > { %v16302_v19 = vpop.f32.mrf.mxu2 }
 0x91c   : > { %v6767_v55 = vpop.f32.mrf.mxu1 }
 0x91d   : > { %v6792_v41 = vpop.f32.mrf.mxu3  ;;  %v6768_v30 = vadd.f32 %v15980_v8, %v6767_v55 }
 0x91e   : > { %v6793_v29 = vadd.f32 %v15980_v8, %v6792_v41 }
 0x91f   : > { %v6855_v49 = vmax.f32 %v6768_v30, 0.0  ;;  %v16308_v22 = vpop.f32.mrf.mxu2 }
 0x920   : > { %v6865_v1 = vmax.f32 %v6793_v29, 0.0 }
 0x924   : > { %v6769_v0 = vpop.f32.mrf.mxu1 }
 0x925   : > { %v6770_v38 = vadd.f32 %v15980_v8, %v6769_v0  ;;  %v6794_v37 = vpop.f32.mrf.mxu3 }
 0x926   : > { %v6795_v2 = vadd.f32 %v15980_v8, %v6794_v37 }
 0x927   : > { %v6856_v3 = vmax.f32 %v6770_v38, 0.0  ;;  %v16312_v27 = vpop.f32.mrf.mxu2 }
 0x928   : > { %v6866_v13 = vmax.f32 %v6795_v2, 0.0 }
 0x929   : > { %v6895_v57 = vpack.c.bf16 %v6856_v3, %v6855_v49 }
 0x92a   : > { %v6900_v60 = vpack.c.bf16 %v6866_v13, %v6865_v1 }
 0x92b   : > { %7853 = vmatmul.msk.bf16.gmra.mxu2 %vm5961_vm3, %v6895_v57 }
 0x92c   : > { %7858 = vmatmul.msk.bf16.gmra.mxu3 %vm5961_vm3, %v6900_v60  ;;  %v7920_v60 = vld [vmem:[%s17010_s8 + $0x38] sm:$0xff] }
 0x92d   : > { %7337 = vmatpush.bf16.msrb.mxu3 %v7920_v60 }
 0x92f   : > { %v16316_v2 = vpop.f32.mrf.mxu2 }
 0x934   : > { %v6797_v36 = vpop.f32.mrf.mxu3 }
 0x935   : > { %v6798_v42 = vadd.f32 %v15980_v8, %v6797_v36 }
 0x937   : > { %v6867_v52 = vmax.f32 %v6798_v42, 0.0  ;;  %v16319_v3 = vpop.f32.mrf.mxu2 }
 0x93b   : > { %7854 = vmatmul.msk.bf16.gmra.mxu2 %vm5961_vm3, %v6896_v10  ;;  %v16348_v10 = vadd.f32 %v16344_v21, %v15563_v44  ;;  %v16367_v44 = vadd.f32 %v16344_v21, %v15652_v5  ;;  %v16384_v5 = vadd.f32 %v16344_v21, %v15831_v32  ;;  %v16401_v32 = vadd.f32 %v16344_v21, %v15903_v26 }
 0x93c   : > { %v6799_v4 = vpop.f32.mrf.mxu3 }
 0x93d   : > { %v6800_v24 = vadd.f32 %v15980_v8, %v6799_v4  ;;  %v16354_v4 = vadd.f32 %v16344_v21, %v15510_v31 }
 0x93f   : > { %v6868_v20 = vmax.f32 %v6800_v24, 0.0  ;;  %v16321_v1 = vpop.f32.mrf.mxu2  ;;  %v16358_v24 = vadd.f32 %v16344_v21, %v15608_v54  ;;  %v16374_v54 = vadd.f32 %v16344_v21, %v15729_v25 }
 0x941   : > { %v6901_v55 = vpack.c.bf16 %v6868_v20, %v6867_v52  ;;  %v7918_v52 = vld [vmem:[%s17010_s8 + $0x28] sm:$0xff]  ;;  %v7176_v20 = vadd.f32 %v16348_v10, %v16354_v4 }
 0x943   : > { %7859 = vmatmul.msk.bf16.gmra.mxu3 %vm5961_vm3, %v6901_v55  ;;  %v7177_v31 = vadd.f32 %v7176_v20, %v16358_v24  ;;  %v16415_v20 = vadd.f32 %v16344_v21, %v16290_v33  ;;  %v16435_v33 = vadd.f32 %v16344_v21, %v16013_v16  ;;  %v16451_v16 = vadd.f32 %v16344_v21, %v16308_v22 }
 0x944   : > { %v6802_v41 = vpop.f32.mrf.mxu3 }
 0x945   : > { %v6803_v30 = vadd.f32 %v15980_v8, %v6802_v41  ;;  %v7178_v41 = vadd.f32 %v7177_v31, %v16367_v44  ;;  %19180 = vst [vmem:[#allocation230_spill] sm:$0xff] %v16451_v16 }
 0x947   : > { %v6869_v38 = vmax.f32 %v6803_v30, 0.0  ;;  %v16323_v13 = vpop.f32.mrf.mxu2  ;;  %v16379_v30 = vadd.f32 %v16344_v21, %v15789_v12 }
 0x94c   : > { %v6804_v29 = vpop.f32.mrf.mxu3 }
 0x94d   : > { %v6805_v0 = vadd.f32 %v15980_v8, %v6804_v29  ;;  %v7919_v8 = vld [vmem:[%s17010_s8 + $0x30] sm:$0xff]  ;;  %v7179_v29 = vadd.f32 %v7178_v41, %v16374_v54  ;;  %v16422_v41 = vadd.f32 %v16344_v21, %v15993_v51  ;;  %v16441_v51 = vadd.f32 %v16344_v21, %v16302_v19 }
 0x94e   : > { %7338 = vmatpush.bf16.msrb.mxu3 %v7919_v8  ;;  %v16406_v8 = vadd.f32 %v16344_v21, %v15919_v43  ;;  %v16426_v43 = vadd.f32 %v16344_v21, %v16288_v28 }
 0x94f   : > { %v6870_v37 = vmax.f32 %v6805_v0, 0.0  ;;  %v16325_v57 = vpop.f32.mrf.mxu2  ;;  %v7917_v0 = vld [vmem:[%s17010_s8 + $0x20] sm:$0xff]  ;;  %v7180_v25 = vadd.f32 %v7179_v29, %v16379_v30 }
 0x951   : > { %v6902_v49 = vpack.c.bf16 %v6870_v37, %v6869_v38  ;;  %v16394_v37 = vadd.f32 %v16344_v21, %v15869_v46  ;;  %v16411_v46 = vadd.f32 %v16344_v21, %v15956_v7  ;;  %v16430_v7 = vadd.f32 %v16344_v21, %v16296_v61 }
 0x952   : > { %7339 = vmatpush.bf16.msrb.mxu3 %v7918_v52  ;;  %v16446_v61 = vadd.f32 %v16344_v21, %v16020_v45 }
 0x953   : > { %7860 = vmatmul.msk.bf16.gmra.mxu3 %vm5961_vm3, %v6902_v49  ;;  %v7181_v49 = vadd.f32 %v7180_v25, %v16384_v5 }
 0x954   : > { %v16333_v14 = vpop.f32.mrf.mxu3 }
 0x955   : > { %v7182_v60 = vadd.f32 %v7181_v49, %v16394_v37 }
 0x956   : > { %7340 = vmatpush.bf16.msrb.mxu3 %v7917_v0  ;;  %v7213_v0 = vadd.f32 %v16415_v20, %v16426_v43 }
 0x957   : > { %v16335_v48 = vpop.f32.mrf.mxu2  ;;  %v7183_v52 = vadd.f32 %v7182_v60, %v16401_v32 }
 0x958   : > { %v7214_v49 = vadd.f32 %v7213_v0, %v16430_v7  ;;  %v16471_v0 = vadd.f32 %v16344_v21, %v16316_v2  ;;  %v16488_v2 = vadd.f32 %v16344_v21, %v16114_v9 }
 0x959   : > { %v7184_v26 = vadd.f32 %v7183_v52, %v16406_v8  ;;  %v16456_v52 = vadd.f32 %v16344_v21, %v16057_v23 }
 0x95a   : > { %v7215_v19 = vadd.f32 %v7214_v49, %v16441_v51 }
 0x95b   : > { %v7185_v29 = vadd.f32 %v7184_v26, %v16411_v46  ;;  %v16461_v26 = vadd.f32 %v16344_v21, %v16312_v27  ;;  %v16478_v27 = vadd.f32 %v16344_v21, %v16105_v34 }
 0x95c   : > { %v16337_v36 = vpop.f32.mrf.mxu3  ;;  %v7216_v22 = vadd.f32 %v7215_v19, %v16451_v16 }
 0x95d   : > { %v7186_v28 = vadd.f32 %v7185_v29, %v16422_v41  ;;  %v16466_v29 = vadd.f32 %v16344_v21, %v16087_v56  ;;  %v16483_v56 = vadd.f32 %v16344_v21, %v16319_v3 }
 0x95e   : > { %v7217_v49 = vadd.f32 %v7216_v22, %v16461_v26  ;;  %v16498_v22 = vadd.f32 %v16344_v21, %v16149_v18 }
 0x95f   : > { %v7187_v60 = vadd.f32 %v7186_v28, %v16435_v33  ;;  %19181 = vst [vmem:[#allocation61_spill] sm:$0xff] %v16483_v56 }
 0x960   : > { %v7218_v16 = vadd.f32 %v7217_v49, %v16471_v0  ;;  %v16508_v49 = vadd.f32 %v16344_v21, %v16171_v35  ;;  %v16525_v35 = vadd.f32 %v16344_v21, %v16335_v48 }
 0x961   : > { %v7188_v45 = vadd.f32 %v7187_v60, %v16446_v61 }
 0x962   : > { %v7219_v3 = vadd.f32 %v7218_v16, %v16483_v56  ;;  %19184 = vst [vmem:[#allocation432_spill] sm:$0xff] %v16525_v35 }
 0x963   : > { %v7189_v28 = vadd.f32 %v7188_v45, %v16456_v52  ;;  %v16493_v45 = vadd.f32 %v16344_v21, %v16321_v1 }
 0x965   : > { %v7190_v19 = vadd.f32 %v7189_v28, %v16466_v29  ;;  %19182 = vst [vmem:[#allocation490_spill] sm:$0xff] %v16493_v45  ;;  %v16503_v28 = vadd.f32 %v16344_v21, %v16323_v13  ;;  %v7220_v1 = vadd.f32 %v7219_v3, %v16493_v45  ;;  %v16520_v13 = vadd.f32 %v16344_v21, %v16187_v63 }
 0x967   : > { %v7191_v34 = vadd.f32 %v7190_v19, %v16478_v27  ;;  %v16513_v19 = vadd.f32 %v16344_v21, %v16325_v57  ;;  %v16530_v57 = vadd.f32 %v16344_v21, %v16204_v58 }
 0x969   : > { %v7192_v9 = vadd.f32 %v7191_v34, %v16488_v2  ;;  %19183 = vst [vmem:[#allocation152_spill] sm:$0xff] %v16513_v19  ;;  %v7221_v34 = vadd.f32 %v7220_v1, %v16503_v28  ;;  %v16540_v1 = vadd.f32 %v16344_v21, %v16223_v59  ;;  %v7916_v59 = vld [vmem:[%s17010_s8 + $0x18] sm:$0xff] }
 0x96a   : > { %7341 = vmatpush.bf16.msrb.mxu3 %v7916_v59  ;;  %v16584_v59 = vadd.f32 %v16344_v21, %v16264_v11 }
 0x96b   : > { %v7193_v16 = vadd.f32 %v7192_v9, %v16498_v22  ;;  %v7222_v45 = vadd.f32 %v7221_v34, %v16513_v19  ;;  %v16550_v34 = vadd.f32 %v16344_v21, %v16242_v47 }
 0x96d   : > { %v7194_v3 = vadd.f32 %v7193_v16, %v16508_v49  ;;  %v7223_v48 = vadd.f32 %v7222_v45, %v16525_v35 }
 0x96e   : > { %v16339_v62 = vpop.f32.mrf.mxu2 }
 0x96f   : > { %v16350_v42 = vpop.f32.mrf.mxu3  ;;  %v16535_v9 = vadd.f32 %v16344_v21, %v16339_v62  ;;  %v7195_v63 = vadd.f32 %v7194_v3, %v16520_v13 }
 0x971   : > { %19185 = vst [vmem:[#allocation436_spill] sm:$0xff] %v16535_v9  ;;  %v7196_v58 = vadd.f32 %v7195_v63, %v16530_v57  ;;  %v7224_v62 = vadd.f32 %v7223_v48, %v16535_v9 }
 0x973   : > { %v7197_v45 = vadd.f32 %v7196_v58, %v16540_v1  ;;  %v16575_v58 = vadd.f32 %v16344_v21, %v16261_v50 }
 0x975   : > { %v7198_v35 = vadd.f32 %v7197_v45, %v16550_v34  ;;  %v16593_v45 = vadd.f32 %v16344_v21, %v16266_v39  ;;  %v16608_v39 = vadd.f32 %v16344_v21, %v16276_v6 }
 0x976   : > { %v16369_v55 = vpop.f32.mrf.mxu2 }
 0x977   : > { %v16389_v38 = vpop.f32.mrf.mxu3  ;;  %v16545_v16 = vadd.f32 %v16344_v21, %v16369_v55  ;;  %v16563_v55 = vadd.f32 %v16344_v21, %v16255_v40 }
 0x979   : > { %19186 = vst [vmem:[#allocation388_spill] sm:$0xff] %v16545_v16  ;;  %v7225_v63 = vadd.f32 %v7224_v62, %v16545_v16 }
 0x98e   : > { %v16396_v12 = vpop.f32.mrf.mxu2 }
 0x98f   : > { %v16417_v31 = vpop.f32.mrf.mxu3  ;;  %v16555_v3 = vadd.f32 %v16344_v21, %v16396_v12  ;;  %v7915_v12 = vld [vmem:[%s17010_s8 + $0x10] sm:$0xff] }
 0x990   : > { %7342 = vmatpush.bf16.msrb.mxu3 %v7915_v12 }
 0x991   : > { %v7226_v40 = vadd.f32 %v7225_v63, %v16555_v3  ;;  %v16602_v63 = vadd.f32 %v16344_v21, %v16273_v17  ;;  %v16617_v17 = vadd.f32 %v16344_v21, %v16278_v15 }
 0x996   : > { %v7133_v25 = vpop.f32.mrf.mxu2 }
 0x997   : > { %v16473_v23 = vpop.f32.mrf.mxu3  ;;  %v16567_v47 = vadd.f32 %v16344_v21, %v7133_v25  ;;  %v7199_v25 = vadd.f32 %v7198_v35, %v16563_v55 }
 0x999   : > { %v7227_v16 = vadd.f32 %v7226_v40, %v16567_v47  ;;  %v7200_v50 = vadd.f32 %v7199_v25, %v16575_v58 }
 0x99b   : > { %v7201_v11 = vadd.f32 %v7200_v50, %v16584_v59 }
 0x99d   : > { %v7202_v25 = vadd.f32 %v7201_v11, %v16593_v45 }
 0x99f   : > { %v7203_v50 = vadd.f32 %v7202_v25, %v16602_v63 }
 0x9a1   : > { %v7204_v6 = vadd.f32 %v7203_v50, %v16608_v39 }
 0x9a3   : > { %v7205_v15 = vadd.f32 %v7204_v6, %v16617_v17 }
 0x9ae   : > { %v7136_v60 = vpop.f32.mrf.mxu2 }
 0x9af   : > { %v16515_v18 = vpop.f32.mrf.mxu3  ;;  %v16579_v62 = vadd.f32 %v16344_v21, %v7136_v60 }
 0x9b1   : > { %19187 = vst [vmem:[#allocation332_spill] sm:$0xff] %v16579_v62  ;;  %v7228_v60 = vadd.f32 %v7227_v16, %v16579_v62 }
 0x9b6   : > { %v7138_v56 = vpop.f32.mrf.mxu2 }
 0x9b7   : > { %v7163_v48 = vpop.f32.mrf.mxu3  ;;  %v16588_v19 = vadd.f32 %v16344_v21, %v7138_v56 }
 0x9b9   : > { %19188 = vst [vmem:[#allocation375_spill] sm:$0xff] %v16588_v19  ;;  %v7229_v56 = vadd.f32 %v7228_v60, %v16588_v19  ;;  %v16621_v60 = vadd.f32 %v16344_v21, %v16333_v14  ;;  %v16637_v14 = vadd.f32 %v16344_v21, %v16350_v42 }
 0x9bb   : > { %19191 = vst [vmem:[#allocation311_spill] sm:$0xff] %v16621_v60 }
 0x9bc   : > { %19193 = vst [vmem:[#allocation155_spill] sm:$0xff] %v16637_v14 }
 0x9be   : > { %v7141_v9 = vpop.f32.mrf.mxu2 }
 0x9bf   : > { %v16597_v35 = vadd.f32 %v16344_v21, %v7141_v9 }
 0x9c1   : > { %19189 = vst [vmem:[#allocation317_spill] sm:$0xff] %v16597_v35  ;;  %v7230_v16 = vadd.f32 %v7229_v56, %v16597_v35  ;;  %v16627_v56 = vadd.f32 %v16344_v21, %v16284_v53  ;;  %v9598_v35 = vmov 256.0   ;;  %v16643_v53 = vadd.f32 %v16344_v21, %v16389_v38  ;;  %v7914_v38 = vld [vmem:[%s17010_s8 + $0x8] sm:$0xff] }
 0x9c2   : > { %9310 = vrcp.f32 %v9598_v35  ;;  %7343 = vmatpush.bf16.msrb.mxu3 %v7914_v38 }
 0x9c3   : > { %v7206_v50 = vadd.f32 %v7205_v15, %v16627_v56  ;;  %19194 = vst [vmem:[#allocation164_spill] sm:$0xff] %v16643_v53 }
 0x9c5   : > { %v7207_v6 = vrot.slane %v7206_v50, 4 }
 0x9c6   : > { %v7143_v12 = vpop.f32.mrf.mxu2  ;;  %v7166_v40 = vpop.f32.mrf.mxu3 }
 0x9c7   : > { %v16612_v9 = vadd.f32 %v16344_v21, %v7143_v12  ;;  %v16631_v12 = vadd.f32 %v16344_v21, %v16337_v36 }
 0x9c8   : > { %v9311_v35 = vpop.eup %9310 }
 0x9c9   : > { %19190 = vst [vmem:[#allocation324_spill] sm:$0xff] %v16612_v9  ;;  %v7231_v11 = vadd.f32 %v7230_v16, %v16612_v9  ;;  %vm7255_vm12 = vweird.f32 %v9311_v35 }
 0x9ca   : > { %19192 = vst [vmem:[#allocation158_spill] sm:$0xff] %v16631_v12 }
 0x9cb   : > { %v7232_v25 = vadd.f32 %v7231_v11, %v16621_v60  ;;  %v16648_v11 = vadd.f32 %v16344_v21, %v16417_v31 }
 0x9cd   : > { %v7233_v16 = vadd.f32 %v7232_v25, %v16631_v12  ;;  %19195 = vst [vmem:[#allocation71_spill] sm:$0xff] %v16648_v11  ;;  %v16653_v25 = vadd.f32 %v16344_v21, %v16473_v23  ;;  %v16675_v12 = vadd.f32 %v16344_v21, %v7166_v40 }
 0x9ce   : > { %v7168_v9 = vpop.f32.mrf.mxu3 }
 0x9cf   : > { %v7234_v36 = vadd.f32 %v7233_v16, %v16637_v14  ;;  %19196 = vst [vmem:[#allocation150_spill] sm:$0xff] %v16653_v25  ;;  %v16661_v16 = vadd.f32 %v16344_v21, %v16515_v18  ;;  %v7251_v14 = vmul.f32 256.0, %v9311_v35  ;;  %v7352_v18 = vld [vmem:[%s17012_s10] sm:$0x3] }
 0x9d0   : > { %19199 = vst [vmem:[#allocation20_spill] sm:$0xff] %v16675_v12  ;;  %v7361_v38 = vsel %vm6634_vm2, %v7352_v18, 0 }
 0x9d1   : > { %v7235_v42 = vadd.f32 %v7234_v36, %v16643_v53  ;;  %19197 = vst [vmem:[#allocation501_spill] sm:$0xff] %v16661_v16  ;;  %v7913_v36 = vld [vmem:[%s17010_s8] sm:$0xff]  ;;  %v7208_v53 = vadd.f32 %v7207_v6, %v7206_v50  ;;  %v16681_v6 = vadd.f32 %v16344_v21, %v7168_v9 }
 0x9d2   : > { %7344 = vmatpush.bf16.msrb.mxu3 %v7913_v36 }
 0x9d3   : > { %v7236_v15 = vadd.f32 %v7235_v42, %v16648_v11  ;;  %v16668_v42 = vadd.f32 %v16344_v21, %v7163_v48  ;;  %v7209_v50 = vrot.slane %v7208_v53, 2  ;;  %19200 = vst [vmem:[#allocation319_spill] sm:$0xff] %v16681_v6 }
 0x9d5   : > { %v7237_v31 = vadd.f32 %v7236_v15, %v16653_v25  ;;  %19198 = vst [vmem:[#allocation449_spill] sm:$0xff] %v16668_v42  ;;  %v7210_v60 = vadd.f32 %v7209_v50, %v7208_v53 }
 0x9d6   : > { %v7171_v23 = vpop.f32.mrf.mxu3  ;;  %7370 = vmatpush.bf16.msra.mxu3 %v7361_v38 }
 0x9d7   : > { %v7238_v11 = vadd.f32 %v7237_v31, %v16661_v16  ;;  %v7252_v31 = vsub.f32 1.0, %v7251_v14  ;;  %v16685_v25 = vadd.f32 %v16344_v21, %v7171_v23 }
 0x9d9   : > { %v7239_v15 = vadd.f32 %v7238_v11, %v16668_v42  ;;  %19201 = vst [vmem:[#allocation321_spill] sm:$0xff] %v16685_v25  ;;  %v7253_v18 = vmul.f32 %v9311_v35, %v7252_v31 }
 0x9db   : > { %v7240_v48 = vadd.f32 %v7239_v15, %v16675_v12  ;;  %v7211_v15 = vrot.slane %v7210_v60, 1  ;;  %v7254_v9 = vadd.f32 %v9311_v35, %v7253_v18 }
 0x9dd   : > { %v7241_v16 = vadd.f32 %v7240_v48, %v16681_v6  ;;  %v7212_v42 = vadd.f32 %v7211_v15, %v7210_v60  ;;  %v7256_v6 = vsel %vm7255_vm12, %v9311_v35, %v7254_v9 }
 0x9de   : > { %v7173_v40 = vpop.f32.mrf.mxu3 }
 0x9df   : > { %v7242_v11 = vadd.f32 %v7241_v16, %v16685_v25  ;;  %v16689_v36 = vadd.f32 %v16344_v21, %v7173_v40  ;;  %v7257_v19 = vmul.f32 %v7256_v6, %v7212_v42 }
 0x9e1   : > { %v7243_v38 = vadd.f32 %v7242_v11, %v16689_v36  ;;  %v7259_v50 = vpack.c.bf16 %v7257_v19, %v7257_v19  ;;  %v9309_v19 = vld [vmem:[%s17013_s11] ss:$0 sm:$0xff] }
 0x9e3   : > { %v7244_v12 = vrot.slane %v7243_v38, 4  ;;  %v7283_v21 = vunpack.c.l.b16 %v7259_v50 }
 0x9e5   : > { %v7245_v14 = vadd.f32 %v7244_v12, %v7243_v38  ;;  %v9308_v12 = vld [vmem:[%s17011_s9] ss:$0 sm:$0xff] }
 0x9e7   : > { %v7246_v48 = vrot.slane %v7245_v14, 2 }
 0x9e9   : > { %v7247_v23 = vadd.f32 %v7246_v48, %v7245_v14 }
 0x9eb   : > { %v7248_v62 = vrot.slane %v7247_v23, 1 }
 0x9ed   : > { %v7249_v53 = vadd.f32 %v7248_v62, %v7247_v23 }
 0x9ef   : > { %v7258_v16 = vmul.f32 %v7256_v6, %v7249_v53 }
 0x9f1   : > { %v7260_v25 = vpack.c.bf16 %v7258_v16, %v7258_v16 }
 0x9f3   : > { %v7284_v31 = vunpack.c.l.b16 %v7260_v25 }
 0x9f5   : > { %v7286_v40 = vsel %vm7285_vm13, %v7284_v31, %v7283_v21 }
 0x9f6   : > { %v7287_v11 = vpack.c.b16 %v7286_v40, %v7286_v40 }
 0x9f8   : > { %7345 = vmatmul.bf16.vlgmr.msrb.gmra.mxu3 %v7287_v11 }
 0xa7b   : > { %v7346_v60 = vpop.f32.mrf.mxu3 }
 0xa7c   : > { %v7347_v18 = vadd.f32 %v9308_v12, %v7346_v60 }
 0xa7e   : > { %v7350_v35 = vmax.f32 %v7347_v18, 0.0 }
 0xa80   : > { %v7351_v38 = vpack.c.bf16 %v7350_v35, %v7350_v35 }
 0xa82   : > { %7893 = vmatmul.msk.bf16.vlgmr.msra.gmra.mxu3 %vm5961_vm3, %v7351_v38 }
 0xa83   : > { %v7348_v62 = vpop.f32.mrf.mxu3 }
 0xb05   : > { %v7372_v42 = vpop.f32.mrf.mxu3 }
 0xb06   : > { %v7373_v25 = vadd.f32 %v9309_v19, %v7372_v42 }
 0xb08   : > { %v7894_v6 = vmul.f32 -1.442695, %v7373_v25  ;;  %v9418_v25 = vld [vmem:[%s9757_s18] sm:$0xff] }
 0xb0a   : > { %9312 = vpow2.f32 %v7894_v6  ;;  %v9419_v6 = vld [vmem:[%s9757_s18 + $0x8] sm:$0xff] }
 0xb0d   : > { %v7374_v15 = vpop.f32.mrf.mxu3 }
 0xb10   : > { %v9313_v9 = vpop.eup %9312 }
 0xb11   : > { %v7379_v14 = vadd.f32 1.0, %v9313_v9  ;;  %v9420_v9 = vld [vmem:[%s9757_s18 + $0x10] sm:$0xff] }
 0xb13   : > { %9314 = vrcp.f32 %v7379_v14  ;;  %v7391_v21 = vand.u32 2147483648, %v7379_v14  ;;  %vm7385_vm15 = vweird.f32 %v7379_v14  ;;  %v7389_v31 = vand.u32 2147483647, %v7379_v14 }
 0xb15   : > { %v7392_v11 = vor.u32 1.1754944e-38, %v7391_v21  ;;  %vm7390_vm1 = vcmp.eq.f32.partialorder %v7389_v31, 8.507059e+37  ;;  %v9424_v21 = vld [vmem:[%s9757_s18 + $0x30] sm:$0xff] }
 0xb19   : > { %v9315_v48 = vpop.eup %9314 }
 0xb1a   : > { %v7381_v23 = vmul.f32 %v9315_v48, %v7379_v14  ;;  %vm7386_vm14 = vweird.f32 %v9315_v48  ;;  %v9421_v14 = vld [vmem:[%s9757_s18 + $0x18] sm:$0xff] }
 0xb1b   : > { %vm7387_vm0 = vmor %vm7385_vm15, %vm7386_vm14 }
 0xb1c   : > { %v7382_v53 = vsub.f32 1.0, %v7381_v23 }
 0xb1e   : > { %v7383_v50 = vmul.f32 %v9315_v48, %v7382_v53 }
 0xb20   : > { %v7384_v16 = vadd.f32 %v9315_v48, %v7383_v50  ;;  %v9423_v50 = vld [vmem:[%s9757_s18 + $0x28] sm:$0xff] }
 0xb22   : > { %v7388_v40 = vsel %vm7387_vm0, %v9315_v48, %v7384_v16  ;;  %v9422_v48 = vld [vmem:[%s9757_s18 + $0x20] sm:$0xff] }
 0xb23   : > { %v16699_v12 = vsel %vm7390_vm1, %v7392_v11, %v7388_v40 }
 0xb24   : > { %v16702_v60 = vperm.slane %v16699_v12, 0 }
 0xb26   : > { %v7401_v18 = vmul.f32 %v16702_v60, %v16354_v4  ;;  %v7402_v35 = vmul.f32 %v16702_v60, %v16348_v10  ;;  %v7403_v38 = vmul.f32 %v16702_v60, %v16358_v24  ;;  %v7404_v62 = vmul.f32 %v16702_v60, %v16367_v44 }
 0xb27   : > { %v7405_v19 = vmul.f32 %v16702_v60, %v16374_v54  ;;  %v7406_v42 = vmul.f32 %v16702_v60, %v16379_v30  ;;  %v7407_v4 = vmul.f32 %v16702_v60, %v16384_v5  ;;  %v7408_v44 = vmul.f32 %v16702_v60, %v16394_v37 }
 0xb28   : > { %v7465_v10 = vadd.f32 %v9418_v25, %v7401_v18  ;;  %v7466_v15 = vadd.f32 %v9419_v6, %v7402_v35  ;;  %v7467_v24 = vadd.f32 %v9420_v9, %v7403_v38  ;;  %v7468_v54 = vadd.f32 %v9421_v14, %v7404_v62  ;;  %v9425_v18 = vld [vmem:[%s9757_s18 + $0x38] sm:$0xff] }
 0xb29   : > { %v7409_v30 = vmul.f32 %v16702_v60, %v16401_v32  ;;  %v7469_v23 = vadd.f32 %v9422_v48, %v7405_v19  ;;  %v7410_v5 = vmul.f32 %v16702_v60, %v16406_v8  ;;  %v7411_v53 = vmul.f32 %v16702_v60, %v16411_v46  ;;  %v9426_v46 = vld [vmem:[%s9757_s18 + $0x40] sm:$0xff] }
 0xb2a   : > { %v7470_v16 = vadd.f32 %v9423_v50, %v7406_v42  ;;  %v7471_v37 = vadd.f32 %v9424_v21, %v7407_v4  ;;  %v7529_v31 = vmax.f32 %v7465_v10, 0.0  ;;  %v7530_v40 = vmax.f32 %v7466_v15, 0.0  ;;  %v9427_v42 = vld [vmem:[%s9757_s18 + $0x48] sm:$0xff]  ;;  %v9428_v10 = vld [vmem:[%s9757_s18 + $0x50] sm:$0xff] }
 0xb2b   : > { %v7531_v11 = vmax.f32 %v7467_v24, 0.0  ;;  %v7412_v32 = vmul.f32 %v16702_v60, %v16422_v41  ;;  %v7472_v35 = vadd.f32 %v9425_v18, %v7408_v44  ;;  %v7532_v38 = vmax.f32 %v7468_v54, 0.0 }
 0xb2c   : > { %v7413_v8 = vmul.f32 %v16702_v60, %v16435_v33  ;;  %v7473_v62 = vadd.f32 %v9426_v46, %v7409_v30  ;;  %v7533_v19 = vmax.f32 %v7469_v23, 0.0  ;;  %7593 = vst [vmem:[%s16741_s27] sm:$0xff] %v7529_v31  ;;  %v7414_v41 = vmul.f32 %v16702_v60, %v16446_v61  ;;  %v9429_v61 = vld [vmem:[%s9757_s18 + $0x58] sm:$0xff]  ;;  %v9436_v46 = vld [vmem:[%s9757_s18 + $0x90] sm:$0xff] }
 0xb2d   : > { %v7474_v4 = vadd.f32 %v9427_v42, %v7410_v5  ;;  %v7534_v25 = vmax.f32 %v7470_v16, 0.0  ;;  %7594 = vst [vmem:[%s16741_s27 + $0x8] sm:$0xff] %v7530_v40  ;;  %v7415_v33 = vmul.f32 %v16702_v60, %v16456_v52  ;;  %v7475_v6 = vadd.f32 %v9428_v10, %v7411_v53  ;;  %v9430_v52 = vld [vmem:[%s9757_s18 + $0x60] sm:$0xff] }
 0xb2e   : > { %v7535_v15 = vmax.f32 %v7471_v37, 0.0  ;;  %7595 = vst [vmem:[%s16741_s27 + $0x10] sm:$0xff] %v7531_v11  ;;  %v7416_v9 = vmul.f32 %v16702_v60, %v16466_v29  ;;  %v7476_v24 = vadd.f32 %v9429_v61, %v7412_v32  ;;  %v7536_v44 = vmax.f32 %v7472_v35, 0.0  ;;  %v9431_v29 = vld [vmem:[%s9757_s18 + $0x68] sm:$0xff]  ;;  %v9440_v61 = vld [vmem:[%s9757_s18 + $0xb0] sm:$0xff] }
 0xb2f   : > { %7596 = vst [vmem:[%s16741_s27 + $0x18] sm:$0xff] %v7532_v38  ;;  %v7417_v14 = vmul.f32 %v16702_v60, %v16478_v27  ;;  %v7477_v54 = vadd.f32 %v9430_v52, %v7413_v8  ;;  %v7537_v30 = vmax.f32 %v7473_v62, 0.0  ;;  %v7418_v48 = vmul.f32 %v16702_v60, %v16488_v2  ;;  %v9432_v27 = vld [vmem:[%s9757_s18 + $0x70] sm:$0xff]  ;;  %v9433_v2 = vld [vmem:[%s9757_s18 + $0x78] sm:$0xff]  ;;  %v9435_v35 = vld [vmem:[%s9757_s18 + $0x88] sm:$0xff] }
 0xb30   : > { %7597 = vst [vmem:[%s16741_s27 + $0x20] sm:$0xff] %v7533_v19  ;;  %v7478_v23 = vadd.f32 %v9431_v29, %v7414_v41  ;;  %v7538_v5 = vmax.f32 %v7474_v4, 0.0  ;;  %v7419_v53 = vmul.f32 %v16702_v60, %v16498_v22  ;;  %v7479_v50 = vadd.f32 %v9432_v27, %v7415_v33  ;;  %v9434_v22 = vld [vmem:[%s9757_s18 + $0x80] sm:$0xff]  ;;  %v9437_v41 = vld [vmem:[%s9757_s18 + $0x98] sm:$0xff] }
 0xb31   : > { %7598 = vst [vmem:[%s16741_s27 + $0x28] sm:$0xff] %v7534_v25  ;;  %v7539_v16 = vmax.f32 %v7475_v6, 0.0  ;;  %v7420_v21 = vmul.f32 %v16702_v60, %v16508_v49  ;;  %v7480_v37 = vadd.f32 %v9433_v2, %v7416_v9  ;;  %v7540_v31 = vmax.f32 %v7476_v24, 0.0  ;;  %v9438_v25 = vld [vmem:[%s9757_s18 + $0xa0] sm:$0xff]  ;;  %v9439_v6 = vld [vmem:[%s9757_s18 + $0xa8] sm:$0xff] }
 0xb32   : > { %7599 = vst [vmem:[%s16741_s27 + $0x30] sm:$0xff] %v7535_v15  ;;  %v7421_v40 = vmul.f32 %v16702_v60, %v16520_v13  ;;  %v7481_v11 = vadd.f32 %v9434_v22, %v7417_v14  ;;  %v7541_v32 = vmax.f32 %v7477_v54, 0.0  ;;  %v7422_v18 = vmul.f32 %v16702_v60, %v16530_v57  ;;  %v9441_v14 = vld [vmem:[%s9757_s18 + $0xb8] sm:$0xff] }
 0xb33   : > { %7600 = vst [vmem:[%s16741_s27 + $0x38] sm:$0xff] %v7536_v44  ;;  %v7482_v49 = vadd.f32 %v9435_v35, %v7418_v48  ;;  %v7542_v38 = vmax.f32 %v7478_v23, 0.0  ;;  %v7423_v8 = vmul.f32 %v16702_v60, %v16540_v1  ;;  %v7483_v13 = vadd.f32 %v9436_v46, %v7419_v53  ;;  %v9443_v23 = vld [vmem:[%s9757_s18 + $0xc8] sm:$0xff] }
 0xb34   : > { %7601 = vst [vmem:[%s16741_s27 + $0x40] sm:$0xff] %v7537_v30  ;;  %v7543_v62 = vmax.f32 %v7479_v50, 0.0  ;;  %v7424_v19 = vmul.f32 %v16702_v60, %v16550_v34  ;;  %v7484_v57 = vadd.f32 %v9437_v41, %v7420_v21  ;;  %v7544_v42 = vmax.f32 %v7480_v37, 0.0  ;;  %v9442_v30 = vld [vmem:[%s9757_s18 + $0xc0] sm:$0xff] }
 0xb35   : > { %7602 = vst [vmem:[%s16741_s27 + $0x48] sm:$0xff] %v7538_v5  ;;  %v7396_v4 = vrot.slane %v16699_v12, 1  ;;  %v7425_v1 = vmul.f32 %v16702_v60, %v16563_v55  ;;  %v7485_v33 = vadd.f32 %v9438_v25, %v7421_v40  ;;  %v7545_v10 = vmax.f32 %v7481_v11, 0.0  ;;  %v9452_v25 = vld [vmem:[%s9757_s18 + $0x110] sm:$0xff] }
 0xb36   : > { %7603 = vst [vmem:[%s16741_s27 + $0x50] sm:$0xff] %v7539_v16  ;;  %v7426_v34 = vmul.f32 %v16702_v60, %v16575_v58  ;;  %v7486_v15 = vadd.f32 %v9439_v6, %v7422_v18  ;;  %v7546_v9 = vmax.f32 %v7482_v49, 0.0  ;;  %v7427_v12 = vmul.f32 %v16702_v60, %v16584_v59 }
 0xb37   : > { %7604 = vst [vmem:[%s16741_s27 + $0x58] sm:$0xff] %v7540_v31  ;;  %v7487_v55 = vadd.f32 %v9440_v61, %v7423_v8  ;;  %v7547_v24 = vmax.f32 %v7483_v13, 0.0  ;;  %v7428_v44 = vmul.f32 %v16702_v60, %v16593_v45  ;;  %v7488_v58 = vadd.f32 %v9441_v14, %v7424_v19  ;;  %v19202_v13 = vld [vmem:[#allocation230_spill] sm:$0xff]  ;;  %v9455_v14 = vld [vmem:[%s9757_s18 + $0x128] sm:$0xff] }
 0xb38   : > { %7605 = vst [vmem:[%s16741_s27 + $0x60] sm:$0xff] %v7541_v32  ;;  %v7548_v52 = vmax.f32 %v7484_v57, 0.0  ;;  %v16805_v54 = vperm.slane %v7396_v4, 0  ;;  %v7429_v59 = vmul.f32 %v16702_v60, %v16602_v63  ;;  %v7489_v48 = vadd.f32 %v9442_v30, %v7425_v1  ;;  %v9444_v63 = vld [vmem:[%s9757_s18 + $0xd0] sm:$0xff] }
 0xb39   : > { %7606 = vst [vmem:[%s16741_s27 + $0x68] sm:$0xff] %v7542_v38  ;;  %v7549_v29 = vmax.f32 %v7485_v33, 0.0  ;;  %v7430_v45 = vmul.f32 %v16702_v60, %v16608_v39  ;;  %v7490_v5 = vadd.f32 %v9443_v23, %v7426_v34  ;;  %v7550_v53 = vmax.f32 %v7486_v15, 0.0  ;;  %v9445_v39 = vld [vmem:[%s9757_s18 + $0xd8] sm:$0xff]  ;;  %v19206_v23 = vld [vmem:[#allocation432_spill] sm:$0xff] }
 0xb3a   : > { %7607 = vst [vmem:[%s16741_s27 + $0x70] sm:$0xff] %v7543_v62  ;;  %v7431_v27 = vmul.f32 %v16702_v60, %v16617_v17  ;;  %v7491_v50 = vadd.f32 %v9444_v63, %v7427_v12  ;;  %v7551_v16 = vmax.f32 %v7487_v55, 0.0  ;;  %v7432_v21 = vmul.f32 %v16702_v60, %v16627_v56  ;;  %v9446_v17 = vld [vmem:[%s9757_s18 + $0xe0] sm:$0xff]  ;;  %v9447_v56 = vld [vmem:[%s9757_s18 + $0xe8] sm:$0xff]  ;;  %v19203_v34 = vld [vmem:[#allocation61_spill] sm:$0xff] }
 0xb3b   : > { %7608 = vst [vmem:[%s16741_s27 + $0x78] sm:$0xff] %v7544_v42  ;;  %v7492_v2 = vadd.f32 %v9445_v39, %v7428_v44  ;;  %v7552_v37 = vmax.f32 %v7488_v58, 0.0  ;;  %v7433_v31 = vmul.f32 %v16805_v54, %v16426_v43  ;;  %v7493_v40 = vadd.f32 %v9446_v17, %v7429_v59  ;;  %v9448_v43 = vld [vmem:[%s9757_s18 + $0xf0] sm:$0xff]  ;;  %v19204_v12 = vld [vmem:[#allocation490_spill] sm:$0xff] }
 0xb3c   : > { %7609 = vst [vmem:[%s16741_s27 + $0x80] sm:$0xff] %v7545_v10  ;;  %v7553_v22 = vmax.f32 %v7489_v48, 0.0  ;;  %v7434_v11 = vmul.f32 %v16805_v54, %v16415_v20  ;;  %v7494_v60 = vadd.f32 %v9447_v56, %v7430_v45  ;;  %v7554_v32 = vmax.f32 %v7490_v5, 0.0  ;;  %v9449_v20 = vld [vmem:[%s9757_s18 + $0xf8] sm:$0xff]  ;;  %v19205_v59 = vld [vmem:[#allocation152_spill] sm:$0xff] }
 0xb3d   : > { %7610 = vst [vmem:[%s16741_s27 + $0x88] sm:$0xff] %v7546_v9  ;;  %v7435_v18 = vmul.f32 %v16805_v54, %v16430_v7  ;;  %v7495_v35 = vadd.f32 %v9448_v43, %v7431_v27  ;;  %v7555_v49 = vmax.f32 %v7491_v50, 0.0  ;;  %v7436_v38 = vmul.f32 %v16805_v54, %v16441_v51  ;;  %v9450_v7 = vld [vmem:[%s9757_s18 + $0x100] sm:$0xff]  ;;  %v9451_v51 = vld [vmem:[%s9757_s18 + $0x108] sm:$0xff]  ;;  %v9456_v48 = vld [vmem:[%s9757_s18 + $0x130] sm:$0xff] }
 0xb3e   : > { %7611 = vst [vmem:[%s16741_s27 + $0x90] sm:$0xff] %v7547_v24  ;;  %v7496_v8 = vadd.f32 %v9449_v20, %v7432_v21  ;;  %v7556_v46 = vmax.f32 %v7492_v2, 0.0  ;;  %v7437_v62 = vmul.f32 %v16805_v54, %v19202_v13  ;;  %v7497_v19 = vadd.f32 %v9450_v7, %v7433_v31  ;;  %v19207_v63 = vld [vmem:[#allocation436_spill] sm:$0xff]  ;;  %v9459_v31 = vld [vmem:[%s9757_s18 + $0x148] sm:$0xff] }
 0xb3f   : > { %7612 = vst [vmem:[%s16741_s27 + $0x98] sm:$0xff] %v7548_v52  ;;  %v7557_v41 = vmax.f32 %v7493_v40, 0.0  ;;  %v7438_v57 = vmul.f32 %v16805_v54, %v16461_v26  ;;  %v7498_v42 = vadd.f32 %v9451_v51, %v7434_v11  ;;  %v7558_v4 = vmax.f32 %v7494_v60, 0.0  ;;  %v9453_v26 = vld [vmem:[%s9757_s18 + $0x118] sm:$0xff]  ;;  %v19208_v2 = vld [vmem:[#allocation388_spill] sm:$0xff] }
 0xb40   : > { %7613 = vst [vmem:[%s16741_s27 + $0xa0] sm:$0xff] %v7549_v29  ;;  %v7439_v1 = vmul.f32 %v16805_v54, %v16471_v0  ;;  %v7499_v33 = vadd.f32 %v9452_v25, %v7435_v18  ;;  %v7559_v10 = vmax.f32 %v7495_v35, 0.0  ;;  %v7440_v6 = vmul.f32 %v16805_v54, %v19203_v34  ;;  %v9454_v0 = vld [vmem:[%s9757_s18 + $0x120] sm:$0xff]  ;;  %v9460_v11 = vld [vmem:[%s9757_s18 + $0x150] sm:$0xff]  ;;  %v9461_v18 = vld [vmem:[%s9757_s18 + $0x158] sm:$0xff] }
 0xb41   : > { %7614 = vst [vmem:[%s16741_s27 + $0xa8] sm:$0xff] %v7550_v53  ;;  %v7500_v15 = vadd.f32 %v9453_v26, %v7436_v38  ;;  %v7560_v9 = vmax.f32 %v7496_v8, 0.0  ;;  %v7441_v61 = vmul.f32 %v16805_v54, %v19204_v12  ;;  %v7501_v55 = vadd.f32 %v9454_v0, %v7437_v62  ;;  %v9465_v25 = vld [vmem:[%s9757_s18 + $0x178] sm:$0xff]  ;;  %v19213_v34 = vld [vmem:[#allocation311_spill] sm:$0xff]  ;;  %v9466_v26 = vld [vmem:[%s9757_s18 + $0x180] sm:$0xff] }
 0xb42   : > { %7615 = vst [vmem:[%s16741_s27 + $0xb0] sm:$0xff] %v7551_v16  ;;  %v7561_v24 = vmax.f32 %v7497_v19, 0.0  ;;  %v7442_v44 = vmul.f32 %v16805_v54, %v16503_v28  ;;  %v7502_v58 = vadd.f32 %v9455_v14, %v7438_v57  ;;  %v7562_v52 = vmax.f32 %v7498_v42, 0.0  ;;  %v9457_v28 = vld [vmem:[%s9757_s18 + $0x138] sm:$0xff]  ;;  %v9458_v16 = vld [vmem:[%s9757_s18 + $0x140] sm:$0xff]  ;;  %v9464_v57 = vld [vmem:[%s9757_s18 + $0x170] sm:$0xff] }
 0xb43   : > { %7616 = vst [vmem:[%s16741_s27 + $0xb8] sm:$0xff] %v7552_v37  ;;  %v7443_v30 = vmul.f32 %v16805_v54, %v19205_v59  ;;  %v7503_v29 = vadd.f32 %v9456_v48, %v7439_v1  ;;  %v7563_v45 = vmax.f32 %v7499_v33, 0.0  ;;  %v7444_v5 = vmul.f32 %v16805_v54, %v19206_v23  ;;  %v19211_v19 = vld [vmem:[#allocation317_spill] sm:$0xff]  ;;  %v19214_v12 = vld [vmem:[#allocation158_spill] sm:$0xff]  ;;  %v9467_v0 = vld [vmem:[%s9757_s18 + $0x188] sm:$0xff] }
 0xb44   : > { %7617 = vst [vmem:[%s16741_s27 + $0xc0] sm:$0xff] %v7553_v22  ;;  %v7504_v53 = vadd.f32 %v9457_v28, %v7440_v6  ;;  %v7564_v27 = vmax.f32 %v7500_v15, 0.0  ;;  %v7445_v50 = vmul.f32 %v16805_v54, %v19207_v63  ;;  %v7505_v21 = vadd.f32 %v9458_v16, %v7441_v61 }
 0xb45   : > { %7618 = vst [vmem:[%s16741_s27 + $0xc8] sm:$0xff] %v7554_v32  ;;  %v7565_v39 = vmax.f32 %v7501_v55, 0.0  ;;  %v7446_v37 = vmul.f32 %v16805_v54, %v19208_v2  ;;  %v7506_v17 = vadd.f32 %v9459_v31, %v7442_v44  ;;  %v7566_v40 = vmax.f32 %v7502_v58, 0.0  ;;  %v19215_v44 = vld [vmem:[#allocation155_spill] sm:$0xff]  ;;  %v9468_v58 = vld [vmem:[%s9757_s18 + $0x190] sm:$0xff] }
 0xb46   : > { %7619 = vst [vmem:[%s16741_s27 + $0xd0] sm:$0xff] %v7555_v49  ;;  %v7447_v22 = vmul.f32 %v16805_v54, %v16555_v3  ;;  %v7507_v56 = vadd.f32 %v9460_v11, %v7443_v30  ;;  %v7567_v60 = vmax.f32 %v7503_v29, 0.0  ;;  %v7448_v32 = vmul.f32 %v16805_v54, %v16567_v47  ;;  %v19209_v49 = vld [vmem:[#allocation332_spill] sm:$0xff]  ;;  %v9462_v3 = vld [vmem:[%s9757_s18 + $0x160] sm:$0xff]  ;;  %v9463_v47 = vld [vmem:[%s9757_s18 + $0x168] sm:$0xff] }
 0xb47   : > { %7620 = vst [vmem:[%s16741_s27 + $0xd8] sm:$0xff] %v7556_v46  ;;  %v7508_v43 = vadd.f32 %v9461_v18, %v7444_v5  ;;  %v7568_v35 = vmax.f32 %v7504_v53, 0.0  ;;  %v7449_v38 = vmul.f32 %v16805_v54, %v19209_v49  ;;  %v7509_v20 = vadd.f32 %v9462_v3, %v7445_v50  ;;  %v19210_v46 = vld [vmem:[#allocation375_spill] sm:$0xff]  ;;  %v19216_v30 = vld [vmem:[#allocation164_spill] sm:$0xff]  ;;  %v9469_v29 = vld [vmem:[%s9757_s18 + $0x198] sm:$0xff] }
 0xb48   : > { %7621 = vst [vmem:[%s16741_s27 + $0xe0] sm:$0xff] %v7557_v41  ;;  %v7569_v8 = vmax.f32 %v7505_v21, 0.0  ;;  %v7450_v13 = vmul.f32 %v16805_v54, %v19210_v46  ;;  %v7510_v62 = vadd.f32 %v9463_v47, %v7446_v37  ;;  %v7570_v7 = vmax.f32 %v7506_v17, 0.0  ;;  %v19217_v5 = vld [vmem:[#allocation71_spill] sm:$0xff]  ;;  %v9470_v53 = vld [vmem:[%s9757_s18 + $0x1a0] sm:$0xff]  ;;  %v19219_v37 = vld [vmem:[#allocation501_spill] sm:$0xff] }
 0xb49   : > { %7622 = vst [vmem:[%s16741_s27 + $0xe8] sm:$0xff] %v7558_v4  ;;  %v7451_v41 = vmul.f32 %v16805_v54, %v19211_v19  ;;  %v7511_v51 = vadd.f32 %v9464_v57, %v7447_v22  ;;  %v7571_v42 = vmax.f32 %v7507_v56, 0.0  ;;  %v19212_v4 = vld [vmem:[#allocation324_spill] sm:$0xff]  ;;  %v7512_v33 = vadd.f32 %v9465_v25, %v7448_v32  ;;  %v19218_v50 = vld [vmem:[#allocation150_spill] sm:$0xff]  ;;  %v9471_v21 = vld [vmem:[%s9757_s18 + $0x1a8] sm:$0xff] }
 0xb4a   : > { %7623 = vst [vmem:[%s16741_s27 + $0xf0] sm:$0xff] %v7559_v10  ;;  %v7452_v1 = vmul.f32 %v16805_v54, %v19212_v4  ;;  %v7572_v10 = vmax.f32 %v7508_v43, 0.0  ;;  %v7453_v6 = vmul.f32 %v16805_v54, %v19213_v34  ;;  %v7513_v15 = vadd.f32 %v9466_v26, %v7449_v38  ;;  %v9472_v17 = vld [vmem:[%s9757_s18 + $0x1b0] sm:$0xff]  ;;  %v19220_v11 = vld [vmem:[#allocation449_spill] sm:$0xff]  ;;  %v9474_v49 = vld [vmem:[%s9757_s18 + $0x1c0] sm:$0xff] }
 0xb4b   : > { %7624 = vst [vmem:[%s16741_s27 + $0xf8] sm:$0xff] %v7560_v9  ;;  %v7573_v9 = vmax.f32 %v7509_v20, 0.0  ;;  %v7454_v61 = vmul.f32 %v16805_v54, %v19214_v12  ;;  %v7514_v55 = vadd.f32 %v9467_v0, %v7450_v13  ;;  %v7455_v14 = vmul.f32 %v16805_v54, %v19215_v44  ;;  %v19221_v43 = vld [vmem:[#allocation20_spill] sm:$0xff]  ;;  %v19222_v20 = vld [vmem:[#allocation319_spill] sm:$0xff]  ;;  %v9478_v25 = vld [vmem:[%s9757_s18 + $0x1e0] sm:$0xff] }
 0xb4c   : > { %7625 = vst [vmem:[%s16741_s27 + $0x100] sm:$0xff] %v7561_v24  ;;  %v7574_v24 = vmax.f32 %v7510_v62, 0.0  ;;  %v7575_v59 = vmax.f32 %v7511_v51, 0.0  ;;  %v7456_v48 = vmul.f32 %v16805_v54, %v19216_v30  ;;  %v7576_v23 = vmax.f32 %v7512_v33, 0.0  ;;  %v9475_v46 = vld [vmem:[%s9757_s18 + $0x1c8] sm:$0xff]  ;;  %v19223_v62 = vld [vmem:[#allocation321_spill] sm:$0xff] }
 0xb4d   : > { %7626 = vst [vmem:[%s16741_s27 + $0x108] sm:$0xff] %v7562_v52  ;;  %v7515_v52 = vadd.f32 %v9468_v58, %v7451_v41  ;;  %v7457_v28 = vmul.f32 %v16805_v54, %v19217_v5  ;;  %v7577_v63 = vmax.f32 %v7513_v15, 0.0  ;;  %v7458_v16 = vmul.f32 %v16805_v54, %v19218_v50  ;;  %v9476_v19 = vld [vmem:[%s9757_s18 + $0x1d0] sm:$0xff]  ;;  %v9479_v34 = vld [vmem:[%s9757_s18 + $0x1e8] sm:$0xff] }
 0xb4e   : > { %7627 = vst [vmem:[%s16741_s27 + $0x110] sm:$0xff] %v7563_v45  ;;  %v7516_v45 = vadd.f32 %v9469_v29, %v7452_v1  ;;  %v7578_v2 = vmax.f32 %v7514_v55, 0.0  ;;  %v7459_v31 = vmul.f32 %v16805_v54, %v19219_v37  ;;  %v7460_v56 = vmul.f32 %v16805_v54, %v19220_v11 }
 0xb4f   : > { %7628 = vst [vmem:[%s16741_s27 + $0x118] sm:$0xff] %v7564_v27  ;;  %v7517_v27 = vadd.f32 %v9470_v53, %v7453_v6  ;;  %v7579_v22 = vmax.f32 %v7515_v52, 0.0  ;;  %v7521_v38 = vadd.f32 %v9474_v49, %v7457_v28  ;;  %v7522_v13 = vadd.f32 %v9475_v46, %v7458_v16 }
 0xb50   : > { %7629 = vst [vmem:[%s16741_s27 + $0x120] sm:$0xff] %v7565_v39  ;;  %v7518_v39 = vadd.f32 %v9471_v21, %v7454_v61  ;;  %v7580_v18 = vmax.f32 %v7516_v45, 0.0  ;;  %v7523_v41 = vadd.f32 %v9476_v19, %v7459_v31  ;;  %v7464_v51 = vmul.f32 %v16805_v54, %v16689_v36  ;;  %v9480_v36 = vld [vmem:[%s9757_s18 + $0x1f0] sm:$0xff] }
 0xb51   : > { %7630 = vst [vmem:[%s16741_s27 + $0x128] sm:$0xff] %v7566_v40  ;;  %v7519_v40 = vadd.f32 %v9472_v17, %v7455_v14  ;;  %v7581_v3 = vmax.f32 %v7517_v27, 0.0  ;;  %v7586_v26 = vmax.f32 %v7522_v13, 0.0 }
 0xb52   : > { %7631 = vst [vmem:[%s16741_s27 + $0x130] sm:$0xff] %v7567_v60  ;;  %v9473_v60 = vld [vmem:[%s9757_s18 + $0x1b8] sm:$0xff]  ;;  %v7582_v47 = vmax.f32 %v7518_v39, 0.0  ;;  %v7587_v15 = vmax.f32 %v7523_v41, 0.0 }
 0xb53   : > { %7632 = vst [vmem:[%s16741_s27 + $0x138] sm:$0xff] %v7568_v35  ;;  %v7520_v32 = vadd.f32 %v9473_v60, %v7456_v48  ;;  %v7461_v35 = vmul.f32 %v16805_v54, %v19221_v43  ;;  %v7583_v57 = vmax.f32 %v7519_v40, 0.0 }
 0xb54   : > { %7633 = vst [vmem:[%s16741_s27 + $0x140] sm:$0xff] %v7569_v8  ;;  %v7462_v8 = vmul.f32 %v16805_v54, %v19222_v20 }
 0xb55   : > { %7634 = vst [vmem:[%s16741_s27 + $0x148] sm:$0xff] %v7570_v7  ;;  %v7463_v7 = vmul.f32 %v16805_v54, %v19223_v62  ;;  %v7584_v1 = vmax.f32 %v7520_v32, 0.0  ;;  %v7525_v33 = vadd.f32 %v9478_v25, %v7461_v35 }
 0xb56   : > { %7635 = vst [vmem:[%s16741_s27 + $0x150] sm:$0xff] %v7571_v42  ;;  %v9477_v42 = vld [vmem:[%s9757_s18 + $0x1d8] sm:$0xff]  ;;  %v7526_v6 = vadd.f32 %v9479_v34, %v7462_v8 }
 0xb57   : > { %7636 = vst [vmem:[%s16741_s27 + $0x158] sm:$0xff] %v7572_v10  ;;  %v7524_v4 = vadd.f32 %v9477_v42, %v7460_v56  ;;  %v7585_v10 = vmax.f32 %v7521_v38, 0.0  ;;  %v7527_v54 = vadd.f32 %v9480_v36, %v7463_v7  ;;  %v7589_v0 = vmax.f32 %v7525_v33, 0.0 }
 0xb58   : > { %7637 = vst [vmem:[%s16741_s27 + $0x160] sm:$0xff] %v7573_v9  ;;  %v9481_v9 = vld [vmem:[%s9757_s18 + $0x1f8] sm:$0xff]  ;;  %v7590_v55 = vmax.f32 %v7526_v6, 0.0  ;;  %s7673_s18 = sshll.u32 %s7670_s28, 4  ;;  %s7674_s18 = int_to_ptr.hbm [resolvable:$true] %s7673_s18 }
 0xb59   : > { %7638 = vst [vmem:[%s16741_s27 + $0x168] sm:$0xff] %v7574_v24  ;;  %v7528_v12 = vadd.f32 %v9481_v9, %v7464_v51  ;;  %v7588_v61 = vmax.f32 %v7524_v4, 0.0  ;;  %v7591_v24 = vmax.f32 %v7527_v54, 0.0  ;;  %s9526_s20 = sshra.s32 %s7674_s18, 4  ;;  %s9527_s20 = int_to_ptr.hbm [resolvable:$true] %s9526_s20 }
 0xb5a   : > { %7639 = vst [vmem:[%s16741_s27 + $0x170] sm:$0xff] %v7575_v59  ;;  %s9528_s29 = scalar_lea.hbm %s9527_s20, 512  ;;  %p9533_p0 = scmp.lt.s32.totalorder %s9527_s20, %s17014_s12 }
 0xb5b   : > { %7640 = vst [vmem:[%s16741_s27 + $0x178] sm:$0xff] %v7576_v23  ;;  %v7592_v44 = vmax.f32 %v7528_v12, 0.0  ;;  %p9529_p6 = scmp.ne.s32.totalorder %s9527_s20, %s9528_s29  ;;  %p9534_p1 = scmp.lt.s32.totalorder %s9532_s23, %s9528_s29 }
 0xb5c   : > { %7641 = vst [vmem:[%s16741_s27 + $0x180] sm:$0xff] %v7577_v63 }
 0xb5d   : > { %7642 = vst [vmem:[%s16741_s27 + $0x188] sm:$0xff] %v7578_v2  ;;  %p9530_p9 = pnand %p9529_p6, %p9715_p11  ;;  %p9535_p3 = por %p9534_p1, %p9533_p0 }
 0xb5e   : > { %7643 = vst [vmem:[%s16741_s27 + $0x190] sm:$0xff] %v7579_v22 }
 0xb5f   : > { %7644 = vst [vmem:[%s16741_s27 + $0x198] sm:$0xff] %v7580_v18  ;;  %p9531_p13 = pneg %p9530_p9 }
 0xb60   : > { %7645 = vst [vmem:[%s16741_s27 + $0x1a0] sm:$0xff] %v7581_v3 }
 0xb61   : > { %7646 = vst [vmem:[%s16741_s27 + $0x1a8] sm:$0xff] %v7582_v47  ;;  %p9536_p4 = pnand %p9535_p3, %p9531_p13 }
 0xb62   : > { %7647 = vst [vmem:[%s16741_s27 + $0x1b0] sm:$0xff] %v7583_v57 }
 0xb63   : > { %7648 = vst [vmem:[%s16741_s27 + $0x1b8] sm:$0xff] %v7584_v1 }
 0xb64   : > { %7649 = vst [vmem:[%s16741_s27 + $0x1c0] sm:$0xff] %v7585_v10 }
 0xb65   : > { %7650 = vst [vmem:[%s16741_s27 + $0x1c8] sm:$0xff] %v7586_v26 }
 0xb66   : > { %7651 = vst [vmem:[%s16741_s27 + $0x1d0] sm:$0xff] %v7587_v15 }
 0xb67   : > { %7652 = vst [vmem:[%s16741_s27 + $0x1d8] sm:$0xff] %v7588_v61 }
 0xb68   : > { %7653 = vst [vmem:[%s16741_s27 + $0x1e0] sm:$0xff] %v7589_v0 }
 0xb69   : > { %7654 = vst [vmem:[%s16741_s27 + $0x1e8] sm:$0xff] %v7590_v55 }
 0xb6a   : > { %7655 = vst [vmem:[%s16741_s27 + $0x1f0] sm:$0xff] %v7591_v24 }
 0xb6b   : > { %7656 = vst [vmem:[%s16741_s27 + $0x1f8] sm:$0xff] %v7592_v44 }
 0xb6c   : > { %9539 = shalt.err (!%p9536_p4)
}
 0xb6d   : > { %s9599_s26 = smov 128  }
 0xb6e   : > { %7937 = dma.vmem_to_hbm [thread:$0]  (%p9715_p11), %s7672_s19, 8192, %s7674_s18, %s7658_s14, %s9599_s26, %s9599_s26, %s9591_s17  }
 0xb6f PF: > { %s19225_s27 = sld [smem:[#allocation8_spill]]  ;;  %p19227_p7 = scmp.ge.s32.totalorder %s9578_s24, 2 }
 0xb71   : > { %p7944_p5 = pnand %p19227_p7, %p9719_p12 }
 0xb73   : > { %p7945_p8 = pneg %p7944_p5 }
 0xb75   : > { %s7688_s28 = sand.u32 1, %s19225_s27  }
 0xb76   : > { %s7689_s16 = scalar_lea.sflag [#allocation4], %s7688_s28 }
 0xb77   : > { %9561 = dma.done.wait (%p7945_p8), %s7689_s16, 8192  }
 0xb78   : > { %9563 = vsyncadd (%p7945_p8), %s7689_s16, 4294959104  ;;  %s19228_s24 = sld [smem:[#allocation10_spill]]  ;;  %s19231_s21 = smov %s9570_s22 }
 0xb79   : > { %s19229_s20 = sld [smem:[#allocation9_spill]] }
 0xb7a   : > { %s19230_s23 = sld [smem:[#allocation11_spill]] }
 0xb7e   : > { %p25_p10 = scmp.ge.s32.totalorder %s19228_s24, 4  }
 0xb7f   : > { %s19232_s22 = smov %s19229_s20 }
 0xb80   :  { %27 = sbr.rel (!%p25_p10) target bundleno = 5 (0x5), region = 113 }
 0xb85   :  { %7695 = vsyncpa [#allocation3], 1 }
 0xb86   :  { %7697 = vsyncpa [#allocation3 + $0x1], 1 }
 0xb87   :  { %7698 = vsyncpa [#allocation4], 1 }
 0xb88   :  { %7700 = vsyncpa [#allocation4 + $0x1], 1 }

</bundles_post_ra>
